<compile_context>
chip_gen: v6e
topology: v6e:2x2x1
jax: 0.10.0
libtpu: 0.0.40
codegen_flags: <defaults>
</compile_context>

<pallas_src>
import functools

import jax
import jax.numpy as jnp
import numpy as np
from jax import lax
from jax.experimental import pallas as pl
from jax.experimental.pallas import tpu as pltpu

KH = KW = 5      # every conv is 5x5 with padding=2 ("same")
H1_PAD = 128     # fc1 hidden dim padded 120 -> 128 (lane-dense blocks)


def _round_up(a, b):
    return -(-a // b) * b


# ----------------------------------------------------------------------------
# Parameter preprocessing (runs once, outside jit, on concrete arrays).
# ----------------------------------------------------------------------------
def _group_conv_weights(w):
    """(cout, cin, 5, 5) torch weights -> (4*cout, 36*cin) polyphase matrix.

    Pooled-output parity (a, b) at pooled position (t, s) needs conv input
    rows/cols (2t + a + kh, 2s + b + kw).  Writing a + kh = 2*qh + pr and
    b + kw = 2*qw + pc, the conv becomes ONE matmul whose K axis is
    (qh, qw, pr, pc, cin) = 36*cin and whose M axis stacks the 4 output
    parities times cout, applied to an im2col tensor of shifted parity planes.
    The 2x2 max-pool is then an elementwise max over the 4 M parity blocks.
    """
    cout, cin = w.shape[0], w.shape[1]
    wg = np.zeros((4 * cout, 36 * cin), np.float32)
    for a in range(2):
        for b in range(2):
            for qh in range(3):
                for qw in range(3):
                    for pr in range(2):
                        for pc in range(2):
                            kh = 2 * qh + pr - a
                            kw = 2 * qw + pc - b
                            if 0 <= kh < KH and 0 <= kw < KW:
                                m0 = (a * 2 + b) * cout
                                k0 = ((qh * 3 + qw) * 4 + pr * 2 + pc) * cin
                                wg[m0:m0 + cout, k0:k0 + cin] = w[:, :, kh, kw]
    return wg


def prepare_params(p):
    """Rearrange the raw (PyTorch-shaped) params for the Pallas kernels."""
    prep = {}
    for name in ("conv1", "conv2", "conv3"):
        w = np.asarray(p[name + "_w"], np.float32)
        b = np.asarray(p[name + "_b"], np.float32)
        wg = _group_conv_weights(w)
        kp = _round_up(wg.shape[1], 8)                       # pad K (108 -> 112)
        wg = np.pad(wg, ((0, 0), (0, kp - wg.shape[1])))
        prep[name + "_wg"] = jnp.asarray(wg, jnp.bfloat16)   # bf16 MXU weights
        prep[name + "_b"] = jnp.asarray(b.reshape(-1, 1), jnp.float32)
    w1 = np.asarray(p["fc1_w"], np.float32)                  # (25088, 120)
    b1 = np.asarray(p["fc1_b"], np.float32).reshape(1, -1)   # (1, 120)
    w2 = np.asarray(p["fc2_w"], np.float32)                  # (120, 14)
    prep["fc1_w"] = jnp.asarray(
        np.pad(w1, ((0, 0), (0, H1_PAD - w1.shape[1]))), jnp.bfloat16)
    prep["fc1_b"] = jnp.asarray(
        np.pad(b1, ((0, 0), (0, H1_PAD - b1.shape[1]))), jnp.float32)
    prep["fc2_w"] = jnp.asarray(
        np.pad(w2, ((0, H1_PAD - w2.shape[0]), (0, 0))), jnp.float32)
    prep["fc2_b"] = jnp.asarray(p["fc2_b"], jnp.float32).reshape(1, -1)
    return prep


# ----------------------------------------------------------------------------
# Activation-side layout: padded input -> polyphase im2col (built in XLA; the
# activations are small, so this pre-materialization is cheap and makes every
# kernel dot fully K-merged and lane-aligned).
# ----------------------------------------------------------------------------
def _conv_inputs(x):
    """(N, C, H, W) -> (N, 36*C, Hh*Wh) bf16 polyphase im2col.

    q[pr, pc, c, i, j] = zero_pad2(x)[c, 2i+pr, 2j+pc]; column m = t*Wh + s of
    the result holds q[pr, pc, c, t+qh, s+qw] at K index
    ((qh*3+qw)*4 + pr*2+pc)*C + c — matching the grouped weight columns.
    """
    N, C, H, W = x.shape
    Hh, Wh = H // 2, W // 2
    x = x.astype(jnp.bfloat16)
    xp = jnp.pad(x, ((0, 0), (0, 0), (2, 2), (2, 2)))          # conv padding=2
    Hq, Wq = Hh + 2, Wh + 2
    q = xp.reshape(N, C, Hq, 2, Wq, 2).transpose(0, 3, 5, 1, 2, 4)  # (N,pr,pc,C,Hq,Wq)
    cols = [q[:, :, :, :, qh:qh + Hh, qw:qw + Wh]
            for qh in range(3) for qw in range(3)]
    xc = jnp.stack(cols, axis=1)                               # (N,9,2,2,C,Hh,Wh)
    return xc.reshape(N, 36 * C, Hh * Wh)


def _choose_pixel_tile(p0, max_tp=2048):
    """Pick a 128-multiple pixel-tile size tp and padded total P = tp*steps."""
    p128 = _round_up(p0, 128)
    n_steps = -(-p128 // max_tp)
    tp = 128 * (-(-(p128 // 128) // n_steps))
    return tp, tp * n_steps, n_steps


# ----------------------------------------------------------------------------
# Fused conv(5x5, pad=2) + bias + ReLU + MaxPool(2,2) kernel.
# Grid = (N, pixel_tiles); one bf16 MXU dot per step, f32 accumulation.
# ----------------------------------------------------------------------------
def _conv_pool_kernel(wg_ref, b_ref, x_ref, o_ref, *, cout):
    # wg_ref: (4*cout, KP) bf16 grouped weights (resident in VMEM)
    # b_ref : (cout, 1) f32 bias (resident)
    # x_ref : (1, KP, tp) bf16 im2col block for this (sample, pixel tile)
    # o_ref : (1, cout, tp) bf16 pooled output block
    acc = jnp.dot(wg_ref[...], x_ref[0],
                  preferred_element_type=jnp.float32)          # (4*cout, tp)
    # 2x2 max-pool == elementwise max over the 4 parity row-blocks of M.
    pooled = jnp.maximum(jnp.maximum(acc[:cout], acc[cout:2 * cout]),
                         jnp.maximum(acc[2 * cout:3 * cout], acc[3 * cout:]))
    # bias + ReLU commute with the max (both monotonic) -> apply after pool.
    o_ref[0] = jnp.maximum(pooled + b_ref[...], 0.0).astype(o_ref.dtype)


def conv5x5_relu_pool(x, wg, bias):
    """maxpool2d(relu(conv2d(x, w, b, padding=2)), 2, 2) — NCHW, like PyTorch."""
    N, cin, H, W = x.shape
    cout = wg.shape[0] // 4
    KP = wg.shape[1]
    assert H % 2 == 0 and W % 2 == 0
    Hh, Wh = H // 2, W // 2

    xc = _conv_inputs(x)                                       # (N, 36*cin, Hh*Wh)
    K = xc.shape[1]
    tp, P, n_steps = _choose_pixel_tile(Hh * Wh)
    xc = jnp.pad(xc, ((0, 0), (0, KP - K), (0, P - Hh * Wh)))  # zero K/pixel pad

    kern = functools.partial(_conv_pool_kernel, cout=cout)
    out = pl.pallas_call(
        kern,
        out_shape=jax.ShapeDtypeStruct((N, cout, P), jnp.bfloat16),
        grid=(N, n_steps),
        in_specs=[
            pl.BlockSpec((4 * cout, KP), lambda n, p: (0, 0)),   # resident weights
            pl.BlockSpec((cout, 1), lambda n, p: (0, 0)),        # resident bias
            pl.BlockSpec((1, KP, tp), lambda n, p: (n, 0, p)),   # streamed im2col
        ],
        out_specs=pl.BlockSpec((1, cout, tp), lambda n, p: (n, 0, p)),
        compiler_params=pltpu.CompilerParams(
            dimension_semantics=("parallel", "parallel")),
    )(wg, bias, xc)
    # drop the pixel padding -> compact (N, cout, H/2, W/2)
    return out[:, :, :Hh * Wh].reshape(N, cout, Hh, Wh)


# ----------------------------------------------------------------------------
# Fused fc1 + fc2 kernel: y = (x @ W1 + b1) @ W2 + b2   (no activations).
# K (=25088) is tiled over the grid (tk=6272 -> 4 steps) with an f32 VMEM
# accumulator; fc2 runs on the last K step.  x and W1 are bf16 (HBM-bound
# stage), hidden dim padded to 128 lanes.
# ----------------------------------------------------------------------------
def _fc_kernel(x_ref, w1_ref, b1_ref, w2_ref, b2_ref, o_ref, acc_ref):
    k = pl.program_id(0)

    @pl.when(k == 0)
    def _():
        acc_ref[...] = jnp.zeros_like(acc_ref)

    acc_ref[...] += jnp.dot(x_ref[...], w1_ref[...],
                            preferred_element_type=jnp.float32)

    @pl.when(k == pl.num_programs(0) - 1)
    def _():
        h = acc_ref[...] + b1_ref[...]                          # fc1 output (f32)
        o_ref[...] = (jnp.dot(h, w2_ref[...],
                              preferred_element_type=jnp.float32)
                      + b2_ref[...]).astype(o_ref.dtype)        # fc2 output


def fc1_fc2(x, w1, b1, w2, b2, *, tk=6272):
    # x: (N, K) bf16; w1: (K, 128) bf16 = padded fc1.weight.T; w2: (128, 14) f32
    N, K = x.shape
    H1, H2 = w1.shape[1], w2.shape[1]
    tk = min(tk, K)
    assert K % tk == 0
    return pl.pallas_call(
        _fc_kernel,
        out_shape=jax.ShapeDtypeStruct((N, H2), jnp.float32),
        grid=(K // tk,),
        in_specs=[
            pl.BlockSpec((N, tk), lambda k: (0, k)),
            pl.BlockSpec((tk, H1), lambda k: (k, 0)),
            pl.BlockSpec((1, H1), lambda k: (0, 0)),
            pl.BlockSpec((H1, H2), lambda k: (0, 0)),
            pl.BlockSpec((1, H2), lambda k: (0, 0)),
        ],
        out_specs=pl.BlockSpec((N, H2), lambda k: (0, 0)),
        scratch_shapes=[pltpu.VMEM((N, H1), jnp.float32)],
        compiler_params=pltpu.CompilerParams(
            dimension_semantics=("arbitrary",)),
    )(x, w1, b1, w2, b2)


# ----------------------------------------------------------------------------
# Deterministic parameter init (shapes from Net.__init__; synthetic weights).
# ----------------------------------------------------------------------------
def init_params():
    ks = jax.random.split(jax.random.PRNGKey(42), 10)
    p = {}
    p["conv1_w"] = 0.05 * jax.random.normal(ks[0], (8, 3, 5, 5), jnp.float32)
    p["conv1_b"] = 0.05 * jax.random.normal(ks[1], (8,), jnp.float32)
    p["conv2_w"] = 0.05 * jax.random.normal(ks[2], (16, 8, 5, 5), jnp.float32)
    p["conv2_b"] = 0.05 * jax.random.normal(ks[3], (16,), jnp.float32)
    p["conv3_w"] = 0.05 * jax.random.normal(ks[4], (32, 16, 5, 5), jnp.float32)
    p["conv3_b"] = 0.05 * jax.random.normal(ks[5], (32,), jnp.float32)
    p["fc1_w"] = 0.01 * jax.random.normal(ks[6], (32 * 28 * 28, 120), jnp.float32)
    p["fc1_b"] = 0.01 * jax.random.normal(ks[7], (1, 120), jnp.float32)
    p["fc2_w"] = 0.05 * jax.random.normal(ks[8], (120, 14), jnp.float32)
    p["fc2_b"] = 0.05 * jax.random.normal(ks[9], (1, 14), jnp.float32)
    return p


def net_forward(x, prep):
    h = conv5x5_relu_pool(x, prep["conv1_wg"], prep["conv1_b"])   # (N, 8, 112, 112)
    h = conv5x5_relu_pool(h, prep["conv2_wg"], prep["conv2_b"])   # (N, 16, 56, 56)
    h = conv5x5_relu_pool(h, prep["conv3_wg"], prep["conv3_b"])   # (N, 32, 28, 28)
    h = h.reshape(h.shape[0], -1)                                 # (N, 25088) bf16
    return fc1_fc2(h, prep["fc1_w"], prep["fc1_b"],
                   prep["fc2_w"], prep["fc2_b"])                  # (N, 14) f32


def net_forward_ref(x, p):
    """Pure-JAX reference (same semantics) for a sanity check."""
    def conv_block(h, w, b):
        h = lax.conv_general_dilated(
            h, w, (1, 1), ((2, 2), (2, 2)),
            dimension_numbers=("NCHW", "OIHW", "NCHW"))
        h = jnp.maximum(h + b[None, :, None, None], 0.0)
        return lax.reduce_window(h, -jnp.inf, lax.max,
                                 (1, 1, 2, 2), (1, 1, 2, 2), "VALID")
    h = conv_block(x, p["conv1_w"], p["conv1_b"])
    h = conv_block(h, p["conv2_w"], p["conv2_b"])
    h = conv_block(h, p["conv3_w"], p["conv3_b"])
    h = h.reshape(h.shape[0], -1)
    w1 = p["fc1_w"].astype(jnp.bfloat16).astype(jnp.float32)      # same bf16 weights
    h = h @ w1 + p["fc1_b"]
    return h @ p["fc2_w"] + p["fc2_b"]


if __name__ == "__main__":
    params = init_params()
    prep = prepare_params(params)
    # fc1's 32*28*28 flatten pins the spatial size to 224x224; batch kept small.
    x = jax.random.normal(jax.random.PRNGKey(0), (2, 3, 224, 224), jnp.float32)

    out = jax.block_until_ready(jax.jit(net_forward)(x, prep))
    assert out.shape == (2, 14) and out.dtype == jnp.float32

    ref = np.asarray(jax.jit(net_forward_ref)(x, params))
    scale = float(np.max(np.abs(ref))) + 1e-6
    np.testing.assert_allclose(np.asarray(out), ref,
                               rtol=3e-2, atol=3e-2 * scale)

    print("KERNEL_OK")
</pallas_src>

<mosaic_0001>
module attributes {stable_mosaic.version = 11 : i64} {
  func.func @_conv_pool_kernel(%arg0: i32, %arg1: i32, %arg2: memref<32x112xbf16, #tpu.memory_space<vmem>>, %arg3: memref<8x1xf32, #tpu.memory_space<vmem>>, %arg4: memref<1x112x1792xbf16, #tpu.memory_space<vmem>>, %arg5: memref<1x8x1792xbf16, #tpu.memory_space<vmem>>) attributes {dimension_semantics = [#tpu.dimension_semantics<parallel>, #tpu.dimension_semantics<parallel>], iteration_bounds = array<i64: 2, 7>, scalar_prefetch = 0 : i64, scratch_operands = 0 : i64, tpu.core_type = #tpu.core_type<tc>, window_params = [{pipeline_mode = #tpu.pipeline_mode<synchronous>, transform_indices = @transform_0, window_bounds = array<i64: 32, 112>}, {pipeline_mode = #tpu.pipeline_mode<synchronous>, transform_indices = @transform_1, window_bounds = array<i64: 8, 1>}, {transform_indices = @transform_2, window_bounds = array<i64: 1, 112, 1792>}, {transform_indices = @transform_3, window_bounds = array<i64: 1, 8, 1792>}]} {
    %c0 = arith.constant 0 : index
    %c0_0 = arith.constant 0 : index
    %0 = vector.load %arg2[%c0, %c0_0] : memref<32x112xbf16, #tpu.memory_space<vmem>>, vector<32x112xbf16>
    %c0_1 = arith.constant 0 : index
    %c0_2 = arith.constant 0 : index
    %c0_3 = arith.constant 0 : index
    %1 = vector.load %arg4[%c0_1, %c0_2, %c0_3] : memref<1x112x1792xbf16, #tpu.memory_space<vmem>>, vector<1x112x1792xbf16>
    %2 = vector.shape_cast %1 : vector<1x112x1792xbf16> to vector<112x1792xbf16>
    %cst = arith.constant dense<0.000000e+00> : vector<32x1792xf32>
    %3 = tpu.matmul %0, %2, %cst {dimension_numbers = #tpu.dot_dimension_numbers<[1], [0], [0], [1], [0, 0, 1, 1], [], []>} : vector<32x112xbf16>, vector<112x1792xbf16>, vector<32x1792xf32> -> vector<32x1792xf32>
    %4 = vector.extract_strided_slice %3 {offsets = [0, 0], sizes = [8, 1792], strides = [1, 1]} : vector<32x1792xf32> to vector<8x1792xf32>
    %5 = vector.extract_strided_slice %3 {offsets = [8, 0], sizes = [8, 1792], strides = [1, 1]} : vector<32x1792xf32> to vector<8x1792xf32>
    %6 = arith.maximumf %4, %5 : vector<8x1792xf32>
    %7 = vector.extract_strided_slice %3 {offsets = [16, 0], sizes = [8, 1792], strides = [1, 1]} : vector<32x1792xf32> to vector<8x1792xf32>
    %8 = vector.extract_strided_slice %3 {offsets = [24, 0], sizes = [8, 1792], strides = [1, 1]} : vector<32x1792xf32> to vector<8x1792xf32>
    %9 = arith.maximumf %7, %8 : vector<8x1792xf32>
    %10 = arith.maximumf %6, %9 : vector<8x1792xf32>
    %c0_4 = arith.constant 0 : index
    %c0_5 = arith.constant 0 : index
    %11 = vector.load %arg3[%c0_4, %c0_5] : memref<8x1xf32, #tpu.memory_space<vmem>>, vector<8x1xf32>
    %12 = vector.broadcast %11 : vector<8x1xf32> to vector<8x1792xf32>
    %13 = arith.addf %10, %12 : vector<8x1792xf32>
    %cst_6 = arith.constant 0.000000e+00 : f32
    %14 = vector.broadcast %cst_6 : f32 to vector<8x1792xf32>
    %15 = arith.maximumf %13, %14 : vector<8x1792xf32>
    %16 = arith.truncf %15 : vector<8x1792xf32> to vector<8x1792xbf16>
    %c0_7 = arith.constant 0 : index
    %c0_8 = arith.constant 0 : index
    %c0_9 = arith.constant 0 : index
    %17 = vector.load %arg5[%c0_7, %c0_8, %c0_9] : memref<1x8x1792xbf16, #tpu.memory_space<vmem>>, vector<1x8x1792xbf16>
    %18 = vector.shape_cast %17 : vector<1x8x1792xbf16> to vector<8x1792xbf16>
    %19 = vector.shape_cast %16 : vector<8x1792xbf16> to vector<1x8x1792xbf16>
    tpu.vector_store %arg5[%c0_7, %c0_8, %c0_9], %19 {strides = array<i32>} : memref<1x8x1792xbf16, #tpu.memory_space<vmem>>, vector<1x8x1792xbf16>,
    return
  }
  func.func @transform_0(%arg0: i32, %arg1: i32) -> (i32, i32) {
    %c0_i32 = arith.constant 0 : i32
    %c0_i32_0 = arith.constant 0 : i32
    %c0_i32_1 = arith.constant 0 : i32
    return %c0_i32, %c0_i32_0 : i32, i32
  }
  func.func @transform_1(%arg0: i32, %arg1: i32) -> (i32, i32) {
    %c0_i32 = arith.constant 0 : i32
    %c0_i32_0 = arith.constant 0 : i32
    %c0_i32_1 = arith.constant 0 : i32
    return %c0_i32, %c0_i32_0 : i32, i32
  }
  func.func @transform_2(%arg0: i32, %arg1: i32) -> (i32, i32, i32) {
    %c0_i32 = arith.constant 0 : i32
    %c0_i32_0 = arith.constant 0 : i32
    return %arg0, %c0_i32, %arg1 : i32, i32, i32
  }
  func.func @transform_3(%arg0: i32, %arg1: i32) -> (i32, i32, i32) {
    %c0_i32 = arith.constant 0 : i32
    %c0_i32_0 = arith.constant 0 : i32
    return %arg0, %c0_i32, %arg1 : i32, i32, i32
  }
}

module attributes {stable_mosaic.version = 11 : i64} {
  func.func @_conv_pool_kernel(%arg0: i32, %arg1: i32, %arg2: memref<64x288xbf16, #tpu.memory_space<vmem>>, %arg3: memref<16x1xf32, #tpu.memory_space<vmem>>, %arg4: memref<1x288x1664xbf16, #tpu.memory_space<vmem>>, %arg5: memref<1x16x1664xbf16, #tpu.memory_space<vmem>>) attributes {dimension_semantics = [#tpu.dimension_semantics<parallel>, #tpu.dimension_semantics<parallel>], iteration_bounds = array<i64: 2, 2>, scalar_prefetch = 0 : i64, scratch_operands = 0 : i64, tpu.core_type = #tpu.core_type<tc>, window_params = [{pipeline_mode = #tpu.pipeline_mode<synchronous>, transform_indices = @transform_0, window_bounds = array<i64: 64, 288>}, {pipeline_mode = #tpu.pipeline_mode<synchronous>, transform_indices = @transform_1, window_bounds = array<i64: 16, 1>}, {transform_indices = @transform_2, window_bounds = array<i64: 1, 288, 1664>}, {transform_indices = @transform_3, window_bounds = array<i64: 1, 16, 1664>}]} {
    %c0 = arith.constant 0 : index
    %c0_0 = arith.constant 0 : index
    %0 = vector.load %arg2[%c0, %c0_0] : memref<64x288xbf16, #tpu.memory_space<vmem>>, vector<64x288xbf16>
    %c0_1 = arith.constant 0 : index
    %c0_2 = arith.constant 0 : index
    %c0_3 = arith.constant 0 : index
    %1 = vector.load %arg4[%c0_1, %c0_2, %c0_3] : memref<1x288x1664xbf16, #tpu.memory_space<vmem>>, vector<1x288x1664xbf16>
    %2 = vector.shape_cast %1 : vector<1x288x1664xbf16> to vector<288x1664xbf16>
    %cst = arith.constant dense<0.000000e+00> : vector<64x1664xf32>
    %3 = tpu.matmul %0, %2, %cst {dimension_numbers = #tpu.dot_dimension_numbers<[1], [0], [0], [1], [0, 0, 1, 1], [], []>} : vector<64x288xbf16>, vector<288x1664xbf16>, vector<64x1664xf32> -> vector<64x1664xf32>
    %4 = vector.extract_strided_slice %3 {offsets = [0, 0], sizes = [16, 1664], strides = [1, 1]} : vector<64x1664xf32> to vector<16x1664xf32>
    %5 = vector.extract_strided_slice %3 {offsets = [16, 0], sizes = [16, 1664], strides = [1, 1]} : vector<64x1664xf32> to vector<16x1664xf32>
    %6 = arith.maximumf %4, %5 : vector<16x1664xf32>
    %7 = vector.extract_strided_slice %3 {offsets = [32, 0], sizes = [16, 1664], strides = [1, 1]} : vector<64x1664xf32> to vector<16x1664xf32>
    %8 = vector.extract_strided_slice %3 {offsets = [48, 0], sizes = [16, 1664], strides = [1, 1]} : vector<64x1664xf32> to vector<16x1664xf32>
    %9 = arith.maximumf %7, %8 : vector<16x1664xf32>
    %10 = arith.maximumf %6, %9 : vector<16x1664xf32>
    %c0_4 = arith.constant 0 : index
    %c0_5 = arith.constant 0 : index
    %11 = vector.load %arg3[%c0_4, %c0_5] : memref<16x1xf32, #tpu.memory_space<vmem>>, vector<16x1xf32>
    %12 = vector.broadcast %11 : vector<16x1xf32> to vector<16x1664xf32>
    %13 = arith.addf %10, %12 : vector<16x1664xf32>
    %cst_6 = arith.constant 0.000000e+00 : f32
    %14 = vector.broadcast %cst_6 : f32 to vector<16x1664xf32>
    %15 = arith.maximumf %13, %14 : vector<16x1664xf32>
    %16 = arith.truncf %15 : vector<16x1664xf32> to vector<16x1664xbf16>
    %c0_7 = arith.constant 0 : index
    %c0_8 = arith.constant 0 : index
    %c0_9 = arith.constant 0 : index
    %17 = vector.load %arg5[%c0_7, %c0_8, %c0_9] : memref<1x16x1664xbf16, #tpu.memory_space<vmem>>, vector<1x16x1664xbf16>
    %18 = vector.shape_cast %17 : vector<1x16x1664xbf16> to vector<16x1664xbf16>
    %19 = vector.shape_cast %16 : vector<16x1664xbf16> to vector<1x16x1664xbf16>
    tpu.vector_store %arg5[%c0_7, %c0_8, %c0_9], %19 {strides = array<i32>} : memref<1x16x1664xbf16, #tpu.memory_space<vmem>>, vector<1x16x1664xbf16>,
    return
  }
  func.func @transform_0(%arg0: i32, %arg1: i32) -> (i32, i32) {
    %c0_i32 = arith.constant 0 : i32
    %c0_i32_0 = arith.constant 0 : i32
    %c0_i32_1 = arith.constant 0 : i32
    return %c0_i32, %c0_i32_0 : i32, i32
  }
  func.func @transform_1(%arg0: i32, %arg1: i32) -> (i32, i32) {
    %c0_i32 = arith.constant 0 : i32
    %c0_i32_0 = arith.constant 0 : i32
    %c0_i32_1 = arith.constant 0 : i32
    return %c0_i32, %c0_i32_0 : i32, i32
  }
  func.func @transform_2(%arg0: i32, %arg1: i32) -> (i32, i32, i32) {
    %c0_i32 = arith.constant 0 : i32
    %c0_i32_0 = arith.constant 0 : i32
    return %arg0, %c0_i32, %arg1 : i32, i32, i32
  }
  func.func @transform_3(%arg0: i32, %arg1: i32) -> (i32, i32, i32) {
    %c0_i32 = arith.constant 0 : i32
    %c0_i32_0 = arith.constant 0 : i32
    return %arg0, %c0_i32, %arg1 : i32, i32, i32
  }
}

module attributes {stable_mosaic.version = 11 : i64} {
  func.func @_conv_pool_kernel(%arg0: i32, %arg1: i32, %arg2: memref<128x576xbf16, #tpu.memory_space<vmem>>, %arg3: memref<32x1xf32, #tpu.memory_space<vmem>>, %arg4: memref<1x576x896xbf16, #tpu.memory_space<vmem>>, %arg5: memref<1x32x896xbf16, #tpu.memory_space<vmem>>) attributes {dimension_semantics = [#tpu.dimension_semantics<parallel>, #tpu.dimension_semantics<parallel>], iteration_bounds = array<i64: 2, 1>, scalar_prefetch = 0 : i64, scratch_operands = 0 : i64, tpu.core_type = #tpu.core_type<tc>, window_params = [{pipeline_mode = #tpu.pipeline_mode<synchronous>, transform_indices = @transform_0, window_bounds = array<i64: 128, 576>}, {pipeline_mode = #tpu.pipeline_mode<synchronous>, transform_indices = @transform_1, window_bounds = array<i64: 32, 1>}, {transform_indices = @transform_2, window_bounds = array<i64: 1, 576, 896>}, {transform_indices = @transform_3, window_bounds = array<i64: 1, 32, 896>}]} {
    %c0 = arith.constant 0 : index
    %c0_0 = arith.constant 0 : index
    %0 = vector.load %arg2[%c0, %c0_0] : memref<128x576xbf16, #tpu.memory_space<vmem>>, vector<128x576xbf16>
    %c0_1 = arith.constant 0 : index
    %c0_2 = arith.constant 0 : index
    %c0_3 = arith.constant 0 : index
    %1 = vector.load %arg4[%c0_1, %c0_2, %c0_3] : memref<1x576x896xbf16, #tpu.memory_space<vmem>>, vector<1x576x896xbf16>
    %2 = vector.shape_cast %1 : vector<1x576x896xbf16> to vector<576x896xbf16>
    %cst = arith.constant dense<0.000000e+00> : vector<128x896xf32>
    %3 = tpu.matmul %0, %2, %cst {dimension_numbers = #tpu.dot_dimension_numbers<[1], [0], [0], [1], [0, 0, 1, 1], [], []>} : vector<128x576xbf16>, vector<576x896xbf16>, vector<128x896xf32> -> vector<128x896xf32>
    %4 = vector.extract_strided_slice %3 {offsets = [0, 0], sizes = [32, 896], strides = [1, 1]} : vector<128x896xf32> to vector<32x896xf32>
    %5 = vector.extract_strided_slice %3 {offsets = [32, 0], sizes = [32, 896], strides = [1, 1]} : vector<128x896xf32> to vector<32x896xf32>
    %6 = arith.maximumf %4, %5 : vector<32x896xf32>
    %7 = vector.extract_strided_slice %3 {offsets = [64, 0], sizes = [32, 896], strides = [1, 1]} : vector<128x896xf32> to vector<32x896xf32>
    %8 = vector.extract_strided_slice %3 {offsets = [96, 0], sizes = [32, 896], strides = [1, 1]} : vector<128x896xf32> to vector<32x896xf32>
    %9 = arith.maximumf %7, %8 : vector<32x896xf32>
    %10 = arith.maximumf %6, %9 : vector<32x896xf32>
    %c0_4 = arith.constant 0 : index
    %c0_5 = arith.constant 0 : index
    %11 = vector.load %arg3[%c0_4, %c0_5] : memref<32x1xf32, #tpu.memory_space<vmem>>, vector<32x1xf32>
    %12 = vector.broadcast %11 : vector<32x1xf32> to vector<32x896xf32>
    %13 = arith.addf %10, %12 : vector<32x896xf32>
    %cst_6 = arith.constant 0.000000e+00 : f32
    %14 = vector.broadcast %cst_6 : f32 to vector<32x896xf32>
    %15 = arith.maximumf %13, %14 : vector<32x896xf32>
    %16 = arith.truncf %15 : vector<32x896xf32> to vector<32x896xbf16>
    %c0_7 = arith.constant 0 : index
    %c0_8 = arith.constant 0 : index
    %c0_9 = arith.constant 0 : index
    %17 = vector.load %arg5[%c0_7, %c0_8, %c0_9] : memref<1x32x896xbf16, #tpu.memory_space<vmem>>, vector<1x32x896xbf16>
    %18 = vector.shape_cast %17 : vector<1x32x896xbf16> to vector<32x896xbf16>
    %19 = vector.shape_cast %16 : vector<32x896xbf16> to vector<1x32x896xbf16>
    tpu.vector_store %arg5[%c0_7, %c0_8, %c0_9], %19 {strides = array<i32>} : memref<1x32x896xbf16, #tpu.memory_space<vmem>>, vector<1x32x896xbf16>,
    return
  }
  func.func @transform_0(%arg0: i32, %arg1: i32) -> (i32, i32) {
    %c0_i32 = arith.constant 0 : i32
    %c0_i32_0 = arith.constant 0 : i32
    %c0_i32_1 = arith.constant 0 : i32
    return %c0_i32, %c0_i32_0 : i32, i32
  }
  func.func @transform_1(%arg0: i32, %arg1: i32) -> (i32, i32) {
    %c0_i32 = arith.constant 0 : i32
    %c0_i32_0 = arith.constant 0 : i32
    %c0_i32_1 = arith.constant 0 : i32
    return %c0_i32, %c0_i32_0 : i32, i32
  }
  func.func @transform_2(%arg0: i32, %arg1: i32) -> (i32, i32, i32) {
    %c0_i32 = arith.constant 0 : i32
    %c0_i32_0 = arith.constant 0 : i32
    return %arg0, %c0_i32, %arg1 : i32, i32, i32
  }
  func.func @transform_3(%arg0: i32, %arg1: i32) -> (i32, i32, i32) {
    %c0_i32 = arith.constant 0 : i32
    %c0_i32_0 = arith.constant 0 : i32
    return %arg0, %c0_i32, %arg1 : i32, i32, i32
  }
}

module attributes {stable_mosaic.version = 11 : i64} {
  func.func @_fc_kernel(%arg0: i32, %arg1: memref<2x6272xbf16, #tpu.memory_space<vmem>>, %arg2: memref<6272x128xbf16, #tpu.memory_space<vmem>>, %arg3: memref<1x128xf32, #tpu.memory_space<vmem>>, %arg4: memref<128x14xf32, #tpu.memory_space<vmem>>, %arg5: memref<1x14xf32, #tpu.memory_space<vmem>>, %arg6: memref<2x14xf32, #tpu.memory_space<vmem>>, %arg7: memref<2x128xf32, #tpu.memory_space<vmem>>) attributes {dimension_semantics = [#tpu.dimension_semantics<arbitrary>], iteration_bounds = array<i64: 4>, scalar_prefetch = 0 : i64, scratch_operands = 1 : i64, tpu.core_type = #tpu.core_type<tc>, window_params = [{transform_indices = @transform_0, window_bounds = array<i64: 2, 6272>}, {transform_indices = @transform_1, window_bounds = array<i64: 6272, 128>}, {pipeline_mode = #tpu.pipeline_mode<synchronous>, transform_indices = @transform_2, window_bounds = array<i64: 1, 128>}, {pipeline_mode = #tpu.pipeline_mode<synchronous>, transform_indices = @transform_3, window_bounds = array<i64: 128, 14>}, {pipeline_mode = #tpu.pipeline_mode<synchronous>, transform_indices = @transform_4, window_bounds = array<i64: 1, 14>}, {pipeline_mode = #tpu.pipeline_mode<synchronous>, transform_indices = @transform_5, window_bounds = array<i64: 2, 14>}]} {
    %c0_i32 = arith.constant 0 : i32
    %0 = arith.cmpi eq, %arg0, %c0_i32 : i32
    %1 = arith.extui %0 : i1 to i32
    %c0_i32_0 = arith.constant 0 : i32
    %2 = arith.cmpi ne, %1, %c0_i32_0 : i32
    scf.if %2 {
      %cst_9 = arith.constant 0.000000e+00 : f32
      %12 = vector.broadcast %cst_9 : f32 to vector<2x128xf32>
      %c0_10 = arith.constant 0 : index
      %c0_11 = arith.constant 0 : index
      %13 = vector.load %arg7[%c0_10, %c0_11] : memref<2x128xf32, #tpu.memory_space<vmem>>, vector<2x128xf32>
      tpu.vector_store %arg7[%c0_10, %c0_11], %12 {strides = array<i32>} : memref<2x128xf32, #tpu.memory_space<vmem>>, vector<2x128xf32>,
    } else {
    }
    %c0 = arith.constant 0 : index
    %c0_1 = arith.constant 0 : index
    %3 = vector.load %arg7[%c0, %c0_1] : memref<2x128xf32, #tpu.memory_space<vmem>>, vector<2x128xf32>
    %c0_2 = arith.constant 0 : index
    %c0_3 = arith.constant 0 : index
    %4 = vector.load %arg1[%c0_2, %c0_3] : memref<2x6272xbf16, #tpu.memory_space<vmem>>, vector<2x6272xbf16>
    %c0_4 = arith.constant 0 : index
    %c0_5 = arith.constant 0 : index
    %5 = vector.load %arg2[%c0_4, %c0_5] : memref<6272x128xbf16, #tpu.memory_space<vmem>>, vector<6272x128xbf16>
    %cst = arith.constant dense<0.000000e+00> : vector<2x128xf32>
    %6 = tpu.matmul %4, %5, %cst {dimension_numbers = #tpu.dot_dimension_numbers<[1], [0], [0], [1], [0, 0, 1, 1], [], []>} : vector<2x6272xbf16>, vector<6272x128xbf16>, vector<2x128xf32> -> vector<2x128xf32>
    %7 = arith.addf %3, %6 : vector<2x128xf32>
    %c0_6 = arith.constant 0 : index
    %c0_7 = arith.constant 0 : index
    %8 = vector.load %arg7[%c0_6, %c0_7] : memref<2x128xf32, #tpu.memory_space<vmem>>, vector<2x128xf32>
    tpu.vector_store %arg7[%c0_6, %c0_7], %7 {strides = array<i32>} : memref<2x128xf32, #tpu.memory_space<vmem>>, vector<2x128xf32>,
    %c3_i32 = arith.constant 3 : i32
    %9 = arith.cmpi eq, %arg0, %c3_i32 : i32
    %10 = arith.extui %9 : i1 to i32
    %c0_i32_8 = arith.constant 0 : i32
    %11 = arith.cmpi ne, %10, %c0_i32_8 : i32
    scf.if %11 {
      %c0_9 = arith.constant 0 : index
      %c0_10 = arith.constant 0 : index
      %12 = vector.load %arg7[%c0_9, %c0_10] : memref<2x128xf32, #tpu.memory_space<vmem>>, vector<2x128xf32>
      %c0_11 = arith.constant 0 : index
      %c0_12 = arith.constant 0 : index
      %13 = vector.load %arg3[%c0_11, %c0_12] : memref<1x128xf32, #tpu.memory_space<vmem>>, vector<1x128xf32>
      %14 = vector.broadcast %13 : vector<1x128xf32> to vector<2x128xf32>
      %15 = arith.addf %12, %14 : vector<2x128xf32>
      %c0_13 = arith.constant 0 : index
      %c0_14 = arith.constant 0 : index
      %16 = vector.load %arg4[%c0_13, %c0_14] : memref<128x14xf32, #tpu.memory_space<vmem>>, vector<128x14xf32>
      %cst_15 = arith.constant dense<0.000000e+00> : vector<2x14xf32>
      %17 = tpu.matmul %15, %16, %cst_15 {dimension_numbers = #tpu.dot_dimension_numbers<[1], [0], [0], [1], [0, 0, 1, 1], [], []>} : vector<2x128xf32>, vector<128x14xf32>, vector<2x14xf32> -> vector<2x14xf32>
      %c0_16 = arith.constant 0 : index
      %c0_17 = arith.constant 0 : index
      %18 = vector.load %arg5[%c0_16, %c0_17] : memref<1x14xf32, #tpu.memory_space<vmem>>, vector<1x14xf32>
      %19 = vector.broadcast %18 : vector<1x14xf32> to vector<2x14xf32>
      %20 = arith.addf %17, %19 : vector<2x14xf32>
      %c0_18 = arith.constant 0 : index
      %c0_19 = arith.constant 0 : index
      %21 = vector.load %arg6[%c0_18, %c0_19] : memref<2x14xf32, #tpu.memory_space<vmem>>, vector<2x14xf32>
      tpu.vector_store %arg6[%c0_18, %c0_19], %20 {strides = array<i32>} : memref<2x14xf32, #tpu.memory_space<vmem>>, vector<2x14xf32>,
    } else {
    }
    return
  }
  func.func @transform_0(%arg0: i32) -> (i32, i32) {
    %c0_i32 = arith.constant 0 : i32
    %c0_i32_0 = arith.constant 0 : i32
    return %c0_i32, %arg0 : i32, i32
  }
  func.func @transform_1(%arg0: i32) -> (i32, i32) {
    %c0_i32 = arith.constant 0 : i32
    %c0_i32_0 = arith.constant 0 : i32
    return %arg0, %c0_i32 : i32, i32
  }
  func.func @transform_2(%arg0: i32) -> (i32, i32) {
    %c0_i32 = arith.constant 0 : i32
    %c0_i32_0 = arith.constant 0 : i32
    %c0_i32_1 = arith.constant 0 : i32
    return %c0_i32, %c0_i32_0 : i32, i32
  }
  func.func @transform_3(%arg0: i32) -> (i32, i32) {
    %c0_i32 = arith.constant 0 : i32
    %c0_i32_0 = arith.constant 0 : i32
    %c0_i32_1 = arith.constant 0 : i32
    return %c0_i32, %c0_i32_0 : i32, i32
  }
  func.func @transform_4(%arg0: i32) -> (i32, i32) {
    %c0_i32 = arith.constant 0 : i32
    %c0_i32_0 = arith.constant 0 : i32
    %c0_i32_1 = arith.constant 0 : i32
    return %c0_i32, %c0_i32_0 : i32, i32
  }
  func.func @transform_5(%arg0: i32) -> (i32, i32) {
    %c0_i32 = arith.constant 0 : i32
    %c0_i32_0 = arith.constant 0 : i32
    %c0_i32_1 = arith.constant 0 : i32
    return %c0_i32, %c0_i32_0 : i32, i32
  }
}

</mosaic_0001>

<bundles_post_ra>
// kernel: net_forward.4
= control target key start
LH: loop header
LB: loop body
LE: loop exit
PB: predicated region body
PF: predicated region fallthrough
CT: control target
= control target key end

     0   :  { %s2065_s12 = smov 0   ;;  %s2067_s13 = smov 0   ;;  %s2536_s0 = inlined_call_operand.vmem [shape: bf16[32,112], index: 0, kind: input, shape index: {}]   ;;  %s2537_s1 = inlined_call_operand.vmem [shape: f32[8,1], index: 1, kind: input, shape index: {}]   ;;  %s2538_s2 = inlined_call_operand.vmem [shape: bf16[2,112,12544], index: 2, kind: input, shape index: {}]   ;;  %s2539_s3 = inlined_call_operand.vmem [shape: bf16[2,8,12544], index: 3, kind: output, shape index: {}]  }
   0x1   :  { %s2069_s14 = smov 0   ;;  %s2071_s15 = smov 0  }
   0x2   :  { %s2073_s16 = smov 0   ;;  %s2075_s17 = smov 0  }
   0x3   :  { %s2077_s18 = smov 0  }
   0x4 LB: > { %s22_s19 = sadd.s32 1, %s2034_s16  ;;  %s25_s20 = sadd.s32 1, %s2038_s17  ;;  %s2042_s18 = sphi %s2077_s18, %s13_s18   ;;  %s2038_s17 = sphi %s2075_s17, %s2545_s17   ;;  %s2034_s16 = sphi %s2073_s16, %s2544_s16   ;;  %s2030_s15 = sphi %s2071_s15, %s2543_s15   ;;  %s2026_s14 = sphi %s2069_s14, %s2542_s14   ;;  %s2022_s13 = sphi %s2067_s13, %s2541_s13   ;;  %s2018_s12 = sphi %s2065_s12, %s2540_s12  }
   0x5   : > { %p23_p0 = scmp.ge.s32.totalorder %s22_s19, 7  ;;  %p83_p1 = scmp.ne.s32.totalorder %s2022_s13, %s2018_s12 }
   0x6   : > { %p84_p2 = scmp.eq.s32.totalorder %s2042_s18, 0  ;;  %s76_s24 = sadd.s32 1, %s2022_s13 }
   0x7   : > { %s2547_s19 = smov (%p23_p0, %s22_s19), 0  ;;  %s2549_s20 = smov (!%p23_p0, %s25_s20), %s2038_s17 }
   0x8   : > { %p85_p3 = por %p84_p2, %p83_p1  ;;  %p27_p4 = scmp.ge.s32.totalorder %s2549_s20, 2 }
   0x9   : > { %s72_s21 = ssub.s32 %s2034_s16, %s2547_s19  ;;  %p1629_p6 = scmp.ge.s32.totalorder %s2042_s18, 14 }
   0xa   : > { %s2551_s20 = smov (%p27_p4, %s2549_s20), 0 }
   0xb   : > { %s71_s22 = ssub.s32 %s2038_s17, %s2551_s20  ;;  %143 = sbr.rel (%p1629_p6) target bundleno = 74 (0x4a), region = 24 }
   0xc   : > { %s73_s23 = sor.u32 %s72_s21, %s71_s22 }
   0xd   : > { %p74_p5 = scmp.eq.s32.totalorder %s73_s23, 0 }
   0xf   : > { %s2116_s25 = scalar_select %p74_p5, %s2022_s13, %s76_s24  }
  0x10   : > { %146 = sbr.rel (!%p85_p3) target bundleno = 74 (0x4a), region = 28  ;;  %s148_s26 = sand.u32 (%p85_p3), 1, %s2022_s13  }
  0x11   : > { %s151_s27 = smul.u32 (%p85_p3), 14, %s2034_s16 }
  0x12   : > { %s1777_s28 = smul.u32 (%p85_p3), 784, %s148_s26 }
  0x13   : > { %s1778_s29 = smul.u32 (%p85_p3), 1372, %s2038_s17 }
  0x14   : > { %s2130_s8 = scalar_lea.vmem (%p85_p3), [#allocation2], %s1777_s28 }
  0x15   : > { %s153_s30 = sadd.s32 %s1778_s29, %s151_s27 }
  0x16   : > { %s1630_s4 = sshll.u32 %s153_s30, 2 }
  0x17   : > { %s2125_s7 = scalar_lea.vmem %s2538_s2, %s1630_s4 }
  0x18   : > { %v168_v0 = vld [vmem:[%s2125_s7] sm:$0xff]  ;;  %v170_v1 = vld [vmem:[%s2125_s7 + $0x8] sm:$0xff]  ;;  %v172_v2 = vld [vmem:[%s2125_s7 + $0x10] sm:$0xff] }
  0x19   : > { %169 = vst [vmem:[%s2130_s8] sm:$0xff] %v168_v0  ;;  %171 = vst [vmem:[%s2130_s8 + $0x8] sm:$0xff] %v170_v1  ;;  %v174_v3 = vld [vmem:[%s2125_s7 + $0x18] sm:$0xff]  ;;  %v176_v4 = vld [vmem:[%s2125_s7 + $0x20] sm:$0xff] }
  0x1a   : > { %173 = vst [vmem:[%s2130_s8 + $0x10] sm:$0xff] %v172_v2  ;;  %v178_v5 = vld [vmem:[%s2125_s7 + $0x28] sm:$0xff]  ;;  %175 = vst [vmem:[%s2130_s8 + $0x18] sm:$0xff] %v174_v3  ;;  %v180_v6 = vld [vmem:[%s2125_s7 + $0x30] sm:$0xff] }
  0x1b   : > { %177 = vst [vmem:[%s2130_s8 + $0x20] sm:$0xff] %v176_v4  ;;  %179 = vst [vmem:[%s2130_s8 + $0x28] sm:$0xff] %v178_v5  ;;  %v182_v7 = vld [vmem:[%s2125_s7 + $0x188] sm:$0xff]  ;;  %v184_v8 = vld [vmem:[%s2125_s7 + $0x190] sm:$0xff] }
  0x1c   : > { %181 = vst [vmem:[%s2130_s8 + $0x30] sm:$0xff] %v180_v6  ;;  %183 = vst [vmem:[%s2130_s8 + $0x38] sm:$0xff] %v182_v7  ;;  %v186_v9 = vld [vmem:[%s2125_s7 + $0x198] sm:$0xff]  ;;  %v188_v10 = vld [vmem:[%s2125_s7 + $0x1a0] sm:$0xff] }
  0x1d   : > { %185 = vst [vmem:[%s2130_s8 + $0x40] sm:$0xff] %v184_v8  ;;  %v190_v11 = vld [vmem:[%s2125_s7 + $0x1a8] sm:$0xff]  ;;  %187 = vst [vmem:[%s2130_s8 + $0x48] sm:$0xff] %v186_v9  ;;  %v192_v12 = vld [vmem:[%s2125_s7 + $0x1b0] sm:$0xff] }
  0x1e   : > { %189 = vst [vmem:[%s2130_s8 + $0x50] sm:$0xff] %v188_v10  ;;  %191 = vst [vmem:[%s2130_s8 + $0x58] sm:$0xff] %v190_v11  ;;  %v194_v13 = vld [vmem:[%s2125_s7 + $0x1b8] sm:$0xff]  ;;  %v196_v14 = vld [vmem:[%s2125_s7 + $0x310] sm:$0xff] }
  0x1f   : > { %193 = vst [vmem:[%s2130_s8 + $0x60] sm:$0xff] %v192_v12  ;;  %195 = vst [vmem:[%s2130_s8 + $0x68] sm:$0xff] %v194_v13  ;;  %v198_v15 = vld [vmem:[%s2125_s7 + $0x318] sm:$0xff]  ;;  %v200_v16 = vld [vmem:[%s2125_s7 + $0x320] sm:$0xff] }
  0x20   : > { %197 = vst [vmem:[%s2130_s8 + $0x70] sm:$0xff] %v196_v14  ;;  %v202_v17 = vld [vmem:[%s2125_s7 + $0x328] sm:$0xff]  ;;  %199 = vst [vmem:[%s2130_s8 + $0x78] sm:$0xff] %v198_v15  ;;  %v204_v18 = vld [vmem:[%s2125_s7 + $0x330] sm:$0xff] }
  0x21   : > { %201 = vst [vmem:[%s2130_s8 + $0x80] sm:$0xff] %v200_v16  ;;  %203 = vst [vmem:[%s2130_s8 + $0x88] sm:$0xff] %v202_v17  ;;  %v206_v19 = vld [vmem:[%s2125_s7 + $0x338] sm:$0xff]  ;;  %v208_v20 = vld [vmem:[%s2125_s7 + $0x340] sm:$0xff] }
  0x22   : > { %205 = vst [vmem:[%s2130_s8 + $0x90] sm:$0xff] %v204_v18  ;;  %207 = vst [vmem:[%s2130_s8 + $0x98] sm:$0xff] %v206_v19  ;;  %v210_v21 = vld [vmem:[%s2125_s7 + $0x498] sm:$0xff]  ;;  %v212_v22 = vld [vmem:[%s2125_s7 + $0x4a0] sm:$0xff] }
  0x23   : > { %209 = vst [vmem:[%s2130_s8 + $0xa0] sm:$0xff] %v208_v20  ;;  %v214_v23 = vld [vmem:[%s2125_s7 + $0x4a8] sm:$0xff]  ;;  %211 = vst [vmem:[%s2130_s8 + $0xa8] sm:$0xff] %v210_v21  ;;  %v216_v24 = vld [vmem:[%s2125_s7 + $0x4b0] sm:$0xff] }
  0x24   : > { %213 = vst [vmem:[%s2130_s8 + $0xb0] sm:$0xff] %v212_v22  ;;  %215 = vst [vmem:[%s2130_s8 + $0xb8] sm:$0xff] %v214_v23  ;;  %v218_v25 = vld [vmem:[%s2125_s7 + $0x4b8] sm:$0xff]  ;;  %v220_v26 = vld [vmem:[%s2125_s7 + $0x4c0] sm:$0xff] }
  0x25   : > { %217 = vst [vmem:[%s2130_s8 + $0xc0] sm:$0xff] %v216_v24  ;;  %219 = vst [vmem:[%s2130_s8 + $0xc8] sm:$0xff] %v218_v25  ;;  %v222_v27 = vld [vmem:[%s2125_s7 + $0x4c8] sm:$0xff]  ;;  %v224_v28 = vld [vmem:[%s2125_s7 + $0x620] sm:$0xff] }
  0x26   : > { %221 = vst [vmem:[%s2130_s8 + $0xd0] sm:$0xff] %v220_v26  ;;  %v226_v29 = vld [vmem:[%s2125_s7 + $0x628] sm:$0xff]  ;;  %223 = vst [vmem:[%s2130_s8 + $0xd8] sm:$0xff] %v222_v27  ;;  %v228_v30 = vld [vmem:[%s2125_s7 + $0x630] sm:$0xff] }
  0x27   : > { %225 = vst [vmem:[%s2130_s8 + $0xe0] sm:$0xff] %v224_v28  ;;  %227 = vst [vmem:[%s2130_s8 + $0xe8] sm:$0xff] %v226_v29  ;;  %v230_v31 = vld [vmem:[%s2125_s7 + $0x638] sm:$0xff]  ;;  %v232_v32 = vld [vmem:[%s2125_s7 + $0x640] sm:$0xff] }
  0x28   : > { %229 = vst [vmem:[%s2130_s8 + $0xf0] sm:$0xff] %v228_v30  ;;  %231 = vst [vmem:[%s2130_s8 + $0xf8] sm:$0xff] %v230_v31  ;;  %v234_v33 = vld [vmem:[%s2125_s7 + $0x648] sm:$0xff]  ;;  %v236_v34 = vld [vmem:[%s2125_s7 + $0x650] sm:$0xff] }
  0x29   : > { %233 = vst [vmem:[%s2130_s8 + $0x100] sm:$0xff] %v232_v32  ;;  %v238_v35 = vld [vmem:[%s2125_s7 + $0x7a8] sm:$0xff]  ;;  %235 = vst [vmem:[%s2130_s8 + $0x108] sm:$0xff] %v234_v33  ;;  %v240_v36 = vld [vmem:[%s2125_s7 + $0x7b0] sm:$0xff] }
  0x2a   : > { %237 = vst [vmem:[%s2130_s8 + $0x110] sm:$0xff] %v236_v34  ;;  %239 = vst [vmem:[%s2130_s8 + $0x118] sm:$0xff] %v238_v35  ;;  %v242_v37 = vld [vmem:[%s2125_s7 + $0x7b8] sm:$0xff]  ;;  %v244_v38 = vld [vmem:[%s2125_s7 + $0x7c0] sm:$0xff] }
  0x2b   : > { %241 = vst [vmem:[%s2130_s8 + $0x120] sm:$0xff] %v240_v36  ;;  %243 = vst [vmem:[%s2130_s8 + $0x128] sm:$0xff] %v242_v37  ;;  %v246_v39 = vld [vmem:[%s2125_s7 + $0x7c8] sm:$0xff]  ;;  %v248_v40 = vld [vmem:[%s2125_s7 + $0x7d0] sm:$0xff] }
  0x2c   : > { %245 = vst [vmem:[%s2130_s8 + $0x130] sm:$0xff] %v244_v38  ;;  %v250_v41 = vld [vmem:[%s2125_s7 + $0x7d8] sm:$0xff]  ;;  %247 = vst [vmem:[%s2130_s8 + $0x138] sm:$0xff] %v246_v39  ;;  %v252_v42 = vld [vmem:[%s2125_s7 + $0x930] sm:$0xff] }
  0x2d   : > { %249 = vst [vmem:[%s2130_s8 + $0x140] sm:$0xff] %v248_v40  ;;  %251 = vst [vmem:[%s2130_s8 + $0x148] sm:$0xff] %v250_v41  ;;  %v254_v43 = vld [vmem:[%s2125_s7 + $0x938] sm:$0xff]  ;;  %v256_v44 = vld [vmem:[%s2125_s7 + $0x940] sm:$0xff] }
  0x2e   : > { %253 = vst [vmem:[%s2130_s8 + $0x150] sm:$0xff] %v252_v42  ;;  %255 = vst [vmem:[%s2130_s8 + $0x158] sm:$0xff] %v254_v43  ;;  %v258_v45 = vld [vmem:[%s2125_s7 + $0x948] sm:$0xff]  ;;  %v260_v46 = vld [vmem:[%s2125_s7 + $0x950] sm:$0xff] }
  0x2f   : > { %257 = vst [vmem:[%s2130_s8 + $0x160] sm:$0xff] %v256_v44  ;;  %v262_v47 = vld [vmem:[%s2125_s7 + $0x958] sm:$0xff]  ;;  %259 = vst [vmem:[%s2130_s8 + $0x168] sm:$0xff] %v258_v45  ;;  %v264_v48 = vld [vmem:[%s2125_s7 + $0x960] sm:$0xff] }
  0x30   : > { %261 = vst [vmem:[%s2130_s8 + $0x170] sm:$0xff] %v260_v46  ;;  %263 = vst [vmem:[%s2130_s8 + $0x178] sm:$0xff] %v262_v47  ;;  %v266_v49 = vld [vmem:[%s2125_s7 + $0xab8] sm:$0xff]  ;;  %v268_v50 = vld [vmem:[%s2125_s7 + $0xac0] sm:$0xff] }
  0x31   : > { %265 = vst [vmem:[%s2130_s8 + $0x180] sm:$0xff] %v264_v48  ;;  %267 = vst [vmem:[%s2130_s8 + $0x188] sm:$0xff] %v266_v49  ;;  %v270_v51 = vld [vmem:[%s2125_s7 + $0xac8] sm:$0xff]  ;;  %v272_v52 = vld [vmem:[%s2125_s7 + $0xad0] sm:$0xff] }
  0x32   : > { %269 = vst [vmem:[%s2130_s8 + $0x190] sm:$0xff] %v268_v50  ;;  %v274_v53 = vld [vmem:[%s2125_s7 + $0xad8] sm:$0xff]  ;;  %271 = vst [vmem:[%s2130_s8 + $0x198] sm:$0xff] %v270_v51  ;;  %v276_v54 = vld [vmem:[%s2125_s7 + $0xae0] sm:$0xff] }
  0x33   : > { %273 = vst [vmem:[%s2130_s8 + $0x1a0] sm:$0xff] %v272_v52  ;;  %275 = vst [vmem:[%s2130_s8 + $0x1a8] sm:$0xff] %v274_v53  ;;  %v278_v55 = vld [vmem:[%s2125_s7 + $0xae8] sm:$0xff]  ;;  %v280_v56 = vld [vmem:[%s2125_s7 + $0xc40] sm:$0xff] }
  0x34   : > { %277 = vst [vmem:[%s2130_s8 + $0x1b0] sm:$0xff] %v276_v54  ;;  %279 = vst [vmem:[%s2130_s8 + $0x1b8] sm:$0xff] %v278_v55  ;;  %v282_v57 = vld [vmem:[%s2125_s7 + $0xc48] sm:$0xff]  ;;  %v284_v58 = vld [vmem:[%s2125_s7 + $0xc50] sm:$0xff] }
  0x35   : > { %281 = vst [vmem:[%s2130_s8 + $0x1c0] sm:$0xff] %v280_v56  ;;  %v286_v59 = vld [vmem:[%s2125_s7 + $0xc58] sm:$0xff]  ;;  %283 = vst [vmem:[%s2130_s8 + $0x1c8] sm:$0xff] %v282_v57  ;;  %v288_v60 = vld [vmem:[%s2125_s7 + $0xc60] sm:$0xff] }
  0x36   : > { %285 = vst [vmem:[%s2130_s8 + $0x1d0] sm:$0xff] %v284_v58  ;;  %287 = vst [vmem:[%s2130_s8 + $0x1d8] sm:$0xff] %v286_v59  ;;  %v290_v61 = vld [vmem:[%s2125_s7 + $0xc68] sm:$0xff]  ;;  %v292_v62 = vld [vmem:[%s2125_s7 + $0xc70] sm:$0xff] }
  0x37   : > { %289 = vst [vmem:[%s2130_s8 + $0x1e0] sm:$0xff] %v288_v60  ;;  %291 = vst [vmem:[%s2130_s8 + $0x1e8] sm:$0xff] %v290_v61  ;;  %v294_v63 = vld [vmem:[%s2125_s7 + $0xdc8] sm:$0xff]  ;;  %v296_v0 = vld [vmem:[%s2125_s7 + $0xdd0] sm:$0xff] }
  0x38   : > { %293 = vst [vmem:[%s2130_s8 + $0x1f0] sm:$0xff] %v292_v62  ;;  %v298_v1 = vld [vmem:[%s2125_s7 + $0xdd8] sm:$0xff]  ;;  %295 = vst [vmem:[%s2130_s8 + $0x1f8] sm:$0xff] %v294_v63  ;;  %v300_v2 = vld [vmem:[%s2125_s7 + $0xde0] sm:$0xff] }
  0x39   : > { %297 = vst [vmem:[%s2130_s8 + $0x200] sm:$0xff] %v296_v0  ;;  %299 = vst [vmem:[%s2130_s8 + $0x208] sm:$0xff] %v298_v1  ;;  %v302_v3 = vld [vmem:[%s2125_s7 + $0xde8] sm:$0xff]  ;;  %v304_v4 = vld [vmem:[%s2125_s7 + $0xdf0] sm:$0xff] }
  0x3a   : > { %301 = vst [vmem:[%s2130_s8 + $0x210] sm:$0xff] %v300_v2  ;;  %303 = vst [vmem:[%s2130_s8 + $0x218] sm:$0xff] %v302_v3  ;;  %v306_v5 = vld [vmem:[%s2125_s7 + $0xdf8] sm:$0xff]  ;;  %v308_v6 = vld [vmem:[%s2125_s7 + $0xf50] sm:$0xff] }
  0x3b   : > { %305 = vst [vmem:[%s2130_s8 + $0x220] sm:$0xff] %v304_v4  ;;  %v310_v7 = vld [vmem:[%s2125_s7 + $0xf58] sm:$0xff]  ;;  %307 = vst [vmem:[%s2130_s8 + $0x228] sm:$0xff] %v306_v5  ;;  %v312_v8 = vld [vmem:[%s2125_s7 + $0xf60] sm:$0xff] }
  0x3c   : > { %309 = vst [vmem:[%s2130_s8 + $0x230] sm:$0xff] %v308_v6  ;;  %311 = vst [vmem:[%s2130_s8 + $0x238] sm:$0xff] %v310_v7  ;;  %v314_v9 = vld [vmem:[%s2125_s7 + $0xf68] sm:$0xff]  ;;  %v316_v10 = vld [vmem:[%s2125_s7 + $0xf70] sm:$0xff] }
  0x3d   : > { %313 = vst [vmem:[%s2130_s8 + $0x240] sm:$0xff] %v312_v8  ;;  %315 = vst [vmem:[%s2130_s8 + $0x248] sm:$0xff] %v314_v9  ;;  %v318_v11 = vld [vmem:[%s2125_s7 + $0xf78] sm:$0xff]  ;;  %v320_v12 = vld [vmem:[%s2125_s7 + $0xf80] sm:$0xff] }
  0x3e   : > { %317 = vst [vmem:[%s2130_s8 + $0x250] sm:$0xff] %v316_v10  ;;  %v322_v13 = vld [vmem:[%s2125_s7 + $0x10d8] sm:$0xff]  ;;  %319 = vst [vmem:[%s2130_s8 + $0x258] sm:$0xff] %v318_v11  ;;  %v324_v14 = vld [vmem:[%s2125_s7 + $0x10e0] sm:$0xff] }
  0x3f   : > { %321 = vst [vmem:[%s2130_s8 + $0x260] sm:$0xff] %v320_v12  ;;  %323 = vst [vmem:[%s2130_s8 + $0x268] sm:$0xff] %v322_v13  ;;  %v326_v15 = vld [vmem:[%s2125_s7 + $0x10e8] sm:$0xff]  ;;  %v328_v16 = vld [vmem:[%s2125_s7 + $0x10f0] sm:$0xff] }
  0x40   : > { %325 = vst [vmem:[%s2130_s8 + $0x270] sm:$0xff] %v324_v14  ;;  %327 = vst [vmem:[%s2130_s8 + $0x278] sm:$0xff] %v326_v15  ;;  %v330_v17 = vld [vmem:[%s2125_s7 + $0x10f8] sm:$0xff]  ;;  %v332_v18 = vld [vmem:[%s2125_s7 + $0x1100] sm:$0xff] }
  0x41   : > { %329 = vst [vmem:[%s2130_s8 + $0x280] sm:$0xff] %v328_v16  ;;  %v334_v19 = vld [vmem:[%s2125_s7 + $0x1108] sm:$0xff]  ;;  %331 = vst [vmem:[%s2130_s8 + $0x288] sm:$0xff] %v330_v17  ;;  %v336_v20 = vld [vmem:[%s2125_s7 + $0x1260] sm:$0xff] }
  0x42   : > { %333 = vst [vmem:[%s2130_s8 + $0x290] sm:$0xff] %v332_v18  ;;  %335 = vst [vmem:[%s2130_s8 + $0x298] sm:$0xff] %v334_v19  ;;  %v338_v21 = vld [vmem:[%s2125_s7 + $0x1268] sm:$0xff]  ;;  %v340_v22 = vld [vmem:[%s2125_s7 + $0x1270] sm:$0xff] }
  0x43   : > { %337 = vst [vmem:[%s2130_s8 + $0x2a0] sm:$0xff] %v336_v20  ;;  %339 = vst [vmem:[%s2130_s8 + $0x2a8] sm:$0xff] %v338_v21  ;;  %v342_v23 = vld [vmem:[%s2125_s7 + $0x1278] sm:$0xff]  ;;  %v344_v24 = vld [vmem:[%s2125_s7 + $0x1280] sm:$0xff] }
  0x44   : > { %341 = vst [vmem:[%s2130_s8 + $0x2b0] sm:$0xff] %v340_v22  ;;  %v346_v25 = vld [vmem:[%s2125_s7 + $0x1288] sm:$0xff]  ;;  %343 = vst [vmem:[%s2130_s8 + $0x2b8] sm:$0xff] %v342_v23  ;;  %v348_v26 = vld [vmem:[%s2125_s7 + $0x1290] sm:$0xff] }
  0x45   : > { %345 = vst [vmem:[%s2130_s8 + $0x2c0] sm:$0xff] %v344_v24  ;;  %347 = vst [vmem:[%s2130_s8 + $0x2c8] sm:$0xff] %v346_v25  ;;  %v350_v27 = vld [vmem:[%s2125_s7 + $0x13e8] sm:$0xff]  ;;  %v352_v28 = vld [vmem:[%s2125_s7 + $0x13f0] sm:$0xff] }
  0x46   : > { %349 = vst [vmem:[%s2130_s8 + $0x2d0] sm:$0xff] %v348_v26  ;;  %351 = vst [vmem:[%s2130_s8 + $0x2d8] sm:$0xff] %v350_v27  ;;  %v354_v29 = vld [vmem:[%s2125_s7 + $0x13f8] sm:$0xff]  ;;  %v356_v30 = vld [vmem:[%s2125_s7 + $0x1400] sm:$0xff] }
  0x47   : > { %353 = vst [vmem:[%s2130_s8 + $0x2e0] sm:$0xff] %v352_v28  ;;  %v358_v31 = vld [vmem:[%s2125_s7 + $0x1408] sm:$0xff]  ;;  %355 = vst [vmem:[%s2130_s8 + $0x2e8] sm:$0xff] %v354_v29  ;;  %v360_v32 = vld [vmem:[%s2125_s7 + $0x1410] sm:$0xff] }
  0x48   : > { %357 = vst [vmem:[%s2130_s8 + $0x2f0] sm:$0xff] %v356_v30  ;;  %359 = vst [vmem:[%s2130_s8 + $0x2f8] sm:$0xff] %v358_v31  ;;  %v362_v33 = vld [vmem:[%s2125_s7 + $0x1418] sm:$0xff] }
  0x49   : > { %361 = vst [vmem:[%s2130_s8 + $0x300] sm:$0xff] %v360_v32  ;;  %363 = vst [vmem:[%s2130_s8 + $0x308] sm:$0xff] %v362_v33 }
  0x4a PF: > { %p1631_p7 = scmp.ge.s32.totalorder %s2042_s18, 1  ;;  %p368_p8 = scmp.lt.s32.totalorder %s2042_s18, 15 }
  0x4c   : > { %p369_p9 = pnand %p1631_p7, %p368_p8 }
  0x4d   : > { %s375_s9 = sand.u32 (!%p369_p9), 1, %s2018_s12   ;;  %p404_p10 = scmp.lt.s32.totalorder (!%p369_p9), %s2030_s15, 1 }
  0x4e   : > { %372 = sbr.rel (%p369_p9) target bundleno = 408 (0x198), region = 51 }
  0x4f   : > { %s1779_s10 = smul.u32 (!%p369_p9), 784, %s375_s9 }
  0x50   : > { %s403_s27 = smul.u32 (!%p369_p9), 14, %s2026_s14 }
  0x51   : > { %s2334_s22 = scalar_lea.vmem (!%p369_p9), [#allocation2], %s1779_s10 }
  0x52   : > { %p406_p11 = scmp.lt.s32.totalorder (!%p369_p9), %s403_s27, 97 }
  0x53   : > { %v2044_v34 = vmov 0   ;;  %v1436_v35 = vld [vmem:[%s2537_s1] sm:$0xff]  ;;  %vm1016_vm0 = vcmask 916480   ;;  %v2388_v11 = vld [vmem:[%s2536_s0 + $0x8] sm:$0xff]   ;;  %s2553_s15 = smov (!%p404_p10, %s2030_s15), 1 }
  0x54   : > { %1055 = vmatprep.mubr.bf16.mxu0 %v2044_v34  ;;  %1108 = vmatprep.mubr.bf16.mxu1 %v2044_v34  ;;  %v1839_v36 = vld [vmem:[%s2334_s22 + $0x2a4] ss:$56 sps:$4 sm:$0xff]   ;;  %v1843_v38 = vld [vmem:[%s2334_s22 + $0x2a0] ss:$56 sps:$4 sm:$0xff]   ;;  %v1845_v40 = vld [vmem:[%s2334_s22 + $0x234] ss:$56 sps:$4 sm:$0xff]  }
  0x55   : > { %1838 = vset.pattern.permute.xlu0 %v2044_v34  ;;  %v1841_v37 = vld [vmem:[%s2334_s22 + $0x2ac] ss:$56 sps:$4 sm:$0xff]   ;;  %1025 = vmatprep.subr.bf16.mxu0 %v1839_v36  ;;  %v1844_v39 = vld [vmem:[%s2334_s22 + $0x2a8] ss:$56 sps:$4 sm:$0xff]   ;;  %v1847_v41 = vld [vmem:[%s2334_s22 + $0x23c] ss:$56 sps:$4 sm:$0xff]  }
  0x56   : > { %1439 = vperm.xlu0 %1838, %v1436_v35   ;;  %1078 = vmatprep.subr.bf16.mxu1 %v1841_v37  ;;  %v1849_v42 = vld [vmem:[%s2334_s22 + $0x230] ss:$56 sps:$4 sm:$0xff]   ;;  %v1851_v44 = vld [vmem:[%s2334_s22 + $0x1c4] ss:$56 sps:$4 sm:$0xff]   ;;  %v1855_v46 = vld [vmem:[%s2334_s22 + $0x1c0] ss:$56 sps:$4 sm:$0xff]  }
  0x57   : > { %1026 = vmatpush1.bf16.msra.mxu0 %v1843_v38  ;;  %1079 = vmatpush1.bf16.msra.mxu1 %v1844_v39  ;;  %v1850_v43 = vld [vmem:[%s2334_s22 + $0x238] ss:$56 sps:$4 sm:$0xff]   ;;  %v1853_v45 = vld [vmem:[%s2334_s22 + $0x1cc] ss:$56 sps:$4 sm:$0xff]   ;;  %v1856_v47 = vld [vmem:[%s2334_s22 + $0x1c8] ss:$56 sps:$4 sm:$0xff]  }
  0x58   : > { %1027 = vmatprep.subr.bf16.mxu0 %v1845_v40  ;;  %1080 = vmatprep.subr.bf16.mxu1 %v1847_v41  ;;  %v1857_v48 = vld [vmem:[%s2334_s22 + $0x154] ss:$56 sps:$4 sm:$0xff]   ;;  %v1861_v50 = vld [vmem:[%s2334_s22 + $0x150] ss:$56 sps:$4 sm:$0xff]   ;;  %v1863_v52 = vld [vmem:[%s2334_s22 + $0xe4] ss:$56 sps:$4 sm:$0xff]  }
  0x59   : > { %v1859_v49 = vld [vmem:[%s2334_s22 + $0x15c] ss:$56 sps:$4 sm:$0xff]   ;;  %v1862_v51 = vld [vmem:[%s2334_s22 + $0x158] ss:$56 sps:$4 sm:$0xff]   ;;  %v1865_v53 = vld [vmem:[%s2334_s22 + $0xec] ss:$56 sps:$4 sm:$0xff]  }
  0x5a   : > { %v1867_v54 = vld [vmem:[%s2334_s22 + $0xe0] ss:$56 sps:$4 sm:$0xff]   ;;  %v1869_v56 = vld [vmem:[%s2334_s22 + $0x74] ss:$56 sps:$4 sm:$0xff]   ;;  %v1873_v58 = vld [vmem:[%s2334_s22 + $0x70] ss:$56 sps:$4 sm:$0xff]  }
  0x5b   : > { %1028 = vmatpush1.bf16.msra.mxu0 %v1849_v42  ;;  %1081 = vmatpush1.bf16.msra.mxu1 %v1850_v43  ;;  %v1868_v55 = vld [vmem:[%s2334_s22 + $0xe8] ss:$56 sps:$4 sm:$0xff]   ;;  %v1871_v57 = vld [vmem:[%s2334_s22 + $0x7c] ss:$56 sps:$4 sm:$0xff]   ;;  %v1874_v59 = vld [vmem:[%s2334_s22 + $0x78] ss:$56 sps:$4 sm:$0xff]  }
  0x5c   : > { %1029 = vmatprep.subr.bf16.mxu0 %v1851_v44  ;;  %1082 = vmatprep.subr.bf16.mxu1 %v1853_v45  ;;  %v1875_v60 = vld [vmem:[%s2334_s22 + $0x4] ss:$56 sps:$4 sm:$0xff]   ;;  %v1879_v62 = vld [vmem:[%s2334_s22] ss:$56 sps:$4 sm:$0xff]   ;;  %v1884_v0 = vld [vmem:[%s2334_s22 + $0x2b4] ss:$56 sps:$4 sm:$0xff]  }
  0x5d   : > { %v1877_v61 = vld [vmem:[%s2334_s22 + $0xc] ss:$56 sps:$4 sm:$0xff]   ;;  %v1880_v63 = vld [vmem:[%s2334_s22 + $0x8] ss:$56 sps:$4 sm:$0xff]   ;;  %v1887_v1 = vld [vmem:[%s2334_s22 + $0x2bc] ss:$56 sps:$4 sm:$0xff]  }
  0x5e   : > { %v2369_v2 = vld [vmem:[%s2536_s0] sm:$0xff]   ;;  %s1780_s28 = smul.u32 98, %s2553_s15  ;;  %s2555_s27 = smov (!%p406_p11, %s403_s27), 97 }
  0x5f   : > { %1030 = vmatpush1.bf16.msra.mxu0 %v1855_v46  ;;  %1083 = vmatpush1.bf16.msra.mxu1 %v1856_v47  ;;  %v1882_v3 = vld [vmem:[%s2334_s22 + $0x2b0] ss:$56 sps:$4 sm:$0xff]   ;;  %v1890_v5 = vld [vmem:[%s2334_s22 + $0x244] ss:$56 sps:$4 sm:$0xff]   ;;  %v1888_v7 = vld [vmem:[%s2334_s22 + $0x240] ss:$56 sps:$4 sm:$0xff]  }
  0x60   : > { %1031 = vmatprep.subr.bf16.mxu0 %v1857_v48  ;;  %1084 = vmatprep.subr.bf16.mxu1 %v1859_v49  ;;  %v1885_v4 = vld [vmem:[%s2334_s22 + $0x2b8] ss:$56 sps:$4 sm:$0xff]   ;;  %v1893_v6 = vld [vmem:[%s2334_s22 + $0x24c] ss:$56 sps:$4 sm:$0xff]   ;;  %v1891_v8 = vld [vmem:[%s2334_s22 + $0x248] ss:$56 sps:$4 sm:$0xff]   ;;  %s409_s14 = sadd.s32 %s1780_s28, %s2555_s27 }
  0x61   : > { %v1897_v9 = vld [vmem:[%s2334_s22 + $0x1d4] ss:$56 sps:$4 sm:$0xff]   ;;  %v1895_v12 = vld [vmem:[%s2334_s22 + $0x1d0] ss:$56 sps:$4 sm:$0xff]   ;;  %v1903_v14 = vld [vmem:[%s2334_s22 + $0x164] ss:$56 sps:$4 sm:$0xff]  }
  0x62   : > { %v1900_v10 = vld [vmem:[%s2334_s22 + $0x1dc] ss:$56 sps:$4 sm:$0xff]   ;;  %v1898_v13 = vld [vmem:[%s2334_s22 + $0x1d8] ss:$56 sps:$4 sm:$0xff]   ;;  %v1906_v15 = vld [vmem:[%s2334_s22 + $0x16c] ss:$56 sps:$4 sm:$0xff]  }
  0x63   : > { %1032 = vmatpush1.bf16.msra.mxu0 %v1861_v50  ;;  %1085 = vmatpush1.bf16.msra.mxu1 %v1862_v51  ;;  %v1901_v16 = vld [vmem:[%s2334_s22 + $0x160] ss:$56 sps:$4 sm:$0xff]   ;;  %v1909_v18 = vld [vmem:[%s2334_s22 + $0xf4] ss:$56 sps:$4 sm:$0xff]   ;;  %v1907_v20 = vld [vmem:[%s2334_s22 + $0xf0] ss:$56 sps:$4 sm:$0xff]  }
  0x64   : > { %1033 = vmatprep.subr.bf16.mxu0 %v1863_v52  ;;  %1086 = vmatprep.subr.bf16.mxu1 %v1865_v53  ;;  %v1904_v17 = vld [vmem:[%s2334_s22 + $0x168] ss:$56 sps:$4 sm:$0xff]   ;;  %v1912_v19 = vld [vmem:[%s2334_s22 + $0xfc] ss:$56 sps:$4 sm:$0xff]   ;;  %v1910_v21 = vld [vmem:[%s2334_s22 + $0xf8] ss:$56 sps:$4 sm:$0xff]  }
  0x65   : > { %v1915_v22 = vld [vmem:[%s2334_s22 + $0x84] ss:$56 sps:$4 sm:$0xff]   ;;  %v1913_v24 = vld [vmem:[%s2334_s22 + $0x80] ss:$56 sps:$4 sm:$0xff]   ;;  %v1921_v26 = vld [vmem:[%s2334_s22 + $0x14] ss:$56 sps:$4 sm:$0xff]  }
  0x66   : > { %v1918_v23 = vld [vmem:[%s2334_s22 + $0x8c] ss:$56 sps:$4 sm:$0xff]   ;;  %v1916_v25 = vld [vmem:[%s2334_s22 + $0x88] ss:$56 sps:$4 sm:$0xff]   ;;  %v1924_v27 = vld [vmem:[%s2334_s22 + $0x1c] ss:$56 sps:$4 sm:$0xff]  }
  0x67   : > { %1034 = vmatpush1.bf16.msra.mxu0 %v1867_v54  ;;  %1087 = vmatpush1.bf16.msra.mxu1 %v1868_v55  ;;  %v1919_v28 = vld [vmem:[%s2334_s22 + $0x10] ss:$56 sps:$4 sm:$0xff]   ;;  %v1927_v30 = vld [vmem:[%s2334_s22 + $0x2c4] ss:$56 sps:$4 sm:$0xff]   ;;  %v1925_v32 = vld [vmem:[%s2334_s22 + $0x2c0] ss:$56 sps:$4 sm:$0xff]  }
  0x68   : > { %1035 = vmatprep.subr.bf16.mxu0 %v1869_v56  ;;  %1088 = vmatprep.subr.bf16.mxu1 %v1871_v57  ;;  %v1922_v29 = vld [vmem:[%s2334_s22 + $0x18] ss:$56 sps:$4 sm:$0xff]   ;;  %v1930_v31 = vld [vmem:[%s2334_s22 + $0x2cc] ss:$56 sps:$4 sm:$0xff]   ;;  %v1928_v33 = vld [vmem:[%s2334_s22 + $0x2c8] ss:$56 sps:$4 sm:$0xff]  }
  0x69   : > { %v1933_v35 = vld [vmem:[%s2334_s22 + $0x254] ss:$56 sps:$4 sm:$0xff]   ;;  %v1931_v37 = vld [vmem:[%s2334_s22 + $0x250] ss:$56 sps:$4 sm:$0xff]   ;;  %v1939_v39 = vld [vmem:[%s2334_s22 + $0x1e4] ss:$56 sps:$4 sm:$0xff]  }
  0x6a   : > { %v1936_v36 = vld [vmem:[%s2334_s22 + $0x25c] ss:$56 sps:$4 sm:$0xff]   ;;  %v1934_v38 = vld [vmem:[%s2334_s22 + $0x258] ss:$56 sps:$4 sm:$0xff]   ;;  %v1942_v40 = vld [vmem:[%s2334_s22 + $0x1ec] ss:$56 sps:$4 sm:$0xff]  }
  0x6b   : > { %1036 = vmatpush1.bf16.msra.mxu0 %v1873_v58  ;;  %1089 = vmatpush1.bf16.msra.mxu1 %v1874_v59  ;;  %v1937_v41 = vld [vmem:[%s2334_s22 + $0x1e0] ss:$56 sps:$4 sm:$0xff]   ;;  %v1945_v43 = vld [vmem:[%s2334_s22 + $0x174] ss:$56 sps:$4 sm:$0xff]   ;;  %v1943_v45 = vld [vmem:[%s2334_s22 + $0x170] ss:$56 sps:$4 sm:$0xff]  }
  0x6c   : > { %1037 = vmatprep.subr.bf16.mxu0 %v1875_v60  ;;  %1090 = vmatprep.subr.bf16.mxu1 %v1877_v61  ;;  %v1940_v42 = vld [vmem:[%s2334_s22 + $0x1e8] ss:$56 sps:$4 sm:$0xff]   ;;  %v1948_v44 = vld [vmem:[%s2334_s22 + $0x17c] ss:$56 sps:$4 sm:$0xff]   ;;  %v1946_v46 = vld [vmem:[%s2334_s22 + $0x178] ss:$56 sps:$4 sm:$0xff]  }
  0x6d   : > { %v1951_v47 = vld [vmem:[%s2334_s22 + $0x104] ss:$56 sps:$4 sm:$0xff]   ;;  %v1949_v49 = vld [vmem:[%s2334_s22 + $0x100] ss:$56 sps:$4 sm:$0xff]   ;;  %v1957_v51 = vld [vmem:[%s2334_s22 + $0x94] ss:$56 sps:$4 sm:$0xff]  }
  0x6e   : > { %v1954_v48 = vld [vmem:[%s2334_s22 + $0x10c] ss:$56 sps:$4 sm:$0xff]   ;;  %v1952_v50 = vld [vmem:[%s2334_s22 + $0x108] ss:$56 sps:$4 sm:$0xff]   ;;  %v1960_v52 = vld [vmem:[%s2334_s22 + $0x9c] ss:$56 sps:$4 sm:$0xff]  }
  0x6f   : > { %1038 = vmatpush1.bf16.msra.mxu0 %v1879_v62  ;;  %1091 = vmatpush1.bf16.msra.mxu1 %v1880_v63  ;;  %v1955_v53 = vld [vmem:[%s2334_s22 + $0x90] ss:$56 sps:$4 sm:$0xff]   ;;  %v1963_v55 = vld [vmem:[%s2334_s22 + $0x24] ss:$56 sps:$4 sm:$0xff]   ;;  %v1961_v57 = vld [vmem:[%s2334_s22 + $0x20] ss:$56 sps:$4 sm:$0xff]  }
  0x70   : > { %1131 = vmatprep.subr.bf16.mxu0 %v1884_v0  ;;  %1184 = vmatprep.subr.bf16.mxu1 %v1887_v1  ;;  %v1958_v54 = vld [vmem:[%s2334_s22 + $0x98] ss:$56 sps:$4 sm:$0xff]   ;;  %v1966_v56 = vld [vmem:[%s2334_s22 + $0x2c] ss:$56 sps:$4 sm:$0xff]   ;;  %v1964_v58 = vld [vmem:[%s2334_s22 + $0x28] ss:$56 sps:$4 sm:$0xff]  }
  0x71   : > { %v1969_v59 = vld [vmem:[%s2334_s22 + $0x2d4] ss:$56 sps:$4 sm:$0xff]   ;;  %v1967_v60 = vld [vmem:[%s2334_s22 + $0x2d0] ss:$56 sps:$4 sm:$0xff]   ;;  %v1972_v61 = vld [vmem:[%s2334_s22 + $0x264] ss:$56 sps:$4 sm:$0xff]  }
  0x72   : > { %1733 = vmatmul.mubr.msk.bf16.vlgmr.msra.gmra.mxu0 %vm1016_vm0, %v2369_v2  ;;  %1735 = vmatmul.mubr.msk.bf16.vlgmr.msra.gmra.mxu1 %vm1016_vm0, %v2369_v2  ;;  %v1970_v62 = vld [vmem:[%s2334_s22 + $0x260] ss:$56 sps:$4 sm:$0xff]   ;;  %v1975_v63 = vld [vmem:[%s2334_s22 + $0x1f4] ss:$56 sps:$4 sm:$0xff]   ;;  %v1973_v0 = vld [vmem:[%s2334_s22 + $0x1f0] ss:$56 sps:$4 sm:$0xff]  }
  0x73   : > { %1132 = vmatpush1.bf16.msra.mxu0 %v1882_v3  ;;  %1185 = vmatpush1.bf16.msra.mxu1 %v1885_v4  ;;  %v1978_v1 = vld [vmem:[%s2334_s22 + $0x184] ss:$56 sps:$4 sm:$0xff]   ;;  %v1976_v3 = vld [vmem:[%s2334_s22 + $0x180] ss:$56 sps:$4 sm:$0xff]   ;;  %v1981_v4 = vld [vmem:[%s2334_s22 + $0x114] ss:$56 sps:$4 sm:$0xff]  }
  0x74   : > { %1133 = vmatprep.subr.bf16.mxu0 %v1890_v5  ;;  %1186 = vmatprep.subr.bf16.mxu1 %v1893_v6  ;;  %v1979_v5 = vld [vmem:[%s2334_s22 + $0x110] ss:$56 sps:$4 sm:$0xff]   ;;  %v1984_v6 = vld [vmem:[%s2334_s22 + $0xa4] ss:$56 sps:$4 sm:$0xff]   ;;  %s1632_s15 = sshll.u32 %s409_s14, 2 }
  0x75   : > { %1065 = vmatprep.mubr.bf16.mxu0 %v2044_v34  ;;  %1118 = vmatprep.mubr.bf16.mxu1 %v2044_v34  ;;  %s2496_s4 = scalar_lea.vmem %s2539_s3, %s1632_s15 }
  0x77   : > { %1134 = vmatpush1.bf16.msra.mxu0 %v1888_v7  ;;  %1187 = vmatpush1.bf16.msra.mxu1 %v1891_v8  ;;  %v1982_v7 = vld [vmem:[%s2334_s22 + $0xa0] ss:$56 sps:$4 sm:$0xff]   ;;  %v1987_v8 = vld [vmem:[%s2334_s22 + $0x34] ss:$56 sps:$4 sm:$0xff]  }
  0x78   : > { %1135 = vmatprep.subr.bf16.mxu0 %v1897_v9  ;;  %1188 = vmatprep.subr.bf16.mxu1 %v1900_v10  ;;  %v1985_v9 = vld [vmem:[%s2334_s22 + $0x30] ss:$56 sps:$4 sm:$0xff]  }
  0x7a   : > { %1734 = vmatmul.mubr.msk.bf16.gmra.mxu0 %vm1016_vm0, %v2388_v11  ;;  %1736 = vmatmul.mubr.msk.bf16.gmra.mxu1 %vm1016_vm0, %v2388_v11 }
  0x7b   : > { %1136 = vmatpush1.bf16.msra.mxu0 %v1895_v12  ;;  %1189 = vmatpush1.bf16.msra.mxu1 %v1898_v13 }
  0x7c   : > { %1137 = vmatprep.subr.bf16.mxu0 %v1903_v14  ;;  %1190 = vmatprep.subr.bf16.mxu1 %v1906_v15 }
  0x7d   : > { %1161 = vmatprep.mubr.bf16.mxu0 %v2044_v34  ;;  %1214 = vmatprep.mubr.bf16.mxu1 %v2044_v34 }
  0x7f   : > { %1138 = vmatpush1.bf16.msra.mxu0 %v1901_v16  ;;  %1191 = vmatpush1.bf16.msra.mxu1 %v1904_v17 }
  0x80   : > { %1139 = vmatprep.subr.bf16.mxu0 %v1909_v18  ;;  %1192 = vmatprep.subr.bf16.mxu1 %v1912_v19 }
  0x83   : > { %1140 = vmatpush1.bf16.msra.mxu0 %v1907_v20  ;;  %1193 = vmatpush1.bf16.msra.mxu1 %v1910_v21 }
  0x84   : > { %1141 = vmatprep.subr.bf16.mxu0 %v1915_v22  ;;  %1194 = vmatprep.subr.bf16.mxu1 %v1918_v23 }
  0x87   : > { %1142 = vmatpush1.bf16.msra.mxu0 %v1913_v24  ;;  %1195 = vmatpush1.bf16.msra.mxu1 %v1916_v25 }
  0x88   : > { %1143 = vmatprep.subr.bf16.mxu0 %v1921_v26  ;;  %1196 = vmatprep.subr.bf16.mxu1 %v1924_v27 }
  0x8b   : > { %1144 = vmatpush1.bf16.msra.mxu0 %v1919_v28  ;;  %1197 = vmatpush1.bf16.msra.mxu1 %v1922_v29 }
  0x8c   : > { %1237 = vmatprep.subr.bf16.mxu0 %v1927_v30  ;;  %1290 = vmatprep.subr.bf16.mxu1 %v1930_v31 }
  0x8e   : > { %1737 = vmatmul.mubr.msk.bf16.vlgmr.msra.gmra.mxu0 %vm1016_vm0, %v2369_v2  ;;  %1739 = vmatmul.mubr.msk.bf16.vlgmr.msra.gmra.mxu1 %vm1016_vm0, %v2369_v2 }
  0x8f   : > { %1238 = vmatpush1.bf16.msra.mxu0 %v1925_v32  ;;  %1291 = vmatpush1.bf16.msra.mxu1 %v1928_v33 }
  0x90   : > { %1239 = vmatprep.subr.bf16.mxu0 %v1933_v35  ;;  %1292 = vmatprep.subr.bf16.mxu1 %v1936_v36 }
  0x91   : > { %1171 = vmatprep.mubr.bf16.mxu0 %v2044_v34  ;;  %1224 = vmatprep.mubr.bf16.mxu1 %v2044_v34 }
  0x93   : > { %1240 = vmatpush1.bf16.msra.mxu0 %v1931_v37  ;;  %1293 = vmatpush1.bf16.msra.mxu1 %v1934_v38 }
  0x94   : > { %1241 = vmatprep.subr.bf16.mxu0 %v1939_v39  ;;  %1294 = vmatprep.subr.bf16.mxu1 %v1942_v40 }
  0x96   : > { %1738 = vmatmul.mubr.msk.bf16.gmra.mxu0 %vm1016_vm0, %v2388_v11  ;;  %1740 = vmatmul.mubr.msk.bf16.gmra.mxu1 %vm1016_vm0, %v2388_v11 }
  0x97   : > { %1242 = vmatpush1.bf16.msra.mxu0 %v1937_v41  ;;  %1295 = vmatpush1.bf16.msra.mxu1 %v1940_v42 }
  0x98   : > { %1243 = vmatprep.subr.bf16.mxu0 %v1945_v43  ;;  %1296 = vmatprep.subr.bf16.mxu1 %v1948_v44 }
  0x99   : > { %1267 = vmatprep.mubr.bf16.mxu0 %v2044_v34  ;;  %1320 = vmatprep.mubr.bf16.mxu1 %v2044_v34 }
  0x9b   : > { %1244 = vmatpush1.bf16.msra.mxu0 %v1943_v45  ;;  %1297 = vmatpush1.bf16.msra.mxu1 %v1946_v46 }
  0x9c   : > { %1245 = vmatprep.subr.bf16.mxu0 %v1951_v47  ;;  %1298 = vmatprep.subr.bf16.mxu1 %v1954_v48 }
  0x9f   : > { %1246 = vmatpush1.bf16.msra.mxu0 %v1949_v49  ;;  %1299 = vmatpush1.bf16.msra.mxu1 %v1952_v50 }
  0xa0   : > { %1247 = vmatprep.subr.bf16.mxu0 %v1957_v51  ;;  %1300 = vmatprep.subr.bf16.mxu1 %v1960_v52 }
  0xa3   : > { %1248 = vmatpush1.bf16.msra.mxu0 %v1955_v53  ;;  %1301 = vmatpush1.bf16.msra.mxu1 %v1958_v54 }
  0xa4   : > { %1249 = vmatprep.subr.bf16.mxu0 %v1963_v55  ;;  %1302 = vmatprep.subr.bf16.mxu1 %v1966_v56 }
  0xa7   : > { %1250 = vmatpush1.bf16.msra.mxu0 %v1961_v57  ;;  %1303 = vmatpush1.bf16.msra.mxu1 %v1964_v58 }
  0xa8   : > { %1343 = vmatprep.subr.bf16.mxu0 %v1969_v59  ;;  %1763 = vmatprep.subr.bf16.mxu1 %v1969_v59 }
  0xaa   : > { %1741 = vmatmul.mubr.msk.bf16.vlgmr.msra.gmra.mxu0 %vm1016_vm0, %v2369_v2  ;;  %1743 = vmatmul.mubr.msk.bf16.vlgmr.msra.gmra.mxu1 %vm1016_vm0, %v2369_v2 }
  0xab   : > { %1344 = vmatpush1.bf16.msra.mxu0 %v1967_v60  ;;  %1770 = vmatpush1.bf16.msra.mxu1 %v1967_v60 }
  0xac   : > { %1345 = vmatprep.subr.bf16.mxu0 %v1972_v61  ;;  %1764 = vmatprep.subr.bf16.mxu1 %v1972_v61 }
  0xad   : > { %1277 = vmatprep.mubr.bf16.mxu0 %v2044_v34  ;;  %1330 = vmatprep.mubr.bf16.mxu1 %v2044_v34 }
  0xaf   : > { %1346 = vmatpush1.bf16.msra.mxu0 %v1970_v62  ;;  %1771 = vmatpush1.bf16.msra.mxu1 %v1970_v62 }
  0xb0   : > { %1347 = vmatprep.subr.bf16.mxu0 %v1975_v63  ;;  %1765 = vmatprep.subr.bf16.mxu1 %v1975_v63 }
  0xb2   : > { %1742 = vmatmul.mubr.msk.bf16.gmra.mxu0 %vm1016_vm0, %v2388_v11  ;;  %1744 = vmatmul.mubr.msk.bf16.gmra.mxu1 %vm1016_vm0, %v2388_v11 }
  0xb3   : > { %1348 = vmatpush1.bf16.msra.mxu0 %v1973_v0  ;;  %1772 = vmatpush1.bf16.msra.mxu1 %v1973_v0 }
  0xb4   : > { %1349 = vmatprep.subr.bf16.mxu0 %v1978_v1  ;;  %1766 = vmatprep.subr.bf16.mxu1 %v1978_v1 }
  0xb5   : > { %1373 = vmatprep.mubr.bf16.mxu0 %v2044_v34  ;;  %1383 = vmatprep.mubr.bf16.mxu1 %v2044_v34 }
  0xb7   : > { %1350 = vmatpush1.bf16.msra.mxu0 %v1976_v3  ;;  %1773 = vmatpush1.bf16.msra.mxu1 %v1976_v3 }
  0xb8   : > { %1351 = vmatprep.subr.bf16.mxu0 %v1981_v4  ;;  %1767 = vmatprep.subr.bf16.mxu1 %v1981_v4 }
  0xbb   : > { %1352 = vmatpush1.bf16.msra.mxu0 %v1979_v5  ;;  %1774 = vmatpush1.bf16.msra.mxu1 %v1979_v5 }
  0xbc   : > { %1353 = vmatprep.subr.bf16.mxu0 %v1984_v6  ;;  %1768 = vmatprep.subr.bf16.mxu1 %v1984_v6 }
  0xbf   : > { %1354 = vmatpush1.bf16.msra.mxu0 %v1982_v7  ;;  %1775 = vmatpush1.bf16.msra.mxu1 %v1982_v7 }
  0xc0   : > { %1355 = vmatprep.subr.bf16.mxu0 %v1987_v8  ;;  %1769 = vmatprep.subr.bf16.mxu1 %v1987_v8 }
  0xc3   : > { %1356 = vmatpush1.bf16.msra.mxu0 %v1985_v9  ;;  %1776 = vmatpush1.bf16.msra.mxu1 %v1985_v9 }
  0xc6   : > { %1745 = vmatmul.mubr.msk.bf16.vlgmr.msra.gmra.mxu0 %vm1016_vm0, %v2369_v2  ;;  %1746 = vmatmul.mubr.msk.bf16.vlgmr.msra.gmra.mxu1 %vm1016_vm0, %v2388_v11 }
  0xd1   : > { %v2487_v26 = vpop.permute.xlu0 %1439 }
 0x132   : > { %v1057_v34 = vpop.f32.mrf.mxu0  ;;  %v1110_v10 = vpop.f32.mrf.mxu1 }
 0x134   : > { %v1059_v12 = vpop.f32.mrf.mxu0  ;;  %v1112_v13 = vpop.f32.mrf.mxu1 }
 0x136   : > { %v1061_v14 = vpop.f32.mrf.mxu0  ;;  %v1114_v15 = vpop.f32.mrf.mxu1 }
 0x137   : > { %v1394_v11 = vmax.f32 %v1057_v34, %v1061_v14  ;;  %v1396_v23 = vmax.f32 %v1110_v10, %v1114_v15 }
 0x138   : > { %v1063_v16 = vpop.f32.mrf.mxu0  ;;  %v1116_v17 = vpop.f32.mrf.mxu1 }
 0x139   : > { %v1395_v27 = vmax.f32 %v1059_v12, %v1063_v16  ;;  %v1397_v28 = vmax.f32 %v1112_v13, %v1116_v17 }
 0x13a   : > { %v1067_v18 = vpop.f32.mrf.mxu0  ;;  %v1120_v19 = vpop.f32.mrf.mxu1 }
 0x13c   : > { %v1069_v20 = vpop.f32.mrf.mxu0  ;;  %v1122_v21 = vpop.f32.mrf.mxu1 }
 0x13e   : > { %v1071_v2 = vpop.f32.mrf.mxu0  ;;  %v1124_v22 = vpop.f32.mrf.mxu1 }
 0x13f   : > { %v1408_v24 = vmax.f32 %v1067_v18, %v1071_v2  ;;  %v1410_v25 = vmax.f32 %v1120_v19, %v1124_v22 }
 0x140   : > { %v1073_v29 = vpop.f32.mrf.mxu0  ;;  %v1126_v30 = vpop.f32.mrf.mxu1 }
 0x141   : > { %v1422_v31 = vmax.f32 %v1394_v11, %v1408_v24  ;;  %v1424_v32 = vmax.f32 %v1396_v23, %v1410_v25  ;;  %v1409_v33 = vmax.f32 %v1069_v20, %v1073_v29  ;;  %v1411_v35 = vmax.f32 %v1122_v21, %v1126_v30 }
 0x143   : > { %v1423_v36 = vmax.f32 %v1395_v27, %v1409_v33  ;;  %v1425_v37 = vmax.f32 %v1397_v28, %v1411_v35  ;;  %v1442_v38 = vadd.f32 %v2487_v26, %v1422_v31  ;;  %v1444_v39 = vadd.f32 %v2487_v26, %v1424_v32 }
 0x145   : > { %v1443_v40 = vadd.f32 %v2487_v26, %v1423_v36  ;;  %v1445_v41 = vadd.f32 %v2487_v26, %v1425_v37  ;;  %v1456_v42 = vmax.f32 %v1442_v38, 0.0  ;;  %v1458_v44 = vmax.f32 %v1444_v39, 0.0 }
 0x147   : > { %v1457_v43 = vmax.f32 %v1443_v40, 0.0  ;;  %v1459_v45 = vmax.f32 %v1445_v41, 0.0 }
 0x149   : > { %v1756_v46 = vpack.c.bf16 %v1457_v43, %v1456_v42  ;;  %v1757_v47 = vpack.c.bf16 %v1459_v45, %v1458_v44 }
 0x14b   : > { %1526 = vst [vmem:[%s2496_s4] sm:$0xff] %v1756_v46  ;;  %1527 = vst [vmem:[%s2496_s4 + $0x8] sm:$0xff] %v1757_v47 }
 0x14e   : > { %v1163_v48 = vpop.f32.mrf.mxu0  ;;  %v1216_v49 = vpop.f32.mrf.mxu1 }
 0x150   : > { %v1165_v50 = vpop.f32.mrf.mxu0  ;;  %v1218_v51 = vpop.f32.mrf.mxu1 }
 0x152   : > { %v1167_v52 = vpop.f32.mrf.mxu0  ;;  %v1220_v53 = vpop.f32.mrf.mxu1 }
 0x153   : > { %v1398_v62 = vmax.f32 %v1163_v48, %v1167_v52  ;;  %v1400_v63 = vmax.f32 %v1216_v49, %v1220_v53 }
 0x154   : > { %v1169_v54 = vpop.f32.mrf.mxu0  ;;  %v1222_v55 = vpop.f32.mrf.mxu1 }
 0x155   : > { %v1399_v3 = vmax.f32 %v1165_v50, %v1169_v54  ;;  %v1401_v4 = vmax.f32 %v1218_v51, %v1222_v55 }
 0x156   : > { %v1173_v56 = vpop.f32.mrf.mxu0  ;;  %v1226_v57 = vpop.f32.mrf.mxu1 }
 0x158   : > { %v1175_v58 = vpop.f32.mrf.mxu0  ;;  %v1228_v59 = vpop.f32.mrf.mxu1 }
 0x15a   : > { %v1177_v60 = vpop.f32.mrf.mxu0  ;;  %v1230_v61 = vpop.f32.mrf.mxu1 }
 0x15b   : > { %v1412_v0 = vmax.f32 %v1173_v56, %v1177_v60  ;;  %v1414_v1 = vmax.f32 %v1226_v57, %v1230_v61 }
 0x15c   : > { %v1179_v5 = vpop.f32.mrf.mxu0  ;;  %v1232_v6 = vpop.f32.mrf.mxu1 }
 0x15d   : > { %v1426_v7 = vmax.f32 %v1398_v62, %v1412_v0  ;;  %v1428_v8 = vmax.f32 %v1400_v63, %v1414_v1  ;;  %v1413_v9 = vmax.f32 %v1175_v58, %v1179_v5  ;;  %v1415_v34 = vmax.f32 %v1228_v59, %v1232_v6 }
 0x15f   : > { %v1446_v10 = vadd.f32 %v2487_v26, %v1426_v7  ;;  %v1448_v12 = vadd.f32 %v2487_v26, %v1428_v8  ;;  %v1427_v13 = vmax.f32 %v1399_v3, %v1413_v9  ;;  %v1429_v14 = vmax.f32 %v1401_v4, %v1415_v34 }
 0x161   : > { %v1447_v15 = vadd.f32 %v2487_v26, %v1427_v13  ;;  %v1449_v16 = vadd.f32 %v2487_v26, %v1429_v14  ;;  %v1460_v17 = vmax.f32 %v1446_v10, 0.0  ;;  %v1462_v18 = vmax.f32 %v1448_v12, 0.0 }
 0x163   : > { %v1461_v19 = vmax.f32 %v1447_v15, 0.0  ;;  %v1463_v20 = vmax.f32 %v1449_v16, 0.0 }
 0x165   : > { %v1758_v21 = vpack.c.bf16 %v1461_v19, %v1460_v17  ;;  %v1759_v2 = vpack.c.bf16 %v1463_v20, %v1462_v18 }
 0x167   : > { %1528 = vst [vmem:[%s2496_s4 + $0x10] sm:$0xff] %v1758_v21  ;;  %1529 = vst [vmem:[%s2496_s4 + $0x18] sm:$0xff] %v1759_v2 }
 0x16a   : > { %v1269_v22 = vpop.f32.mrf.mxu0  ;;  %v1322_v11 = vpop.f32.mrf.mxu1 }
 0x16c   : > { %v1271_v23 = vpop.f32.mrf.mxu0  ;;  %v1324_v24 = vpop.f32.mrf.mxu1 }
 0x16e   : > { %v1273_v25 = vpop.f32.mrf.mxu0  ;;  %v1326_v27 = vpop.f32.mrf.mxu1 }
 0x16f   : > { %v1402_v37 = vmax.f32 %v1269_v22, %v1273_v25  ;;  %v1404_v38 = vmax.f32 %v1322_v11, %v1326_v27 }
 0x170   : > { %v1275_v28 = vpop.f32.mrf.mxu0  ;;  %v1328_v29 = vpop.f32.mrf.mxu1 }
 0x171   : > { %v1403_v41 = vmax.f32 %v1271_v23, %v1275_v28  ;;  %v1405_v42 = vmax.f32 %v1324_v24, %v1328_v29 }
 0x172   : > { %v1279_v30 = vpop.f32.mrf.mxu0  ;;  %v1332_v31 = vpop.f32.mrf.mxu1 }
 0x174   : > { %v1281_v32 = vpop.f32.mrf.mxu0  ;;  %v1334_v33 = vpop.f32.mrf.mxu1 }
 0x176   : > { %v1283_v35 = vpop.f32.mrf.mxu0  ;;  %v1336_v36 = vpop.f32.mrf.mxu1 }
 0x177   : > { %v1416_v39 = vmax.f32 %v1279_v30, %v1283_v35  ;;  %v1418_v40 = vmax.f32 %v1332_v31, %v1336_v36 }
 0x178   : > { %v1285_v43 = vpop.f32.mrf.mxu0  ;;  %v1338_v44 = vpop.f32.mrf.mxu1 }
 0x179   : > { %v1430_v45 = vmax.f32 %v1402_v37, %v1416_v39  ;;  %v1432_v46 = vmax.f32 %v1404_v38, %v1418_v40  ;;  %v1417_v47 = vmax.f32 %v1281_v32, %v1285_v43  ;;  %v1419_v48 = vmax.f32 %v1334_v33, %v1338_v44 }
 0x17b   : > { %v1450_v49 = vadd.f32 %v2487_v26, %v1430_v45  ;;  %v1452_v50 = vadd.f32 %v2487_v26, %v1432_v46  ;;  %v1431_v51 = vmax.f32 %v1403_v41, %v1417_v47  ;;  %v1433_v52 = vmax.f32 %v1405_v42, %v1419_v48 }
 0x17d   : > { %v1451_v53 = vadd.f32 %v2487_v26, %v1431_v51  ;;  %v1453_v54 = vadd.f32 %v2487_v26, %v1433_v52  ;;  %v1464_v55 = vmax.f32 %v1450_v49, 0.0  ;;  %v1466_v56 = vmax.f32 %v1452_v50, 0.0 }
 0x17f   : > { %v1465_v57 = vmax.f32 %v1451_v53, 0.0  ;;  %v1467_v58 = vmax.f32 %v1453_v54, 0.0 }
 0x181   : > { %v1760_v59 = vpack.c.bf16 %v1465_v57, %v1464_v55  ;;  %v1761_v60 = vpack.c.bf16 %v1467_v58, %v1466_v56 }
 0x183   : > { %1530 = vst [vmem:[%s2496_s4 + $0x20] sm:$0xff] %v1760_v59  ;;  %1531 = vst [vmem:[%s2496_s4 + $0x28] sm:$0xff] %v1761_v60 }
 0x186   : > { %v1375_v61 = vpop.f32.mrf.mxu0  ;;  %v1385_v62 = vpop.f32.mrf.mxu1 }
 0x188   : > { %v1377_v63 = vpop.f32.mrf.mxu0  ;;  %v1387_v0 = vpop.f32.mrf.mxu1 }
 0x18a   : > { %v1379_v1 = vpop.f32.mrf.mxu0  ;;  %v1389_v3 = vpop.f32.mrf.mxu1 }
 0x18b   : > { %v1406_v4 = vmax.f32 %v1375_v61, %v1379_v1  ;;  %v1420_v5 = vmax.f32 %v1385_v62, %v1389_v3 }
 0x18c   : > { %v1381_v6 = vpop.f32.mrf.mxu0  ;;  %v1391_v7 = vpop.f32.mrf.mxu1 }
 0x18d   : > { %v1434_v8 = vmax.f32 %v1406_v4, %v1420_v5  ;;  %v1407_v9 = vmax.f32 %v1377_v63, %v1381_v6  ;;  %v1421_v34 = vmax.f32 %v1387_v0, %v1391_v7 }
 0x18f   : > { %v1454_v10 = vadd.f32 %v2487_v26, %v1434_v8  ;;  %v1435_v12 = vmax.f32 %v1407_v9, %v1421_v34 }
 0x191   : > { %v1455_v13 = vadd.f32 %v2487_v26, %v1435_v12  ;;  %v1468_v14 = vmax.f32 %v1454_v10, 0.0 }
 0x193   : > { %v1469_v15 = vmax.f32 %v1455_v13, 0.0 }
 0x195   : > { %v1762_v16 = vpack.c.bf16 %v1469_v15, %v1468_v14 }
 0x197   : > { %1532 = vst [vmem:[%s2496_s4 + $0x30] sm:$0xff] %v1762_v16 }
 0x198 PF: > { %s13_s18 = sadd.s32 1, %s2042_s18   ;;  %s2540_s12 = smov %s2022_s13 }
 0x199   : > { %p10_p12 = scmp.ge.s32.totalorder %s13_s18, 16   ;;  %s2541_s13 = smov %s2116_s25 }
 0x19a   : > { %s2542_s14 = smov %s2034_s16  ;;  %s2543_s15 = smov %s2038_s17 }
 0x19b   : > { %s2544_s16 = smov %s2547_s19  ;;  %s2545_s17 = smov %s2551_s20 }
 0x19c   :  { %12 = sbr.rel (!%p10_p12) target bundleno = 4 (0x4), region = 90 }

// kernel: net_forward.5
= control target key start
LH: loop header
LB: loop body
LE: loop exit
PB: predicated region body
PF: predicated region fallthrough
CT: control target
= control target key end

     0   :  { %s4591_s12 = smov 0   ;;  %s4593_s13 = smov 0   ;;  %s5835_s0 = inlined_call_operand.vmem [shape: bf16[64,288], index: 0, kind: input, shape index: {}]   ;;  %s5836_s1 = inlined_call_operand.vmem [shape: f32[16,1], index: 1, kind: input, shape index: {}]   ;;  %s5837_s2 = inlined_call_operand.vmem [shape: bf16[2,288,3328], index: 2, kind: input, shape index: {}]   ;;  %s5838_s3 = inlined_call_operand.vmem [shape: bf16[2,16,3328], index: 3, kind: output, shape index: {}]  }
   0x1   :  { %s4595_s14 = smov 0   ;;  %s4597_s15 = smov 0  }
   0x2   :  { %s4599_s16 = smov 0   ;;  %s4601_s17 = smov 0  }
   0x3   :  { %s4603_s18 = smov 0  }
   0x4 LB: > { %s22_s19 = sadd.s32 1, %s4560_s16  ;;  %s25_s20 = sadd.s32 1, %s4564_s17  ;;  %s4568_s18 = sphi %s4603_s18, %s13_s18   ;;  %s4564_s17 = sphi %s4601_s17, %s5845_s17   ;;  %s4560_s16 = sphi %s4599_s16, %s5844_s16   ;;  %s4556_s15 = sphi %s4597_s15, %s5843_s15   ;;  %s4552_s14 = sphi %s4595_s14, %s5842_s14   ;;  %s4548_s13 = sphi %s4593_s13, %s5841_s13   ;;  %s4544_s12 = sphi %s4591_s12, %s5840_s12  }
   0x5   : > { %p23_p0 = scmp.ge.s32.totalorder %s22_s19, 2  ;;  %s3636_s21 = sadd.s32 4294967295, %s4568_s18  }
   0x6   : > { %p83_p1 = scmp.ne.s32.totalorder %s4548_s13, %s4544_s12  ;;  %p84_p2 = scmp.eq.s32.totalorder %s4568_s18, 0 }
   0x7   : > { %s5847_s19 = smov (%p23_p0, %s22_s19), 0  ;;  %s5849_s20 = smov (!%p23_p0, %s25_s20), %s4564_s17 }
   0x8   : > { %p27_p3 = scmp.ge.s32.totalorder %s5849_s20, 2  ;;  %p115_p4 = scmp.eq.s32.totalorder %s3636_s21, 3 }
   0x9   : > { %s72_s22 = ssub.s32 %s4560_s16, %s5847_s19  ;;  %p85_p5 = por %p84_p2, %p83_p1 }
   0xa   : > { %s5851_s20 = smov (%p27_p3, %s5849_s20), 0  ;;  %p4639_p6 = por %p115_p4, %p83_p1 }
   0xb   : > { %s71_s24 = ssub.s32 %s4564_s17, %s5851_s20  ;;  %s76_s26 = sadd.s32 1, %s4548_s13 }
   0xc   : > { %s73_s25 = sor.u32 %s72_s22, %s71_s24  ;;  %p3639_p8 = scmp.ge.s32.totalorder %s4568_s18, 4 }
   0xd   : > { %p74_p7 = scmp.eq.s32.totalorder %s73_s25, 0 }
   0xe   : > { %143 = sbr.rel (%p3639_p8) target bundleno = 160 (0xa0), region = 24 }
   0xf   : > { %s4647_s27 = scalar_select %p74_p7, %s4548_s13, %s76_s26  }
  0x13   : > { %146 = sbr.rel (!%p85_p5) target bundleno = 160 (0xa0), region = 28  ;;  %s148_s28 = sand.u32 (%p85_p5), 1, %s4548_s13  }
  0x14   : > { %s151_s29 = smul.u32 (%p85_p5), 13, %s4560_s16 }
  0x15   : > { %s4081_s30 = smul.u32 (%p85_p5), 1872, %s148_s28 }
  0x16   : > { %s4082_s4 = smul.u32 (%p85_p5), 936, %s4564_s17 }
  0x17   : > { %s4661_s10 = scalar_lea.vmem (%p85_p5), [#allocation2], %s4081_s30 }
  0x18   : > { %s153_s5 = sadd.s32 %s4082_s4, %s151_s29 }
  0x19   : > { %s3640_s6 = sshll.u32 %s153_s5, 2 }
  0x1a   : > { %s4656_s9 = scalar_lea.vmem %s5837_s2, %s3640_s6 }
  0x1b   : > { %v170_v0 = vld [vmem:[%s4656_s9] sm:$0xff]  ;;  %v172_v1 = vld [vmem:[%s4656_s9 + $0x8] sm:$0xff]  ;;  %v174_v2 = vld [vmem:[%s4656_s9 + $0x10] sm:$0xff] }
  0x1c   : > { %171 = vst [vmem:[%s4661_s10] sm:$0xff] %v170_v0  ;;  %173 = vst [vmem:[%s4661_s10 + $0x8] sm:$0xff] %v172_v1  ;;  %v176_v3 = vld [vmem:[%s4656_s9 + $0x18] sm:$0xff]  ;;  %v178_v4 = vld [vmem:[%s4656_s9 + $0x20] sm:$0xff] }
  0x1d   : > { %175 = vst [vmem:[%s4661_s10 + $0x10] sm:$0xff] %v174_v2  ;;  %v180_v5 = vld [vmem:[%s4656_s9 + $0x28] sm:$0xff]  ;;  %177 = vst [vmem:[%s4661_s10 + $0x18] sm:$0xff] %v176_v3  ;;  %v184_v7 = vld [vmem:[%s4656_s9 + $0x70] sm:$0xff] }
  0x1e   : > { %179 = vst [vmem:[%s4661_s10 + $0x20] sm:$0xff] %v178_v4  ;;  %181 = vst [vmem:[%s4661_s10 + $0x28] sm:$0xff] %v180_v5  ;;  %v182_v6 = vld [vmem:[%s4656_s9 + $0x68] sm:$0xff]  ;;  %v186_v8 = vld [vmem:[%s4656_s9 + $0x78] sm:$0xff] }
  0x1f   : > { %183 = vst [vmem:[%s4661_s10 + $0x34] sm:$0xff] %v182_v6  ;;  %185 = vst [vmem:[%s4661_s10 + $0x3c] sm:$0xff] %v184_v7  ;;  %v188_v9 = vld [vmem:[%s4656_s9 + $0x80] sm:$0xff]  ;;  %v190_v10 = vld [vmem:[%s4656_s9 + $0x88] sm:$0xff] }
  0x20   : > { %187 = vst [vmem:[%s4661_s10 + $0x44] sm:$0xff] %v186_v8  ;;  %v192_v11 = vld [vmem:[%s4656_s9 + $0x90] sm:$0xff]  ;;  %189 = vst [vmem:[%s4661_s10 + $0x4c] sm:$0xff] %v188_v9  ;;  %v196_v13 = vld [vmem:[%s4656_s9 + $0xd8] sm:$0xff] }
  0x21   : > { %191 = vst [vmem:[%s4661_s10 + $0x54] sm:$0xff] %v190_v10  ;;  %193 = vst [vmem:[%s4661_s10 + $0x5c] sm:$0xff] %v192_v11  ;;  %v194_v12 = vld [vmem:[%s4656_s9 + $0xd0] sm:$0xff]  ;;  %v198_v14 = vld [vmem:[%s4656_s9 + $0xe0] sm:$0xff] }
  0x22   : > { %195 = vst [vmem:[%s4661_s10 + $0x68] sm:$0xff] %v194_v12  ;;  %197 = vst [vmem:[%s4661_s10 + $0x70] sm:$0xff] %v196_v13  ;;  %v200_v15 = vld [vmem:[%s4656_s9 + $0xe8] sm:$0xff]  ;;  %v202_v16 = vld [vmem:[%s4656_s9 + $0xf0] sm:$0xff] }
  0x23   : > { %199 = vst [vmem:[%s4661_s10 + $0x78] sm:$0xff] %v198_v14  ;;  %v204_v17 = vld [vmem:[%s4656_s9 + $0xf8] sm:$0xff]  ;;  %201 = vst [vmem:[%s4661_s10 + $0x80] sm:$0xff] %v200_v15  ;;  %v208_v19 = vld [vmem:[%s4656_s9 + $0x140] sm:$0xff] }
  0x24   : > { %203 = vst [vmem:[%s4661_s10 + $0x88] sm:$0xff] %v202_v16  ;;  %205 = vst [vmem:[%s4661_s10 + $0x90] sm:$0xff] %v204_v17  ;;  %v206_v18 = vld [vmem:[%s4656_s9 + $0x138] sm:$0xff]  ;;  %v210_v20 = vld [vmem:[%s4656_s9 + $0x148] sm:$0xff] }
  0x25   : > { %207 = vst [vmem:[%s4661_s10 + $0x9c] sm:$0xff] %v206_v18  ;;  %209 = vst [vmem:[%s4661_s10 + $0xa4] sm:$0xff] %v208_v19  ;;  %v212_v21 = vld [vmem:[%s4656_s9 + $0x150] sm:$0xff]  ;;  %v214_v22 = vld [vmem:[%s4656_s9 + $0x158] sm:$0xff] }
  0x26   : > { %211 = vst [vmem:[%s4661_s10 + $0xac] sm:$0xff] %v210_v20  ;;  %v216_v23 = vld [vmem:[%s4656_s9 + $0x160] sm:$0xff]  ;;  %213 = vst [vmem:[%s4661_s10 + $0xb4] sm:$0xff] %v212_v21  ;;  %v220_v25 = vld [vmem:[%s4656_s9 + $0x1a8] sm:$0xff] }
  0x27   : > { %215 = vst [vmem:[%s4661_s10 + $0xbc] sm:$0xff] %v214_v22  ;;  %217 = vst [vmem:[%s4661_s10 + $0xc4] sm:$0xff] %v216_v23  ;;  %v218_v24 = vld [vmem:[%s4656_s9 + $0x1a0] sm:$0xff]  ;;  %v222_v26 = vld [vmem:[%s4656_s9 + $0x1b0] sm:$0xff] }
  0x28   : > { %219 = vst [vmem:[%s4661_s10 + $0xd0] sm:$0xff] %v218_v24  ;;  %221 = vst [vmem:[%s4661_s10 + $0xd8] sm:$0xff] %v220_v25  ;;  %v224_v27 = vld [vmem:[%s4656_s9 + $0x1b8] sm:$0xff]  ;;  %v226_v28 = vld [vmem:[%s4656_s9 + $0x1c0] sm:$0xff] }
  0x29   : > { %223 = vst [vmem:[%s4661_s10 + $0xe0] sm:$0xff] %v222_v26  ;;  %v228_v29 = vld [vmem:[%s4656_s9 + $0x1c8] sm:$0xff]  ;;  %225 = vst [vmem:[%s4661_s10 + $0xe8] sm:$0xff] %v224_v27  ;;  %v232_v31 = vld [vmem:[%s4656_s9 + $0x210] sm:$0xff] }
  0x2a   : > { %227 = vst [vmem:[%s4661_s10 + $0xf0] sm:$0xff] %v226_v28  ;;  %229 = vst [vmem:[%s4661_s10 + $0xf8] sm:$0xff] %v228_v29  ;;  %v230_v30 = vld [vmem:[%s4656_s9 + $0x208] sm:$0xff]  ;;  %v234_v32 = vld [vmem:[%s4656_s9 + $0x218] sm:$0xff] }
  0x2b   : > { %231 = vst [vmem:[%s4661_s10 + $0x104] sm:$0xff] %v230_v30  ;;  %233 = vst [vmem:[%s4661_s10 + $0x10c] sm:$0xff] %v232_v31  ;;  %v236_v33 = vld [vmem:[%s4656_s9 + $0x220] sm:$0xff]  ;;  %v238_v34 = vld [vmem:[%s4656_s9 + $0x228] sm:$0xff] }
  0x2c   : > { %235 = vst [vmem:[%s4661_s10 + $0x114] sm:$0xff] %v234_v32  ;;  %v240_v35 = vld [vmem:[%s4656_s9 + $0x230] sm:$0xff]  ;;  %237 = vst [vmem:[%s4661_s10 + $0x11c] sm:$0xff] %v236_v33  ;;  %v244_v37 = vld [vmem:[%s4656_s9 + $0x278] sm:$0xff] }
  0x2d   : > { %239 = vst [vmem:[%s4661_s10 + $0x124] sm:$0xff] %v238_v34  ;;  %241 = vst [vmem:[%s4661_s10 + $0x12c] sm:$0xff] %v240_v35  ;;  %v242_v36 = vld [vmem:[%s4656_s9 + $0x270] sm:$0xff]  ;;  %v246_v38 = vld [vmem:[%s4656_s9 + $0x280] sm:$0xff] }
  0x2e   : > { %243 = vst [vmem:[%s4661_s10 + $0x138] sm:$0xff] %v242_v36  ;;  %245 = vst [vmem:[%s4661_s10 + $0x140] sm:$0xff] %v244_v37  ;;  %v248_v39 = vld [vmem:[%s4656_s9 + $0x288] sm:$0xff]  ;;  %v250_v40 = vld [vmem:[%s4656_s9 + $0x290] sm:$0xff] }
  0x2f   : > { %247 = vst [vmem:[%s4661_s10 + $0x148] sm:$0xff] %v246_v38  ;;  %v252_v41 = vld [vmem:[%s4656_s9 + $0x298] sm:$0xff]  ;;  %249 = vst [vmem:[%s4661_s10 + $0x150] sm:$0xff] %v248_v39  ;;  %v256_v43 = vld [vmem:[%s4656_s9 + $0x2e0] sm:$0xff] }
  0x30   : > { %251 = vst [vmem:[%s4661_s10 + $0x158] sm:$0xff] %v250_v40  ;;  %253 = vst [vmem:[%s4661_s10 + $0x160] sm:$0xff] %v252_v41  ;;  %v254_v42 = vld [vmem:[%s4656_s9 + $0x2d8] sm:$0xff]  ;;  %v258_v44 = vld [vmem:[%s4656_s9 + $0x2e8] sm:$0xff] }
  0x31   : > { %255 = vst [vmem:[%s4661_s10 + $0x16c] sm:$0xff] %v254_v42  ;;  %257 = vst [vmem:[%s4661_s10 + $0x174] sm:$0xff] %v256_v43  ;;  %v260_v45 = vld [vmem:[%s4656_s9 + $0x2f0] sm:$0xff]  ;;  %v262_v46 = vld [vmem:[%s4656_s9 + $0x2f8] sm:$0xff] }
  0x32   : > { %259 = vst [vmem:[%s4661_s10 + $0x17c] sm:$0xff] %v258_v44  ;;  %v264_v47 = vld [vmem:[%s4656_s9 + $0x300] sm:$0xff]  ;;  %261 = vst [vmem:[%s4661_s10 + $0x184] sm:$0xff] %v260_v45  ;;  %v268_v49 = vld [vmem:[%s4656_s9 + $0x348] sm:$0xff] }
  0x33   : > { %263 = vst [vmem:[%s4661_s10 + $0x18c] sm:$0xff] %v262_v46  ;;  %265 = vst [vmem:[%s4661_s10 + $0x194] sm:$0xff] %v264_v47  ;;  %v266_v48 = vld [vmem:[%s4656_s9 + $0x340] sm:$0xff]  ;;  %v270_v50 = vld [vmem:[%s4656_s9 + $0x350] sm:$0xff] }
  0x34   : > { %267 = vst [vmem:[%s4661_s10 + $0x1a0] sm:$0xff] %v266_v48  ;;  %269 = vst [vmem:[%s4661_s10 + $0x1a8] sm:$0xff] %v268_v49  ;;  %v272_v51 = vld [vmem:[%s4656_s9 + $0x358] sm:$0xff]  ;;  %v274_v52 = vld [vmem:[%s4656_s9 + $0x360] sm:$0xff] }
  0x35   : > { %271 = vst [vmem:[%s4661_s10 + $0x1b0] sm:$0xff] %v270_v50  ;;  %v276_v53 = vld [vmem:[%s4656_s9 + $0x368] sm:$0xff]  ;;  %273 = vst [vmem:[%s4661_s10 + $0x1b8] sm:$0xff] %v272_v51  ;;  %v280_v55 = vld [vmem:[%s4656_s9 + $0x3b0] sm:$0xff] }
  0x36   : > { %275 = vst [vmem:[%s4661_s10 + $0x1c0] sm:$0xff] %v274_v52  ;;  %277 = vst [vmem:[%s4661_s10 + $0x1c8] sm:$0xff] %v276_v53  ;;  %v278_v54 = vld [vmem:[%s4656_s9 + $0x3a8] sm:$0xff]  ;;  %v282_v56 = vld [vmem:[%s4656_s9 + $0x3b8] sm:$0xff] }
  0x37   : > { %279 = vst [vmem:[%s4661_s10 + $0x1d4] sm:$0xff] %v278_v54  ;;  %281 = vst [vmem:[%s4661_s10 + $0x1dc] sm:$0xff] %v280_v55  ;;  %v284_v57 = vld [vmem:[%s4656_s9 + $0x3c0] sm:$0xff]  ;;  %v286_v58 = vld [vmem:[%s4656_s9 + $0x3c8] sm:$0xff] }
  0x38   : > { %283 = vst [vmem:[%s4661_s10 + $0x1e4] sm:$0xff] %v282_v56  ;;  %v288_v59 = vld [vmem:[%s4656_s9 + $0x3d0] sm:$0xff]  ;;  %285 = vst [vmem:[%s4661_s10 + $0x1ec] sm:$0xff] %v284_v57  ;;  %v292_v61 = vld [vmem:[%s4656_s9 + $0x418] sm:$0xff] }
  0x39   : > { %287 = vst [vmem:[%s4661_s10 + $0x1f4] sm:$0xff] %v286_v58  ;;  %289 = vst [vmem:[%s4661_s10 + $0x1fc] sm:$0xff] %v288_v59  ;;  %v290_v60 = vld [vmem:[%s4656_s9 + $0x410] sm:$0xff]  ;;  %v294_v62 = vld [vmem:[%s4656_s9 + $0x420] sm:$0xff] }
  0x3a   : > { %291 = vst [vmem:[%s4661_s10 + $0x208] sm:$0xff] %v290_v60  ;;  %293 = vst [vmem:[%s4661_s10 + $0x210] sm:$0xff] %v292_v61  ;;  %v296_v63 = vld [vmem:[%s4656_s9 + $0x428] sm:$0xff]  ;;  %v298_v0 = vld [vmem:[%s4656_s9 + $0x430] sm:$0xff] }
  0x3b   : > { %295 = vst [vmem:[%s4661_s10 + $0x218] sm:$0xff] %v294_v62  ;;  %v300_v1 = vld [vmem:[%s4656_s9 + $0x438] sm:$0xff]  ;;  %297 = vst [vmem:[%s4661_s10 + $0x220] sm:$0xff] %v296_v63  ;;  %v304_v3 = vld [vmem:[%s4656_s9 + $0x480] sm:$0xff] }
  0x3c   : > { %299 = vst [vmem:[%s4661_s10 + $0x228] sm:$0xff] %v298_v0  ;;  %301 = vst [vmem:[%s4661_s10 + $0x230] sm:$0xff] %v300_v1  ;;  %v302_v2 = vld [vmem:[%s4656_s9 + $0x478] sm:$0xff]  ;;  %v306_v4 = vld [vmem:[%s4656_s9 + $0x488] sm:$0xff] }
  0x3d   : > { %303 = vst [vmem:[%s4661_s10 + $0x23c] sm:$0xff] %v302_v2  ;;  %305 = vst [vmem:[%s4661_s10 + $0x244] sm:$0xff] %v304_v3  ;;  %v308_v5 = vld [vmem:[%s4656_s9 + $0x490] sm:$0xff]  ;;  %v310_v6 = vld [vmem:[%s4656_s9 + $0x498] sm:$0xff] }
  0x3e   : > { %307 = vst [vmem:[%s4661_s10 + $0x24c] sm:$0xff] %v306_v4  ;;  %v312_v7 = vld [vmem:[%s4656_s9 + $0x4a0] sm:$0xff]  ;;  %309 = vst [vmem:[%s4661_s10 + $0x254] sm:$0xff] %v308_v5  ;;  %v316_v9 = vld [vmem:[%s4656_s9 + $0x4e8] sm:$0xff] }
  0x3f   : > { %311 = vst [vmem:[%s4661_s10 + $0x25c] sm:$0xff] %v310_v6  ;;  %313 = vst [vmem:[%s4661_s10 + $0x264] sm:$0xff] %v312_v7  ;;  %v314_v8 = vld [vmem:[%s4656_s9 + $0x4e0] sm:$0xff]  ;;  %v318_v10 = vld [vmem:[%s4656_s9 + $0x4f0] sm:$0xff] }
  0x40   : > { %315 = vst [vmem:[%s4661_s10 + $0x270] sm:$0xff] %v314_v8  ;;  %317 = vst [vmem:[%s4661_s10 + $0x278] sm:$0xff] %v316_v9  ;;  %v320_v11 = vld [vmem:[%s4656_s9 + $0x4f8] sm:$0xff]  ;;  %v322_v12 = vld [vmem:[%s4656_s9 + $0x500] sm:$0xff] }
  0x41   : > { %319 = vst [vmem:[%s4661_s10 + $0x280] sm:$0xff] %v318_v10  ;;  %v324_v13 = vld [vmem:[%s4656_s9 + $0x508] sm:$0xff]  ;;  %321 = vst [vmem:[%s4661_s10 + $0x288] sm:$0xff] %v320_v11  ;;  %v328_v15 = vld [vmem:[%s4656_s9 + $0x550] sm:$0xff] }
  0x42   : > { %323 = vst [vmem:[%s4661_s10 + $0x290] sm:$0xff] %v322_v12  ;;  %325 = vst [vmem:[%s4661_s10 + $0x298] sm:$0xff] %v324_v13  ;;  %v326_v14 = vld [vmem:[%s4656_s9 + $0x548] sm:$0xff]  ;;  %v330_v16 = vld [vmem:[%s4656_s9 + $0x558] sm:$0xff] }
  0x43   : > { %327 = vst [vmem:[%s4661_s10 + $0x2a4] sm:$0xff] %v326_v14  ;;  %329 = vst [vmem:[%s4661_s10 + $0x2ac] sm:$0xff] %v328_v15  ;;  %v332_v17 = vld [vmem:[%s4656_s9 + $0x560] sm:$0xff]  ;;  %v334_v18 = vld [vmem:[%s4656_s9 + $0x568] sm:$0xff] }
  0x44   : > { %331 = vst [vmem:[%s4661_s10 + $0x2b4] sm:$0xff] %v330_v16  ;;  %v336_v19 = vld [vmem:[%s4656_s9 + $0x570] sm:$0xff]  ;;  %333 = vst [vmem:[%s4661_s10 + $0x2bc] sm:$0xff] %v332_v17  ;;  %v340_v21 = vld [vmem:[%s4656_s9 + $0x5b8] sm:$0xff] }
  0x45   : > { %335 = vst [vmem:[%s4661_s10 + $0x2c4] sm:$0xff] %v334_v18  ;;  %337 = vst [vmem:[%s4661_s10 + $0x2cc] sm:$0xff] %v336_v19  ;;  %v338_v20 = vld [vmem:[%s4656_s9 + $0x5b0] sm:$0xff]  ;;  %v342_v22 = vld [vmem:[%s4656_s9 + $0x5c0] sm:$0xff] }
  0x46   : > { %339 = vst [vmem:[%s4661_s10 + $0x2d8] sm:$0xff] %v338_v20  ;;  %341 = vst [vmem:[%s4661_s10 + $0x2e0] sm:$0xff] %v340_v21  ;;  %v344_v23 = vld [vmem:[%s4656_s9 + $0x5c8] sm:$0xff]  ;;  %v346_v24 = vld [vmem:[%s4656_s9 + $0x5d0] sm:$0xff] }
  0x47   : > { %343 = vst [vmem:[%s4661_s10 + $0x2e8] sm:$0xff] %v342_v22  ;;  %v348_v25 = vld [vmem:[%s4656_s9 + $0x5d8] sm:$0xff]  ;;  %345 = vst [vmem:[%s4661_s10 + $0x2f0] sm:$0xff] %v344_v23  ;;  %v352_v27 = vld [vmem:[%s4656_s9 + $0x620] sm:$0xff] }
  0x48   : > { %347 = vst [vmem:[%s4661_s10 + $0x2f8] sm:$0xff] %v346_v24  ;;  %349 = vst [vmem:[%s4661_s10 + $0x300] sm:$0xff] %v348_v25  ;;  %v350_v26 = vld [vmem:[%s4656_s9 + $0x618] sm:$0xff]  ;;  %v354_v28 = vld [vmem:[%s4656_s9 + $0x628] sm:$0xff] }
  0x49   : > { %351 = vst [vmem:[%s4661_s10 + $0x30c] sm:$0xff] %v350_v26  ;;  %353 = vst [vmem:[%s4661_s10 + $0x314] sm:$0xff] %v352_v27  ;;  %v356_v29 = vld [vmem:[%s4656_s9 + $0x630] sm:$0xff]  ;;  %v358_v30 = vld [vmem:[%s4656_s9 + $0x638] sm:$0xff] }
  0x4a   : > { %355 = vst [vmem:[%s4661_s10 + $0x31c] sm:$0xff] %v354_v28  ;;  %v360_v31 = vld [vmem:[%s4656_s9 + $0x640] sm:$0xff]  ;;  %357 = vst [vmem:[%s4661_s10 + $0x324] sm:$0xff] %v356_v29  ;;  %v364_v33 = vld [vmem:[%s4656_s9 + $0x688] sm:$0xff] }
  0x4b   : > { %359 = vst [vmem:[%s4661_s10 + $0x32c] sm:$0xff] %v358_v30  ;;  %361 = vst [vmem:[%s4661_s10 + $0x334] sm:$0xff] %v360_v31  ;;  %v362_v32 = vld [vmem:[%s4656_s9 + $0x680] sm:$0xff]  ;;  %v366_v34 = vld [vmem:[%s4656_s9 + $0x690] sm:$0xff] }
  0x4c   : > { %363 = vst [vmem:[%s4661_s10 + $0x340] sm:$0xff] %v362_v32  ;;  %365 = vst [vmem:[%s4661_s10 + $0x348] sm:$0xff] %v364_v33  ;;  %v368_v35 = vld [vmem:[%s4656_s9 + $0x698] sm:$0xff]  ;;  %v370_v36 = vld [vmem:[%s4656_s9 + $0x6a0] sm:$0xff] }
  0x4d   : > { %367 = vst [vmem:[%s4661_s10 + $0x350] sm:$0xff] %v366_v34  ;;  %v372_v37 = vld [vmem:[%s4656_s9 + $0x6a8] sm:$0xff]  ;;  %369 = vst [vmem:[%s4661_s10 + $0x358] sm:$0xff] %v368_v35  ;;  %v376_v39 = vld [vmem:[%s4656_s9 + $0x6f0] sm:$0xff] }
  0x4e   : > { %371 = vst [vmem:[%s4661_s10 + $0x360] sm:$0xff] %v370_v36  ;;  %373 = vst [vmem:[%s4661_s10 + $0x368] sm:$0xff] %v372_v37  ;;  %v374_v38 = vld [vmem:[%s4656_s9 + $0x6e8] sm:$0xff]  ;;  %v378_v40 = vld [vmem:[%s4656_s9 + $0x6f8] sm:$0xff] }
  0x4f   : > { %375 = vst [vmem:[%s4661_s10 + $0x374] sm:$0xff] %v374_v38  ;;  %377 = vst [vmem:[%s4661_s10 + $0x37c] sm:$0xff] %v376_v39  ;;  %v380_v41 = vld [vmem:[%s4656_s9 + $0x700] sm:$0xff]  ;;  %v382_v42 = vld [vmem:[%s4656_s9 + $0x708] sm:$0xff] }
  0x50   : > { %379 = vst [vmem:[%s4661_s10 + $0x384] sm:$0xff] %v378_v40  ;;  %v384_v43 = vld [vmem:[%s4656_s9 + $0x710] sm:$0xff]  ;;  %381 = vst [vmem:[%s4661_s10 + $0x38c] sm:$0xff] %v380_v41  ;;  %v388_v45 = vld [vmem:[%s4656_s9 + $0x758] sm:$0xff] }
  0x51   : > { %383 = vst [vmem:[%s4661_s10 + $0x394] sm:$0xff] %v382_v42  ;;  %385 = vst [vmem:[%s4661_s10 + $0x39c] sm:$0xff] %v384_v43  ;;  %v386_v44 = vld [vmem:[%s4656_s9 + $0x750] sm:$0xff]  ;;  %v390_v46 = vld [vmem:[%s4656_s9 + $0x760] sm:$0xff] }
  0x52   : > { %387 = vst [vmem:[%s4661_s10 + $0x3a8] sm:$0xff] %v386_v44  ;;  %389 = vst [vmem:[%s4661_s10 + $0x3b0] sm:$0xff] %v388_v45  ;;  %v392_v47 = vld [vmem:[%s4656_s9 + $0x768] sm:$0xff]  ;;  %v394_v48 = vld [vmem:[%s4656_s9 + $0x770] sm:$0xff] }
  0x53   : > { %391 = vst [vmem:[%s4661_s10 + $0x3b8] sm:$0xff] %v390_v46  ;;  %v396_v49 = vld [vmem:[%s4656_s9 + $0x778] sm:$0xff]  ;;  %393 = vst [vmem:[%s4661_s10 + $0x3c0] sm:$0xff] %v392_v47  ;;  %v400_v51 = vld [vmem:[%s4656_s9 + $0x7c0] sm:$0xff] }
  0x54   : > { %395 = vst [vmem:[%s4661_s10 + $0x3c8] sm:$0xff] %v394_v48  ;;  %397 = vst [vmem:[%s4661_s10 + $0x3d0] sm:$0xff] %v396_v49  ;;  %v398_v50 = vld [vmem:[%s4656_s9 + $0x7b8] sm:$0xff]  ;;  %v402_v52 = vld [vmem:[%s4656_s9 + $0x7c8] sm:$0xff] }
  0x55   : > { %399 = vst [vmem:[%s4661_s10 + $0x3dc] sm:$0xff] %v398_v50  ;;  %401 = vst [vmem:[%s4661_s10 + $0x3e4] sm:$0xff] %v400_v51  ;;  %v404_v53 = vld [vmem:[%s4656_s9 + $0x7d0] sm:$0xff]  ;;  %v406_v54 = vld [vmem:[%s4656_s9 + $0x7d8] sm:$0xff] }
  0x56   : > { %403 = vst [vmem:[%s4661_s10 + $0x3ec] sm:$0xff] %v402_v52  ;;  %v408_v55 = vld [vmem:[%s4656_s9 + $0x7e0] sm:$0xff]  ;;  %405 = vst [vmem:[%s4661_s10 + $0x3f4] sm:$0xff] %v404_v53  ;;  %v412_v57 = vld [vmem:[%s4656_s9 + $0x828] sm:$0xff] }
  0x57   : > { %407 = vst [vmem:[%s4661_s10 + $0x3fc] sm:$0xff] %v406_v54  ;;  %409 = vst [vmem:[%s4661_s10 + $0x404] sm:$0xff] %v408_v55  ;;  %v410_v56 = vld [vmem:[%s4656_s9 + $0x820] sm:$0xff]  ;;  %v414_v58 = vld [vmem:[%s4656_s9 + $0x830] sm:$0xff] }
  0x58   : > { %411 = vst [vmem:[%s4661_s10 + $0x410] sm:$0xff] %v410_v56  ;;  %413 = vst [vmem:[%s4661_s10 + $0x418] sm:$0xff] %v412_v57  ;;  %v416_v59 = vld [vmem:[%s4656_s9 + $0x838] sm:$0xff]  ;;  %v418_v60 = vld [vmem:[%s4656_s9 + $0x840] sm:$0xff] }
  0x59   : > { %415 = vst [vmem:[%s4661_s10 + $0x420] sm:$0xff] %v414_v58  ;;  %v420_v61 = vld [vmem:[%s4656_s9 + $0x848] sm:$0xff]  ;;  %417 = vst [vmem:[%s4661_s10 + $0x428] sm:$0xff] %v416_v59  ;;  %v424_v63 = vld [vmem:[%s4656_s9 + $0x890] sm:$0xff] }
  0x5a   : > { %419 = vst [vmem:[%s4661_s10 + $0x430] sm:$0xff] %v418_v60  ;;  %421 = vst [vmem:[%s4661_s10 + $0x438] sm:$0xff] %v420_v61  ;;  %v422_v62 = vld [vmem:[%s4656_s9 + $0x888] sm:$0xff]  ;;  %v426_v0 = vld [vmem:[%s4656_s9 + $0x898] sm:$0xff] }
  0x5b   : > { %423 = vst [vmem:[%s4661_s10 + $0x444] sm:$0xff] %v422_v62  ;;  %425 = vst [vmem:[%s4661_s10 + $0x44c] sm:$0xff] %v424_v63  ;;  %v428_v1 = vld [vmem:[%s4656_s9 + $0x8a0] sm:$0xff]  ;;  %v430_v2 = vld [vmem:[%s4656_s9 + $0x8a8] sm:$0xff] }
  0x5c   : > { %427 = vst [vmem:[%s4661_s10 + $0x454] sm:$0xff] %v426_v0  ;;  %v432_v3 = vld [vmem:[%s4656_s9 + $0x8b0] sm:$0xff]  ;;  %429 = vst [vmem:[%s4661_s10 + $0x45c] sm:$0xff] %v428_v1  ;;  %v436_v5 = vld [vmem:[%s4656_s9 + $0x8f8] sm:$0xff] }
  0x5d   : > { %431 = vst [vmem:[%s4661_s10 + $0x464] sm:$0xff] %v430_v2  ;;  %433 = vst [vmem:[%s4661_s10 + $0x46c] sm:$0xff] %v432_v3  ;;  %v434_v4 = vld [vmem:[%s4656_s9 + $0x8f0] sm:$0xff]  ;;  %v438_v6 = vld [vmem:[%s4656_s9 + $0x900] sm:$0xff] }
  0x5e   : > { %435 = vst [vmem:[%s4661_s10 + $0x478] sm:$0xff] %v434_v4  ;;  %437 = vst [vmem:[%s4661_s10 + $0x480] sm:$0xff] %v436_v5  ;;  %v440_v7 = vld [vmem:[%s4656_s9 + $0x908] sm:$0xff]  ;;  %v442_v8 = vld [vmem:[%s4656_s9 + $0x910] sm:$0xff] }
  0x5f   : > { %439 = vst [vmem:[%s4661_s10 + $0x488] sm:$0xff] %v438_v6  ;;  %v444_v9 = vld [vmem:[%s4656_s9 + $0x918] sm:$0xff]  ;;  %441 = vst [vmem:[%s4661_s10 + $0x490] sm:$0xff] %v440_v7  ;;  %v448_v11 = vld [vmem:[%s4656_s9 + $0x960] sm:$0xff] }
  0x60   : > { %443 = vst [vmem:[%s4661_s10 + $0x498] sm:$0xff] %v442_v8  ;;  %445 = vst [vmem:[%s4661_s10 + $0x4a0] sm:$0xff] %v444_v9  ;;  %v446_v10 = vld [vmem:[%s4656_s9 + $0x958] sm:$0xff]  ;;  %v450_v12 = vld [vmem:[%s4656_s9 + $0x968] sm:$0xff] }
  0x61   : > { %447 = vst [vmem:[%s4661_s10 + $0x4ac] sm:$0xff] %v446_v10  ;;  %449 = vst [vmem:[%s4661_s10 + $0x4b4] sm:$0xff] %v448_v11  ;;  %v452_v13 = vld [vmem:[%s4656_s9 + $0x970] sm:$0xff]  ;;  %v454_v14 = vld [vmem:[%s4656_s9 + $0x978] sm:$0xff] }
  0x62   : > { %451 = vst [vmem:[%s4661_s10 + $0x4bc] sm:$0xff] %v450_v12  ;;  %v456_v15 = vld [vmem:[%s4656_s9 + $0x980] sm:$0xff]  ;;  %453 = vst [vmem:[%s4661_s10 + $0x4c4] sm:$0xff] %v452_v13  ;;  %v460_v17 = vld [vmem:[%s4656_s9 + $0x9c8] sm:$0xff] }
  0x63   : > { %455 = vst [vmem:[%s4661_s10 + $0x4cc] sm:$0xff] %v454_v14  ;;  %457 = vst [vmem:[%s4661_s10 + $0x4d4] sm:$0xff] %v456_v15  ;;  %v458_v16 = vld [vmem:[%s4656_s9 + $0x9c0] sm:$0xff]  ;;  %v462_v18 = vld [vmem:[%s4656_s9 + $0x9d0] sm:$0xff] }
  0x64   : > { %459 = vst [vmem:[%s4661_s10 + $0x4e0] sm:$0xff] %v458_v16  ;;  %461 = vst [vmem:[%s4661_s10 + $0x4e8] sm:$0xff] %v460_v17  ;;  %v464_v19 = vld [vmem:[%s4656_s9 + $0x9d8] sm:$0xff]  ;;  %v466_v20 = vld [vmem:[%s4656_s9 + $0x9e0] sm:$0xff] }
  0x65   : > { %463 = vst [vmem:[%s4661_s10 + $0x4f0] sm:$0xff] %v462_v18  ;;  %v468_v21 = vld [vmem:[%s4656_s9 + $0x9e8] sm:$0xff]  ;;  %465 = vst [vmem:[%s4661_s10 + $0x4f8] sm:$0xff] %v464_v19  ;;  %v472_v23 = vld [vmem:[%s4656_s9 + $0xa30] sm:$0xff] }
  0x66   : > { %467 = vst [vmem:[%s4661_s10 + $0x500] sm:$0xff] %v466_v20  ;;  %469 = vst [vmem:[%s4661_s10 + $0x508] sm:$0xff] %v468_v21  ;;  %v470_v22 = vld [vmem:[%s4656_s9 + $0xa28] sm:$0xff]  ;;  %v474_v24 = vld [vmem:[%s4656_s9 + $0xa38] sm:$0xff] }
  0x67   : > { %471 = vst [vmem:[%s4661_s10 + $0x514] sm:$0xff] %v470_v22  ;;  %473 = vst [vmem:[%s4661_s10 + $0x51c] sm:$0xff] %v472_v23  ;;  %v476_v25 = vld [vmem:[%s4656_s9 + $0xa40] sm:$0xff]  ;;  %v478_v26 = vld [vmem:[%s4656_s9 + $0xa48] sm:$0xff] }
  0x68   : > { %475 = vst [vmem:[%s4661_s10 + $0x524] sm:$0xff] %v474_v24  ;;  %v480_v27 = vld [vmem:[%s4656_s9 + $0xa50] sm:$0xff]  ;;  %477 = vst [vmem:[%s4661_s10 + $0x52c] sm:$0xff] %v476_v25  ;;  %v484_v29 = vld [vmem:[%s4656_s9 + $0xa98] sm:$0xff] }
  0x69   : > { %479 = vst [vmem:[%s4661_s10 + $0x534] sm:$0xff] %v478_v26  ;;  %481 = vst [vmem:[%s4661_s10 + $0x53c] sm:$0xff] %v480_v27  ;;  %v482_v28 = vld [vmem:[%s4656_s9 + $0xa90] sm:$0xff]  ;;  %v486_v30 = vld [vmem:[%s4656_s9 + $0xaa0] sm:$0xff] }
  0x6a   : > { %483 = vst [vmem:[%s4661_s10 + $0x548] sm:$0xff] %v482_v28  ;;  %485 = vst [vmem:[%s4661_s10 + $0x550] sm:$0xff] %v484_v29  ;;  %v488_v31 = vld [vmem:[%s4656_s9 + $0xaa8] sm:$0xff]  ;;  %v490_v32 = vld [vmem:[%s4656_s9 + $0xab0] sm:$0xff] }
  0x6b   : > { %487 = vst [vmem:[%s4661_s10 + $0x558] sm:$0xff] %v486_v30  ;;  %v492_v33 = vld [vmem:[%s4656_s9 + $0xab8] sm:$0xff]  ;;  %489 = vst [vmem:[%s4661_s10 + $0x560] sm:$0xff] %v488_v31  ;;  %v496_v35 = vld [vmem:[%s4656_s9 + $0xb00] sm:$0xff] }
  0x6c   : > { %491 = vst [vmem:[%s4661_s10 + $0x568] sm:$0xff] %v490_v32  ;;  %493 = vst [vmem:[%s4661_s10 + $0x570] sm:$0xff] %v492_v33  ;;  %v494_v34 = vld [vmem:[%s4656_s9 + $0xaf8] sm:$0xff]  ;;  %v498_v36 = vld [vmem:[%s4656_s9 + $0xb08] sm:$0xff] }
  0x6d   : > { %495 = vst [vmem:[%s4661_s10 + $0x57c] sm:$0xff] %v494_v34  ;;  %497 = vst [vmem:[%s4661_s10 + $0x584] sm:$0xff] %v496_v35  ;;  %v500_v37 = vld [vmem:[%s4656_s9 + $0xb10] sm:$0xff]  ;;  %v502_v38 = vld [vmem:[%s4656_s9 + $0xb18] sm:$0xff] }
  0x6e   : > { %499 = vst [vmem:[%s4661_s10 + $0x58c] sm:$0xff] %v498_v36  ;;  %v504_v39 = vld [vmem:[%s4656_s9 + $0xb20] sm:$0xff]  ;;  %501 = vst [vmem:[%s4661_s10 + $0x594] sm:$0xff] %v500_v37  ;;  %v508_v41 = vld [vmem:[%s4656_s9 + $0xb68] sm:$0xff] }
  0x6f   : > { %503 = vst [vmem:[%s4661_s10 + $0x59c] sm:$0xff] %v502_v38  ;;  %505 = vst [vmem:[%s4661_s10 + $0x5a4] sm:$0xff] %v504_v39  ;;  %v506_v40 = vld [vmem:[%s4656_s9 + $0xb60] sm:$0xff]  ;;  %v510_v42 = vld [vmem:[%s4656_s9 + $0xb70] sm:$0xff] }
  0x70   : > { %507 = vst [vmem:[%s4661_s10 + $0x5b0] sm:$0xff] %v506_v40  ;;  %509 = vst [vmem:[%s4661_s10 + $0x5b8] sm:$0xff] %v508_v41  ;;  %v512_v43 = vld [vmem:[%s4656_s9 + $0xb78] sm:$0xff]  ;;  %v514_v44 = vld [vmem:[%s4656_s9 + $0xb80] sm:$0xff] }
  0x71   : > { %511 = vst [vmem:[%s4661_s10 + $0x5c0] sm:$0xff] %v510_v42  ;;  %v516_v45 = vld [vmem:[%s4656_s9 + $0xb88] sm:$0xff]  ;;  %513 = vst [vmem:[%s4661_s10 + $0x5c8] sm:$0xff] %v512_v43  ;;  %v520_v47 = vld [vmem:[%s4656_s9 + $0xbd0] sm:$0xff] }
  0x72   : > { %515 = vst [vmem:[%s4661_s10 + $0x5d0] sm:$0xff] %v514_v44  ;;  %517 = vst [vmem:[%s4661_s10 + $0x5d8] sm:$0xff] %v516_v45  ;;  %v518_v46 = vld [vmem:[%s4656_s9 + $0xbc8] sm:$0xff]  ;;  %v522_v48 = vld [vmem:[%s4656_s9 + $0xbd8] sm:$0xff] }
  0x73   : > { %519 = vst [vmem:[%s4661_s10 + $0x5e4] sm:$0xff] %v518_v46  ;;  %521 = vst [vmem:[%s4661_s10 + $0x5ec] sm:$0xff] %v520_v47  ;;  %v524_v49 = vld [vmem:[%s4656_s9 + $0xbe0] sm:$0xff]  ;;  %v526_v50 = vld [vmem:[%s4656_s9 + $0xbe8] sm:$0xff] }
  0x74   : > { %523 = vst [vmem:[%s4661_s10 + $0x5f4] sm:$0xff] %v522_v48  ;;  %v528_v51 = vld [vmem:[%s4656_s9 + $0xbf0] sm:$0xff]  ;;  %525 = vst [vmem:[%s4661_s10 + $0x5fc] sm:$0xff] %v524_v49  ;;  %v532_v53 = vld [vmem:[%s4656_s9 + $0xc38] sm:$0xff] }
  0x75   : > { %527 = vst [vmem:[%s4661_s10 + $0x604] sm:$0xff] %v526_v50  ;;  %529 = vst [vmem:[%s4661_s10 + $0x60c] sm:$0xff] %v528_v51  ;;  %v530_v52 = vld [vmem:[%s4656_s9 + $0xc30] sm:$0xff]  ;;  %v534_v54 = vld [vmem:[%s4656_s9 + $0xc40] sm:$0xff] }
  0x76   : > { %531 = vst [vmem:[%s4661_s10 + $0x618] sm:$0xff] %v530_v52  ;;  %533 = vst [vmem:[%s4661_s10 + $0x620] sm:$0xff] %v532_v53  ;;  %v536_v55 = vld [vmem:[%s4656_s9 + $0xc48] sm:$0xff]  ;;  %v538_v56 = vld [vmem:[%s4656_s9 + $0xc50] sm:$0xff] }
  0x77   : > { %535 = vst [vmem:[%s4661_s10 + $0x628] sm:$0xff] %v534_v54  ;;  %v540_v57 = vld [vmem:[%s4656_s9 + $0xc58] sm:$0xff]  ;;  %537 = vst [vmem:[%s4661_s10 + $0x630] sm:$0xff] %v536_v55  ;;  %v544_v59 = vld [vmem:[%s4656_s9 + $0xca0] sm:$0xff] }
  0x78   : > { %539 = vst [vmem:[%s4661_s10 + $0x638] sm:$0xff] %v538_v56  ;;  %541 = vst [vmem:[%s4661_s10 + $0x640] sm:$0xff] %v540_v57  ;;  %v542_v58 = vld [vmem:[%s4656_s9 + $0xc98] sm:$0xff]  ;;  %v546_v60 = vld [vmem:[%s4656_s9 + $0xca8] sm:$0xff] }
  0x79   : > { %543 = vst [vmem:[%s4661_s10 + $0x64c] sm:$0xff] %v542_v58  ;;  %545 = vst [vmem:[%s4661_s10 + $0x654] sm:$0xff] %v544_v59  ;;  %v548_v61 = vld [vmem:[%s4656_s9 + $0xcb0] sm:$0xff]  ;;  %v550_v62 = vld [vmem:[%s4656_s9 + $0xcb8] sm:$0xff] }
  0x7a   : > { %547 = vst [vmem:[%s4661_s10 + $0x65c] sm:$0xff] %v546_v60  ;;  %v552_v63 = vld [vmem:[%s4656_s9 + $0xcc0] sm:$0xff]  ;;  %549 = vst [vmem:[%s4661_s10 + $0x664] sm:$0xff] %v548_v61  ;;  %v556_v1 = vld [vmem:[%s4656_s9 + $0xd08] sm:$0xff] }
  0x7b   : > { %551 = vst [vmem:[%s4661_s10 + $0x66c] sm:$0xff] %v550_v62  ;;  %553 = vst [vmem:[%s4661_s10 + $0x674] sm:$0xff] %v552_v63  ;;  %v554_v0 = vld [vmem:[%s4656_s9 + $0xd00] sm:$0xff]  ;;  %v558_v2 = vld [vmem:[%s4656_s9 + $0xd10] sm:$0xff] }
  0x7c   : > { %555 = vst [vmem:[%s4661_s10 + $0x680] sm:$0xff] %v554_v0  ;;  %557 = vst [vmem:[%s4661_s10 + $0x688] sm:$0xff] %v556_v1  ;;  %v560_v3 = vld [vmem:[%s4656_s9 + $0xd18] sm:$0xff]  ;;  %v562_v4 = vld [vmem:[%s4656_s9 + $0xd20] sm:$0xff] }
  0x7d   : > { %559 = vst [vmem:[%s4661_s10 + $0x690] sm:$0xff] %v558_v2  ;;  %v564_v5 = vld [vmem:[%s4656_s9 + $0xd28] sm:$0xff]  ;;  %561 = vst [vmem:[%s4661_s10 + $0x698] sm:$0xff] %v560_v3  ;;  %v568_v7 = vld [vmem:[%s4656_s9 + $0xd70] sm:$0xff] }
  0x7e   : > { %563 = vst [vmem:[%s4661_s10 + $0x6a0] sm:$0xff] %v562_v4  ;;  %565 = vst [vmem:[%s4661_s10 + $0x6a8] sm:$0xff] %v564_v5  ;;  %v566_v6 = vld [vmem:[%s4656_s9 + $0xd68] sm:$0xff]  ;;  %v570_v8 = vld [vmem:[%s4656_s9 + $0xd78] sm:$0xff] }
  0x7f   : > { %567 = vst [vmem:[%s4661_s10 + $0x6b4] sm:$0xff] %v566_v6  ;;  %569 = vst [vmem:[%s4661_s10 + $0x6bc] sm:$0xff] %v568_v7  ;;  %v572_v9 = vld [vmem:[%s4656_s9 + $0xd80] sm:$0xff]  ;;  %v574_v10 = vld [vmem:[%s4656_s9 + $0xd88] sm:$0xff] }
  0x80   : > { %571 = vst [vmem:[%s4661_s10 + $0x6c4] sm:$0xff] %v570_v8  ;;  %v576_v11 = vld [vmem:[%s4656_s9 + $0xd90] sm:$0xff]  ;;  %573 = vst [vmem:[%s4661_s10 + $0x6cc] sm:$0xff] %v572_v9  ;;  %v580_v13 = vld [vmem:[%s4656_s9 + $0xdd8] sm:$0xff] }
  0x81   : > { %575 = vst [vmem:[%s4661_s10 + $0x6d4] sm:$0xff] %v574_v10  ;;  %577 = vst [vmem:[%s4661_s10 + $0x6dc] sm:$0xff] %v576_v11  ;;  %v578_v12 = vld [vmem:[%s4656_s9 + $0xdd0] sm:$0xff]  ;;  %v582_v14 = vld [vmem:[%s4656_s9 + $0xde0] sm:$0xff] }
  0x82   : > { %579 = vst [vmem:[%s4661_s10 + $0x6e8] sm:$0xff] %v578_v12  ;;  %581 = vst [vmem:[%s4661_s10 + $0x6f0] sm:$0xff] %v580_v13  ;;  %v584_v15 = vld [vmem:[%s4656_s9 + $0xde8] sm:$0xff]  ;;  %v586_v16 = vld [vmem:[%s4656_s9 + $0xdf0] sm:$0xff] }
  0x83   : > { %583 = vst [vmem:[%s4661_s10 + $0x6f8] sm:$0xff] %v582_v14  ;;  %v588_v17 = vld [vmem:[%s4656_s9 + $0xdf8] sm:$0xff]  ;;  %585 = vst [vmem:[%s4661_s10 + $0x700] sm:$0xff] %v584_v15  ;;  %v592_v19 = vld [vmem:[%s4656_s9 + $0xe40] sm:$0xff] }
  0x84   : > { %587 = vst [vmem:[%s4661_s10 + $0x708] sm:$0xff] %v586_v16  ;;  %589 = vst [vmem:[%s4661_s10 + $0x710] sm:$0xff] %v588_v17  ;;  %v590_v18 = vld [vmem:[%s4656_s9 + $0xe38] sm:$0xff]  ;;  %v594_v20 = vld [vmem:[%s4656_s9 + $0xe48] sm:$0xff] }
  0x85   : > { %591 = vst [vmem:[%s4661_s10 + $0x71c] sm:$0xff] %v590_v18  ;;  %593 = vst [vmem:[%s4661_s10 + $0x724] sm:$0xff] %v592_v19  ;;  %v596_v21 = vld [vmem:[%s4656_s9 + $0xe50] sm:$0xff]  ;;  %v598_v22 = vld [vmem:[%s4656_s9 + $0xe58] sm:$0xff] }
  0x86   : > { %595 = vst [vmem:[%s4661_s10 + $0x72c] sm:$0xff] %v594_v20  ;;  %v600_v23 = vld [vmem:[%s4656_s9 + $0xe60] sm:$0xff]  ;;  %597 = vst [vmem:[%s4661_s10 + $0x734] sm:$0xff] %v596_v21  ;;  %v3641_v24 = vld [vmem:[%s4656_s9 + $0x30] sm:$0xf] }
  0x87   : > { %599 = vst [vmem:[%s4661_s10 + $0x73c] sm:$0xff] %v598_v22  ;;  %601 = vst [vmem:[%s4661_s10 + $0x744] sm:$0xff] %v600_v23  ;;  %v3643_v25 = vld [vmem:[%s4656_s9 + $0x98] sm:$0xf]  ;;  %v3645_v26 = vld [vmem:[%s4656_s9 + $0x100] sm:$0xf] }
  0x88   : > { %3642 = vst [vmem:[%s4661_s10 + $0x30] sm:$0xf] %v3641_v24  ;;  %3644 = vst [vmem:[%s4661_s10 + $0x64] sm:$0xf] %v3643_v25  ;;  %v3647_v27 = vld [vmem:[%s4656_s9 + $0x168] sm:$0xf] }
  0x89   : > { %3646 = vst [vmem:[%s4661_s10 + $0x98] sm:$0xf] %v3645_v26  ;;  %v3649_v28 = vld [vmem:[%s4656_s9 + $0x1d0] sm:$0xf]  ;;  %v3651_v29 = vld [vmem:[%s4656_s9 + $0x238] sm:$0xf] }
  0x8a   : > { %3648 = vst [vmem:[%s4661_s10 + $0xcc] sm:$0xf] %v3647_v27  ;;  %3650 = vst [vmem:[%s4661_s10 + $0x100] sm:$0xf] %v3649_v28  ;;  %v3653_v30 = vld [vmem:[%s4656_s9 + $0x2a0] sm:$0xf] }
  0x8b   : > { %3652 = vst [vmem:[%s4661_s10 + $0x134] sm:$0xf] %v3651_v29  ;;  %v3655_v31 = vld [vmem:[%s4656_s9 + $0x308] sm:$0xf]  ;;  %v3657_v32 = vld [vmem:[%s4656_s9 + $0x370] sm:$0xf] }
  0x8c   : > { %3654 = vst [vmem:[%s4661_s10 + $0x168] sm:$0xf] %v3653_v30  ;;  %3656 = vst [vmem:[%s4661_s10 + $0x19c] sm:$0xf] %v3655_v31  ;;  %v3659_v33 = vld [vmem:[%s4656_s9 + $0x3d8] sm:$0xf] }
  0x8d   : > { %3658 = vst [vmem:[%s4661_s10 + $0x1d0] sm:$0xf] %v3657_v32  ;;  %v3661_v34 = vld [vmem:[%s4656_s9 + $0x440] sm:$0xf]  ;;  %v3663_v35 = vld [vmem:[%s4656_s9 + $0x4a8] sm:$0xf] }
  0x8e   : > { %3660 = vst [vmem:[%s4661_s10 + $0x204] sm:$0xf] %v3659_v33  ;;  %3662 = vst [vmem:[%s4661_s10 + $0x238] sm:$0xf] %v3661_v34  ;;  %v3665_v36 = vld [vmem:[%s4656_s9 + $0x510] sm:$0xf] }
  0x8f   : > { %3664 = vst [vmem:[%s4661_s10 + $0x26c] sm:$0xf] %v3663_v35  ;;  %v3667_v37 = vld [vmem:[%s4656_s9 + $0x578] sm:$0xf]  ;;  %v3669_v38 = vld [vmem:[%s4656_s9 + $0x5e0] sm:$0xf] }
  0x90   : > { %3666 = vst [vmem:[%s4661_s10 + $0x2a0] sm:$0xf] %v3665_v36  ;;  %3668 = vst [vmem:[%s4661_s10 + $0x2d4] sm:$0xf] %v3667_v37  ;;  %v3671_v39 = vld [vmem:[%s4656_s9 + $0x648] sm:$0xf] }
  0x91   : > { %3670 = vst [vmem:[%s4661_s10 + $0x308] sm:$0xf] %v3669_v38  ;;  %v3673_v40 = vld [vmem:[%s4656_s9 + $0x6b0] sm:$0xf]  ;;  %v3675_v41 = vld [vmem:[%s4656_s9 + $0x718] sm:$0xf] }
  0x92   : > { %3672 = vst [vmem:[%s4661_s10 + $0x33c] sm:$0xf] %v3671_v39  ;;  %3674 = vst [vmem:[%s4661_s10 + $0x370] sm:$0xf] %v3673_v40  ;;  %v3677_v42 = vld [vmem:[%s4656_s9 + $0x780] sm:$0xf] }
  0x93   : > { %3676 = vst [vmem:[%s4661_s10 + $0x3a4] sm:$0xf] %v3675_v41  ;;  %v3679_v43 = vld [vmem:[%s4656_s9 + $0x7e8] sm:$0xf]  ;;  %v3681_v44 = vld [vmem:[%s4656_s9 + $0x850] sm:$0xf] }
  0x94   : > { %3678 = vst [vmem:[%s4661_s10 + $0x3d8] sm:$0xf] %v3677_v42  ;;  %3680 = vst [vmem:[%s4661_s10 + $0x40c] sm:$0xf] %v3679_v43  ;;  %v3683_v45 = vld [vmem:[%s4656_s9 + $0x8b8] sm:$0xf] }
  0x95   : > { %3682 = vst [vmem:[%s4661_s10 + $0x440] sm:$0xf] %v3681_v44  ;;  %v3685_v46 = vld [vmem:[%s4656_s9 + $0x920] sm:$0xf]  ;;  %v3687_v47 = vld [vmem:[%s4656_s9 + $0x988] sm:$0xf] }
  0x96   : > { %3684 = vst [vmem:[%s4661_s10 + $0x474] sm:$0xf] %v3683_v45  ;;  %3686 = vst [vmem:[%s4661_s10 + $0x4a8] sm:$0xf] %v3685_v46  ;;  %v3689_v48 = vld [vmem:[%s4656_s9 + $0x9f0] sm:$0xf] }
  0x97   : > { %3688 = vst [vmem:[%s4661_s10 + $0x4dc] sm:$0xf] %v3687_v47  ;;  %v3691_v49 = vld [vmem:[%s4656_s9 + $0xa58] sm:$0xf]  ;;  %v3693_v50 = vld [vmem:[%s4656_s9 + $0xac0] sm:$0xf] }
  0x98   : > { %3690 = vst [vmem:[%s4661_s10 + $0x510] sm:$0xf] %v3689_v48  ;;  %3692 = vst [vmem:[%s4661_s10 + $0x544] sm:$0xf] %v3691_v49  ;;  %v3695_v51 = vld [vmem:[%s4656_s9 + $0xb28] sm:$0xf] }
  0x99   : > { %3694 = vst [vmem:[%s4661_s10 + $0x578] sm:$0xf] %v3693_v50  ;;  %v3697_v52 = vld [vmem:[%s4656_s9 + $0xb90] sm:$0xf]  ;;  %v3699_v53 = vld [vmem:[%s4656_s9 + $0xbf8] sm:$0xf] }
  0x9a   : > { %3696 = vst [vmem:[%s4661_s10 + $0x5ac] sm:$0xf] %v3695_v51  ;;  %3698 = vst [vmem:[%s4661_s10 + $0x5e0] sm:$0xf] %v3697_v52  ;;  %v3701_v54 = vld [vmem:[%s4656_s9 + $0xc60] sm:$0xf] }
  0x9b   : > { %3700 = vst [vmem:[%s4661_s10 + $0x614] sm:$0xf] %v3699_v53  ;;  %v3703_v55 = vld [vmem:[%s4656_s9 + $0xcc8] sm:$0xf]  ;;  %v3705_v56 = vld [vmem:[%s4656_s9 + $0xd30] sm:$0xf] }
  0x9c   : > { %3702 = vst [vmem:[%s4661_s10 + $0x648] sm:$0xf] %v3701_v54  ;;  %3704 = vst [vmem:[%s4661_s10 + $0x67c] sm:$0xf] %v3703_v55  ;;  %v3707_v57 = vld [vmem:[%s4656_s9 + $0xd98] sm:$0xf] }
  0x9d   : > { %3706 = vst [vmem:[%s4661_s10 + $0x6b0] sm:$0xf] %v3705_v56  ;;  %v3709_v58 = vld [vmem:[%s4656_s9 + $0xe00] sm:$0xf]  ;;  %v3711_v59 = vld [vmem:[%s4656_s9 + $0xe68] sm:$0xf] }
  0x9e   : > { %3708 = vst [vmem:[%s4661_s10 + $0x6e4] sm:$0xf] %v3707_v57  ;;  %3710 = vst [vmem:[%s4661_s10 + $0x718] sm:$0xf] %v3709_v58 }
  0x9f   : > { %3712 = vst [vmem:[%s4661_s10 + $0x74c] sm:$0xf] %v3711_v59 }
  0xa0 PF: > { %p3713_p9 = scmp.ge.s32.totalorder %s4568_s18, 1  ;;  %p686_p10 = scmp.lt.s32.totalorder %s4568_s18, 5 }
  0xa2   : > { %p687_p11 = pnand %p3713_p9, %p686_p10 }
  0xa3   : > { %s693_s11 = sand.u32 (!%p687_p11), 1, %s4544_s12  }
  0xa4   : > { %690 = sbr.rel (%p687_p11) target bundleno = 719 (0x2cf), region = 54 }
  0xa5   : > { %s4083_s21 = smul.u32 (!%p687_p11), 1872, %s693_s11 }
  0xa6   : > { %s4084_s8 = smul.u32 (!%p687_p11), 104, %s693_s11 }
  0xa7   : > { %s5171_s22 = scalar_lea.vmem (!%p687_p11), [#allocation2], %s4083_s21 }
  0xa9   : > { %v4570_v60 = vmov 0   ;;  %v4144_v61 = vld [vmem:[%s5171_s22 + $0x2dc] ss:$52 sps:$4 sm:$0xff]   ;;  %v4146_v62 = vld [vmem:[%s5171_s22 + $0x6ec] ss:$52 sps:$4 sm:$0xff]   ;;  %vm2234_vm0 = vcmask 261120  }
  0xaa   : > { %2352 = vmatprep.mubr.bf16.mxu1 %v4570_v60  ;;  %4143 = vset.pattern.permute.xlu0 %v4570_v60  ;;  %v4148_v63 = vld [vmem:[%s5171_s22 + $0x2d8] ss:$52 sps:$4 sm:$0xff]   ;;  %v4149_v0 = vld [vmem:[%s5171_s22 + $0x6e8] ss:$52 sps:$4 sm:$0xff]   ;;  %v4154_v3 = vld [vmem:[%s5171_s22 + $0x270] ss:$52 sps:$4 sm:$0xff]  }
  0xab   : > { %2247 = vmatprep.subr.bf16.mxu0 %v4144_v61  ;;  %2332 = vmatprep.subr.bf16.mxu1 %v4146_v62  ;;  %v4150_v1 = vld [vmem:[%s5171_s22 + $0x274] ss:$52 sps:$4 sm:$0xff]   ;;  %v4152_v2 = vld [vmem:[%s5171_s22 + $0x684] ss:$52 sps:$4 sm:$0xff]   ;;  %v4156_v5 = vld [vmem:[%s5171_s22 + $0x20c] ss:$52 sps:$4 sm:$0xff]  }
  0xac   : > { %2248 = vmatpush1.bf16.msra.mxu0 %v4148_v63  ;;  %2333 = vmatpush1.bf16.msra.mxu1 %v4149_v0  ;;  %v4155_v4 = vld [vmem:[%s5171_s22 + $0x680] ss:$52 sps:$4 sm:$0xff]   ;;  %v4161_v8 = vld [vmem:[%s5171_s22 + $0x2e4] ss:$52 sps:$4 sm:$0xff]   ;;  %v4162_v9 = vld [vmem:[%s5171_s22 + $0x208] ss:$52 sps:$4 sm:$0xff]  }
  0xad   : > { %2249 = vmatprep.subr.bf16.mxu0 %v4150_v1  ;;  %2334 = vmatprep.subr.bf16.mxu1 %v4152_v2  ;;  %v5185_v6 = vld [vmem:[%s5835_s0 + $0x8] ss:$12 sps:$4 sm:$0xff]   ;;  %v4167_v11 = vld [vmem:[%s5171_s22 + $0x27c] ss:$52 sps:$4 sm:$0xff]   ;;  %v4179_v20 = vld [vmem:[%s5171_s22 + $0x1ac] ss:$52 sps:$4 sm:$0xff]  }
  0xae   : > { %v4159_v7 = vld [vmem:[%s5171_s22 + $0x2e0] ss:$52 sps:$4 sm:$0xff]   ;;  %v4163_v10 = vld [vmem:[%s5171_s22 + $0x1a4] ss:$52 sps:$4 sm:$0xff]   ;;  %v4169_v14 = vld [vmem:[%s5171_s22 + $0x13c] ss:$52 sps:$4 sm:$0xff]  }
  0xaf   : > { %v4165_v12 = vld [vmem:[%s5171_s22 + $0x278] ss:$52 sps:$4 sm:$0xff]   ;;  %v4168_v13 = vld [vmem:[%s5171_s22 + $0x1a0] ss:$52 sps:$4 sm:$0xff]   ;;  %v4171_v16 = vld [vmem:[%s5171_s22 + $0x210] ss:$52 sps:$4 sm:$0xff]  }
  0xb0   : > { %2250 = vmatpush1.bf16.msra.mxu0 %v4154_v3  ;;  %2335 = vmatpush1.bf16.msra.mxu1 %v4155_v4  ;;  %v4173_v15 = vld [vmem:[%s5171_s22 + $0x214] ss:$52 sps:$4 sm:$0xff]   ;;  %v4174_v17 = vld [vmem:[%s5171_s22 + $0x138] ss:$52 sps:$4 sm:$0xff]   ;;  %v4180_v22 = vld [vmem:[%s5171_s22 + $0xd0] ss:$52 sps:$4 sm:$0xff]  }
  0xb1   : > { %2251 = vmatprep.subr.bf16.mxu0 %v4156_v5  ;;  %2393 = vmatprep.subr.bf16.mxu1 %v4161_v8  ;;  %v5204_v18 = vld [vmem:[%s5835_s0 + $0x20] ss:$12 sps:$4 sm:$0xff]   ;;  %v4175_v19 = vld [vmem:[%s5171_s22 + $0xd4] ss:$52 sps:$4 sm:$0xff]   ;;  %v4185_v24 = vld [vmem:[%s5171_s22 + $0x144] ss:$52 sps:$4 sm:$0xff]  }
  0xb2   : > { %v4177_v21 = vld [vmem:[%s5171_s22 + $0x1a8] ss:$52 sps:$4 sm:$0xff]   ;;  %v4181_v23 = vld [vmem:[%s5171_s22 + $0x6c] ss:$52 sps:$4 sm:$0xff]   ;;  %v4187_v28 = vld [vmem:[%s5171_s22 + $0x4] ss:$52 sps:$4 sm:$0xff]  }
  0xb3   : > { %3960 = vmatmul.mubr.msk.bf16.vlgmr.msra.gmra.mxu1 %vm2234_vm0, %v5185_v6  ;;  %v4183_v25 = vld [vmem:[%s5171_s22 + $0x140] ss:$52 sps:$4 sm:$0xff]   ;;  %v4186_v26 = vld [vmem:[%s5171_s22 + $0x68] ss:$52 sps:$4 sm:$0xff]   ;;  %v4189_v30 = vld [vmem:[%s5171_s22 + $0xd8] ss:$52 sps:$4 sm:$0xff]  }
  0xb4   : > { %2252 = vmatpush1.bf16.msra.mxu0 %v4162_v9  ;;  %2394 = vmatpush1.bf16.msra.mxu1 %v4159_v7  ;;  %v5220_v27 = vld [vmem:[%s5835_s0 + $0x38] ss:$12 sps:$4 sm:$0xff]   ;;  %v4191_v29 = vld [vmem:[%s5171_s22 + $0xdc] ss:$52 sps:$4 sm:$0xff]   ;;  %v4203_v37 = vld [vmem:[%s5171_s22 + $0xc] ss:$52 sps:$4 sm:$0xff]  }
  0xb5   : > { %2253 = vmatprep.subr.bf16.mxu0 %v4163_v10  ;;  %2395 = vmatprep.subr.bf16.mxu1 %v4167_v11  ;;  %v4192_v31 = vld [vmem:[%s5171_s22] ss:$52 sps:$4 sm:$0xff]   ;;  %v4193_v32 = vld [vmem:[%s5171_s22 + $0x61c] ss:$52 sps:$4 sm:$0xff]   ;;  %v4198_v35 = vld [vmem:[%s5171_s22 + $0x618] ss:$52 sps:$4 sm:$0xff]  }
  0xb6   : > { %2362 = vmatprep.mubr.bf16.mxu1 %v4570_v60  ;;  %v4197_v33 = vld [vmem:[%s5171_s22 + $0x74] ss:$52 sps:$4 sm:$0xff]   ;;  %v4195_v34 = vld [vmem:[%s5171_s22 + $0x70] ss:$52 sps:$4 sm:$0xff]   ;;  %v4205_v40 = vld [vmem:[%s5171_s22 + $0x54c] ss:$52 sps:$4 sm:$0xff]  }
  0xb7   : > { %v4199_v36 = vld [vmem:[%s5171_s22 + $0x5b4] ss:$52 sps:$4 sm:$0xff]   ;;  %v4204_v39 = vld [vmem:[%s5171_s22 + $0x5b0] ss:$52 sps:$4 sm:$0xff]   ;;  %v4213_v46 = vld [vmem:[%s5171_s22 + $0x5b8] ss:$52 sps:$4 sm:$0xff]  }
  0xb8   : > { %2254 = vmatpush1.bf16.msra.mxu0 %v4168_v13  ;;  %2396 = vmatpush1.bf16.msra.mxu1 %v4165_v12  ;;  %v4201_v38 = vld [vmem:[%s5171_s22 + $0x8] ss:$52 sps:$4 sm:$0xff]   ;;  %v4209_v41 = vld [vmem:[%s5171_s22 + $0x624] ss:$52 sps:$4 sm:$0xff]   ;;  %v4207_v42 = vld [vmem:[%s5171_s22 + $0x620] ss:$52 sps:$4 sm:$0xff]  }
  0xb9   : > { %2255 = vmatprep.subr.bf16.mxu0 %v4169_v14  ;;  %2397 = vmatprep.subr.bf16.mxu1 %v4173_v15  ;;  %v4210_v43 = vld [vmem:[%s5171_s22 + $0x548] ss:$52 sps:$4 sm:$0xff]   ;;  %v4211_v44 = vld [vmem:[%s5171_s22 + $0x4e4] ss:$52 sps:$4 sm:$0xff]   ;;  %v4216_v47 = vld [vmem:[%s5171_s22 + $0x4e0] ss:$52 sps:$4 sm:$0xff]  }
  0xba   : > { %v4215_v45 = vld [vmem:[%s5171_s22 + $0x5bc] ss:$52 sps:$4 sm:$0xff]   ;;  %v4222_v51 = vld [vmem:[%s5171_s22 + $0x554] ss:$52 sps:$4 sm:$0xff]   ;;  %v4223_v53 = vld [vmem:[%s5171_s22 + $0x478] ss:$52 sps:$4 sm:$0xff]  }
  0xbb   : > { %3961 = vmatmul.mubr.msk.bf16.gmra.mxu1 %vm2234_vm0, %v5204_v18  ;;  %v5248_v48 = vld [vmem:[%s5835_s0 + $0x4] ss:$12 sps:$4 sm:$0xff]   ;;  %v4226_v56 = vld [vmem:[%s5171_s22 + $0x4e8] ss:$52 sps:$4 sm:$0xff]   ;;  %v4239_v1 = vld [vmem:[%s5171_s22 + $0x418] ss:$52 sps:$4 sm:$0xff]  }
  0xbc   : > { %2256 = vmatpush1.bf16.msra.mxu0 %v4174_v17  ;;  %2398 = vmatpush1.bf16.msra.mxu1 %v4171_v16  ;;  %v5253_v49 = vld [vmem:[%s5835_s0 + $0x50] ss:$12 sps:$4 sm:$0xff]   ;;  %v4224_v54 = vld [vmem:[%s5171_s22 + $0x414] ss:$52 sps:$4 sm:$0xff]   ;;  %v4235_v59 = vld [vmem:[%s5171_s22 + $0x484] ss:$52 sps:$4 sm:$0xff]  }
  0xbd   : > { %2257 = vmatprep.subr.bf16.mxu0 %v4175_v19  ;;  %2399 = vmatprep.subr.bf16.mxu1 %v4179_v20  ;;  %v4217_v50 = vld [vmem:[%s5171_s22 + $0x47c] ss:$52 sps:$4 sm:$0xff]   ;;  %v4228_v55 = vld [vmem:[%s5171_s22 + $0x4ec] ss:$52 sps:$4 sm:$0xff]   ;;  %v4237_v63 = vld [vmem:[%s5171_s22 + $0x344] ss:$52 sps:$4 sm:$0xff]  }
  0xbe   : > { %2372 = vmatprep.mubr.bf16.mxu1 %v4570_v60  ;;  %2279 = vmatprep.mubr.bf16.mxu0 %v5248_v48  ;;  %v4220_v52 = vld [vmem:[%s5171_s22 + $0x550] ss:$52 sps:$4 sm:$0xff]   ;;  %v4230_v58 = vld [vmem:[%s5171_s22 + $0x3ac] ss:$52 sps:$4 sm:$0xff]   ;;  %v4236_v62 = vld [vmem:[%s5171_s22 + $0x3a8] ss:$52 sps:$4 sm:$0xff]  }
  0xbf   : > { %v4229_v57 = vld [vmem:[%s5171_s22 + $0x410] ss:$52 sps:$4 sm:$0xff]   ;;  %v4233_v61 = vld [vmem:[%s5171_s22 + $0x480] ss:$52 sps:$4 sm:$0xff]   ;;  %v5288_v10 = vld [vmem:[%s5835_s0 + $0x1c] ss:$12 sps:$4 sm:$0xff]  }
  0xc0   : > { %2258 = vmatpush1.bf16.msra.mxu0 %v4180_v22  ;;  %2400 = vmatpush1.bf16.msra.mxu1 %v4177_v21  ;;  %v4241_v0 = vld [vmem:[%s5171_s22 + $0x41c] ss:$52 sps:$4 sm:$0xff]   ;;  %v4242_v2 = vld [vmem:[%s5171_s22 + $0x340] ss:$52 sps:$4 sm:$0xff]   ;;  %v4264_v20 = vld [vmem:[%s5171_s22 + $0x284] ss:$52 sps:$4 sm:$0xff]  }
  0xc1   : > { %2259 = vmatprep.subr.bf16.mxu0 %v4181_v23  ;;  %2401 = vmatprep.subr.bf16.mxu1 %v4185_v24  ;;  %v4249_v3 = vld [vmem:[%s5171_s22 + $0x3b4] ss:$52 sps:$4 sm:$0xff]   ;;  %v5280_v5 = vld [vmem:[%s5835_s0] ss:$12 sps:$4 sm:$0xff]   ;;  %v5318_v23 = vld [vmem:[%s5835_s0 + $0x30] ss:$12 sps:$4 sm:$0xff]  }
  0xc2   : > { %v4252_v4 = vld [vmem:[%s5171_s22 + $0x6f4] ss:$52 sps:$4 sm:$0xff]   ;;  %v4247_v7 = vld [vmem:[%s5171_s22 + $0x3b0] ss:$52 sps:$4 sm:$0xff]   ;;  %v4255_v9 = vld [vmem:[%s5171_s22 + $0x34c] ss:$52 sps:$4 sm:$0xff]  }
  0xc3   : > { %3962 = vmatmul.mubr.msk.bf16.gmra.mxu1 %vm2234_vm0, %v5220_v27  ;;  %v4250_v8 = vld [vmem:[%s5171_s22 + $0x6f0] ss:$52 sps:$4 sm:$0xff]   ;;  %v4270_v11 = vld [vmem:[%s5171_s22 + $0x68c] ss:$52 sps:$4 sm:$0xff]   ;;  %v4253_v12 = vld [vmem:[%s5171_s22 + $0x348] ss:$52 sps:$4 sm:$0xff]  }
  0xc4   : > { %2260 = vmatpush1.bf16.msra.mxu0 %v4186_v26  ;;  %2402 = vmatpush1.bf16.msra.mxu1 %v4183_v25  ;;  %v4268_v13 = vld [vmem:[%s5171_s22 + $0x688] ss:$52 sps:$4 sm:$0xff]   ;;  %v4261_v14 = vld [vmem:[%s5171_s22 + $0x2ec] ss:$52 sps:$4 sm:$0xff]   ;;  %s3496_s7 = smul.u32 (%p4639_p6), 13, %s4552_s14 }
  0xc5   : > { %2261 = vmatprep.subr.bf16.mxu0 %v4187_v28  ;;  %2403 = vmatprep.subr.bf16.mxu1 %v4191_v29  ;;  %v4291_v15 = vld [vmem:[%s5171_s22 + $0x6fc] ss:$52 sps:$4 sm:$0xff]   ;;  %v5300_v16 = vld [vmem:[%s5835_s0 + $0x18] ss:$12 sps:$4 sm:$0xff]   ;;  %v4282_v29 = vld [vmem:[%s5171_s22 + $0x14c] ss:$52 sps:$4 sm:$0xff]  }
  0xc6   : > { %2382 = vmatprep.mubr.bf16.mxu1 %v4570_v60  ;;  %v4259_v17 = vld [vmem:[%s5171_s22 + $0x2e8] ss:$52 sps:$4 sm:$0xff]   ;;  %v5306_v19 = vld [vmem:[%s5835_s0 + $0x34] ss:$12 sps:$4 sm:$0xff]   ;;  %v4271_v24 = vld [vmem:[%s5171_s22 + $0x218] ss:$52 sps:$4 sm:$0xff]  }
  0xc7   : > { %v4262_v21 = vld [vmem:[%s5171_s22 + $0x280] ss:$52 sps:$4 sm:$0xff]   ;;  %v4273_v22 = vld [vmem:[%s5171_s22 + $0x21c] ss:$52 sps:$4 sm:$0xff]  }
  0xc8   : > { %2262 = vmatpush1.bf16.msra.mxu0 %v4192_v31  ;;  %2404 = vmatpush1.bf16.msra.mxu1 %v4189_v30  ;;  %v5324_v25 = vld [vmem:[%s5835_s0 + $0x4c] ss:$12 sps:$4 sm:$0xff]   ;;  %v4274_v28 = vld [vmem:[%s5171_s22 + $0x1b0] ss:$52 sps:$4 sm:$0xff]  }
  0xc9   : > { %2263 = vmatprep.subr.bf16.mxu0 %v4193_v32  ;;  %2405 = vmatprep.subr.bf16.mxu1 %v4197_v33  ;;  %v4276_v26 = vld [vmem:[%s5171_s22 + $0x1b4] ss:$52 sps:$4 sm:$0xff]   ;;  %v4285_v32 = vld [vmem:[%s5171_s22 + $0xe4] ss:$52 sps:$4 sm:$0xff]  }
  0xca   : > { %v5336_v30 = vld [vmem:[%s5835_s0 + $0x48] ss:$12 sps:$4 sm:$0xff]  }
  0xcb   : > { %3963 = vmatmul.mubr.msk.bf16.gmra.mxu1 %vm2234_vm0, %v5253_v49  ;;  %v4280_v31 = vld [vmem:[%s5171_s22 + $0x148] ss:$52 sps:$4 sm:$0xff]   ;;  %v4283_v33 = vld [vmem:[%s5171_s22 + $0xe0] ss:$52 sps:$4 sm:$0xff]  }
  0xcc   : > { %2264 = vmatpush2.bf16.msra.mxu0 %v4198_v35  ;;  %2406 = vmatpush1.bf16.msra.mxu1 %v4195_v34  ;;  %v3331_v34 = vld [vmem:[%s5836_s1] sm:$0xff] }
  0xcd   : > { %2265 = vmatprep.subr.bf16.mxu0 %v4199_v36  ;;  %2407 = vmatprep.subr.bf16.mxu1 %v4203_v37  ;;  %v4288_v35 = vld [vmem:[%s5171_s22 + $0x7c] ss:$52 sps:$4 sm:$0xff]   ;;  %v4286_v36 = vld [vmem:[%s5171_s22 + $0x78] ss:$52 sps:$4 sm:$0xff]  }
  0xce   : > { %2425 = vmatprep.mubr.bf16.mxu1 %v5248_v48  ;;  %3335 = vperm.xlu0 %4143, %v3331_v34   ;;  %v3332_v37 = vld [vmem:[%s5836_s1 + $0x8] sm:$0xff] }
  0xcf   : > { %v4369_v34 = vld [vmem:[%s5171_s22 + $0x294] ss:$52 sps:$4 sm:$0xff]  }
  0xd0   : > { %2266 = vmatpush2.bf16.msra.mxu0 %v4204_v39  ;;  %2408 = vmatpush1.bf16.msra.mxu1 %v4201_v38  ;;  %v4289_v38 = vld [vmem:[%s5171_s22 + $0x6f8] ss:$52 sps:$4 sm:$0xff]   ;;  %v4294_v39 = vld [vmem:[%s5171_s22 + $0x14] ss:$52 sps:$4 sm:$0xff]  }
  0xd1   : > { %2267 = vmatprep.subr.bf16.mxu0 %v4205_v40  ;;  %2409 = vmatprep.subr.bf16.mxu1 %v4209_v41  ;;  %v4306_v40 = vld [vmem:[%s5171_s22 + $0x694] ss:$52 sps:$4 sm:$0xff]   ;;  %v4292_v41 = vld [vmem:[%s5171_s22 + $0x10] ss:$52 sps:$4 sm:$0xff]  }
  0xd2   : > { %3340 = vperm.xlu0 %4143, %v3332_v37   ;;  %v4367_v37 = vld [vmem:[%s5171_s22 + $0x290] ss:$52 sps:$4 sm:$0xff]  }
  0xd4   : > { %2268 = vmatpush2.bf16.msra.mxu0 %v4210_v43  ;;  %2410 = vmatpush2.bf16.msra.mxu1 %v4207_v42  ;;  %v4297_v42 = vld [vmem:[%s5171_s22 + $0x62c] ss:$52 sps:$4 sm:$0xff]   ;;  %v4304_v43 = vld [vmem:[%s5171_s22 + $0x690] ss:$52 sps:$4 sm:$0xff]  }
  0xd5   : > { %2269 = vmatprep.subr.bf16.mxu0 %v4211_v44  ;;  %2411 = vmatprep.subr.bf16.mxu1 %v4215_v45  ;;  %v4318_v44 = vld [vmem:[%s5171_s22 + $0x2f4] ss:$52 sps:$4 sm:$0xff]  }
  0xd6   : > { %v4295_v45 = vld [vmem:[%s5171_s22 + $0x628] ss:$52 sps:$4 sm:$0xff]  }
  0xd8   : > { %2270 = vmatpush2.bf16.msra.mxu0 %v4216_v47  ;;  %2412 = vmatpush2.bf16.msra.mxu1 %v4213_v46  ;;  %v4300_v46 = vld [vmem:[%s5171_s22 + $0x5c4] ss:$52 sps:$4 sm:$0xff]   ;;  %v4298_v47 = vld [vmem:[%s5171_s22 + $0x5c0] ss:$52 sps:$4 sm:$0xff]  }
  0xd9   : > { %2271 = vmatprep.subr.bf16.mxu0 %v4217_v50  ;;  %2413 = vmatprep.subr.bf16.mxu1 %v4222_v51  ;;  %v4303_v50 = vld [vmem:[%s5171_s22 + $0x55c] ss:$52 sps:$4 sm:$0xff]   ;;  %v4301_v51 = vld [vmem:[%s5171_s22 + $0x558] ss:$52 sps:$4 sm:$0xff]  }
  0xdc   : > { %2272 = vmatpush2.bf16.msra.mxu0 %v4223_v53  ;;  %2414 = vmatpush2.bf16.msra.mxu1 %v4220_v52  ;;  %v4309_v52 = vld [vmem:[%s5171_s22 + $0x4f4] ss:$52 sps:$4 sm:$0xff]   ;;  %v4307_v53 = vld [vmem:[%s5171_s22 + $0x4f0] ss:$52 sps:$4 sm:$0xff]  }
  0xdd   : > { %2273 = vmatprep.subr.bf16.mxu0 %v4224_v54  ;;  %2415 = vmatprep.subr.bf16.mxu1 %v4228_v55  ;;  %v4312_v54 = vld [vmem:[%s5171_s22 + $0x48c] ss:$52 sps:$4 sm:$0xff]   ;;  %v4310_v55 = vld [vmem:[%s5171_s22 + $0x488] ss:$52 sps:$4 sm:$0xff]  }
  0xe0   : > { %2274 = vmatpush2.bf16.msra.mxu0 %v4229_v57  ;;  %2416 = vmatpush2.bf16.msra.mxu1 %v4226_v56  ;;  %v4315_v56 = vld [vmem:[%s5171_s22 + $0x424] ss:$52 sps:$4 sm:$0xff]   ;;  %v4313_v57 = vld [vmem:[%s5171_s22 + $0x420] ss:$52 sps:$4 sm:$0xff]  }
  0xe1   : > { %2275 = vmatprep.subr.bf16.mxu0 %v4230_v58  ;;  %2417 = vmatprep.subr.bf16.mxu1 %v4235_v59  ;;  %v4321_v58 = vld [vmem:[%s5171_s22 + $0x3bc] ss:$52 sps:$4 sm:$0xff]  }
  0xe2   : > { %v4316_v59 = vld [vmem:[%s5171_s22 + $0x2f0] ss:$52 sps:$4 sm:$0xff]  }
  0xe4   : > { %2276 = vmatpush2.bf16.msra.mxu0 %v4236_v62  ;;  %2418 = vmatpush2.bf16.msra.mxu1 %v4233_v61  ;;  %v4319_v61 = vld [vmem:[%s5171_s22 + $0x3b8] ss:$52 sps:$4 sm:$0xff]  }
  0xe5   : > { %2277 = vmatprep.subr.bf16.mxu0 %v4237_v63  ;;  %2419 = vmatprep.subr.bf16.mxu1 %v4241_v0  ;;  %v4324_v62 = vld [vmem:[%s5171_s22 + $0x28c] ss:$52 sps:$4 sm:$0xff]   ;;  %v4327_v63 = vld [vmem:[%s5171_s22 + $0x354] ss:$52 sps:$4 sm:$0xff]  }
  0xe6   : > { %v4322_v0 = vld [vmem:[%s5171_s22 + $0x288] ss:$52 sps:$4 sm:$0xff]  }
  0xe8   : > { %2278 = vmatpush2.bf16.msra.mxu0 %v4242_v2  ;;  %2420 = vmatpush2.bf16.msra.mxu1 %v4239_v1  ;;  %v4325_v1 = vld [vmem:[%s5171_s22 + $0x350] ss:$52 sps:$4 sm:$0xff]  }
  0xe9   : > { %2421 = vmatprep.subr.bf16.mxu1 %v4249_v3  ;;  %2478 = vmatprep.subr.bf16.mxu0 %v4252_v4  ;;  %v4330_v2 = vld [vmem:[%s5171_s22 + $0x224] ss:$52 sps:$4 sm:$0xff]   ;;  %v4328_v4 = vld [vmem:[%s5171_s22 + $0x220] ss:$52 sps:$4 sm:$0xff]  }
  0xea   : > { %v4336_v3 = vld [vmem:[%s5171_s22 + $0x704] ss:$52 sps:$4 sm:$0xff]  }
  0xeb   : > { %2280 = vmatmul.mubr.bf16.vlgmr.msra.gmra.mxu0 %v5280_v5 }
  0xec   : > { %2422 = vmatpush2.bf16.msra.mxu1 %v4247_v7  ;;  %2479 = vmatpush1.bf16.msra.mxu0 %v4250_v8  ;;  %v4334_v7 = vld [vmem:[%s5171_s22 + $0x700] ss:$52 sps:$4 sm:$0xff]   ;;  %v4351_v8 = vld [vmem:[%s5171_s22 + $0x69c] ss:$52 sps:$4 sm:$0xff]  }
  0xed   : > { %2423 = vmatprep.subr.bf16.mxu1 %v4255_v9  ;;  %2289 = vmatprep.mubr.bf16.mxu0 %v5288_v10  ;;  %v4331_v9 = vld [vmem:[%s5171_s22 + $0x1b8] ss:$52 sps:$4 sm:$0xff]  }
  0xee   : > { %2480 = vmatprep.subr.bf16.mxu0 %v4270_v11  ;;  %v4339_v11 = vld [vmem:[%s5171_s22 + $0x154] ss:$52 sps:$4 sm:$0xff]  }
  0xf0   : > { %2424 = vmatpush2.bf16.msra.mxu1 %v4253_v12  ;;  %2481 = vmatpush1.bf16.msra.mxu0 %v4268_v13  ;;  %v4349_v12 = vld [vmem:[%s5171_s22 + $0x698] ss:$52 sps:$4 sm:$0xff]   ;;  %v4363_v13 = vld [vmem:[%s5171_s22 + $0x2fc] ss:$52 sps:$4 sm:$0xff]  }
  0xf1   : > { %2539 = vmatprep.subr.bf16.mxu1 %v4261_v14  ;;  %2624 = vmatprep.subr.bf16.mxu0 %v4291_v15  ;;  %v4337_v14 = vld [vmem:[%s5171_s22 + $0x150] ss:$52 sps:$4 sm:$0xff]   ;;  %v4342_v15 = vld [vmem:[%s5171_s22 + $0xec] ss:$52 sps:$4 sm:$0xff]  }
  0xf3   : > { %2290 = vmatmul.mubr.bf16.gmra.mxu0 %v5300_v16  ;;  %2426 = vmatmul.mubr.bf16.vlgmr.msra.gmra.mxu1 %v5280_v5 }
  0xf4   : > { %2540 = vmatpush1.bf16.msra.mxu1 %v4259_v17  ;;  %2299 = vmatprep.mubr.bf16.mxu0 %v5306_v19  ;;  %v4345_v17 = vld [vmem:[%s5171_s22 + $0x84] ss:$52 sps:$4 sm:$0xff]  }
  0xf5   : > { %2541 = vmatprep.subr.bf16.mxu1 %v4264_v20  ;;  %2435 = vmatprep.mubr.bf16.mxu1 %v5288_v10  ;;  %v4343_v20 = vld [vmem:[%s5171_s22 + $0x80] ss:$52 sps:$4 sm:$0xff]  }
  0xf8   : > { %2542 = vmatpush1.bf16.msra.mxu1 %v4262_v21  ;;  %v4348_v21 = vld [vmem:[%s5171_s22 + $0x1c] ss:$52 sps:$4 sm:$0xff]  }
  0xf9   : > { %2543 = vmatprep.subr.bf16.mxu1 %v4273_v22  ;;  %v4354_v22 = vld [vmem:[%s5171_s22 + $0x634] ss:$52 sps:$4 sm:$0xff]  }
  0xfb   : > { %2300 = vmatmul.mubr.bf16.gmra.mxu0 %v5318_v23  ;;  %2436 = vmatmul.mubr.bf16.gmra.mxu1 %v5300_v16 }
  0xfc   : > { %2544 = vmatpush1.bf16.msra.mxu1 %v4271_v24  ;;  %2309 = vmatprep.mubr.bf16.mxu0 %v5324_v25  ;;  %v4352_v24 = vld [vmem:[%s5171_s22 + $0x630] ss:$52 sps:$4 sm:$0xff]  }
  0xfd   : > { %2545 = vmatprep.subr.bf16.mxu1 %v4276_v26  ;;  %2445 = vmatprep.mubr.bf16.mxu1 %v5306_v19  ;;  %v4357_v26 = vld [vmem:[%s5171_s22 + $0x5cc] ss:$52 sps:$4 sm:$0xff]  }
 0x100   : > { %2546 = vmatpush1.bf16.msra.mxu1 %v4274_v28  ;;  %v4355_v28 = vld [vmem:[%s5171_s22 + $0x5c8] ss:$52 sps:$4 sm:$0xff]  }
 0x101   : > { %2547 = vmatprep.subr.bf16.mxu1 %v4282_v29  ;;  %v4360_v29 = vld [vmem:[%s5171_s22 + $0x564] ss:$52 sps:$4 sm:$0xff]  }
 0x103   : > { %2310 = vmatmul.mubr.bf16.gmra.mxu0 %v5336_v30  ;;  %2446 = vmatmul.mubr.bf16.gmra.mxu1 %v5318_v23 }
 0x104   : > { %2548 = vmatpush1.bf16.msra.mxu1 %v4280_v31  ;;  %2498 = vmatprep.mubr.bf16.mxu0 %v4570_v60  ;;  %v4358_v31 = vld [vmem:[%s5171_s22 + $0x560] ss:$52 sps:$4 sm:$0xff]  }
 0x105   : > { %2549 = vmatprep.subr.bf16.mxu1 %v4285_v32  ;;  %2455 = vmatprep.mubr.bf16.mxu1 %v5324_v25  ;;  %v4361_v32 = vld [vmem:[%s5171_s22 + $0x2f8] ss:$52 sps:$4 sm:$0xff]  }
 0x108   : > { %2550 = vmatpush1.bf16.msra.mxu1 %v4283_v33  ;;  %v4366_v33 = vld [vmem:[%s5171_s22 + $0x4fc] ss:$52 sps:$4 sm:$0xff]  }
 0x109   : > { %2551 = vmatprep.subr.bf16.mxu1 %v4288_v35  ;;  %v5441_v35 = vld [vmem:[%s5835_s0 + $0x8] ss:$12 sps:$4 sm:$0xff]  }
 0x10b   : > { %3964 = vmatmul.mubr.msk.bf16.vlgmr.msra.gmra.mxu0 %vm2234_vm0, %v5185_v6  ;;  %2456 = vmatmul.mubr.bf16.gmra.mxu1 %v5336_v30 }
 0x10c   : > { %2552 = vmatpush1.bf16.msra.mxu1 %v4286_v36  ;;  %2625 = vmatpush1.bf16.msra.mxu0 %v4289_v38  ;;  %v4364_v36 = vld [vmem:[%s5171_s22 + $0x4f8] ss:$52 sps:$4 sm:$0xff]   ;;  %v4372_v38 = vld [vmem:[%s5171_s22 + $0x494] ss:$52 sps:$4 sm:$0xff]  }
 0x10d   : > { %2553 = vmatprep.subr.bf16.mxu1 %v4294_v39  ;;  %2508 = vmatprep.mubr.bf16.mxu0 %v4570_v60  ;;  %v4375_v39 = vld [vmem:[%s5171_s22 + $0x22c] ss:$52 sps:$4 sm:$0xff]  }
 0x10e   : > { %2626 = vmatprep.subr.bf16.mxu0 %v4306_v40  ;;  %2571 = vmatprep.mubr.bf16.mxu1 %v5248_v48  ;;  %v4370_v40 = vld [vmem:[%s5171_s22 + $0x490] ss:$52 sps:$4 sm:$0xff]  }
 0x110   : > { %2554 = vmatpush1.bf16.msra.mxu1 %v4292_v41  ;;  %2627 = vmatpush1.bf16.msra.mxu0 %v4304_v43  ;;  %v4373_v41 = vld [vmem:[%s5171_s22 + $0x228] ss:$52 sps:$4 sm:$0xff]   ;;  %v4381_v43 = vld [vmem:[%s5171_s22 + $0x1c4] ss:$52 sps:$4 sm:$0xff]  }
 0x111   : > { %2555 = vmatprep.subr.bf16.mxu1 %v4297_v42  ;;  %2685 = vmatprep.subr.bf16.mxu0 %v4318_v44  ;;  %v4378_v42 = vld [vmem:[%s5171_s22 + $0x42c] ss:$52 sps:$4 sm:$0xff]  }
 0x112   : > { %v5457_v44 = vld [vmem:[%s5835_s0 + $0x20] ss:$12 sps:$4 sm:$0xff]  }
 0x113   : > { %3965 = vmatmul.mubr.msk.bf16.gmra.mxu0 %vm2234_vm0, %v5204_v18 }
 0x114   : > { %2556 = vmatpush2.bf16.msra.mxu1 %v4295_v45  ;;  %2518 = vmatprep.mubr.bf16.mxu0 %v4570_v60  ;;  %v4376_v45 = vld [vmem:[%s5171_s22 + $0x428] ss:$52 sps:$4 sm:$0xff]  }
 0x115   : > { %2557 = vmatprep.subr.bf16.mxu1 %v4300_v46  ;;  %v4379_v46 = vld [vmem:[%s5171_s22 + $0x1c0] ss:$52 sps:$4 sm:$0xff]  }
 0x118   : > { %2558 = vmatpush2.bf16.msra.mxu1 %v4298_v47  ;;  %v4384_v47 = vld [vmem:[%s5171_s22 + $0x3c4] ss:$52 sps:$4 sm:$0xff]  }
 0x119   : > { %2559 = vmatprep.subr.bf16.mxu1 %v4303_v50  ;;  %v4387_v50 = vld [vmem:[%s5171_s22 + $0x15c] ss:$52 sps:$4 sm:$0xff]  }
 0x11b   : > { %3966 = vmatmul.mubr.msk.bf16.gmra.mxu0 %vm2234_vm0, %v5220_v27 }
 0x11c   : > { %2560 = vmatpush2.bf16.msra.mxu1 %v4301_v51  ;;  %2528 = vmatprep.mubr.bf16.mxu0 %v4570_v60  ;;  %v4382_v51 = vld [vmem:[%s5171_s22 + $0x3c0] ss:$52 sps:$4 sm:$0xff]  }
 0x11d   : > { %2561 = vmatprep.subr.bf16.mxu1 %v4309_v52  ;;  %v4385_v52 = vld [vmem:[%s5171_s22 + $0x158] ss:$52 sps:$4 sm:$0xff]  }
 0x120   : > { %2562 = vmatpush2.bf16.msra.mxu1 %v4307_v53  ;;  %v4390_v53 = vld [vmem:[%s5171_s22 + $0x35c] ss:$52 sps:$4 sm:$0xff]  }
 0x121   : > { %2563 = vmatprep.subr.bf16.mxu1 %v4312_v54  ;;  %v4393_v54 = vld [vmem:[%s5171_s22 + $0xf4] ss:$52 sps:$4 sm:$0xff]  }
 0x123   : > { %3967 = vmatmul.mubr.msk.bf16.gmra.mxu0 %vm2234_vm0, %v5253_v49 }
 0x124   : > { %2564 = vmatpush2.bf16.msra.mxu1 %v4310_v55  ;;  %2644 = vmatprep.mubr.bf16.mxu0 %v4570_v60  ;;  %v5473_v55 = vld [vmem:[%s5835_s0 + $0x38] ss:$12 sps:$4 sm:$0xff]  }
 0x125   : > { %2565 = vmatprep.subr.bf16.mxu1 %v4315_v56  ;;  %v4388_v56 = vld [vmem:[%s5171_s22 + $0x358] ss:$52 sps:$4 sm:$0xff]  }
 0x128   : > { %2566 = vmatpush2.bf16.msra.mxu1 %v4313_v57  ;;  %v4391_v57 = vld [vmem:[%s5171_s22 + $0xf0] ss:$52 sps:$4 sm:$0xff]  }
 0x129   : > { %2567 = vmatprep.subr.bf16.mxu1 %v4321_v58  ;;  %v4396_v58 = vld [vmem:[%s5171_s22 + $0x8c] ss:$52 sps:$4 sm:$0xff]  }
 0x12b   : > { %3968 = vmatmul.mubr.msk.bf16.vlgmr.msra.gmra.mxu0 %vm2234_vm0, %v5185_v6  ;;  %v4333_v6 = vld [vmem:[%s5171_s22 + $0x1bc] ss:$52 sps:$4 sm:$0xff]  }
 0x12c   : > { %2686 = vmatpush1.bf16.msra.mxu0 %v4316_v59  ;;  %2568 = vmatpush2.bf16.msra.mxu1 %v4319_v61  ;;  %v4399_v59 = vld [vmem:[%s5171_s22 + $0x70c] ss:$52 sps:$4 sm:$0xff]   ;;  %v4394_v61 = vld [vmem:[%s5171_s22 + $0x88] ss:$52 sps:$4 sm:$0xff]  }
 0x12d   : > { %2687 = vmatprep.subr.bf16.mxu0 %v4324_v62  ;;  %2569 = vmatprep.subr.bf16.mxu1 %v4327_v63  ;;  %v4397_v62 = vld [vmem:[%s5171_s22 + $0x708] ss:$52 sps:$4 sm:$0xff]   ;;  %v4402_v63 = vld [vmem:[%s5171_s22 + $0x24] ss:$52 sps:$4 sm:$0xff]  }
 0x12e   : > { %2654 = vmatprep.mubr.bf16.mxu0 %v4570_v60 }
 0x130   : > { %2688 = vmatpush1.bf16.msra.mxu0 %v4322_v0  ;;  %2570 = vmatpush2.bf16.msra.mxu1 %v4325_v1  ;;  %v4414_v0 = vld [vmem:[%s5171_s22 + $0x6a4] ss:$52 sps:$4 sm:$0xff]   ;;  %v4400_v1 = vld [vmem:[%s5171_s22 + $0x20] ss:$52 sps:$4 sm:$0xff]  }
 0x131   : > { %2689 = vmatprep.subr.bf16.mxu0 %v4330_v2  ;;  %2770 = vmatprep.subr.bf16.mxu1 %v4336_v3  ;;  %v4412_v2 = vld [vmem:[%s5171_s22 + $0x6a0] ss:$52 sps:$4 sm:$0xff]   ;;  %v4405_v3 = vld [vmem:[%s5171_s22 + $0x63c] ss:$52 sps:$4 sm:$0xff]  }
 0x133   : > { %2572 = vmatmul.mubr.bf16.vlgmr.msra.gmra.mxu1 %v5280_v5  ;;  %3969 = vmatmul.mubr.msk.bf16.gmra.mxu0 %vm2234_vm0, %v5204_v18  ;;  %v4340_v18 = vld [vmem:[%s5171_s22 + $0xe8] ss:$52 sps:$4 sm:$0xff]  }
 0x134   : > { %2690 = vmatpush1.bf16.msra.mxu0 %v4328_v4  ;;  %2771 = vmatpush1.bf16.msra.mxu1 %v4334_v7  ;;  %v4426_v4 = vld [vmem:[%s5171_s22 + $0x304] ss:$52 sps:$4 sm:$0xff]  }
 0x135   : > { %2691 = vmatprep.subr.bf16.mxu0 %v4333_v6  ;;  %2581 = vmatprep.mubr.bf16.mxu1 %v5288_v10  ;;  %v4403_v7 = vld [vmem:[%s5171_s22 + $0x638] ss:$52 sps:$4 sm:$0xff]   ;;  %v4406_v6 = vld [vmem:[%s5171_s22 + $0x5d0] ss:$52 sps:$4 sm:$0xff]  }
 0x136   : > { %2664 = vmatprep.mubr.bf16.mxu0 %v4570_v60  ;;  %2772 = vmatprep.subr.bf16.mxu1 %v4351_v8 }
 0x138   : > { %2692 = vmatpush1.bf16.msra.mxu0 %v4331_v9  ;;  %2773 = vmatpush1.bf16.msra.mxu1 %v4349_v12  ;;  %v4409_v9 = vld [vmem:[%s5171_s22 + $0x568] ss:$52 sps:$4 sm:$0xff]   ;;  %v4417_v12 = vld [vmem:[%s5171_s22 + $0x504] ss:$52 sps:$4 sm:$0xff]  }
 0x139   : > { %2693 = vmatprep.subr.bf16.mxu0 %v4339_v11  ;;  %2831 = vmatprep.subr.bf16.mxu1 %v4363_v13  ;;  %v4415_v13 = vld [vmem:[%s5171_s22 + $0x500] ss:$52 sps:$4 sm:$0xff]  }
 0x13b   : > { %2582 = vmatmul.mubr.bf16.gmra.mxu1 %v5300_v16  ;;  %3970 = vmatmul.mubr.msk.bf16.gmra.mxu0 %vm2234_vm0, %v5220_v27  ;;  %v4346_v27 = vld [vmem:[%s5171_s22 + $0x18] ss:$52 sps:$4 sm:$0xff]  }
 0x13c   : > { %2694 = vmatpush1.bf16.msra.mxu0 %v4337_v14  ;;  %2591 = vmatprep.mubr.bf16.mxu1 %v5306_v19 }
 0x13d   : > { %2695 = vmatprep.subr.bf16.mxu0 %v4342_v15  ;;  %2674 = vmatprep.mubr.bf16.mxu0 %v4570_v60  ;;  %v4420_v15 = vld [vmem:[%s5171_s22 + $0x49c] ss:$52 sps:$4 sm:$0xff]  }
 0x140   : > { %2696 = vmatpush1.bf16.msra.mxu0 %v4340_v18  ;;  %v4418_v18 = vld [vmem:[%s5171_s22 + $0x498] ss:$52 sps:$4 sm:$0xff]  }
 0x141   : > { %2697 = vmatprep.subr.bf16.mxu0 %v4345_v17 }
 0x143   : > { %2592 = vmatmul.mubr.bf16.gmra.mxu1 %v5318_v23  ;;  %3971 = vmatmul.mubr.msk.bf16.gmra.mxu0 %vm2234_vm0, %v5253_v49 }
 0x144   : > { %2698 = vmatpush1.bf16.msra.mxu0 %v4343_v20  ;;  %2601 = vmatprep.mubr.bf16.mxu1 %v5324_v25  ;;  %v4423_v20 = vld [vmem:[%s5171_s22 + $0x434] ss:$52 sps:$4 sm:$0xff]  }
 0x145   : > { %2699 = vmatprep.subr.bf16.mxu0 %v4348_v21  ;;  %2717 = vmatprep.mubr.bf16.mxu0 %v5248_v48 }
 0x148   : > { %2700 = vmatpush1.bf16.msra.mxu0 %v4346_v27  ;;  %v4421_v27 = vld [vmem:[%s5171_s22 + $0x430] ss:$52 sps:$4 sm:$0xff]  }
 0x149   : > { %2701 = vmatprep.subr.bf16.mxu0 %v4354_v22  ;;  %v4429_v22 = vld [vmem:[%s5171_s22 + $0x3cc] ss:$52 sps:$4 sm:$0xff]  }
 0x14b   : > { %2602 = vmatmul.mubr.bf16.gmra.mxu1 %v5336_v30 }
 0x14c   : > { %2702 = vmatpush2.bf16.msra.mxu0 %v4352_v24  ;;  %2790 = vmatprep.mubr.bf16.mxu1 %v4570_v60 }
 0x14d   : > { %2703 = vmatprep.subr.bf16.mxu0 %v4357_v26  ;;  %v4424_v26 = vld [vmem:[%s5171_s22 + $0x300] ss:$52 sps:$4 sm:$0xff]  }
 0x150   : > { %2704 = vmatpush2.bf16.msra.mxu0 %v4355_v28  ;;  %v4427_v28 = vld [vmem:[%s5171_s22 + $0x3c8] ss:$52 sps:$4 sm:$0xff]  }
 0x151   : > { %2705 = vmatprep.subr.bf16.mxu0 %v4360_v29  ;;  %v4432_v29 = vld [vmem:[%s5171_s22 + $0x29c] ss:$52 sps:$4 sm:$0xff]  }
 0x153   : > { %3972 = vmatmul.mubr.msk.bf16.vlgmr.msra.gmra.mxu1 %vm2234_vm0, %v5441_v35 }
 0x154   : > { %2706 = vmatpush2.bf16.msra.mxu0 %v4358_v31  ;;  %2832 = vmatpush1.bf16.msra.mxu1 %v4361_v32  ;;  %v4435_v31 = vld [vmem:[%s5171_s22 + $0x364] ss:$52 sps:$4 sm:$0xff]  }
 0x155   : > { %2707 = vmatprep.subr.bf16.mxu0 %v4366_v33  ;;  %2833 = vmatprep.subr.bf16.mxu1 %v4369_v34  ;;  %v4430_v33 = vld [vmem:[%s5171_s22 + $0x298] ss:$52 sps:$4 sm:$0xff]   ;;  %v4433_v34 = vld [vmem:[%s5171_s22 + $0x360] ss:$52 sps:$4 sm:$0xff]  }
 0x156   : > { %2800 = vmatprep.mubr.bf16.mxu1 %v4570_v60 }
 0x158   : > { %2708 = vmatpush2.bf16.msra.mxu0 %v4364_v36  ;;  %2834 = vmatpush1.bf16.msra.mxu1 %v4367_v37  ;;  %v4438_v36 = vld [vmem:[%s5171_s22 + $0x234] ss:$52 sps:$4 sm:$0xff]  }
 0x159   : > { %2709 = vmatprep.subr.bf16.mxu0 %v4372_v38  ;;  %2835 = vmatprep.subr.bf16.mxu1 %v4375_v39  ;;  %v4444_v37 = vld [vmem:[%s5171_s22 + $0x714] ss:$52 sps:$4 sm:$0xff]   ;;  %v4436_v39 = vld [vmem:[%s5171_s22 + $0x230] ss:$52 sps:$4 sm:$0xff]  }
 0x15b   : > { %3973 = vmatmul.mubr.msk.bf16.gmra.mxu1 %vm2234_vm0, %v5457_v44 }
 0x15c   : > { %2710 = vmatpush2.bf16.msra.mxu0 %v4370_v40  ;;  %2836 = vmatpush1.bf16.msra.mxu1 %v4373_v41  ;;  %v4442_v40 = vld [vmem:[%s5171_s22 + $0x710] ss:$52 sps:$4 sm:$0xff]   ;;  %v4441_v41 = vld [vmem:[%s5171_s22 + $0x1cc] ss:$52 sps:$4 sm:$0xff]  }
 0x15d   : > { %2711 = vmatprep.subr.bf16.mxu0 %v4378_v42  ;;  %2837 = vmatprep.subr.bf16.mxu1 %v4381_v43  ;;  %v4459_v42 = vld [vmem:[%s5171_s22 + $0x6ac] ss:$52 sps:$4 sm:$0xff]  }
 0x15e   : > { %2810 = vmatprep.mubr.bf16.mxu1 %v4570_v60 }
 0x160   : > { %2712 = vmatpush2.bf16.msra.mxu0 %v4376_v45  ;;  %2838 = vmatpush1.bf16.msra.mxu1 %v4379_v46  ;;  %v4439_v45 = vld [vmem:[%s5171_s22 + $0x1c8] ss:$52 sps:$4 sm:$0xff]  }
 0x161   : > { %2713 = vmatprep.subr.bf16.mxu0 %v4384_v47  ;;  %2839 = vmatprep.subr.bf16.mxu1 %v4387_v50  ;;  %v4457_v46 = vld [vmem:[%s5171_s22 + $0x6a8] ss:$52 sps:$4 sm:$0xff]   ;;  %v4447_v47 = vld [vmem:[%s5171_s22 + $0x164] ss:$52 sps:$4 sm:$0xff]  }
 0x162   : > { %v4469_v50 = vld [vmem:[%s5171_s22 + $0x648] ss:$52 sps:$4 sm:$0xff]  }
 0x163   : > { %3974 = vmatmul.mubr.msk.bf16.gmra.mxu1 %vm2234_vm0, %v5473_v55 }
 0x164   : > { %2714 = vmatpush2.bf16.msra.mxu0 %v4382_v51  ;;  %2840 = vmatpush1.bf16.msra.mxu1 %v4385_v52  ;;  %v4445_v51 = vld [vmem:[%s5171_s22 + $0x160] ss:$52 sps:$4 sm:$0xff]   ;;  %v4450_v52 = vld [vmem:[%s5171_s22 + $0xfc] ss:$52 sps:$4 sm:$0xff]  }
 0x165   : > { %2715 = vmatprep.subr.bf16.mxu0 %v4390_v53  ;;  %2841 = vmatprep.subr.bf16.mxu1 %v4393_v54  ;;  %v4448_v53 = vld [vmem:[%s5171_s22 + $0xf8] ss:$52 sps:$4 sm:$0xff]   ;;  %v4453_v54 = vld [vmem:[%s5171_s22 + $0x94] ss:$52 sps:$4 sm:$0xff]  }
 0x166   : > { %2820 = vmatprep.mubr.bf16.mxu1 %v4570_v60 }
 0x168   : > { %2716 = vmatpush2.bf16.msra.mxu0 %v4388_v56  ;;  %2842 = vmatpush1.bf16.msra.mxu1 %v4391_v57  ;;  %v4451_v57 = vld [vmem:[%s5171_s22 + $0x90] ss:$52 sps:$4 sm:$0xff]  }
 0x169   : > { %2843 = vmatprep.subr.bf16.mxu1 %v4396_v58  ;;  %2916 = vmatprep.subr.bf16.mxu0 %v4399_v59  ;;  %v5576_v58 = vld [vmem:[%s5835_s0 + $0x50] ss:$12 sps:$4 sm:$0xff]  }
 0x16a   : > { %v4454_v59 = vld [vmem:[%s5171_s22 + $0x28] ss:$52 sps:$4 sm:$0xff]  }
 0x16b   : > { %2718 = vmatmul.mubr.bf16.vlgmr.msra.gmra.mxu0 %v5280_v5  ;;  %3975 = vmatmul.mubr.msk.bf16.gmra.mxu1 %vm2234_vm0, %v5253_v49  ;;  %v4408_v49 = vld [vmem:[%s5171_s22 + $0x5d4] ss:$52 sps:$4 sm:$0xff]  }
 0x16c   : > { %2844 = vmatpush1.bf16.msra.mxu1 %v4394_v61  ;;  %2917 = vmatpush1.bf16.msra.mxu0 %v4397_v62  ;;  %v4462_v61 = vld [vmem:[%s5171_s22 + $0x644] ss:$52 sps:$4 sm:$0xff]  }
 0x16d   : > { %2845 = vmatprep.subr.bf16.mxu1 %v4402_v63  ;;  %2727 = vmatprep.mubr.bf16.mxu0 %v5288_v10  ;;  %v4460_v63 = vld [vmem:[%s5171_s22 + $0x640] ss:$52 sps:$4 sm:$0xff]  }
 0x16e   : > { %2918 = vmatprep.subr.bf16.mxu0 %v4414_v0  ;;  %2863 = vmatprep.mubr.bf16.mxu1 %v5248_v48  ;;  %v4411_v48 = vld [vmem:[%s5171_s22 + $0x56c] ss:$52 sps:$4 sm:$0xff]   ;;  %v4465_v0 = vld [vmem:[%s5171_s22 + $0x5dc] ss:$52 sps:$4 sm:$0xff]  }
 0x170   : > { %2846 = vmatpush1.bf16.msra.mxu1 %v4400_v1  ;;  %2919 = vmatpush1.bf16.msra.mxu0 %v4412_v2  ;;  %v4463_v2 = vld [vmem:[%s5171_s22 + $0x5d8] ss:$52 sps:$4 sm:$0xff]  }
 0x171   : > { %2847 = vmatprep.subr.bf16.mxu1 %v4405_v3  ;;  %2977 = vmatprep.subr.bf16.mxu0 %v4426_v4  ;;  %v4468_v4 = vld [vmem:[%s5171_s22 + $0x574] ss:$52 sps:$4 sm:$0xff]  }
 0x173   : > { %2728 = vmatmul.mubr.bf16.gmra.mxu0 %v5300_v16  ;;  %v5500_v8 = vpop.f32.mrf.mxu1 }
 0x174   : > { %2848 = vmatpush2.bf16.msra.mxu1 %v4403_v7  ;;  %2737 = vmatprep.mubr.bf16.mxu0 %v5306_v19 }
 0x175   : > { %2849 = vmatprep.subr.bf16.mxu1 %v4408_v49  ;;  %v5504_v11 = vpop.f32.mrf.mxu1 }
 0x177   : > { %v5510_v14 = vpop.f32.mrf.mxu1 }
 0x178   : > { %2850 = vmatpush2.bf16.msra.mxu1 %v4406_v6  ;;  %v4470_v6 = vld [vmem:[%s5171_s22 + $0x308] ss:$52 sps:$4 sm:$0xff]  }
 0x179   : > { %2851 = vmatprep.subr.bf16.mxu1 %v4411_v48  ;;  %v5514_v17 = vpop.f32.mrf.mxu1 }
 0x17b   : > { %2738 = vmatmul.mubr.bf16.gmra.mxu0 %v5318_v23  ;;  %v5518_v21 = vpop.f32.mrf.mxu1 }
 0x17c   : > { %2852 = vmatpush2.bf16.msra.mxu1 %v4409_v9  ;;  %2747 = vmatprep.mubr.bf16.mxu0 %v5324_v25  ;;  %v4473_v9 = vld [vmem:[%s5171_s22 + $0x50c] ss:$52 sps:$4 sm:$0xff]  }
 0x17d   : > { %2853 = vmatprep.subr.bf16.mxu1 %v4417_v12  ;;  %v5523_v24 = vpop.f32.mrf.mxu1  ;;  %v4474_v12 = vld [vmem:[%s5171_s22 + $0x5e0] ss:$52 sps:$4 sm:$0xff]  }
 0x17f   : > { %v5531_v32 = vpop.f32.mrf.mxu1 }
 0x180   : > { %2854 = vmatpush2.bf16.msra.mxu1 %v4415_v13 }
 0x181   : > { %2855 = vmatprep.subr.bf16.mxu1 %v4420_v15  ;;  %v5538_v38 = vpop.f32.mrf.mxu1 }
 0x183   : > { %2748 = vmatmul.mubr.bf16.gmra.mxu0 %v5336_v30  ;;  %v5547_v43 = vpop.f32.mrf.mxu1 }
 0x184   : > { %2856 = vmatpush2.bf16.msra.mxu1 %v4418_v18  ;;  %2936 = vmatprep.mubr.bf16.mxu0 %v4570_v60  ;;  %v4471_v18 = vld [vmem:[%s5171_s22 + $0x508] ss:$52 sps:$4 sm:$0xff]  }
 0x185   : > { %2857 = vmatprep.subr.bf16.mxu1 %v4423_v20  ;;  %v4475_v20 = vld [vmem:[%s5171_s22 + $0x2a0] ss:$52 sps:$4 sm:$0xff]  }
 0x188   : > { %2858 = vmatpush2.bf16.msra.mxu1 %v4421_v27 }
 0x189   : > { %2859 = vmatprep.subr.bf16.mxu1 %v4429_v22 }
 0x18b   : > { %3976 = vmatmul.mubr.msk.bf16.vlgmr.msra.gmra.mxu0 %vm2234_vm0, %v5441_v35 }
 0x18c   : > { %2978 = vmatpush1.bf16.msra.mxu0 %v4424_v26  ;;  %2860 = vmatpush2.bf16.msra.mxu1 %v4427_v28  ;;  %v4478_v26 = vld [vmem:[%s5171_s22 + $0x4a4] ss:$52 sps:$4 sm:$0xff]  }
 0x18d   : > { %2979 = vmatprep.subr.bf16.mxu0 %v4432_v29  ;;  %2861 = vmatprep.subr.bf16.mxu1 %v4435_v31  ;;  %v4479_v28 = vld [vmem:[%s5171_s22 + $0x578] ss:$52 sps:$4 sm:$0xff]  }
 0x18e   : > { %2946 = vmatprep.mubr.bf16.mxu0 %v4570_v60 }
 0x190   : > { %2980 = vmatpush1.bf16.msra.mxu0 %v4430_v33  ;;  %2862 = vmatpush2.bf16.msra.mxu1 %v4433_v34  ;;  %v4476_v33 = vld [vmem:[%s5171_s22 + $0x4a0] ss:$52 sps:$4 sm:$0xff]   ;;  %v4480_v34 = vld [vmem:[%s5171_s22 + $0x238] ss:$52 sps:$4 sm:$0xff]  }
 0x191   : > { %2981 = vmatprep.subr.bf16.mxu0 %v4438_v36  ;;  %3062 = vmatprep.subr.bf16.mxu1 %v4444_v37 }
 0x193   : > { %2864 = vmatmul.mubr.bf16.vlgmr.msra.gmra.mxu1 %v5280_v5  ;;  %3977 = vmatmul.mubr.msk.bf16.gmra.mxu0 %vm2234_vm0, %v5457_v44  ;;  %v5555_v5 = vpop.f32.mrf.mxu1 }
 0x194   : > { %2982 = vmatpush1.bf16.msra.mxu0 %v4436_v39  ;;  %3063 = vmatpush1.bf16.msra.mxu1 %v4442_v40  ;;  %v4483_v39 = vld [vmem:[%s5171_s22 + $0x43c] ss:$52 sps:$4 sm:$0xff]  }
 0x195   : > { %2983 = vmatprep.subr.bf16.mxu0 %v4441_v41  ;;  %2873 = vmatprep.mubr.bf16.mxu1 %v5288_v10  ;;  %v5562_v10 = vpop.f32.mrf.mxu1  ;;  %v4484_v40 = vld [vmem:[%s5171_s22 + $0x510] ss:$52 sps:$4 sm:$0xff]  }
 0x196   : > { %2956 = vmatprep.mubr.bf16.mxu0 %v4570_v60  ;;  %3064 = vmatprep.subr.bf16.mxu1 %v4459_v42 }
 0x197   : > { %v5568_v56 = vpop.f32.mrf.mxu1 }
 0x198   : > { %2984 = vmatpush1.bf16.msra.mxu0 %v4439_v45  ;;  %3065 = vmatpush1.bf16.msra.mxu1 %v4457_v46  ;;  %v4481_v45 = vld [vmem:[%s5171_s22 + $0x438] ss:$52 sps:$4 sm:$0xff]   ;;  %v4485_v46 = vld [vmem:[%s5171_s22 + $0x1d0] ss:$52 sps:$4 sm:$0xff]  }
 0x199   : > { %2985 = vmatprep.subr.bf16.mxu0 %v4447_v47  ;;  %4023 = vmatprep.subr.bf16.mxu1 %v4469_v50  ;;  %v4488_v50 = vld [vmem:[%s5171_s22 + $0x3d4] ss:$52 sps:$4 sm:$0xff]  }
 0x19b   : > { %2874 = vmatmul.mubr.bf16.gmra.mxu1 %v5300_v16  ;;  %3978 = vmatmul.mubr.msk.bf16.gmra.mxu0 %vm2234_vm0, %v5473_v55  ;;  %v4456_v16 = vld [vmem:[%s5171_s22 + $0x2c] ss:$52 sps:$4 sm:$0xff]  }
 0x19c   : > { %2986 = vmatpush1.bf16.msra.mxu0 %v4445_v51  ;;  %2883 = vmatprep.mubr.bf16.mxu1 %v5306_v19  ;;  %v5580_v19 = vpop.f32.mrf.mxu1  ;;  %v4489_v51 = vld [vmem:[%s5171_s22 + $0x4a8] ss:$52 sps:$4 sm:$0xff]  }
 0x19d   : > { %2987 = vmatprep.subr.bf16.mxu0 %v4450_v52  ;;  %2966 = vmatprep.mubr.bf16.mxu0 %v4570_v60 }
 0x19e   : > { %v5591_v62 = vpop.f32.mrf.mxu1 }
 0x1a0   : > { %2988 = vmatpush1.bf16.msra.mxu0 %v4448_v53  ;;  %v5598_v1 = vpop.f32.mrf.mxu1 }
 0x1a1   : > { %2989 = vmatprep.subr.bf16.mxu0 %v4453_v54  ;;  %v4486_v54 = vld [vmem:[%s5171_s22 + $0x3d0] ss:$52 sps:$4 sm:$0xff]  }
 0x1a2   : > { %v5607_v49 = vpop.f32.mrf.mxu1 }
 0x1a3   : > { %2884 = vmatmul.mubr.bf16.gmra.mxu1 %v5318_v23  ;;  %3979 = vmatmul.mubr.msk.bf16.gmra.mxu0 %vm2234_vm0, %v5576_v58  ;;  %v5588_v23 = vld [vmem:[%s5835_s0 + $0x4] ss:$12 sps:$4 sm:$0xff]  }
 0x1a4   : > { %2990 = vmatpush1.bf16.msra.mxu0 %v4451_v57  ;;  %2893 = vmatprep.mubr.bf16.mxu1 %v5324_v25  ;;  %v4490_v57 = vld [vmem:[%s5171_s22 + $0x168] ss:$52 sps:$4 sm:$0xff]  }
 0x1a5   : > { %2991 = vmatprep.subr.bf16.mxu0 %v4456_v16  ;;  %3009 = vmatprep.mubr.bf16.mxu0 %v5588_v23 }
 0x1a8   : > { %2992 = vmatpush1.bf16.msra.mxu0 %v4454_v59  ;;  %v4493_v59 = vld [vmem:[%s5171_s22 + $0x36c] ss:$52 sps:$4 sm:$0xff]  }
 0x1a9   : > { %2993 = vmatprep.subr.bf16.mxu0 %v4462_v61  ;;  %v4494_v61 = vld [vmem:[%s5171_s22 + $0x440] ss:$52 sps:$4 sm:$0xff]  }
 0x1ab   : > { %2894 = vmatmul.mubr.bf16.gmra.mxu1 %v5336_v30  ;;  %v5596_v25 = vpop.f32.mrf.mxu0  ;;  %v4466_v30 = vld [vmem:[%s5171_s22 + $0x570] ss:$52 sps:$4 sm:$0xff]  }
 0x1ac   : > { %2994 = vmatpush2.bf16.msra.mxu0 %v4460_v63  ;;  %3082 = vmatprep.mubr.bf16.mxu1 %v4570_v60 }
 0x1ad   : > { %v5602_v3 = vpop.f32.mrf.mxu0  ;;  %2995 = vmatprep.subr.bf16.mxu0 %v4465_v0 }
 0x1af   : > { %v5605_v7 = vpop.f32.mrf.mxu0 }
 0x1b0   : > { %2996 = vmatpush2.bf16.msra.mxu0 %v4463_v2 }
 0x1b1   : > { %v5611_v48 = vpop.f32.mrf.mxu0  ;;  %2997 = vmatprep.subr.bf16.mxu0 %v4468_v4 }
 0x1b3   : > { %3980 = vmatmul.mubr.msk.bf16.vlgmr.msra.gmra.mxu1 %vm2234_vm0, %v5441_v35  ;;  %v2291_v13 = vpop.f32.mrf.mxu0  ;;  %v5617_v15 = vpop.f32.mrf.mxu1 }
 0x1b4   : > { %2998 = vmatpush2.bf16.msra.mxu0 %v4466_v30  ;;  %4024 = vmatpush3.bf16.msra.mxu1 %v4470_v6  ;;  %v2365_v63 = vadd.f32 %v5518_v21, %v2291_v13  ;;  %v2355_v30 = vadd.f32 %v5500_v8, %v5596_v25  ;;  %v4491_v21 = vld [vmem:[%s5171_s22 + $0x368] ss:$52 sps:$4 sm:$0xff]   ;;  %v2357_v13 = vadd.f32 %v5504_v11, %v5602_v3  ;;  %v4497_v8 = vld [vmem:[%s5171_s22 + $0x3d8] ss:$52 sps:$4 sm:$0xff]  }
 0x1b5   : > { %v2293_v27 = vpop.f32.mrf.mxu0  ;;  %v5621_v22 = vpop.f32.mrf.mxu1  ;;  %2999 = vmatprep.subr.bf16.mxu0 %v4473_v9  ;;  %4025 = vmatprep.subr.bf16.mxu1 %v4474_v12  ;;  %v4495_v12 = vld [vmem:[%s5171_s22 + $0x100] ss:$52 sps:$4 sm:$0xff]  }
 0x1b6   : > { %3092 = vmatprep.mubr.bf16.mxu1 %v4570_v60  ;;  %v2367_v0 = vadd.f32 %v5523_v24, %v2293_v27  ;;  %v5661_v24 = vpop.permute.xlu0 %3335  ;;  %v4496_v27 = vld [vmem:[%s5171_s22 + $0x718] ss:$52 sps:$4 sm:$0xff]   ;;  %v3253_v25 = vmax.f32 %v2355_v30, %v2365_v63 }
 0x1b7   : > { %v2295_v29 = vpop.f32.mrf.mxu0  ;;  %v5626_v31 = vpop.f32.mrf.mxu1 }
 0x1b8   : > { %3000 = vmatpush2.bf16.msra.mxu0 %v4471_v18  ;;  %4026 = vmatpush3.bf16.msra.mxu1 %v4475_v20  ;;  %v2369_v18 = vadd.f32 %v5531_v32, %v2295_v29  ;;  %v3254_v11 = vmax.f32 %v2357_v13, %v2367_v0 }
 0x1b9   : > { %v2297_v36 = vpop.f32.mrf.mxu0  ;;  %v5630_v37 = vpop.f32.mrf.mxu1  ;;  %3001 = vmatprep.subr.bf16.mxu0 %v4478_v26  ;;  %4027 = vmatprep.subr.bf16.mxu1 %v4479_v28  ;;  %v2359_v28 = vadd.f32 %v5510_v14, %v5605_v7  ;;  %v2361_v14 = vadd.f32 %v5514_v17, %v5611_v48  ;;  %v4507_v17 = vld [vmem:[%s5835_s0] ss:$12 sps:$4 sm:$0xff]  }
 0x1ba   : > { %v2371_v32 = vadd.f32 %v5538_v38, %v2297_v36 }
 0x1bb   : > { %3981 = vmatmul.mubr.msk.bf16.gmra.mxu1 %vm2234_vm0, %v5457_v44  ;;  %v2301_v41 = vpop.f32.mrf.mxu0  ;;  %v5636_v42 = vpop.f32.mrf.mxu1 }
 0x1bc   : > { %3002 = vmatpush2.bf16.msra.mxu0 %v4476_v33  ;;  %4028 = vmatpush3.bf16.msra.mxu1 %v4480_v34  ;;  %v2375_v6 = vadd.f32 %v5547_v43, %v2301_v41 }
 0x1bd   : > { %v2303_v47 = vpop.f32.mrf.mxu0  ;;  %3003 = vmatprep.subr.bf16.mxu0 %v4483_v39  ;;  %4029 = vmatprep.subr.bf16.mxu1 %v4484_v40  ;;  %v5643_v53 = vpop.f32.mrf.mxu1 }
 0x1be   : > { %3102 = vmatprep.mubr.bf16.mxu1 %v4570_v60  ;;  %v2377_v43 = vadd.f32 %v5555_v5, %v2303_v47  ;;  %v3267_v47 = vmax.f32 %v2361_v14, %v2371_v32  ;;  %v4512_v32 = vld [vmem:[%s5835_s0 + $0x4c] ss:$12 sps:$4 sm:$0xff]   ;;  %v4513_v14 = vld [vmem:[%s5835_s0 + $0x48] ss:$12 sps:$4 sm:$0xff]  }
 0x1bf   : > { %v2305_v52 = vpop.f32.mrf.mxu0  ;;  %v5653_v4 = vpop.f32.mrf.mxu1 }
 0x1c0   : > { %3004 = vmatpush2.bf16.msra.mxu0 %v4481_v45  ;;  %4030 = vmatpush3.bf16.msra.mxu1 %v4485_v46  ;;  %v2379_v3 = vadd.f32 %v5562_v10, %v2305_v52  ;;  %v4499_v10 = vld [vmem:[%s5171_s22 + $0x370] ss:$52 sps:$4 sm:$0xff]   ;;  %v5685_v45 = vpop.permute.xlu0 %3340 }
 0x1c1   : > { %v2307_v16 = vpop.f32.mrf.mxu0  ;;  %3005 = vmatprep.subr.bf16.mxu0 %v4488_v50  ;;  %4031 = vmatprep.subr.bf16.mxu1 %v4489_v51  ;;  %v5675_v33 = vpop.f32.mrf.mxu1  ;;  %v4501_v46 = vld [vmem:[%s5171_s22 + $0x6b0] ss:$52 sps:$4 sm:$0xff]  }
 0x1c2   : > { %v2381_v38 = vadd.f32 %v5568_v56, %v2307_v16  ;;  %v4500_v52 = vld [vmem:[%s5171_s22 + $0x30] ss:$52 sps:$4 sm:$0xff]  }
 0x1c3   : > { %3982 = vmatmul.mubr.msk.bf16.gmra.mxu1 %vm2234_vm0, %v5473_v55  ;;  %v2311_v2 = vpop.f32.mrf.mxu0  ;;  %v2447_v48 = vpop.f32.mrf.mxu1 }
 0x1c4   : > { %3006 = vmatpush2.bf16.msra.mxu0 %v4486_v54  ;;  %v2385_v9 = vadd.f32 %v5580_v19, %v2311_v2  ;;  %4032 = vmatpush3.bf16.msra.mxu1 %v4490_v57  ;;  %v4508_v57 = vld [vmem:[%s5835_s0 + $0x1c] ss:$12 sps:$4 sm:$0xff]  }
 0x1c5   : > { %v2313_v20 = vpop.f32.mrf.mxu0  ;;  %3007 = vmatprep.subr.bf16.mxu0 %v4493_v59  ;;  %4033 = vmatprep.subr.bf16.mxu1 %v4494_v61  ;;  %v2449_v2 = vpop.f32.mrf.mxu1 }
 0x1c6   : > { %v3279_v19 = vmax.f32 %v2375_v6, %v2385_v9  ;;  %v2387_v26 = vadd.f32 %v5591_v62, %v2313_v20  ;;  %3112 = vmatprep.mubr.bf16.mxu1 %v4570_v60  ;;  %v4498_v60 = vld [vmem:[%s5171_s22 + $0x98] ss:$52 sps:$4 sm:$0xff]   ;;  %v3266_v62 = vmax.f32 %v2359_v28, %v2369_v18  ;;  %s5703_s22 = scalar_lea.vmem [#allocation3], %s4084_s8  ;;  %s4085_s8 = smul.u32 (%p4639_p6), 52, %s4556_s15 }
 0x1c7   : > { %v2315_v29 = vpop.f32.mrf.mxu0  ;;  %v2451_v18 = vpop.f32.mrf.mxu1 }
 0x1c8   : > { %v3305_v34 = vmax.f32 %v3253_v25, %v3279_v19  ;;  %v3280_v39 = vmax.f32 %v2377_v43, %v2387_v26  ;;  %3008 = vmatpush2.bf16.msra.mxu0 %v4491_v21  ;;  %v2389_v5 = vadd.f32 %v5598_v1, %v2315_v29  ;;  %4034 = vmatpush3.bf16.msra.mxu1 %v4495_v12  ;;  %v4511_v26 = vld [vmem:[%s5835_s0 + $0x30] ss:$12 sps:$4 sm:$0xff]   ;;  %s3498_s23 = sadd.s32 (%p4639_p6), %s4085_s8, %s3496_s7 }
 0x1c9   : > { %v2317_v7 = vpop.f32.mrf.mxu0  ;;  %4069 = vmatprep.subr.bf16.mxu0 %v4496_v27  ;;  %4035 = vmatprep.subr.bf16.mxu1 %v4497_v8  ;;  %v2453_v43 = vpop.f32.mrf.mxu1  ;;  %s4002_s9 = sshll.u32 (%p4639_p6), %s3498_s23, 2 }
 0x1ca   : > { %v3306_v36 = vmax.f32 %v3254_v11, %v3280_v39  ;;  %v3292_v40 = vmax.f32 %v2379_v3, %v2389_v5  ;;  %v3343_v41 = vadd.f32 %v5661_v24, %v3305_v34  ;;  %v2391_v1 = vadd.f32 %v5607_v49, %v2317_v7  ;;  %s3500_s15 = scalar_lea.vmem (%p4639_p6), %s5838_s3, %s4002_s9 }
 0x1cb   : > { %3010 = vmatmul.mubr.bf16.vlgmr.msra.gmra.mxu0 %v4507_v17  ;;  %3983 = vmatmul.mubr.msk.bf16.gmra.mxu1 %vm2234_vm0, %v5576_v58  ;;  %v2500_v56 = vpop.f32.mrf.mxu0  ;;  %v2457_v11 = vpop.f32.mrf.mxu1 }
 0x1cc   : > { %v3318_v50 = vmax.f32 %v3266_v62, %v3292_v40  ;;  %v3344_v51 = vadd.f32 %v5661_v24, %v3306_v36  ;;  %v3293_v49 = vmax.f32 %v2381_v38, %v2391_v1  ;;  %4070 = vmatpush3.bf16.msra.mxu0 %v4496_v27  ;;  %4036 = vmatpush3.bf16.msra.mxu1 %v4498_v60  ;;  %v3369_v16 = vmax.f32 %v3343_v41, 0.0  ;;  %v4510_v27 = vld [vmem:[%s5835_s0 + $0x34] ss:$12 sps:$4 sm:$0xff]  }
 0x1cd   : > { %v2502_v54 = vpop.f32.mrf.mxu0  ;;  %4037 = vmatprep.subr.bf16.mxu1 %v4499_v10  ;;  %3019 = vmatprep.mubr.bf16.mxu0 %v4508_v57  ;;  %v2459_v34 = vpop.f32.mrf.mxu1  ;;  %v2501_v7 = vadd.f32 %v2500_v56, %v5617_v15 }
 0x1ce   : > { %v3370_v59 = vmax.f32 %v3344_v51, 0.0  ;;  %v3319_v61 = vmax.f32 %v3267_v47, %v3293_v49  ;;  %v3356_v63 = vadd.f32 %v5685_v45, %v3318_v50  ;;  %3155 = vmatprep.mubr.bf16.mxu1 %v5588_v23  ;;  %4071 = vmatprep.subr.bf16.mxu0 %v4501_v46  ;;  %v4509_v23 = vld [vmem:[%s5835_s0 + $0x18] ss:$12 sps:$4 sm:$0xff]  }
 0x1cf   : > { %v2504_v0 = vpop.f32.mrf.mxu0  ;;  %v2461_v38 = vpop.f32.mrf.mxu1 }
 0x1d0   : > { %v4009_v30 = vpack.c.bf16 %v3370_v59, %v3369_v16  ;;  %v3357_v6 = vadd.f32 %v5685_v45, %v3319_v61  ;;  %4038 = vmatpush3.bf16.msra.mxu1 %v4500_v52  ;;  %4072 = vmatpush3.bf16.msra.mxu0 %v4501_v46  ;;  %v3382_v21 = vmax.f32 %v3356_v63, 0.0 }
 0x1d1   : > { %v2506_v9 = vpop.f32.mrf.mxu0 }
 0x1d2   : > { %3475 = vst [vmem:[%s5703_s22] sm:$0xff] %v4009_v30  ;;  %v3383_v12 = vmax.f32 %v3357_v6, 0.0 }
 0x1d3   : > { %3020 = vmatmul.mubr.bf16.gmra.mxu0 %v4509_v23  ;;  %3156 = vmatmul.mubr.bf16.vlgmr.msra.gmra.mxu1 %v4507_v17  ;;  %v2510_v13 = vpop.f32.mrf.mxu0  ;;  %v2505_v17 = vadd.f32 %v2504_v0, %v5626_v31 }
 0x1d4   : > { %v4016_v20 = vpack.c.bf16 %v3383_v12, %v3382_v21  ;;  %3029 = vmatprep.mubr.bf16.mxu0 %v4510_v27  ;;  %3163 = vmatprep.mubr.bf16.mxu1 %v4508_v57  ;;  %v2511_v5 = vadd.f32 %v2510_v13, %v5636_v42  ;;  %v2503_v42 = vadd.f32 %v2502_v54, %v5621_v22 }
 0x1d5   : > { %v2512_v8 = vpop.f32.mrf.mxu0  ;;  %v2507_v22 = vadd.f32 %v2506_v9, %v5630_v37 }
 0x1d6   : > { %3482 = vst [vmem:[%s5703_s22 + $0x34] sm:$0xff] %v4016_v20  ;;  %v2513_v60 = vadd.f32 %v2512_v8, %v5643_v53  ;;  %v3255_v41 = vmax.f32 %v2501_v7, %v2511_v5 }
 0x1d7   : > { %v2514_v25 = vpop.f32.mrf.mxu0 }
 0x1d8   : > { %v2515_v53 = vadd.f32 %v2514_v25, %v5653_v4  ;;  %v3256_v50 = vmax.f32 %v2503_v42, %v2513_v60 }
 0x1d9   : > { %v2516_v19 = vpop.f32.mrf.mxu0 }
 0x1da   : > { %v2517_v15 = vadd.f32 %v2516_v19, %v5675_v33  ;;  %v3268_v54 = vmax.f32 %v2505_v17, %v2515_v53 }
 0x1db   : > { %3030 = vmatmul.mubr.bf16.gmra.mxu0 %v4511_v26  ;;  %3164 = vmatmul.mubr.bf16.gmra.mxu1 %v4509_v23  ;;  %v2520_v28 = vpop.f32.mrf.mxu0 }
 0x1dc   : > { %3039 = vmatprep.mubr.bf16.mxu0 %v4512_v32  ;;  %3171 = vmatprep.mubr.bf16.mxu1 %v4510_v27  ;;  %v2521_v10 = vadd.f32 %v2520_v28, %v2447_v48  ;;  %v2463_v48 = vpop.f32.mrf.mxu1  ;;  %v3269_v33 = vmax.f32 %v2507_v22, %v2517_v15 }
 0x1dd   : > { %v2522_v3 = vpop.f32.mrf.mxu0 }
 0x1de   : > { %v2523_v1 = vadd.f32 %v2522_v3, %v2449_v2 }
 0x1df   : > { %v2524_v29 = vpop.f32.mrf.mxu0 }
 0x1e0   : > { %v2525_v51 = vadd.f32 %v2524_v29, %v2451_v18 }
 0x1e1   : > { %v2526_v39 = vpop.f32.mrf.mxu0 }
 0x1e2   : > { %v2527_v4 = vadd.f32 %v2526_v39, %v2453_v43 }
 0x1e3   : > { %3040 = vmatmul.mubr.bf16.gmra.mxu0 %v4513_v14  ;;  %3172 = vmatmul.mubr.bf16.gmra.mxu1 %v4511_v26  ;;  %v2530_v62 = vpop.f32.mrf.mxu0 }
 0x1e4   : > { %v2531_v36 = vadd.f32 %v2530_v62, %v2457_v11  ;;  %4073 = vmatprep.mubr.msk.bf16.mxu0 %vm2234_vm0, %v5441_v35  ;;  %3179 = vmatprep.mubr.bf16.mxu1 %v4512_v32 }
 0x1e5   : > { %v2532_v40 = vpop.f32.mrf.mxu0 }
 0x1e6   : > { %v3281_v46 = vmax.f32 %v2521_v10, %v2531_v36  ;;  %v2533_v47 = vadd.f32 %v2532_v40, %v2459_v34 }
 0x1e7   : > { %v2534_v56 = vpop.f32.mrf.mxu0 }
 0x1e8   : > { %v3307_v49 = vmax.f32 %v3255_v41, %v3281_v46  ;;  %v3282_v35 = vmax.f32 %v2523_v1, %v2533_v47  ;;  %v2535_v52 = vadd.f32 %v2534_v56, %v2461_v38 }
 0x1e9   : > { %v2536_v57 = vpop.f32.mrf.mxu0 }
 0x1ea   : > { %v3345_v16 = vadd.f32 %v5661_v24, %v3307_v49  ;;  %v3308_v59 = vmax.f32 %v3256_v50, %v3282_v35  ;;  %v3294_v61 = vmax.f32 %v2525_v51, %v2535_v52  ;;  %v2537_v63 = vadd.f32 %v2536_v57, %v2463_v48 }
 0x1eb   : > { %4074 = vmatmul.mubr.msk.bf16.vlgmr.msra.gmra.mxu0 %vm2234_vm0, %v5457_v44  ;;  %3180 = vmatmul.mubr.bf16.gmra.mxu1 %v4513_v14  ;;  %v2646_v31 = vpop.f32.mrf.mxu0 }
 0x1ec   : > { %v3346_v0 = vadd.f32 %v5661_v24, %v3308_v59  ;;  %v3320_v2 = vmax.f32 %v3268_v54, %v3294_v61  ;;  %v3295_v30 = vmax.f32 %v2527_v4, %v2537_v63  ;;  %4077 = vmatprep.mubr.msk.bf16.mxu0 %vm2234_vm0, %v5473_v55  ;;  %v3371_v6 = vmax.f32 %v3345_v16, 0.0 }
 0x1ed   : > { %v2648_v37 = vpop.f32.mrf.mxu0 }
 0x1ee   : > { %v3372_v9 = vmax.f32 %v3346_v0, 0.0  ;;  %v3358_v21 = vadd.f32 %v5685_v45, %v3320_v2  ;;  %v3321_v12 = vmax.f32 %v3269_v33, %v3295_v30 }
 0x1ef   : > { %v2650_v23 = vpop.f32.mrf.mxu0 }
 0x1f0   : > { %v4010_v44 = vpack.c.bf16 %v3372_v9, %v3371_v6  ;;  %v3359_v13 = vadd.f32 %v5685_v45, %v3321_v12  ;;  %v3384_v20 = vmax.f32 %v3358_v21, 0.0 }
 0x1f1   : > { %v2652_v18 = vpop.f32.mrf.mxu0 }
 0x1f2   : > { %3476 = vst [vmem:[%s5703_s22 + $0x8] sm:$0xff] %v4010_v44  ;;  %v3385_v27 = vmax.f32 %v3359_v13, 0.0 }
 0x1f3   : > { %4078 = vmatmul.mubr.msk.bf16.gmra.mxu0 %vm2234_vm0, %v5576_v58  ;;  %v2573_v8 = vpop.f32.mrf.mxu1  ;;  %v2656_v55 = vpop.f32.mrf.mxu0 }
 0x1f4   : > { %v4017_v25 = vpack.c.bf16 %v3385_v27, %v3384_v20  ;;  %v2647_v46 = vadd.f32 %v2646_v31, %v2573_v8 }
 0x1f5   : > { %v2575_v43 = vpop.f32.mrf.mxu1  ;;  %v2658_v19 = vpop.f32.mrf.mxu0 }
 0x1f6   : > { %3483 = vst [vmem:[%s5703_s22 + $0x3c] sm:$0xff] %v4017_v25  ;;  %v2649_v50 = vadd.f32 %v2648_v37, %v2575_v43 }
 0x1f7   : > { %v2577_v26 = vpop.f32.mrf.mxu1  ;;  %v2660_v28 = vpop.f32.mrf.mxu0 }
 0x1f8   : > { %v2651_v52 = vadd.f32 %v2650_v23, %v2577_v26 }
 0x1f9   : > { %v2579_v11 = vpop.f32.mrf.mxu1  ;;  %v2662_v32 = vpop.f32.mrf.mxu0 }
 0x1fa   : > { %v2653_v33 = vadd.f32 %v2652_v18, %v2579_v11 }
 0x1fb   : > { %v2583_v3 = vpop.f32.mrf.mxu1  ;;  %v2666_v29 = vpop.f32.mrf.mxu0 }
 0x1fc   : > { %v2657_v53 = vadd.f32 %v2656_v55, %v2583_v3 }
 0x1fd   : > { %v2585_v34 = vpop.f32.mrf.mxu1  ;;  %v2668_v39 = vpop.f32.mrf.mxu0 }
 0x1fe   : > { %v2659_v40 = vadd.f32 %v2658_v19, %v2585_v34  ;;  %v3257_v48 = vmax.f32 %v2647_v46, %v2657_v53 }
 0x1ff   : > { %v2587_v5 = vpop.f32.mrf.mxu1  ;;  %v2670_v60 = vpop.f32.mrf.mxu0 }
 0x200   : > { %v2661_v15 = vadd.f32 %v2660_v28, %v2587_v5  ;;  %v3258_v22 = vmax.f32 %v2649_v50, %v2659_v40 }
 0x201   : > { %v2589_v14 = vpop.f32.mrf.mxu1  ;;  %v2672_v62 = vpop.f32.mrf.mxu0 }
 0x202   : > { %v2663_v54 = vadd.f32 %v2662_v32, %v2589_v14  ;;  %v3270_v31 = vmax.f32 %v2651_v52, %v2661_v15 }
 0x203   : > { %v2593_v38 = vpop.f32.mrf.mxu1  ;;  %v2676_v58 = vpop.f32.mrf.mxu0 }
 0x204   : > { %v2667_v47 = vadd.f32 %v2666_v29, %v2593_v38  ;;  %v3271_v12 = vmax.f32 %v2653_v33, %v2663_v54 }
 0x205   : > { %v2595_v7 = vpop.f32.mrf.mxu1  ;;  %v2678_v36 = vpop.f32.mrf.mxu0 }
 0x206   : > { %v2669_v51 = vadd.f32 %v2668_v39, %v2595_v7 }
 0x207   : > { %v2597_v10 = vpop.f32.mrf.mxu1  ;;  %v2680_v1 = vpop.f32.mrf.mxu0 }
 0x208   : > { %v2671_v16 = vadd.f32 %v2670_v60, %v2597_v10 }
 0x209   : > { %v2599_v42 = vpop.f32.mrf.mxu1  ;;  %v2682_v57 = vpop.f32.mrf.mxu0 }
 0x20a   : > { %v2673_v0 = vadd.f32 %v2672_v62, %v2599_v42 }
 0x20b   : > { %v2603_v41 = vpop.f32.mrf.mxu1 }
 0x20c   : > { %v2677_v17 = vadd.f32 %v2676_v58, %v2603_v41 }
 0x20d   : > { %v2605_v56 = vpop.f32.mrf.mxu1 }
 0x20e   : > { %v3283_v49 = vmax.f32 %v2667_v47, %v2677_v17  ;;  %v2679_v35 = vadd.f32 %v2678_v36, %v2605_v56 }
 0x20f   : > { %v2607_v4 = vpop.f32.mrf.mxu1 }
 0x210   : > { %v3309_v59 = vmax.f32 %v3257_v48, %v3283_v49  ;;  %v3284_v61 = vmax.f32 %v2669_v51, %v2679_v35  ;;  %v2681_v63 = vadd.f32 %v2680_v1, %v2607_v4 }
 0x211   : > { %v2609_v2 = vpop.f32.mrf.mxu1 }
 0x212   : > { %v3347_v30 = vadd.f32 %v5661_v24, %v3309_v59  ;;  %v3310_v37 = vmax.f32 %v3258_v22, %v3284_v61  ;;  %v3296_v6 = vmax.f32 %v2671_v16, %v2681_v63  ;;  %v2683_v9 = vadd.f32 %v2682_v57, %v2609_v2 }
 0x213   : > { %v2792_v21 = vpop.f32.mrf.mxu1 }
 0x214   : > { %v3348_v23 = vadd.f32 %v5661_v24, %v3310_v37  ;;  %v3322_v44 = vmax.f32 %v3270_v31, %v3296_v6  ;;  %v3297_v13 = vmax.f32 %v2673_v0, %v2683_v9  ;;  %v3373_v27 = vmax.f32 %v3347_v30, 0.0 }
 0x215   : > { %v2794_v20 = vpop.f32.mrf.mxu1 }
 0x216   : > { %v3374_v8 = vmax.f32 %v3348_v23, 0.0  ;;  %v3360_v18 = vadd.f32 %v5685_v45, %v3322_v44  ;;  %v3323_v55 = vmax.f32 %v3271_v12, %v3297_v13 }
 0x217   : > { %v2796_v25 = vpop.f32.mrf.mxu1 }
 0x218   : > { %v4011_v43 = vpack.c.bf16 %v3374_v8, %v3373_v27  ;;  %v3361_v19 = vadd.f32 %v5685_v45, %v3323_v55  ;;  %v3386_v28 = vmax.f32 %v3360_v18, 0.0 }
 0x219   : > { %v2798_v26 = vpop.f32.mrf.mxu1 }
 0x21a   : > { %3477 = vst [vmem:[%s5703_s22 + $0x10] sm:$0xff] %v4011_v43  ;;  %v3387_v11 = vmax.f32 %v3361_v19, 0.0 }
 0x21b   : > { %v2802_v32 = vpop.f32.mrf.mxu1 }
 0x21c   : > { %v4018_v3 = vpack.c.bf16 %v3387_v11, %v3386_v28 }
 0x21d   : > { %v2804_v29 = vpop.f32.mrf.mxu1 }
 0x21e   : > { %3484 = vst [vmem:[%s5703_s22 + $0x44] sm:$0xff] %v4018_v3 }
 0x21f   : > { %v2806_v34 = vpop.f32.mrf.mxu1 }
 0x221   : > { %v2808_v39 = vpop.f32.mrf.mxu1 }
 0x223   : > { %v2812_v60 = vpop.f32.mrf.mxu1 }
 0x225   : > { %v2814_v38 = vpop.f32.mrf.mxu1 }
 0x227   : > { %v2816_v10 = vpop.f32.mrf.mxu1 }
 0x229   : > { %v2818_v53 = vpop.f32.mrf.mxu1 }
 0x22b   : > { %v2719_v5 = vpop.f32.mrf.mxu0  ;;  %v2822_v1 = vpop.f32.mrf.mxu1 }
 0x22c   : > { %v2793_v49 = vadd.f32 %v2792_v21, %v2719_v5 }
 0x22d   : > { %v2721_v14 = vpop.f32.mrf.mxu0  ;;  %v2824_v17 = vpop.f32.mrf.mxu1 }
 0x22e   : > { %v2795_v22 = vadd.f32 %v2794_v20, %v2721_v14 }
 0x22f   : > { %v2723_v62 = vpop.f32.mrf.mxu0  ;;  %v2826_v51 = vpop.f32.mrf.mxu1 }
 0x230   : > { %v2797_v63 = vadd.f32 %v2796_v25, %v2723_v62 }
 0x231   : > { %v2725_v58 = vpop.f32.mrf.mxu0  ;;  %v2828_v2 = vpop.f32.mrf.mxu1 }
 0x232   : > { %v2799_v12 = vadd.f32 %v2798_v26, %v2725_v58 }
 0x233   : > { %v2729_v7 = vpop.f32.mrf.mxu0 }
 0x234   : > { %v2803_v15 = vadd.f32 %v2802_v32, %v2729_v7 }
 0x235   : > { %v2731_v36 = vpop.f32.mrf.mxu0 }
 0x236   : > { %v2805_v56 = vadd.f32 %v2804_v29, %v2731_v36  ;;  %v3259_v57 = vmax.f32 %v2793_v49, %v2803_v15 }
 0x237   : > { %v2733_v42 = vpop.f32.mrf.mxu0 }
 0x238   : > { %v2807_v54 = vadd.f32 %v2806_v34, %v2733_v42  ;;  %v3260_v33 = vmax.f32 %v2795_v22, %v2805_v56 }
 0x239   : > { %v2735_v40 = vpop.f32.mrf.mxu0 }
 0x23a   : > { %v2809_v31 = vadd.f32 %v2808_v39, %v2735_v40  ;;  %v3272_v21 = vmax.f32 %v2797_v63, %v2807_v54 }
 0x23b   : > { %v2739_v41 = vpop.f32.mrf.mxu0 }
 0x23c   : > { %v2813_v35 = vadd.f32 %v2812_v60, %v2739_v41  ;;  %v3273_v55 = vmax.f32 %v2799_v12, %v2809_v31 }
 0x23d   : > { %v2741_v46 = vpop.f32.mrf.mxu0 }
 0x23e   : > { %v2815_v16 = vadd.f32 %v2814_v38, %v2741_v46 }
 0x23f   : > { %v2743_v47 = vpop.f32.mrf.mxu0 }
 0x240   : > { %v2817_v30 = vadd.f32 %v2816_v10, %v2743_v47 }
 0x241   : > { %v2745_v50 = vpop.f32.mrf.mxu0 }
 0x242   : > { %v2819_v23 = vadd.f32 %v2818_v53, %v2745_v50 }
 0x243   : > { %v2749_v48 = vpop.f32.mrf.mxu0 }
 0x244   : > { %v2823_v52 = vadd.f32 %v2822_v1, %v2749_v48 }
 0x245   : > { %v2751_v4 = vpop.f32.mrf.mxu0 }
 0x246   : > { %v3285_v59 = vmax.f32 %v2813_v35, %v2823_v52  ;;  %v2825_v61 = vadd.f32 %v2824_v17, %v2751_v4 }
 0x247   : > { %v2753_v0 = vpop.f32.mrf.mxu0 }
 0x248   : > { %v3311_v37 = vmax.f32 %v3259_v57, %v3285_v59  ;;  %v3286_v6 = vmax.f32 %v2815_v16, %v2825_v61  ;;  %v2827_v9 = vadd.f32 %v2826_v51, %v2753_v0 }
 0x249   : > { %v2755_v44 = vpop.f32.mrf.mxu0 }
 0x24a   : > { %v3349_v13 = vadd.f32 %v5661_v24, %v3311_v37  ;;  %v3312_v20 = vmax.f32 %v3260_v33, %v3286_v6  ;;  %v3298_v27 = vmax.f32 %v2817_v30, %v2827_v9  ;;  %v2829_v8 = vadd.f32 %v2828_v2, %v2755_v44 }
 0x24b   : > { %v2938_v18 = vpop.f32.mrf.mxu0 }
 0x24c   : > { %v3350_v25 = vadd.f32 %v5661_v24, %v3312_v20  ;;  %v3324_v43 = vmax.f32 %v3272_v21, %v3298_v27  ;;  %v3299_v19 = vmax.f32 %v2819_v23, %v2829_v8  ;;  %v3375_v11 = vmax.f32 %v3349_v13, 0.0 }
 0x24d   : > { %v2940_v28 = vpop.f32.mrf.mxu0 }
 0x24e   : > { %v3376_v32 = vmax.f32 %v3350_v25, 0.0  ;;  %v3362_v26 = vadd.f32 %v5685_v45, %v3324_v43  ;;  %v3325_v3 = vmax.f32 %v3273_v55, %v3299_v19 }
 0x24f   : > { %v2942_v29 = vpop.f32.mrf.mxu0 }
 0x250   : > { %v4012_v34 = vpack.c.bf16 %v3376_v32, %v3375_v11  ;;  %v3363_v39 = vadd.f32 %v5685_v45, %v3325_v3  ;;  %v3388_v60 = vmax.f32 %v3362_v26, 0.0 }
 0x251   : > { %v2944_v5 = vpop.f32.mrf.mxu0 }
 0x252   : > { %3478 = vst [vmem:[%s5703_s22 + $0x18] sm:$0xff] %v4012_v34  ;;  %v3389_v14 = vmax.f32 %v3363_v39, 0.0 }
 0x253   : > { %v2865_v62 = vpop.f32.mrf.mxu1  ;;  %v2948_v38 = vpop.f32.mrf.mxu0 }
 0x254   : > { %v4019_v58 = vpack.c.bf16 %v3389_v14, %v3388_v60  ;;  %v2939_v59 = vadd.f32 %v2938_v18, %v2865_v62 }
 0x255   : > { %v2867_v7 = vpop.f32.mrf.mxu1  ;;  %v2950_v10 = vpop.f32.mrf.mxu0 }
 0x256   : > { %3485 = vst [vmem:[%s5703_s22 + $0x4c] sm:$0xff] %v4019_v58  ;;  %v2941_v33 = vadd.f32 %v2940_v28, %v2867_v7 }
 0x257   : > { %v2869_v36 = vpop.f32.mrf.mxu1  ;;  %v2952_v42 = vpop.f32.mrf.mxu0 }
 0x258   : > { %v2943_v9 = vadd.f32 %v2942_v29, %v2869_v36 }
 0x259   : > { %v2871_v53 = vpop.f32.mrf.mxu1  ;;  %v2954_v40 = vpop.f32.mrf.mxu0 }
 0x25a   : > { %v2945_v55 = vadd.f32 %v2944_v5, %v2871_v53 }
 0x25b   : > { %v2875_v41 = vpop.f32.mrf.mxu1  ;;  %v2958_v1 = vpop.f32.mrf.mxu0 }
 0x25c   : > { %v2949_v54 = vadd.f32 %v2948_v38, %v2875_v41 }
 0x25d   : > { %v2877_v46 = vpop.f32.mrf.mxu1  ;;  %v2960_v47 = vpop.f32.mrf.mxu0 }
 0x25e   : > { %v2951_v4 = vadd.f32 %v2950_v10, %v2877_v46  ;;  %v3261_v2 = vmax.f32 %v2939_v59, %v2949_v54 }
 0x25f   : > { %v2879_v17 = vpop.f32.mrf.mxu1  ;;  %v2962_v50 = vpop.f32.mrf.mxu0 }
 0x260   : > { %v2953_v31 = vadd.f32 %v2952_v42, %v2879_v17  ;;  %v3262_v12 = vmax.f32 %v2941_v33, %v2951_v4 }
 0x261   : > { %v2881_v15 = vpop.f32.mrf.mxu1  ;;  %v2964_v56 = vpop.f32.mrf.mxu0 }
 0x262   : > { %v2955_v21 = vadd.f32 %v2954_v40, %v2881_v15  ;;  %v3274_v18 = vmax.f32 %v2943_v9, %v2953_v31 }
 0x263   : > { %v2885_v48 = vpop.f32.mrf.mxu1  ;;  %v2968_v51 = vpop.f32.mrf.mxu0 }
 0x264   : > { %v2959_v61 = vadd.f32 %v2958_v1, %v2885_v48  ;;  %v3275_v3 = vmax.f32 %v2945_v55, %v2955_v21 }
 0x265   : > { %v2887_v49 = vpop.f32.mrf.mxu1  ;;  %v2970_v52 = vpop.f32.mrf.mxu0 }
 0x266   : > { %v2961_v30 = vadd.f32 %v2960_v47, %v2887_v49 }
 0x267   : > { %v2889_v35 = vpop.f32.mrf.mxu1  ;;  %v2972_v16 = vpop.f32.mrf.mxu0 }
 0x268   : > { %v2963_v13 = vadd.f32 %v2962_v50, %v2889_v35 }
 0x269   : > { %v2891_v22 = vpop.f32.mrf.mxu1  ;;  %v2974_v44 = vpop.f32.mrf.mxu0 }
 0x26a   : > { %v2965_v25 = vadd.f32 %v2964_v56, %v2891_v22 }
 0x26b   : > { %v2895_v57 = vpop.f32.mrf.mxu1 }
 0x26c   : > { %v2969_v63 = vadd.f32 %v2968_v51, %v2895_v57 }
 0x26d   : > { %v2897_v0 = vpop.f32.mrf.mxu1 }
 0x26e   : > { %v3287_v37 = vmax.f32 %v2959_v61, %v2969_v63  ;;  %v2971_v6 = vadd.f32 %v2970_v52, %v2897_v0 }
 0x26f   : > { %v2899_v23 = vpop.f32.mrf.mxu1 }
 0x270   : > { %v3313_v20 = vmax.f32 %v3261_v2, %v3287_v37  ;;  %v3288_v27 = vmax.f32 %v2961_v30, %v2971_v6  ;;  %v2973_v8 = vadd.f32 %v2972_v16, %v2899_v23 }
 0x271   : > { %v2901_v43 = vpop.f32.mrf.mxu1 }
 0x272   : > { %v3351_v19 = vadd.f32 %v5661_v24, %v3313_v20  ;;  %v3314_v28 = vmax.f32 %v3262_v12, %v3288_v27  ;;  %v3300_v11 = vmax.f32 %v2963_v13, %v2973_v8  ;;  %v2975_v32 = vadd.f32 %v2974_v44, %v2901_v43 }
 0x273   : > { %v3084_v26 = vpop.f32.mrf.mxu1 }
 0x274   : > { %v3352_v29 = vadd.f32 %v5661_v24, %v3314_v28  ;;  %v3326_v34 = vmax.f32 %v3274_v18, %v3300_v11  ;;  %v3301_v39 = vmax.f32 %v2965_v25, %v2975_v32  ;;  %v3377_v14 = vmax.f32 %v3351_v19, 0.0 }
 0x275   : > { %v3086_v60 = vpop.f32.mrf.mxu1 }
 0x276   : > { %v3378_v62 = vmax.f32 %v3352_v29, 0.0  ;;  %v3364_v5 = vadd.f32 %v5685_v45, %v3326_v34  ;;  %v3327_v38 = vmax.f32 %v3275_v3, %v3301_v39 }
 0x277   : > { %v3088_v58 = vpop.f32.mrf.mxu1 }
 0x278   : > { %v4013_v7 = vpack.c.bf16 %v3378_v62, %v3377_v14  ;;  %v3365_v10 = vadd.f32 %v5685_v45, %v3327_v38  ;;  %v3390_v42 = vmax.f32 %v3364_v5, 0.0 }
 0x279   : > { %v3090_v36 = vpop.f32.mrf.mxu1 }
 0x27a   : > { %3479 = vst [vmem:[%s5703_s22 + $0x20] sm:$0xff] %v4013_v7  ;;  %v3391_v53 = vmax.f32 %v3365_v10, 0.0 }
 0x27b   : > { %v3094_v40 = vpop.f32.mrf.mxu1 }
 0x27c   : > { %v4020_v41 = vpack.c.bf16 %v3391_v53, %v3390_v42 }
 0x27d   : > { %v3096_v1 = vpop.f32.mrf.mxu1 }
 0x27e   : > { %3486 = vst [vmem:[%s5703_s22 + $0x54] sm:$0xff] %v4020_v41 }
 0x27f   : > { %v3098_v46 = vpop.f32.mrf.mxu1 }
 0x281   : > { %v3100_v47 = vpop.f32.mrf.mxu1 }
 0x283   : > { %v3104_v17 = vpop.f32.mrf.mxu1 }
 0x285   : > { %v3106_v50 = vpop.f32.mrf.mxu1 }
 0x287   : > { %v3108_v15 = vpop.f32.mrf.mxu1 }
 0x289   : > { %v3110_v56 = vpop.f32.mrf.mxu1 }
 0x28b   : > { %v3011_v48 = vpop.f32.mrf.mxu0  ;;  %v3114_v51 = vpop.f32.mrf.mxu1 }
 0x28c   : > { %v3085_v8 = vadd.f32 %v3084_v26, %v3011_v48 }
 0x28d   : > { %v3013_v49 = vpop.f32.mrf.mxu0  ;;  %v3116_v35 = vpop.f32.mrf.mxu1 }
 0x28e   : > { %v3087_v25 = vadd.f32 %v3086_v60, %v3013_v49 }
 0x28f   : > { %v3015_v52 = vpop.f32.mrf.mxu0  ;;  %v3118_v22 = vpop.f32.mrf.mxu1 }
 0x290   : > { %v3089_v34 = vadd.f32 %v3088_v58, %v3015_v52 }
 0x291   : > { %v3017_v54 = vpop.f32.mrf.mxu0  ;;  %v3120_v4 = vpop.f32.mrf.mxu1 }
 0x292   : > { %v3091_v26 = vadd.f32 %v3090_v36, %v3017_v54 }
 0x293   : > { %v3021_v57 = vpop.f32.mrf.mxu0  ;;  %v5762_v16 = vpop.f32.mrf.mxu1 }
 0x294   : > { %v3095_v44 = vadd.f32 %v3094_v40, %v3021_v57 }
 0x295   : > { %v3023_v59 = vpop.f32.mrf.mxu0  ;;  %v5764_v61 = vpop.f32.mrf.mxu1 }
 0x296   : > { %v3097_v13 = vadd.f32 %v3096_v1, %v3023_v59  ;;  %v3263_v11 = vmax.f32 %v3085_v8, %v3095_v44 }
 0x297   : > { %v3025_v63 = vpop.f32.mrf.mxu0  ;;  %v5766_v33 = vpop.f32.mrf.mxu1 }
 0x298   : > { %v3099_v43 = vadd.f32 %v3098_v46, %v3025_v63  ;;  %v3264_v39 = vmax.f32 %v3087_v25, %v3097_v13 }
 0x299   : > { %v3027_v31 = vpop.f32.mrf.mxu0  ;;  %v5768_v0 = vpop.f32.mrf.mxu1 }
 0x29a   : > { %v3101_v14 = vadd.f32 %v3100_v47, %v3027_v31  ;;  %v3276_v53 = vmax.f32 %v3089_v34, %v3099_v43  ;;  %v4044_v43 = vadd.f32 %v5768_v0, %v5766_v33 }
 0x29b   : > { %v3031_v2 = vpop.f32.mrf.mxu0  ;;  %v5770_v30 = vpop.f32.mrf.mxu1 }
 0x29c   : > { %v3105_v55 = vadd.f32 %v3104_v17, %v3031_v2  ;;  %v4041_v2 = vadd.f32 %v5764_v61, %v5762_v16 }
 0x29d   : > { %v3033_v37 = vpop.f32.mrf.mxu0  ;;  %v4046_v6 = vpop.f32.mrf.mxu1 }
 0x29e   : > { %v3107_v32 = vadd.f32 %v3106_v50, %v3033_v37  ;;  %v4047_v13 = vadd.f32 %v4046_v6, %v5770_v30 }
 0x29f   : > { %v3035_v9 = vpop.f32.mrf.mxu0  ;;  %v5772_v12 = vpop.f32.mrf.mxu1 }
 0x2a0   : > { %v3109_v38 = vadd.f32 %v3108_v15, %v3035_v9 }
 0x2a1   : > { %v3037_v21 = vpop.f32.mrf.mxu0  ;;  %v5774_v23 = vpop.f32.mrf.mxu1 }
 0x2a2   : > { %v3111_v40 = vadd.f32 %v3110_v56, %v3037_v21  ;;  %v4050_v16 = vadd.f32 %v5774_v23, %v5772_v12 }
 0x2a3   : > { %v3041_v20 = vpop.f32.mrf.mxu0  ;;  %v4051_v27 = vpop.f32.mrf.mxu1 }
 0x2a4   : > { %v3115_v18 = vadd.f32 %v3114_v51, %v3041_v20  ;;  %v3277_v51 = vmax.f32 %v3091_v26, %v3101_v14  ;;  %v3519_v26 = vld [vmem:[%s5703_s22 + $0x10] sm:$0xff] (%p4639_p6) }
 0x2a5   : > { %v3043_v19 = vpop.f32.mrf.mxu0  ;;  %v4052_v28 = vpop.f32.mrf.mxu1  ;;  %3520 = vst [vmem:[%s3500_s15 + $0x10] sm:$0xff] (%p4639_p6), %v3519_v26 }
 0x2a6   : > { %v3289_v3 = vmax.f32 %v3105_v55, %v3115_v18  ;;  %v3117_v29 = vadd.f32 %v3116_v35, %v3043_v19  ;;  %v4053_v20 = vadd.f32 %v4052_v28, %v4051_v27 }
 0x2a7   : > { %v3045_v62 = vpop.f32.mrf.mxu0  ;;  %v4054_v5 = vpop.f32.mrf.mxu1 }
 0x2a8   : > { %v3315_v7 = vmax.f32 %v3263_v11, %v3289_v3  ;;  %v3290_v10 = vmax.f32 %v3107_v32, %v3117_v29  ;;  %v3119_v42 = vadd.f32 %v3118_v22, %v3045_v62 }
 0x2a9   : > { %v3047_v60 = vpop.f32.mrf.mxu0  ;;  %v4055_v41 = vpop.f32.mrf.mxu1 }
 0x2aa   : > { %v3353_v1 = vadd.f32 %v5661_v24, %v3315_v7  ;;  %v3316_v46 = vmax.f32 %v3264_v39, %v3290_v10  ;;  %v3302_v17 = vmax.f32 %v3109_v38, %v3119_v42  ;;  %v3121_v50 = vadd.f32 %v3120_v4, %v3047_v60 }
 0x2ab   : > { %v4075_v48 = vpop.f32.mrf.mxu0  ;;  %v4057_v58 = vpop.f32.mrf.mxu1  ;;  %v4056_v61 = vadd.f32 %v4055_v41, %v4054_v5  ;;  %v3527_v41 = vld [vmem:[%s5703_s22 + $0x34] sm:$0xff] (%p4639_p6) }
 0x2ac   : > { %v3354_v47 = vadd.f32 %v5661_v24, %v3316_v46  ;;  %v3328_v15 = vmax.f32 %v3276_v53, %v3302_v17  ;;  %v3303_v49 = vmax.f32 %v3111_v40, %v3121_v50  ;;  %v3379_v36 = vmax.f32 %v3353_v1, 0.0  ;;  %v3521_v53 = vld [vmem:[%s5703_s22 + $0x18] sm:$0xff] (%p4639_p6)  ;;  %v3523_v40 = vld [vmem:[%s5703_s22 + $0x20] sm:$0xff] (%p4639_p6)  ;;  %v3533_v17 = vld [vmem:[%s5703_s22 + $0x4c] sm:$0xff] (%p4639_p6)  ;;  %3528 = vst [vmem:[%s3500_s15 + $0x68] sm:$0xff] (%p4639_p6), %v3527_v41 }
 0x2ad   : > { %v3222_v35 = vpop.f32.mrf.mxu0  ;;  %v4058_v52 = vpop.f32.mrf.mxu1  ;;  %v3231_v19 = vadd.f32 %v4075_v48, %v4047_v13  ;;  %v3529_v1 = vld [vmem:[%s5703_s22 + $0x3c] sm:$0xff] (%p4639_p6)  ;;  %v3531_v46 = vld [vmem:[%s5703_s22 + $0x44] sm:$0xff] (%p4639_p6)  ;;  %v3535_v50 = vld [vmem:[%s5703_s22 + $0x54] sm:$0xff] (%p4639_p6)  ;;  %3522 = vst [vmem:[%s3500_s15 + $0x18] sm:$0xff] (%p4639_p6), %v3521_v53 }
 0x2ae   : > { %v3380_v22 = vmax.f32 %v3354_v47, 0.0  ;;  %v3366_v56 = vadd.f32 %v5685_v45, %v3328_v15  ;;  %v3329_v54 = vmax.f32 %v3277_v51, %v3303_v49  ;;  %v4059_v21 = vadd.f32 %v4058_v52, %v4057_v58  ;;  %3524 = vst [vmem:[%s3500_s15 + $0x20] sm:$0xff] (%p4639_p6), %v3523_v40  ;;  %3530 = vst [vmem:[%s3500_s15 + $0x70] sm:$0xff] (%p4639_p6), %v3529_v1 }
 0x2af   : > { %v4076_v57 = vpop.f32.mrf.mxu0  ;;  %v4060_v4 = vpop.f32.mrf.mxu1  ;;  %v3223_v55 = vadd.f32 %v4041_v2, %v3222_v35  ;;  %3532 = vst [vmem:[%s3500_s15 + $0x78] sm:$0xff] (%p4639_p6), %v3531_v46  ;;  %3534 = vst [vmem:[%s3500_s15 + $0x80] sm:$0xff] (%p4639_p6), %v3533_v17 }
 0x2b0   : > { %v4014_v59 = vpack.c.bf16 %v3380_v22, %v3379_v36  ;;  %v3367_v63 = vadd.f32 %v5685_v45, %v3329_v54  ;;  %v3392_v37 = vmax.f32 %v3366_v56, 0.0  ;;  %v3234_v34 = vadd.f32 %v4076_v57, %v4050_v16  ;;  %3536 = vst [vmem:[%s3500_s15 + $0x88] sm:$0xff] (%p4639_p6), %v3535_v50 }
 0x2b1   : > { %v3225_v31 = vpop.f32.mrf.mxu0  ;;  %v4061_v18 = vpop.f32.mrf.mxu1  ;;  %v3265_v29 = vmax.f32 %v3223_v55, %v3231_v19 }
 0x2b2   : > { %3480 = vst [vmem:[%s5703_s22 + $0x28] sm:$0xff] %v4014_v59  ;;  %v3393_v9 = vmax.f32 %v3367_v63, 0.0  ;;  %v3226_v30 = vadd.f32 %v4044_v43, %v3225_v31  ;;  %v4062_v6 = vadd.f32 %v4061_v18, %v4060_v4 }
 0x2b3   : > { %v4079_v44 = vpop.f32.mrf.mxu0 }
 0x2b4   : > { %v4021_v8 = vpack.c.bf16 %v3393_v9, %v3392_v37  ;;  %v3247_v11 = vadd.f32 %v4079_v44, %v4059_v21  ;;  %v3278_v0 = vmax.f32 %v3226_v30, %v3234_v34 }
 0x2b5   : > { %v3238_v25 = vpop.f32.mrf.mxu0 }
 0x2b6   : > { %3487 = vst [vmem:[%s5703_s22 + $0x5c] sm:$0xff] %v4021_v8  ;;  %v3239_v32 = vadd.f32 %v4053_v20, %v3238_v25 }
 0x2b7   : > { %v4080_v3 = vpop.f32.mrf.mxu0 }
 0x2b8   : > { %v3291_v27 = vmax.f32 %v3239_v32, %v3247_v11  ;;  %v3250_v14 = vadd.f32 %v4080_v3, %v4062_v6 }
 0x2b9   : > { %v3241_v28 = vpop.f32.mrf.mxu0  ;;  %v3525_v60 = vld [vmem:[%s5703_s22 + $0x28] sm:$0xff] (%p4639_p6) }
 0x2ba   : > { %v3317_v39 = vmax.f32 %v3265_v29, %v3291_v27  ;;  %v3242_v33 = vadd.f32 %v4056_v61, %v3241_v28  ;;  %3526 = vst [vmem:[%s3500_s15 + $0x28] sm:$0xff] (%p4639_p6), %v3525_v60 }
 0x2bc   : > { %v3355_v62 = vadd.f32 %v5661_v24, %v3317_v39  ;;  %v3304_v38 = vmax.f32 %v3242_v33, %v3250_v14  ;;  %v3515_v24 = vld [vmem:[%s5703_s22] sm:$0xff] (%p4639_p6) }
 0x2bd   : > { %v3537_v48 = vld [vmem:[%s5703_s22 + $0x5c] sm:$0xff] (%p4639_p6)  ;;  %3516 = vst [vmem:[%s3500_s15] sm:$0xff] (%p4639_p6), %v3515_v24 }
 0x2be   : > { %v3381_v7 = vmax.f32 %v3355_v62, 0.0  ;;  %v3330_v10 = vmax.f32 %v3278_v0, %v3304_v38  ;;  %3538 = vst [vmem:[%s3500_s15 + $0x90] sm:$0xff] (%p4639_p6), %v3537_v48 }
 0x2c0   : > { %v4015_v12 = vpack.c.bf16 %v3381_v7, %v3381_v7  ;;  %v3368_v23 = vadd.f32 %v5685_v45, %v3330_v10  ;;  %v3517_v45 = vld [vmem:[%s5703_s22 + $0x8] sm:$0xff] (%p4639_p6) }
 0x2c1   : > { %3518 = vst [vmem:[%s3500_s15 + $0x8] sm:$0xff] (%p4639_p6), %v3517_v45 }
 0x2c2   : > { %3481 = vst [vmem:[%s5703_s22 + $0x30] sm:$0xf] %v4015_v12  ;;  %v3394_v5 = vmax.f32 %v3368_v23, 0.0  ;;  %3495 = sbr.rel (!%p4639_p6) target bundleno = 719 (0x2cf), region = 62 }
 0x2c4   : > { %v4022_v42 = vpack.c.bf16 %v3394_v5, %v3394_v5 }
 0x2c6   : > { %3488 = vst [vmem:[%s5703_s22 + $0x64] sm:$0xf] %v4022_v42 }
 0x2c9   : > { %v4003_v58 = vld [vmem:[%s5703_s22 + $0x30] sm:$0xf] }
 0x2ca   : > { %4004 = vst [vmem:[%s3500_s15 + $0x30] sm:$0xf] %v4003_v58 }
 0x2cd   : > { %v4005_v51 = vld [vmem:[%s5703_s22 + $0x64] sm:$0xf] }
 0x2ce   : > { %4006 = vst [vmem:[%s3500_s15 + $0x98] sm:$0xf] %v4005_v51 }
 0x2cf PF: > { %s13_s18 = sadd.s32 1, %s4568_s18   ;;  %s5840_s12 = smov %s4548_s13 }
 0x2d0   : > { %p10_p12 = scmp.ge.s32.totalorder %s13_s18, 6   ;;  %s5841_s13 = smov %s4647_s27 }
 0x2d1   : > { %s5842_s14 = smov %s4560_s16  ;;  %s5843_s15 = smov %s4564_s17 }
 0x2d2   : > { %s5844_s16 = smov %s5847_s19  ;;  %s5845_s17 = smov %s5851_s20 }
 0x2d3   :  { %12 = sbr.rel (!%p10_p12) target bundleno = 4 (0x4), region = 131 }

// kernel: net_forward.6
= control target key start
LH: loop header
LB: loop body
LE: loop exit
PB: predicated region body
PF: predicated region fallthrough
CT: control target
= control target key end

     0   :  { %s4807_s12 = smov 0   ;;  %s4809_s13 = smov 0   ;;  %s6437_s0 = inlined_call_operand.vmem [shape: bf16[128,576], index: 0, kind: input, shape index: {}]   ;;  %s6438_s1 = inlined_call_operand.vmem [shape: f32[32,1], index: 1, kind: input, shape index: {}]   ;;  %s6439_s2 = inlined_call_operand.vmem [shape: bf16[2,576,896], index: 2, kind: input, shape index: {}]   ;;  %s6440_s3 = inlined_call_operand.vmem [shape: bf16[2,32,896], index: 3, kind: output, shape index: {}]  }
   0x1   :  { %s4811_s14 = smov 0  }
   0x2 LB: > { %s25_s15 = sadd.s32 1, %s4780_s13  ;;  %p3735_p0 = scmp.ge.s32.totalorder %s4784_s14, 1  ;;  %s4784_s14 = sphi %s4811_s14, %s13_s14   ;;  %s4780_s13 = sphi %s4809_s13, %s6590_s13   ;;  %s4776_s12 = sphi %s4807_s12, %s6589_s12  }
   0x3   : > { %p27_p1 = scmp.ge.s32.totalorder %s25_s15, 2  ;;  %p158_p2 = scmp.lt.s32.totalorder %s4784_s14, 3 }
   0x5   : > { %s6592_s15 = smov (%p27_p1, %s25_s15), 0  ;;  %p159_p3 = pnand %p3735_p0, %p158_p2 }
   0x7   : > { %162 = sbr.rel (%p159_p3) target bundleno = 660 (0x294), region = 32 }
   0xc   : > { %p191_p4 = scmp.lt.s32.totalorder %s4776_s12, 1  ;;  %v4828_v0 = vld [vmem:[%s6437_s0 + $0x4] ss:$20 sps:$4 sm:$0xff]   ;;  %v4403_v1 = vld [vmem:[%s6437_s0 + $0xc] ss:$20 sps:$4 sm:$0xff]   ;;  %v6441_v4 = vmov 0  }
   0xd   : > { %2100 = vmatprep.mubr.bf16.mxu0 %v4828_v0  ;;  %2213 = vmatprep.mubr.bf16.mxu1 %v4403_v1  ;;  %vm2043_vm0 = vcmask 523264  }
   0xe   : > { %s6594_s12 = smov (!%p191_p4, %s4776_s12), 1  ;;  %4303 = vset.pattern.permute.xlu0 %v6441_v4  ;;  %4304 = vset.pattern.permute.xlu1 %v6441_v4 }
   0xf   : > { %s4276_s20 = smul.u32 2016, %s6594_s12 }
  0x10   : > { %s4277_s5 = smul.u32 112, %s6594_s12 }
  0x11   : > { %s4840_s23 = scalar_lea.vmem %s6439_s2, %s4276_s20 }
  0x12   : > { %v4305_v2 = vld [vmem:[%s4840_s23 + $0x18c] ss:$28 sps:$4 sm:$0xff]   ;;  %v4311_v7 = vld [vmem:[%s4840_s23 + $0x154] ss:$28 sps:$4 sm:$0xff]   ;;  %v4317_v11 = vld [vmem:[%s4840_s23 + $0x11c] ss:$28 sps:$4 sm:$0xff]   ;;  %s5940_s11 = scalar_lea.vmem %s6440_s3, %s4277_s5 }
  0x13   : > { %v4307_v3 = vld [vmem:[%s4840_s23 + $0x50c] ss:$28 sps:$4 sm:$0xff]   ;;  %2068 = vmatprep.subr.bf16.mxu0 %v4305_v2  ;;  %v4313_v8 = vld [vmem:[%s4840_s23 + $0x4d4] ss:$28 sps:$4 sm:$0xff]   ;;  %v4319_v12 = vld [vmem:[%s4840_s23 + $0x49c] ss:$28 sps:$4 sm:$0xff]  }
  0x14   : > { %v4309_v5 = vld [vmem:[%s4840_s23 + $0x188] ss:$28 sps:$4 sm:$0xff]   ;;  %2181 = vmatprep.subr.bf16.mxu1 %v4307_v3  ;;  %v4315_v9 = vld [vmem:[%s4840_s23 + $0x150] ss:$28 sps:$4 sm:$0xff]   ;;  %v4321_v13 = vld [vmem:[%s4840_s23 + $0x118] ss:$28 sps:$4 sm:$0xff]  }
  0x15   : > { %v4310_v6 = vld [vmem:[%s4840_s23 + $0x508] ss:$28 sps:$4 sm:$0xff]   ;;  %2069 = vmatpush1.bf16.msra.mxu0 %v4309_v5  ;;  %v4316_v10 = vld [vmem:[%s4840_s23 + $0x4d0] ss:$28 sps:$4 sm:$0xff]   ;;  %v4322_v14 = vld [vmem:[%s4840_s23 + $0x498] ss:$28 sps:$4 sm:$0xff]  }
  0x16   : > { %2182 = vmatpush1.bf16.msra.mxu1 %v4310_v6  ;;  %2070 = vmatprep.subr.bf16.mxu0 %v4311_v7  ;;  %v4323_v15 = vld [vmem:[%s4840_s23 + $0xe4] ss:$28 sps:$4 sm:$0xff]   ;;  %v4329_v19 = vld [vmem:[%s4840_s23 + $0xac] ss:$28 sps:$4 sm:$0xff]   ;;  %v4335_v23 = vld [vmem:[%s4840_s23 + $0x74] ss:$28 sps:$4 sm:$0xff]  }
  0x17   : > { %2183 = vmatprep.subr.bf16.mxu1 %v4313_v8  ;;  %v4325_v16 = vld [vmem:[%s4840_s23 + $0x464] ss:$28 sps:$4 sm:$0xff]   ;;  %v4331_v20 = vld [vmem:[%s4840_s23 + $0x42c] ss:$28 sps:$4 sm:$0xff]   ;;  %v4337_v24 = vld [vmem:[%s4840_s23 + $0x3f4] ss:$28 sps:$4 sm:$0xff]  }
  0x18   : > { %v4327_v17 = vld [vmem:[%s4840_s23 + $0xe0] ss:$28 sps:$4 sm:$0xff]   ;;  %v4333_v21 = vld [vmem:[%s4840_s23 + $0xa8] ss:$28 sps:$4 sm:$0xff]   ;;  %v4339_v25 = vld [vmem:[%s4840_s23 + $0x70] ss:$28 sps:$4 sm:$0xff]  }
  0x19   : > { %2071 = vmatpush1.bf16.msra.mxu0 %v4315_v9  ;;  %v4328_v18 = vld [vmem:[%s4840_s23 + $0x460] ss:$28 sps:$4 sm:$0xff]   ;;  %v4334_v22 = vld [vmem:[%s4840_s23 + $0x428] ss:$28 sps:$4 sm:$0xff]   ;;  %v4340_v26 = vld [vmem:[%s4840_s23 + $0x3f0] ss:$28 sps:$4 sm:$0xff]  }
  0x1a   : > { %2184 = vmatpush1.bf16.msra.mxu1 %v4316_v10  ;;  %2072 = vmatprep.subr.bf16.mxu0 %v4317_v11  ;;  %v4341_v27 = vld [vmem:[%s4840_s23 + $0x3c] ss:$28 sps:$4 sm:$0xff]   ;;  %v4347_v31 = vld [vmem:[%s4840_s23 + $0x4] ss:$28 sps:$4 sm:$0xff]   ;;  %v4353_v35 = vld [vmem:[%s4840_s23 + $0x34c] ss:$28 sps:$4 sm:$0xff]  }
  0x1b   : > { %2185 = vmatprep.subr.bf16.mxu1 %v4319_v12  ;;  %v4343_v28 = vld [vmem:[%s4840_s23 + $0x3bc] ss:$28 sps:$4 sm:$0xff]   ;;  %v4349_v32 = vld [vmem:[%s4840_s23 + $0x384] ss:$28 sps:$4 sm:$0xff]   ;;  %v4355_v36 = vld [vmem:[%s4840_s23 + $0x6cc] ss:$28 sps:$4 sm:$0xff]  }
  0x1c   : > { %v4345_v29 = vld [vmem:[%s4840_s23 + $0x38] ss:$28 sps:$4 sm:$0xff]   ;;  %v4351_v33 = vld [vmem:[%s4840_s23] ss:$28 sps:$4 sm:$0xff]   ;;  %v4357_v37 = vld [vmem:[%s4840_s23 + $0x348] ss:$28 sps:$4 sm:$0xff]  }
  0x1d   : > { %2073 = vmatpush1.bf16.msra.mxu0 %v4321_v13  ;;  %v4346_v30 = vld [vmem:[%s4840_s23 + $0x3b8] ss:$28 sps:$4 sm:$0xff]   ;;  %v4352_v34 = vld [vmem:[%s4840_s23 + $0x380] ss:$28 sps:$4 sm:$0xff]   ;;  %v4358_v38 = vld [vmem:[%s4840_s23 + $0x6c8] ss:$28 sps:$4 sm:$0xff]  }
  0x1e   : > { %2186 = vmatpush1.bf16.msra.mxu1 %v4322_v14  ;;  %2074 = vmatprep.subr.bf16.mxu0 %v4323_v15  ;;  %v4359_v39 = vld [vmem:[%s4840_s23 + $0x314] ss:$28 sps:$4 sm:$0xff]   ;;  %v4365_v43 = vld [vmem:[%s4840_s23 + $0x2dc] ss:$28 sps:$4 sm:$0xff]   ;;  %v4371_v47 = vld [vmem:[%s4840_s23 + $0x2a4] ss:$28 sps:$4 sm:$0xff]  }
  0x1f   : > { %2187 = vmatprep.subr.bf16.mxu1 %v4325_v16  ;;  %v4361_v40 = vld [vmem:[%s4840_s23 + $0x694] ss:$28 sps:$4 sm:$0xff]   ;;  %v4367_v44 = vld [vmem:[%s4840_s23 + $0x65c] ss:$28 sps:$4 sm:$0xff]   ;;  %v4373_v48 = vld [vmem:[%s4840_s23 + $0x624] ss:$28 sps:$4 sm:$0xff]  }
  0x20   : > { %v4363_v41 = vld [vmem:[%s4840_s23 + $0x310] ss:$28 sps:$4 sm:$0xff]   ;;  %v4369_v45 = vld [vmem:[%s4840_s23 + $0x2d8] ss:$28 sps:$4 sm:$0xff]   ;;  %v4375_v49 = vld [vmem:[%s4840_s23 + $0x2a0] ss:$28 sps:$4 sm:$0xff]  }
  0x21   : > { %2075 = vmatpush1.bf16.msra.mxu0 %v4327_v17  ;;  %v4364_v42 = vld [vmem:[%s4840_s23 + $0x690] ss:$28 sps:$4 sm:$0xff]   ;;  %v4370_v46 = vld [vmem:[%s4840_s23 + $0x658] ss:$28 sps:$4 sm:$0xff]   ;;  %v4376_v50 = vld [vmem:[%s4840_s23 + $0x620] ss:$28 sps:$4 sm:$0xff]  }
  0x22   : > { %2188 = vmatpush1.bf16.msra.mxu1 %v4328_v18  ;;  %2076 = vmatprep.subr.bf16.mxu0 %v4329_v19  ;;  %v4377_v51 = vld [vmem:[%s4840_s23 + $0x26c] ss:$28 sps:$4 sm:$0xff]   ;;  %v4383_v55 = vld [vmem:[%s4840_s23 + $0x234] ss:$28 sps:$4 sm:$0xff]   ;;  %v4389_v59 = vld [vmem:[%s4840_s23 + $0x1fc] ss:$28 sps:$4 sm:$0xff]  }
  0x23   : > { %2189 = vmatprep.subr.bf16.mxu1 %v4331_v20  ;;  %v4379_v52 = vld [vmem:[%s4840_s23 + $0x5ec] ss:$28 sps:$4 sm:$0xff]   ;;  %v4385_v56 = vld [vmem:[%s4840_s23 + $0x5b4] ss:$28 sps:$4 sm:$0xff]   ;;  %v4391_v60 = vld [vmem:[%s4840_s23 + $0x57c] ss:$28 sps:$4 sm:$0xff]  }
  0x24   : > { %v4381_v53 = vld [vmem:[%s4840_s23 + $0x268] ss:$28 sps:$4 sm:$0xff]   ;;  %v4387_v57 = vld [vmem:[%s4840_s23 + $0x230] ss:$28 sps:$4 sm:$0xff]   ;;  %v4393_v61 = vld [vmem:[%s4840_s23 + $0x1f8] ss:$28 sps:$4 sm:$0xff]  }
  0x25   : > { %2077 = vmatpush1.bf16.msra.mxu0 %v4333_v21  ;;  %v4382_v54 = vld [vmem:[%s4840_s23 + $0x5e8] ss:$28 sps:$4 sm:$0xff]   ;;  %v4388_v58 = vld [vmem:[%s4840_s23 + $0x5b0] ss:$28 sps:$4 sm:$0xff]   ;;  %v4394_v62 = vld [vmem:[%s4840_s23 + $0x578] ss:$28 sps:$4 sm:$0xff]  }
  0x26   : > { %2190 = vmatpush1.bf16.msra.mxu1 %v4334_v22  ;;  %2078 = vmatprep.subr.bf16.mxu0 %v4335_v23  ;;  %v4395_v63 = vld [vmem:[%s4840_s23 + $0x1c4] ss:$28 sps:$4 sm:$0xff]   ;;  %v4409_v5 = vld [vmem:[%s4840_s23 + $0x7ac] ss:$28 sps:$4 sm:$0xff]   ;;  %v4412_v6 = vld [vmem:[%s4840_s23 + $0x194] ss:$28 sps:$4 sm:$0xff]  }
  0x27   : > { %2191 = vmatprep.subr.bf16.mxu1 %v4337_v24  ;;  %v4397_v1 = vld [vmem:[%s4840_s23 + $0x544] ss:$28 sps:$4 sm:$0xff]   ;;  %v4918_v8 = vld [vmem:[%s6437_s0 + $0x8] ss:$20 sps:$4 sm:$0xff]   ;;  %v4410_v11 = vld [vmem:[%s4840_s23 + $0x190] ss:$28 sps:$4 sm:$0xff]  }
  0x28   : > { %v4399_v2 = vld [vmem:[%s4840_s23 + $0x1c0] ss:$28 sps:$4 sm:$0xff]   ;;  %v4407_v10 = vld [vmem:[%s4840_s23 + $0x7a8] ss:$28 sps:$4 sm:$0xff]   ;;  %v4436_v14 = vld [vmem:[%s4840_s23 + $0x774] ss:$28 sps:$4 sm:$0xff]  }
  0x29   : > { %2079 = vmatpush1.bf16.msra.mxu0 %v4339_v25  ;;  %v4400_v3 = vld [vmem:[%s4840_s23 + $0x540] ss:$28 sps:$4 sm:$0xff]   ;;  %v4930_v12 = vld [vmem:[%s6437_s0 + $0x34] ss:$20 sps:$4 sm:$0xff]   ;;  %v4434_v17 = vld [vmem:[%s4840_s23 + $0x770] ss:$28 sps:$4 sm:$0xff]  }
  0x2a   : > { %2192 = vmatpush1.bf16.msra.mxu1 %v4340_v26  ;;  %2080 = vmatprep.subr.bf16.mxu0 %v4341_v27  ;;  %v4913_v7 = vld [vmem:[%s6437_s0] ss:$20 sps:$4 sm:$0xff]   ;;  %v4415_v13 = vld [vmem:[%s4840_s23 + $0x15c] ss:$28 sps:$4 sm:$0xff]   ;;  %v4950_v20 = vld [vmem:[%s6437_s0 + $0x30] ss:$20 sps:$4 sm:$0xff]  }
  0x2b   : > { %2193 = vmatprep.subr.bf16.mxu1 %v4343_v28  ;;  %v4923_v9 = vld [vmem:[%s6437_s0 + $0x2c] ss:$20 sps:$4 sm:$0xff]   ;;  %v4413_v15 = vld [vmem:[%s4840_s23 + $0x158] ss:$28 sps:$4 sm:$0xff]   ;;  %v4945_v19 = vld [vmem:[%s6437_s0 + $0x28] ss:$20 sps:$4 sm:$0xff]  }
  0x2c   : > { %v4424_v16 = vld [vmem:[%s4840_s23 + $0x124] ss:$28 sps:$4 sm:$0xff]   ;;  %v4463_v18 = vld [vmem:[%s4840_s23 + $0x73c] ss:$28 sps:$4 sm:$0xff]   ;;  %v4955_v21 = vld [vmem:[%s6437_s0 + $0x54] ss:$20 sps:$4 sm:$0xff]  }
  0x2d   : > { %2081 = vmatpush1.bf16.msra.mxu0 %v4345_v29  ;;  %v4422_v22 = vld [vmem:[%s4840_s23 + $0x120] ss:$28 sps:$4 sm:$0xff]   ;;  %v4427_v23 = vld [vmem:[%s4840_s23 + $0xec] ss:$28 sps:$4 sm:$0xff]   ;;  %v4461_v25 = vld [vmem:[%s4840_s23 + $0x738] ss:$28 sps:$4 sm:$0xff]  }
  0x2e   : > { %2194 = vmatpush1.bf16.msra.mxu1 %v4346_v30  ;;  %2082 = vmatprep.subr.bf16.mxu0 %v4347_v31  ;;  %v4962_v24 = vld [vmem:[%s6437_s0 + $0x5c] ss:$20 sps:$4 sm:$0xff]   ;;  %v4490_v26 = vld [vmem:[%s4840_s23 + $0x704] ss:$28 sps:$4 sm:$0xff]   ;;  %v4981_v31 = vld [vmem:[%s6437_s0 + $0x58] ss:$20 sps:$4 sm:$0xff]  }
  0x2f   : > { %2195 = vmatprep.subr.bf16.mxu1 %v4349_v32  ;;  %v4425_v27 = vld [vmem:[%s4840_s23 + $0xe8] ss:$28 sps:$4 sm:$0xff]   ;;  %v4439_v29 = vld [vmem:[%s4840_s23 + $0xb4] ss:$28 sps:$4 sm:$0xff]   ;;  %v4488_v30 = vld [vmem:[%s4840_s23 + $0x700] ss:$28 sps:$4 sm:$0xff]  }
  0x30   : > { %v4974_v28 = vld [vmem:[%s6437_s0 + $0x50] ss:$20 sps:$4 sm:$0xff]  }
  0x31   : > { %2083 = vmatpush1.bf16.msra.mxu0 %v4351_v33  ;;  %v4437_v32 = vld [vmem:[%s4840_s23 + $0xb0] ss:$28 sps:$4 sm:$0xff]   ;;  %v4442_v33 = vld [vmem:[%s4840_s23 + $0x7c] ss:$28 sps:$4 sm:$0xff]  }
  0x32   : > { %2196 = vmatpush1.bf16.msra.mxu1 %v4352_v34  ;;  %2084 = vmatprep.subr.bf16.mxu0 %v4353_v35  ;;  %v4988_v34 = vld [vmem:[%s6437_s0 + $0x7c] ss:$20 sps:$4 sm:$0xff]   ;;  %v4993_v35 = vld [vmem:[%s6437_s0 + $0x84] ss:$20 sps:$4 sm:$0xff]  }
  0x33   : > { %2197 = vmatprep.subr.bf16.mxu1 %v4355_v36  ;;  %v4440_v36 = vld [vmem:[%s4840_s23 + $0x78] ss:$28 sps:$4 sm:$0xff]  }
  0x35   : > { %2085 = vmatpush2.bf16.msra.mxu0 %v4357_v37  ;;  %v5003_v37 = vld [vmem:[%s6437_s0 + $0x78] ss:$20 sps:$4 sm:$0xff]  }
  0x36   : > { %2198 = vmatpush2.bf16.msra.mxu1 %v4358_v38  ;;  %2086 = vmatprep.subr.bf16.mxu0 %v4359_v39  ;;  %v4451_v38 = vld [vmem:[%s4840_s23 + $0x44] ss:$28 sps:$4 sm:$0xff]   ;;  %v4512_v39 = vld [vmem:[%s4840_s23 + $0x514] ss:$28 sps:$4 sm:$0xff]  }
  0x37   : > { %2199 = vmatprep.subr.bf16.mxu1 %v4361_v40  ;;  %v5010_v40 = vld [vmem:[%s6437_s0 + $0x80] ss:$20 sps:$4 sm:$0xff]  }
  0x39   : > { %2087 = vmatpush2.bf16.msra.mxu0 %v4363_v41  ;;  %v4449_v41 = vld [vmem:[%s4840_s23 + $0x40] ss:$28 sps:$4 sm:$0xff]  }
  0x3a   : > { %2200 = vmatpush2.bf16.msra.mxu1 %v4364_v42  ;;  %2088 = vmatprep.subr.bf16.mxu0 %v4365_v43  ;;  %v4454_v42 = vld [vmem:[%s4840_s23 + $0xc] ss:$28 sps:$4 sm:$0xff]   ;;  %v5017_v43 = vld [vmem:[%s6437_s0 + $0xa4] ss:$20 sps:$4 sm:$0xff]  }
  0x3b   : > { %2201 = vmatprep.subr.bf16.mxu1 %v4367_v44  ;;  %v5022_v44 = vld [vmem:[%s6437_s0 + $0xac] ss:$20 sps:$4 sm:$0xff]  }
  0x3d   : > { %2089 = vmatpush2.bf16.msra.mxu0 %v4369_v45  ;;  %v4452_v45 = vld [vmem:[%s4840_s23 + $0x8] ss:$28 sps:$4 sm:$0xff]  }
  0x3e   : > { %2202 = vmatpush2.bf16.msra.mxu1 %v4370_v46  ;;  %2090 = vmatprep.subr.bf16.mxu0 %v4371_v47  ;;  %v4466_v46 = vld [vmem:[%s4840_s23 + $0x354] ss:$28 sps:$4 sm:$0xff]  }
  0x3f   : > { %2203 = vmatprep.subr.bf16.mxu1 %v4373_v48  ;;  %v5033_v47 = vld [vmem:[%s6437_s0 + $0xa0] ss:$20 sps:$4 sm:$0xff]   ;;  %v5038_v48 = vld [vmem:[%s6437_s0 + $0xa8] ss:$20 sps:$4 sm:$0xff]  }
  0x41   : > { %2091 = vmatpush2.bf16.msra.mxu0 %v4375_v49  ;;  %v4464_v49 = vld [vmem:[%s4840_s23 + $0x350] ss:$28 sps:$4 sm:$0xff]  }
  0x42   : > { %2204 = vmatpush2.bf16.msra.mxu1 %v4376_v50  ;;  %2092 = vmatprep.subr.bf16.mxu0 %v4377_v51  ;;  %v4469_v50 = vld [vmem:[%s4840_s23 + $0x31c] ss:$28 sps:$4 sm:$0xff]   ;;  %v5045_v51 = vld [vmem:[%s6437_s0 + $0xcc] ss:$20 sps:$4 sm:$0xff]  }
  0x43   : > { %2205 = vmatprep.subr.bf16.mxu1 %v4379_v52  ;;  %v5050_v52 = vld [vmem:[%s6437_s0 + $0xd4] ss:$20 sps:$4 sm:$0xff]  }
  0x45   : > { %2093 = vmatpush2.bf16.msra.mxu0 %v4381_v53  ;;  %v4467_v53 = vld [vmem:[%s4840_s23 + $0x318] ss:$28 sps:$4 sm:$0xff]  }
  0x46   : > { %2206 = vmatpush2.bf16.msra.mxu1 %v4382_v54  ;;  %2094 = vmatprep.subr.bf16.mxu0 %v4383_v55  ;;  %v4478_v54 = vld [vmem:[%s4840_s23 + $0x2e4] ss:$28 sps:$4 sm:$0xff]   ;;  %v5061_v55 = vld [vmem:[%s6437_s0 + $0xc8] ss:$20 sps:$4 sm:$0xff]  }
  0x47   : > { %2207 = vmatprep.subr.bf16.mxu1 %v4385_v56  ;;  %v5066_v56 = vld [vmem:[%s6437_s0 + $0xd0] ss:$20 sps:$4 sm:$0xff]  }
  0x49   : > { %2095 = vmatpush2.bf16.msra.mxu0 %v4387_v57  ;;  %v4476_v57 = vld [vmem:[%s4840_s23 + $0x2e0] ss:$28 sps:$4 sm:$0xff]  }
  0x4a   : > { %2208 = vmatpush2.bf16.msra.mxu1 %v4388_v58  ;;  %2096 = vmatprep.subr.bf16.mxu0 %v4389_v59  ;;  %v5072_v58 = vld [vmem:[%s6437_s0 + $0xf4] ss:$20 sps:$4 sm:$0xff]  }
  0x4b   : > { %2209 = vmatprep.subr.bf16.mxu1 %v4391_v60  ;;  %v4481_v59 = vld [vmem:[%s4840_s23 + $0x2ac] ss:$28 sps:$4 sm:$0xff]   ;;  %v5078_v60 = vld [vmem:[%s6437_s0 + $0xfc] ss:$20 sps:$4 sm:$0xff]  }
  0x4d   : > { %2097 = vmatpush2.bf16.msra.mxu0 %v4393_v61  ;;  %v4479_v61 = vld [vmem:[%s4840_s23 + $0x2a8] ss:$28 sps:$4 sm:$0xff]  }
  0x4e   : > { %2210 = vmatpush2.bf16.msra.mxu1 %v4394_v62  ;;  %2098 = vmatprep.subr.bf16.mxu0 %v4395_v63  ;;  %v5088_v62 = vld [vmem:[%s6437_s0 + $0xf0] ss:$20 sps:$4 sm:$0xff]  }
  0x4f   : > { %2211 = vmatprep.subr.bf16.mxu1 %v4397_v1  ;;  %v4493_v63 = vld [vmem:[%s4840_s23 + $0x274] ss:$28 sps:$4 sm:$0xff]   ;;  %v5094_v1 = vld [vmem:[%s6437_s0 + $0xf8] ss:$20 sps:$4 sm:$0xff]  }
  0x51   : > { %2099 = vmatpush2.bf16.msra.mxu0 %v4399_v2  ;;  %v4491_v2 = vld [vmem:[%s4840_s23 + $0x270] ss:$28 sps:$4 sm:$0xff]  }
  0x52   : > { %2212 = vmatpush2.bf16.msra.mxu1 %v4400_v3  ;;  %2302 = vmatprep.subr.bf16.mxu0 %v4409_v5  ;;  %v4496_v3 = vld [vmem:[%s4840_s23 + $0x23c] ss:$28 sps:$4 sm:$0xff]  }
  0x53   : > { %2407 = vmatprep.subr.bf16.mxu1 %v4412_v6  ;;  %v5101_v5 = vld [vmem:[%s6437_s0 + $0x11c] ss:$20 sps:$4 sm:$0xff]   ;;  %v5106_v6 = vld [vmem:[%s6437_s0 + $0x124] ss:$20 sps:$4 sm:$0xff]  }
  0x54   : > { %2101 = vmatmul.mubr.bf16.vlgmr.msra.gmra.mxu0 %v4913_v7 }
  0x55   : > { %2214 = vmatmul.mubr.bf16.vlgmr.msra.gmra.mxu1 %v4918_v8  ;;  %2303 = vmatpush1.bf16.msra.mxu0 %v4407_v10  ;;  %v4494_v10 = vld [vmem:[%s4840_s23 + $0x238] ss:$28 sps:$4 sm:$0xff]  }
  0x56   : > { %2408 = vmatpush1.bf16.msra.mxu1 %v4410_v11  ;;  %2110 = vmatprep.mubr.bf16.mxu0 %v4923_v9  ;;  %v4505_v11 = vld [vmem:[%s4840_s23 + $0x204] ss:$28 sps:$4 sm:$0xff]  }
  0x57   : > { %2409 = vmatprep.subr.bf16.mxu1 %v4415_v13  ;;  %2223 = vmatprep.mubr.bf16.mxu1 %v4930_v12  ;;  %v5117_v13 = vld [vmem:[%s6437_s0 + $0x118] ss:$20 sps:$4 sm:$0xff]  }
  0x58   : > { %2304 = vmatprep.subr.bf16.mxu0 %v4436_v14  ;;  %v5122_v14 = vld [vmem:[%s6437_s0 + $0x120] ss:$20 sps:$4 sm:$0xff]  }
  0x59   : > { %2305 = vmatpush1.bf16.msra.mxu0 %v4434_v17  ;;  %v4506_v17 = vld [vmem:[%s4840_s23 + $0x1c8] ss:$28 sps:$4 sm:$0xff]  }
  0x5a   : > { %2410 = vmatpush1.bf16.msra.mxu1 %v4413_v15  ;;  %2306 = vmatprep.subr.bf16.mxu0 %v4463_v18  ;;  %v4503_v15 = vld [vmem:[%s4840_s23 + $0x200] ss:$28 sps:$4 sm:$0xff]   ;;  %v4518_v18 = vld [vmem:[%s4840_s23 + $0x7b4] ss:$28 sps:$4 sm:$0xff]  }
  0x5b   : > { %2411 = vmatprep.subr.bf16.mxu1 %v4424_v16  ;;  %v4508_v16 = vld [vmem:[%s4840_s23 + $0x1cc] ss:$28 sps:$4 sm:$0xff]  }
  0x5c   : > { %2111 = vmatmul.mubr.bf16.gmra.mxu0 %v4945_v19 }
  0x5d   : > { %2224 = vmatmul.mubr.bf16.gmra.mxu1 %v4950_v20  ;;  %2120 = vmatprep.mubr.bf16.mxu0 %v4955_v21 }
  0x5e   : > { %2412 = vmatpush1.bf16.msra.mxu1 %v4422_v22  ;;  %2233 = vmatprep.mubr.bf16.mxu1 %v4962_v24  ;;  %v5135_v22 = vld [vmem:[%s6437_s0 + $0x10] ss:$20 sps:$4 sm:$0xff]  }
  0x5f   : > { %2413 = vmatprep.subr.bf16.mxu1 %v4427_v23  ;;  %2307 = vmatpush1.bf16.msra.mxu0 %v4461_v25  ;;  %v4510_v23 = vld [vmem:[%s4840_s23 + $0x510] ss:$28 sps:$4 sm:$0xff]  }
  0x60   : > { %2308 = vmatprep.subr.bf16.mxu0 %v4490_v26  ;;  %v4516_v25 = vld [vmem:[%s4840_s23 + $0x7b0] ss:$28 sps:$4 sm:$0xff]   ;;  %v4515_v26 = vld [vmem:[%s4840_s23 + $0x4dc] ss:$28 sps:$4 sm:$0xff]  }
  0x62   : > { %2414 = vmatpush1.bf16.msra.mxu1 %v4425_v27  ;;  %v4535_v27 = vld [vmem:[%s4840_s23 + $0x77c] ss:$28 sps:$4 sm:$0xff]  }
  0x63   : > { %2415 = vmatprep.subr.bf16.mxu1 %v4439_v29  ;;  %2309 = vmatpush1.bf16.msra.mxu0 %v4488_v30  ;;  %v4522_v29 = vld [vmem:[%s4840_s23 + $0x4a4] ss:$28 sps:$4 sm:$0xff]   ;;  %v4533_v30 = vld [vmem:[%s4840_s23 + $0x778] ss:$28 sps:$4 sm:$0xff]  }
  0x64   : > { %2121 = vmatmul.mubr.bf16.gmra.mxu0 %v4974_v28  ;;  %2520 = vmatprep.subr.bf16.mxu0 %v4512_v39  ;;  %v4523_v39 = vld [vmem:[%s4840_s23 + $0x468] ss:$28 sps:$4 sm:$0xff]  }
  0x65   : > { %2234 = vmatmul.mubr.bf16.gmra.mxu1 %v4981_v31  ;;  %2130 = vmatprep.mubr.bf16.mxu0 %v4988_v34 }
  0x66   : > { %2416 = vmatpush1.bf16.msra.mxu1 %v4437_v32  ;;  %2243 = vmatprep.mubr.bf16.mxu1 %v4993_v35  ;;  %v4552_v32 = vld [vmem:[%s4840_s23 + $0x744] ss:$28 sps:$4 sm:$0xff]  }
  0x67   : > { %2417 = vmatprep.subr.bf16.mxu1 %v4442_v33  ;;  %v4520_v33 = vld [vmem:[%s4840_s23 + $0x4a0] ss:$28 sps:$4 sm:$0xff]  }
  0x6a   : > { %2418 = vmatpush1.bf16.msra.mxu1 %v4440_v36  ;;  %v4525_v36 = vld [vmem:[%s4840_s23 + $0x46c] ss:$28 sps:$4 sm:$0xff]  }
  0x6b   : > { %2419 = vmatprep.subr.bf16.mxu1 %v4451_v38  ;;  %v4550_v38 = vld [vmem:[%s4840_s23 + $0x740] ss:$28 sps:$4 sm:$0xff]  }
  0x6c   : > { %2131 = vmatmul.mubr.bf16.gmra.mxu0 %v5003_v37 }
  0x6d   : > { %2244 = vmatmul.mubr.bf16.gmra.mxu1 %v5010_v40  ;;  %2140 = vmatprep.mubr.bf16.mxu0 %v5017_v43 }
  0x6e   : > { %2420 = vmatpush1.bf16.msra.mxu1 %v4449_v41  ;;  %2253 = vmatprep.mubr.bf16.mxu1 %v5022_v44  ;;  %v4529_v41 = vld [vmem:[%s4840_s23 + $0x434] ss:$28 sps:$4 sm:$0xff]  }
  0x6f   : > { %2421 = vmatprep.subr.bf16.mxu1 %v4454_v42  ;;  %v4567_v42 = vld [vmem:[%s4840_s23 + $0x708] ss:$28 sps:$4 sm:$0xff]  }
  0x72   : > { %2422 = vmatpush1.bf16.msra.mxu1 %v4452_v45  ;;  %v5170_v45 = vld [vmem:[%s6437_s0 + $0x60] ss:$20 sps:$4 sm:$0xff]  }
  0x73   : > { %2423 = vmatprep.subr.bf16.mxu1 %v4466_v46  ;;  %v4532_v46 = vld [vmem:[%s4840_s23 + $0x3fc] ss:$28 sps:$4 sm:$0xff]  }
  0x74   : > { %2141 = vmatmul.mubr.bf16.gmra.mxu0 %v5033_v47 }
  0x75   : > { %2254 = vmatmul.mubr.bf16.gmra.mxu1 %v5038_v48  ;;  %2150 = vmatprep.mubr.bf16.mxu0 %v5045_v51 }
  0x76   : > { %2424 = vmatpush2.bf16.msra.mxu1 %v4464_v49  ;;  %2263 = vmatprep.mubr.bf16.mxu1 %v5050_v52  ;;  %v4582_v49 = vld [vmem:[%s4840_s23 + $0x51c] ss:$28 sps:$4 sm:$0xff]  }
  0x77   : > { %2425 = vmatprep.subr.bf16.mxu1 %v4469_v50  ;;  %v4539_v50 = vld [vmem:[%s4840_s23 + $0x3c4] ss:$28 sps:$4 sm:$0xff]  }
  0x7a   : > { %2426 = vmatpush2.bf16.msra.mxu1 %v4467_v53  ;;  %v5185_v53 = vld [vmem:[%s6437_s0 + $0x88] ss:$20 sps:$4 sm:$0xff]  }
  0x7b   : > { %2427 = vmatprep.subr.bf16.mxu1 %v4478_v54  ;;  %v4537_v54 = vld [vmem:[%s4840_s23 + $0x3c0] ss:$28 sps:$4 sm:$0xff]  }
  0x7c   : > { %2151 = vmatmul.mubr.bf16.gmra.mxu0 %v5061_v55 }
  0x7d   : > { %2264 = vmatmul.mubr.bf16.gmra.mxu1 %v5066_v56  ;;  %2160 = vmatprep.mubr.bf16.mxu0 %v5072_v58 }
  0x7e   : > { %2428 = vmatpush2.bf16.msra.mxu1 %v4476_v57  ;;  %2273 = vmatprep.mubr.bf16.mxu1 %v5078_v60  ;;  %v4546_v57 = vld [vmem:[%s4840_s23 + $0x6d4] ss:$28 sps:$4 sm:$0xff]  }
  0x7f   : > { %2429 = vmatprep.subr.bf16.mxu1 %v4481_v59  ;;  %v3460_v59 = vld [vmem:[%s6438_s1] sm:$0xff] }
  0x80   : > { %3466 = vperm.xlu0 %4303, %v3460_v59   ;;  %v4624_v59 = vld [vmem:[%s4840_s23 + $0x394] ss:$28 sps:$4 sm:$0xff]  }
  0x82   : > { %2430 = vmatpush2.bf16.msra.mxu1 %v4479_v61  ;;  %v5202_v61 = vld [vmem:[%s6437_s0 + $0xb0] ss:$20 sps:$4 sm:$0xff]  }
  0x83   : > { %2431 = vmatprep.subr.bf16.mxu1 %v4493_v63  ;;  %v4549_v63 = vld [vmem:[%s4840_s23 + $0x69c] ss:$28 sps:$4 sm:$0xff]  }
  0x84   : > { %2161 = vmatmul.mubr.bf16.gmra.mxu0 %v5088_v62 }
  0x85   : > { %2274 = vmatmul.mubr.bf16.gmra.mxu1 %v5094_v1  ;;  %2170 = vmatprep.mubr.bf16.mxu0 %v5101_v5 }
  0x86   : > { %2432 = vmatpush2.bf16.msra.mxu1 %v4491_v2  ;;  %2283 = vmatprep.mubr.bf16.mxu1 %v5106_v6  ;;  %v3462_v2 = vld [vmem:[%s6438_s1 + $0x10] sm:$0xff] }
  0x87   : > { %2433 = vmatprep.subr.bf16.mxu1 %v4496_v3  ;;  %v4547_v3 = vld [vmem:[%s4840_s23 + $0x698] ss:$28 sps:$4 sm:$0xff]   ;;  %3476 = vperm.xlu1 %4304, %v3462_v2   ;;  %v4633_v2 = vld [vmem:[%s4840_s23 + $0x324] ss:$28 sps:$4 sm:$0xff]  }
  0x8a   : > { %2434 = vmatpush2.bf16.msra.mxu1 %v4494_v10  ;;  %v4556_v10 = vld [vmem:[%s4840_s23 + $0x664] ss:$28 sps:$4 sm:$0xff]  }
  0x8b   : > { %2435 = vmatprep.subr.bf16.mxu1 %v4505_v11  ;;  %v5222_v11 = vld [vmem:[%s6437_s0 + $0xd8] ss:$20 sps:$4 sm:$0xff]  }
  0x8c   : > { %2171 = vmatmul.mubr.bf16.gmra.mxu0 %v5117_v13 }
  0x8d   : > { %2284 = vmatmul.mubr.bf16.gmra.mxu1 %v5122_v14  ;;  %2326 = vmatprep.mubr.bf16.mxu0 %v6441_v4 }
  0x8e   : > { %2436 = vmatpush2.bf16.msra.mxu1 %v4503_v15  ;;  %2439 = vmatprep.mubr.bf16.mxu1 %v4828_v0  ;;  %v4513_v0 = vld [vmem:[%s4840_s23 + $0x4d8] ss:$28 sps:$4 sm:$0xff]   ;;  %v4554_v15 = vld [vmem:[%s4840_s23 + $0x660] ss:$28 sps:$4 sm:$0xff]  }
  0x8f   : > { %2437 = vmatprep.subr.bf16.mxu1 %v4508_v16  ;;  %v4559_v16 = vld [vmem:[%s4840_s23 + $0x62c] ss:$28 sps:$4 sm:$0xff]  }
  0x92   : > { %2438 = vmatpush2.bf16.msra.mxu1 %v4506_v17  ;;  %v4563_v17 = vld [vmem:[%s4840_s23 + $0x5f4] ss:$28 sps:$4 sm:$0xff]  }
  0x93   : > { %2641 = vmatprep.subr.bf16.mxu1 %v4518_v18  ;;  %v5239_v18 = vld [vmem:[%s6437_s0 + $0x100] ss:$20 sps:$4 sm:$0xff]  }
  0x94   : > { %4030 = vmatmul.mubr.msk.bf16.vlgmr.msra.gmra.mxu0 %vm2043_vm0, %v5135_v22 }
  0x95   : > { %2440 = vmatmul.mubr.bf16.vlgmr.msra.gmra.mxu1 %v4913_v7  ;;  %2521 = vmatpush1.bf16.msra.mxu0 %v4510_v23  ;;  %v5153_v7 = vld [vmem:[%s6437_s0 + $0x38] ss:$20 sps:$4 sm:$0xff]  }
  0x96   : > { %2642 = vmatpush1.bf16.msra.mxu1 %v4516_v25  ;;  %2522 = vmatprep.subr.bf16.mxu0 %v4515_v26  ;;  %v4561_v23 = vld [vmem:[%s4840_s23 + $0x5f0] ss:$28 sps:$4 sm:$0xff]   ;;  %v4573_v25 = vld [vmem:[%s4840_s23 + $0x584] ss:$28 sps:$4 sm:$0xff]   ;;  %v5253_v26 = vld [vmem:[%s6437_s0 + $0x128] ss:$20 sps:$4 sm:$0xff]  }
  0x97   : > { %2336 = vmatprep.mubr.bf16.mxu0 %v6441_v4  ;;  %2449 = vmatprep.mubr.bf16.mxu1 %v4923_v9  ;;  %v4569_v9 = vld [vmem:[%s4840_s23 + $0x70c] ss:$28 sps:$4 sm:$0xff]  }
  0x98   : > { %2643 = vmatprep.subr.bf16.mxu1 %v4535_v27  ;;  %v4576_v27 = vld [vmem:[%s4840_s23 + $0x54c] ss:$28 sps:$4 sm:$0xff]  }
  0x99   : > { %2523 = vmatpush1.bf16.msra.mxu0 %v4513_v0  ;;  %v4574_v0 = vld [vmem:[%s4840_s23 + $0x548] ss:$28 sps:$4 sm:$0xff]  }
  0x9a   : > { %2644 = vmatpush1.bf16.msra.mxu1 %v4533_v30  ;;  %2524 = vmatprep.subr.bf16.mxu0 %v4522_v29  ;;  %v4579_v29 = vld [vmem:[%s4840_s23 + $0x19c] ss:$28 sps:$4 sm:$0xff]  }
  0x9b   : > { %2645 = vmatprep.subr.bf16.mxu1 %v4552_v32  ;;  %v4577_v30 = vld [vmem:[%s4840_s23 + $0x198] ss:$28 sps:$4 sm:$0xff]  }
  0x9c   : > { %4031 = vmatmul.mubr.msk.bf16.gmra.mxu0 %vm2043_vm0, %v5153_v7  ;;  %v4580_v32 = vld [vmem:[%s4840_s23 + $0x518] ss:$28 sps:$4 sm:$0xff]  }
  0x9d   : > { %2450 = vmatmul.mubr.bf16.gmra.mxu1 %v4945_v19  ;;  %2525 = vmatpush1.bf16.msra.mxu0 %v4520_v33  ;;  %v4527_v19 = vld [vmem:[%s4840_s23 + $0x430] ss:$28 sps:$4 sm:$0xff]   ;;  %v4585_v33 = vld [vmem:[%s4840_s23 + $0x164] ss:$28 sps:$4 sm:$0xff]  }
  0x9e   : > { %2346 = vmatprep.mubr.bf16.mxu0 %v6441_v4  ;;  %2526 = vmatprep.subr.bf16.mxu0 %v4525_v36  ;;  %v4588_v36 = vld [vmem:[%s4840_s23 + $0x4e4] ss:$28 sps:$4 sm:$0xff]  }
  0x9f   : > { %2459 = vmatprep.mubr.bf16.mxu1 %v4955_v21  ;;  %2646 = vmatpush1.bf16.msra.mxu1 %v4550_v38  ;;  %v4530_v21 = vld [vmem:[%s4840_s23 + $0x3f8] ss:$28 sps:$4 sm:$0xff]   ;;  %v4586_v38 = vld [vmem:[%s4840_s23 + $0x4e0] ss:$28 sps:$4 sm:$0xff]  }
  0xa0   : > { %2647 = vmatprep.subr.bf16.mxu1 %v4569_v9  ;;  %v4591_v9 = vld [vmem:[%s4840_s23 + $0x12c] ss:$28 sps:$4 sm:$0xff]  }
  0xa1   : > { %2527 = vmatpush1.bf16.msra.mxu0 %v4523_v39  ;;  %v4594_v39 = vld [vmem:[%s4840_s23 + $0x4ac] ss:$28 sps:$4 sm:$0xff]  }
  0xa2   : > { %2528 = vmatprep.subr.bf16.mxu0 %v4529_v41  ;;  %v4597_v41 = vld [vmem:[%s4840_s23 + $0xf4] ss:$28 sps:$4 sm:$0xff]  }
  0xa3   : > { %2648 = vmatpush1.bf16.msra.mxu1 %v4567_v42  ;;  %v4600_v42 = vld [vmem:[%s4840_s23 + $0x474] ss:$28 sps:$4 sm:$0xff]  }
  0xa4   : > { %4032 = vmatmul.mubr.msk.bf16.gmra.mxu0 %vm2043_vm0, %v5170_v45  ;;  %2859 = vmatprep.subr.bf16.mxu1 %v4582_v49  ;;  %v4606_v49 = vld [vmem:[%s4840_s23 + $0x43c] ss:$28 sps:$4 sm:$0xff]  }
  0xa5   : > { %2460 = vmatmul.mubr.bf16.gmra.mxu1 %v4974_v28  ;;  %2529 = vmatpush1.bf16.msra.mxu0 %v4527_v19  ;;  %v4542_v28 = vld [vmem:[%s4840_s23 + $0x38c] ss:$28 sps:$4 sm:$0xff]  }
  0xa6   : > { %2356 = vmatprep.mubr.bf16.mxu0 %v6441_v4  ;;  %2530 = vmatprep.subr.bf16.mxu0 %v4532_v46  ;;  %v4598_v19 = vld [vmem:[%s4840_s23 + $0x470] ss:$28 sps:$4 sm:$0xff]   ;;  %v4603_v46 = vld [vmem:[%s4840_s23 + $0xbc] ss:$28 sps:$4 sm:$0xff]  }
  0xa7   : > { %2469 = vmatprep.mubr.bf16.mxu1 %v4988_v34  ;;  %v4540_v34 = vld [vmem:[%s4840_s23 + $0x388] ss:$28 sps:$4 sm:$0xff]  }
  0xa9   : > { %2531 = vmatpush1.bf16.msra.mxu0 %v4530_v21  ;;  %v4609_v21 = vld [vmem:[%s4840_s23 + $0x84] ss:$28 sps:$4 sm:$0xff]  }
  0xaa   : > { %2532 = vmatprep.subr.bf16.mxu0 %v4539_v50  ;;  %v4612_v50 = vld [vmem:[%s4840_s23 + $0x404] ss:$28 sps:$4 sm:$0xff]  }
  0xac   : > { %4033 = vmatmul.mubr.msk.bf16.gmra.mxu0 %vm2043_vm0, %v5185_v53 }
  0xad   : > { %2470 = vmatmul.mubr.bf16.gmra.mxu1 %v5003_v37  ;;  %2533 = vmatpush1.bf16.msra.mxu0 %v4537_v54  ;;  %v4544_v37 = vld [vmem:[%s4840_s23 + $0x6d0] ss:$28 sps:$4 sm:$0xff]   ;;  %v4610_v54 = vld [vmem:[%s4840_s23 + $0x400] ss:$28 sps:$4 sm:$0xff]  }
  0xae   : > { %2366 = vmatprep.mubr.bf16.mxu0 %v6441_v4  ;;  %2534 = vmatprep.subr.bf16.mxu0 %v4542_v28  ;;  %v4615_v28 = vld [vmem:[%s4840_s23 + $0x4c] ss:$28 sps:$4 sm:$0xff]  }
  0xaf   : > { %2479 = vmatprep.mubr.bf16.mxu1 %v5017_v43  ;;  %v3461_v43 = vld [vmem:[%s6438_s1 + $0x8] sm:$0xff] }
  0xb0   : > { %3471 = vperm.xlu0 %4303, %v3461_v43   ;;  %v4630_v43 = vld [vmem:[%s4840_s23 + $0x6dc] ss:$28 sps:$4 sm:$0xff]  }
  0xb1   : > { %2535 = vmatpush1.bf16.msra.mxu0 %v4540_v34  ;;  %v4618_v34 = vld [vmem:[%s4840_s23 + $0x3cc] ss:$28 sps:$4 sm:$0xff]  }
  0xb2   : > { %2536 = vmatprep.subr.bf16.mxu0 %v4546_v57  ;;  %v4621_v57 = vld [vmem:[%s4840_s23 + $0x14] ss:$28 sps:$4 sm:$0xff]  }
  0xb4   : > { %4034 = vmatmul.mubr.msk.bf16.gmra.mxu0 %vm2043_vm0, %v5202_v61 }
  0xb5   : > { %2480 = vmatmul.mubr.bf16.gmra.mxu1 %v5033_v47  ;;  %2537 = vmatpush2.bf16.msra.mxu0 %v4544_v37  ;;  %v3463_v47 = vld [vmem:[%s6438_s1 + $0x18] sm:$0xff]  ;;  %v4622_v37 = vld [vmem:[%s4840_s23 + $0x390] ss:$28 sps:$4 sm:$0xff]  }
  0xb6   : > { %2376 = vmatprep.mubr.bf16.mxu0 %v6441_v4  ;;  %2538 = vmatprep.subr.bf16.mxu0 %v4549_v63  ;;  %v4627_v63 = vld [vmem:[%s4840_s23 + $0x35c] ss:$28 sps:$4 sm:$0xff]  }
  0xb7   : > { %2489 = vmatprep.mubr.bf16.mxu1 %v5045_v51  ;;  %3481 = vperm.xlu1 %4304, %v3463_v47   ;;  %v4557_v51 = vld [vmem:[%s4840_s23 + $0x628] ss:$28 sps:$4 sm:$0xff]  }
  0xb8   : > { %v4639_v47 = vld [vmem:[%s4840_s23 + $0x2ec] ss:$28 sps:$4 sm:$0xff]  }
  0xb9   : > { %2539 = vmatpush2.bf16.msra.mxu0 %v4547_v3  ;;  %v4636_v3 = vld [vmem:[%s4840_s23 + $0x6a4] ss:$28 sps:$4 sm:$0xff]  }
  0xba   : > { %2540 = vmatprep.subr.bf16.mxu0 %v4556_v10  ;;  %v4634_v10 = vld [vmem:[%s4840_s23 + $0x6a0] ss:$28 sps:$4 sm:$0xff]  }
  0xbc   : > { %4035 = vmatmul.mubr.msk.bf16.gmra.mxu0 %vm2043_vm0, %v5222_v11 }
  0xbd   : > { %2490 = vmatmul.mubr.bf16.gmra.mxu1 %v5061_v55  ;;  %2541 = vmatpush2.bf16.msra.mxu0 %v4554_v15  ;;  %v4566_v55 = vld [vmem:[%s4840_s23 + $0x5bc] ss:$28 sps:$4 sm:$0xff]   ;;  %v4642_v15 = vld [vmem:[%s4840_s23 + $0x66c] ss:$28 sps:$4 sm:$0xff]  }
  0xbe   : > { %2386 = vmatprep.mubr.bf16.mxu0 %v6441_v4  ;;  %2542 = vmatprep.subr.bf16.mxu0 %v4559_v16  ;;  %v4645_v16 = vld [vmem:[%s4840_s23 + $0x2b4] ss:$28 sps:$4 sm:$0xff]  }
  0xbf   : > { %2499 = vmatprep.mubr.bf16.mxu1 %v5072_v58  ;;  %v4564_v58 = vld [vmem:[%s4840_s23 + $0x5b8] ss:$28 sps:$4 sm:$0xff]  }
  0xc1   : > { %2543 = vmatpush2.bf16.msra.mxu0 %v4557_v51  ;;  %v4648_v51 = vld [vmem:[%s4840_s23 + $0x634] ss:$28 sps:$4 sm:$0xff]  }
  0xc2   : > { %2544 = vmatprep.subr.bf16.mxu0 %v4563_v17  ;;  %v4646_v17 = vld [vmem:[%s4840_s23 + $0x630] ss:$28 sps:$4 sm:$0xff]  }
  0xc4   : > { %4036 = vmatmul.mubr.msk.bf16.gmra.mxu0 %vm2043_vm0, %v5239_v18 }
  0xc5   : > { %2500 = vmatmul.mubr.bf16.gmra.mxu1 %v5088_v62  ;;  %2545 = vmatpush2.bf16.msra.mxu0 %v4561_v23  ;;  %v4571_v62 = vld [vmem:[%s4840_s23 + $0x580] ss:$28 sps:$4 sm:$0xff]  }
  0xc6   : > { %2396 = vmatprep.mubr.bf16.mxu0 %v6441_v4  ;;  %2546 = vmatprep.subr.bf16.mxu0 %v4566_v55  ;;  %v4651_v23 = vld [vmem:[%s4840_s23 + $0x27c] ss:$28 sps:$4 sm:$0xff]  }
  0xc7   : > { %2509 = vmatprep.mubr.bf16.mxu1 %v5101_v5  ;;  %v5264_v5 = vld [vmem:[%s6437_s0 + $0xc] ss:$20 sps:$4 sm:$0xff]   ;;  %v4654_v55 = vld [vmem:[%s4840_s23 + $0x5fc] ss:$28 sps:$4 sm:$0xff]  }
  0xc9   : > { %2547 = vmatpush2.bf16.msra.mxu0 %v4564_v58  ;;  %v4657_v58 = vld [vmem:[%s4840_s23 + $0x244] ss:$28 sps:$4 sm:$0xff]  }
  0xca   : > { %2548 = vmatprep.subr.bf16.mxu0 %v4573_v25  ;;  %v4660_v25 = vld [vmem:[%s4840_s23 + $0x5c4] ss:$28 sps:$4 sm:$0xff]  }
  0xcc   : > { %4037 = vmatmul.mubr.msk.bf16.gmra.mxu0 %vm2043_vm0, %v5253_v26 }
  0xcd   : > { %2510 = vmatmul.mubr.bf16.gmra.mxu1 %v5117_v13  ;;  %2549 = vmatpush2.bf16.msra.mxu0 %v4571_v62  ;;  %v4583_v13 = vld [vmem:[%s4840_s23 + $0x160] ss:$28 sps:$4 sm:$0xff]  }
  0xce   : > { %2552 = vmatprep.mubr.bf16.mxu0 %v5264_v5  ;;  %2550 = vmatprep.subr.bf16.mxu0 %v4576_v27  ;;  %v4658_v62 = vld [vmem:[%s4840_s23 + $0x5c0] ss:$28 sps:$4 sm:$0xff]   ;;  %v4663_v27 = vld [vmem:[%s4840_s23 + $0x20c] ss:$28 sps:$4 sm:$0xff]  }
  0xcf   : > { %2665 = vmatprep.mubr.bf16.mxu1 %v6441_v4 }
  0xd1   : > { %2551 = vmatpush2.bf16.msra.mxu0 %v4574_v0  ;;  %v4666_v0 = vld [vmem:[%s4840_s23 + $0x58c] ss:$28 sps:$4 sm:$0xff]  }
  0xd2   : > { %2746 = vmatprep.subr.bf16.mxu0 %v4579_v29  ;;  %v4669_v29 = vld [vmem:[%s4840_s23 + $0x1d4] ss:$28 sps:$4 sm:$0xff]  }
  0xd4   : > { %2553 = vmatmul.mubr.bf16.vlgmr.msra.gmra.mxu0 %v4918_v8  ;;  %v4589_v8 = vld [vmem:[%s4840_s23 + $0x128] ss:$28 sps:$4 sm:$0xff]  }
  0xd5   : > { %4038 = vmatmul.mubr.msk.bf16.vlgmr.msra.gmra.mxu1 %vm2043_vm0, %v5135_v22  ;;  %2747 = vmatpush1.bf16.msra.mxu0 %v4577_v30  ;;  %v4592_v22 = vld [vmem:[%s4840_s23 + $0x4a8] ss:$28 sps:$4 sm:$0xff]   ;;  %v4672_v30 = vld [vmem:[%s4840_s23 + $0x554] ss:$28 sps:$4 sm:$0xff]  }
  0xd6   : > { %2860 = vmatpush1.bf16.msra.mxu1 %v4580_v32  ;;  %2748 = vmatprep.subr.bf16.mxu0 %v4585_v33  ;;  %v4670_v32 = vld [vmem:[%s4840_s23 + $0x550] ss:$28 sps:$4 sm:$0xff]   ;;  %v4675_v33 = vld [vmem:[%s4840_s23 + $0x7bc] ss:$28 sps:$4 sm:$0xff]  }
  0xd7   : > { %2861 = vmatprep.subr.bf16.mxu1 %v4588_v36  ;;  %2562 = vmatprep.mubr.bf16.mxu0 %v4930_v12  ;;  %v4595_v12 = vld [vmem:[%s4840_s23 + $0xf0] ss:$28 sps:$4 sm:$0xff]   ;;  %v4676_v36 = vld [vmem:[%s4840_s23 + $0x360] ss:$28 sps:$4 sm:$0xff]  }
  0xd8   : > { %2675 = vmatprep.mubr.bf16.mxu1 %v6441_v4 }
  0xd9   : > { %2749 = vmatpush1.bf16.msra.mxu0 %v4583_v13  ;;  %v5374_v13 = vld [vmem:[%s6437_s0 + $0x4] ss:$20 sps:$4 sm:$0xff]  }
  0xda   : > { %2862 = vmatpush1.bf16.msra.mxu1 %v4586_v38  ;;  %2750 = vmatprep.subr.bf16.mxu0 %v4591_v9  ;;  %v4678_v38 = vld [vmem:[%s4840_s23 + $0x328] ss:$28 sps:$4 sm:$0xff]  }
  0xdb   : > { %2863 = vmatprep.subr.bf16.mxu1 %v4594_v39  ;;  %v4682_v9 = vld [vmem:[%s4840_s23 + $0x784] ss:$28 sps:$4 sm:$0xff]  }
  0xdc   : > { %2563 = vmatmul.mubr.bf16.gmra.mxu0 %v4950_v20  ;;  %v4601_v20 = vld [vmem:[%s4840_s23 + $0xb8] ss:$28 sps:$4 sm:$0xff]  }
  0xdd   : > { %4039 = vmatmul.mubr.msk.bf16.gmra.mxu1 %vm2043_vm0, %v5153_v7  ;;  %2751 = vmatpush1.bf16.msra.mxu0 %v4589_v8  ;;  %v4604_v7 = vld [vmem:[%s4840_s23 + $0x438] ss:$28 sps:$4 sm:$0xff]  }
  0xde   : > { %2864 = vmatpush1.bf16.msra.mxu1 %v4592_v22  ;;  %2752 = vmatprep.subr.bf16.mxu0 %v4597_v41  ;;  %v5385_v22 = vld [vmem:[%s6437_s0] ss:$20 sps:$4 sm:$0xff]  }
  0xdf   : > { %2865 = vmatprep.subr.bf16.mxu1 %v4600_v42  ;;  %2572 = vmatprep.mubr.bf16.mxu0 %v4962_v24  ;;  %v4607_v24 = vld [vmem:[%s4840_s23 + $0x80] ss:$28 sps:$4 sm:$0xff]   ;;  %v4679_v42 = vld [vmem:[%s4840_s23 + $0x168] ss:$28 sps:$4 sm:$0xff]  }
  0xe0   : > { %2685 = vmatprep.mubr.bf16.mxu1 %v6441_v4 }
  0xe1   : > { %2753 = vmatpush1.bf16.msra.mxu0 %v4595_v12  ;;  %v4680_v12 = vld [vmem:[%s4840_s23 + $0x780] ss:$28 sps:$4 sm:$0xff]  }
  0xe2   : > { %2866 = vmatpush1.bf16.msra.mxu1 %v4598_v19  ;;  %2754 = vmatprep.subr.bf16.mxu0 %v4603_v46 }
  0xe3   : > { %2867 = vmatprep.subr.bf16.mxu1 %v4606_v49  ;;  %v5401_v49 = vld [vmem:[%s6437_s0 + $0x2c] ss:$20 sps:$4 sm:$0xff]  }
  0xe4   : > { %2573 = vmatmul.mubr.bf16.gmra.mxu0 %v4981_v31  ;;  %v4613_v31 = vld [vmem:[%s4840_s23 + $0x48] ss:$28 sps:$4 sm:$0xff]  }
  0xe5   : > { %4040 = vmatmul.mubr.msk.bf16.gmra.mxu1 %vm2043_vm0, %v5170_v45  ;;  %2755 = vmatpush1.bf16.msra.mxu0 %v4601_v20  ;;  %v4616_v45 = vld [vmem:[%s4840_s23 + $0x3c8] ss:$28 sps:$4 sm:$0xff]  }
  0xe6   : > { %2868 = vmatpush1.bf16.msra.mxu1 %v4604_v7  ;;  %2756 = vmatprep.subr.bf16.mxu0 %v4609_v21  ;;  %v5407_v20 = vld [vmem:[%s6437_s0 + $0x34] ss:$20 sps:$4 sm:$0xff]   ;;  %v4683_v7 = vld [vmem:[%s4840_s23 + $0x2f0] ss:$28 sps:$4 sm:$0xff]  }
  0xe7   : > { %2869 = vmatprep.subr.bf16.mxu1 %v4612_v50  ;;  %2582 = vmatprep.mubr.bf16.mxu0 %v4993_v35  ;;  %v4619_v35 = vld [vmem:[%s4840_s23 + $0x10] ss:$28 sps:$4 sm:$0xff]   ;;  %6463 = vst [vmem:[#allocation3_spill] sm:$0xff] %v5407_v20 }
  0xe8   : > { %2695 = vmatprep.mubr.bf16.mxu1 %v6441_v4  ;;  %v4689_v21 = vld [vmem:[%s4840_s23 + $0x74c] ss:$28 sps:$4 sm:$0xff]  }
  0xe9   : > { %2757 = vmatpush1.bf16.msra.mxu0 %v4607_v24 }
  0xea   : > { %2870 = vmatpush1.bf16.msra.mxu1 %v4610_v54  ;;  %2758 = vmatprep.subr.bf16.mxu0 %v4615_v28 }
  0xeb   : > { %2871 = vmatprep.subr.bf16.mxu1 %v4618_v34 }
  0xec   : > { %2583 = vmatmul.mubr.bf16.gmra.mxu0 %v5010_v40  ;;  %v4625_v40 = vld [vmem:[%s4840_s23 + $0x358] ss:$28 sps:$4 sm:$0xff]  }
  0xed   : > { %4041 = vmatmul.mubr.msk.bf16.gmra.mxu1 %vm2043_vm0, %v5185_v53  ;;  %2759 = vmatpush1.bf16.msra.mxu0 %v4613_v31  ;;  %v4628_v53 = vld [vmem:[%s4840_s23 + $0x6d8] ss:$28 sps:$4 sm:$0xff]  }
  0xee   : > { %2872 = vmatpush1.bf16.msra.mxu1 %v4616_v45  ;;  %2760 = vmatprep.subr.bf16.mxu0 %v4621_v57  ;;  %v4684_v45 = vld [vmem:[%s4840_s23 + $0x130] ss:$28 sps:$4 sm:$0xff]   ;;  %v4687_v57 = vld [vmem:[%s4840_s23 + $0x748] ss:$28 sps:$4 sm:$0xff]  }
  0xef   : > { %2873 = vmatprep.subr.bf16.mxu1 %v4624_v59  ;;  %2592 = vmatprep.mubr.bf16.mxu0 %v5022_v44  ;;  %v4631_v44 = vld [vmem:[%s4840_s23 + $0x320] ss:$28 sps:$4 sm:$0xff]  }
  0xf0   : > { %2705 = vmatprep.mubr.bf16.mxu1 %v6441_v4 }
  0xf1   : > { %2761 = vmatpush1.bf16.msra.mxu0 %v4619_v35  ;;  %v4685_v35 = vld [vmem:[%s4840_s23 + $0x2b8] ss:$28 sps:$4 sm:$0xff]  }
  0xf2   : > { %2874 = vmatpush1.bf16.msra.mxu1 %v4622_v37  ;;  %2762 = vmatprep.subr.bf16.mxu0 %v4627_v63  ;;  %v4696_v37 = vld [vmem:[%s4840_s23 + $0x714] ss:$28 sps:$4 sm:$0xff]  }
  0xf3   : > { %2875 = vmatprep.subr.bf16.mxu1 %v4630_v43 }
  0xf4   : > { %2593 = vmatmul.mubr.bf16.gmra.mxu0 %v5038_v48  ;;  %v4637_v48 = vld [vmem:[%s4840_s23 + $0x2e8] ss:$28 sps:$4 sm:$0xff]  }
  0xf5   : > { %4042 = vmatmul.mubr.msk.bf16.gmra.mxu1 %vm2043_vm0, %v5202_v61  ;;  %2763 = vmatpush2.bf16.msra.mxu0 %v4625_v40  ;;  %v4640_v61 = vld [vmem:[%s4840_s23 + $0x668] ss:$28 sps:$4 sm:$0xff]  }
  0xf6   : > { %2876 = vmatpush2.bf16.msra.mxu1 %v4628_v53  ;;  %2764 = vmatprep.subr.bf16.mxu0 %v4633_v2  ;;  %v5425_v40 = vld [vmem:[%s6437_s0 + $0x28] ss:$20 sps:$4 sm:$0xff]   ;;  %v5431_v53 = vld [vmem:[%s6437_s0 + $0x30] ss:$20 sps:$4 sm:$0xff]  }
  0xf7   : > { %2877 = vmatprep.subr.bf16.mxu1 %v4636_v3  ;;  %2602 = vmatprep.mubr.bf16.mxu0 %v5050_v52  ;;  %v4643_v52 = vld [vmem:[%s4840_s23 + $0x2b0] ss:$28 sps:$4 sm:$0xff]   ;;  %6464 = vst [vmem:[#allocation4_spill] sm:$0xff] %v5431_v53  ;;  %v5439_v3 = vld [vmem:[%s6437_s0 + $0x54] ss:$20 sps:$4 sm:$0xff]  }
  0xf8   : > { %2715 = vmatprep.mubr.bf16.mxu1 %v6441_v4 }
  0xf9   : > { %2765 = vmatpush2.bf16.msra.mxu0 %v4631_v44  ;;  %v5445_v44 = vld [vmem:[%s6437_s0 + $0x5c] ss:$20 sps:$4 sm:$0xff]  }
  0xfa   : > { %2878 = vmatpush2.bf16.msra.mxu1 %v4634_v10  ;;  %2766 = vmatprep.subr.bf16.mxu0 %v4639_v47  ;;  %6465 = vst [vmem:[#allocation5_spill] sm:$0xff] %v5445_v44 }
  0xfb   : > { %2879 = vmatprep.subr.bf16.mxu1 %v4642_v15  ;;  %v4686_v15 = vld [vmem:[%s4840_s23 + $0xf8] ss:$28 sps:$4 sm:$0xff]  }
  0xfc   : > { %2603 = vmatmul.mubr.bf16.gmra.mxu0 %v5066_v56  ;;  %v4649_v56 = vld [vmem:[%s4840_s23 + $0x278] ss:$28 sps:$4 sm:$0xff]  }
  0xfd   : > { %4043 = vmatmul.mubr.msk.bf16.gmra.mxu1 %vm2043_vm0, %v5222_v11  ;;  %2767 = vmatpush2.bf16.msra.mxu0 %v4637_v48  ;;  %v4652_v11 = vld [vmem:[%s4840_s23 + $0x5f8] ss:$28 sps:$4 sm:$0xff]   ;;  %v4694_v48 = vld [vmem:[%s4840_s23 + $0x710] ss:$28 sps:$4 sm:$0xff]  }
  0xfe   : > { %2880 = vmatpush2.bf16.msra.mxu1 %v4640_v61  ;;  %2768 = vmatprep.subr.bf16.mxu0 %v4645_v16  ;;  %v4690_v16 = vld [vmem:[%s4840_s23 + $0x280] ss:$28 sps:$4 sm:$0xff]  }
  0xff   : > { %2881 = vmatprep.subr.bf16.mxu1 %v4648_v51  ;;  %2612 = vmatprep.mubr.bf16.mxu0 %v5078_v60  ;;  %v4655_v60 = vld [vmem:[%s4840_s23 + $0x240] ss:$28 sps:$4 sm:$0xff]  }
 0x100   : > { %2725 = vmatprep.mubr.bf16.mxu1 %v6441_v4  ;;  %v5454_v51 = vld [vmem:[%s4840_s23 + $0x6e0] ss:$28 sps:$4 sm:$0xff]  }
 0x101   : > { %2769 = vmatpush2.bf16.msra.mxu0 %v4643_v52 }
 0x102   : > { %2882 = vmatpush2.bf16.msra.mxu1 %v4646_v17  ;;  %2770 = vmatprep.subr.bf16.mxu0 %v4651_v23 }
 0x103   : > { %2883 = vmatprep.subr.bf16.mxu1 %v4654_v55 }
 0x104   : > { %2613 = vmatmul.mubr.bf16.gmra.mxu0 %v5094_v1  ;;  %v4661_v1 = vld [vmem:[%s4840_s23 + $0x208] ss:$28 sps:$4 sm:$0xff]  }
 0x105   : > { %4044 = vmatmul.mubr.msk.bf16.gmra.mxu1 %vm2043_vm0, %v5239_v18  ;;  %2771 = vmatpush2.bf16.msra.mxu0 %v4649_v56  ;;  %v4664_v18 = vld [vmem:[%s4840_s23 + $0x588] ss:$28 sps:$4 sm:$0xff]  }
 0x106   : > { %2884 = vmatpush2.bf16.msra.mxu1 %v4652_v11  ;;  %2772 = vmatprep.subr.bf16.mxu0 %v4657_v58  ;;  %v4691_v11 = vld [vmem:[%s4840_s23 + $0xc0] ss:$28 sps:$4 sm:$0xff]  }
 0x107   : > { %2885 = vmatprep.subr.bf16.mxu1 %v4660_v25  ;;  %2622 = vmatprep.mubr.bf16.mxu0 %v5106_v6  ;;  %v4667_v6 = vld [vmem:[%s4840_s23 + $0x1d0] ss:$28 sps:$4 sm:$0xff]   ;;  %v4692_v25 = vld [vmem:[%s4840_s23 + $0x248] ss:$28 sps:$4 sm:$0xff]  }
 0x108   : > { %2735 = vmatprep.mubr.bf16.mxu1 %v6441_v4  ;;  %v5636_v4 = vld [vmem:[%s6437_s0 + $0x118] ss:$20 sps:$4 sm:$0xff]  }
 0x109   : > { %2773 = vmatpush2.bf16.msra.mxu0 %v4655_v60 }
 0x10a   : > { %2886 = vmatpush2.bf16.msra.mxu1 %v4658_v62  ;;  %2774 = vmatprep.subr.bf16.mxu0 %v4663_v27  ;;  %v5466_v27 = vld [vmem:[%s6437_s0 + $0x50] ss:$20 sps:$4 sm:$0xff]  }
 0x10b   : > { %2887 = vmatprep.subr.bf16.mxu1 %v4666_v0  ;;  %v5472_v0 = vld [vmem:[%s6437_s0 + $0x58] ss:$20 sps:$4 sm:$0xff]  }
 0x10c   : > { %2623 = vmatmul.mubr.bf16.gmra.mxu0 %v5122_v14  ;;  %v4673_v14 = vld [vmem:[%s4840_s23 + $0x7b8] ss:$28 sps:$4 sm:$0xff]   ;;  %6466 = vst [vmem:[#allocation6_spill] sm:$0xff] %v5472_v0 }
 0x10d   : > { %4045 = vmatmul.mubr.msk.bf16.gmra.mxu1 %vm2043_vm0, %v5253_v26  ;;  %2775 = vmatpush2.bf16.msra.mxu0 %v4661_v1  ;;  %v4677_v26 = vld [vmem:[%s4840_s23 + $0x1a0] ss:$28 sps:$4 sm:$0xff]  }
 0x10e   : > { %2888 = vmatpush2.bf16.msra.mxu1 %v4664_v18  ;;  %2776 = vmatprep.subr.bf16.mxu0 %v4669_v29  ;;  %v5480_v18 = vld [vmem:[%s6437_s0 + $0x7c] ss:$20 sps:$4 sm:$0xff]   ;;  %v5486_v29 = vld [vmem:[%s6437_s0 + $0x84] ss:$20 sps:$4 sm:$0xff]  }
 0x10f   : > { %2889 = vmatprep.subr.bf16.mxu1 %v4672_v30  ;;  %2778 = vmatprep.mubr.bf16.mxu0 %v5374_v13  ;;  %6467 = vst [vmem:[#allocation7_spill] sm:$0xff] %v5486_v29 }
 0x110   : > { %2891 = vmatprep.mubr.bf16.mxu1 %v5264_v5  ;;  %v5391_v5 = vld [vmem:[%s6437_s0 + $0x8] ss:$20 sps:$4 sm:$0xff]  }
 0x111   : > { %2777 = vmatpush2.bf16.msra.mxu0 %v4667_v6  ;;  %6462 = vst [vmem:[#allocation2_spill] sm:$0xff] %v5391_v5 }
 0x112   : > { %2890 = vmatpush2.bf16.msra.mxu1 %v4670_v32  ;;  %2980 = vmatprep.subr.bf16.mxu0 %v4675_v33  ;;  %v4693_v32 = vld [vmem:[%s4840_s23 + $0x88] ss:$28 sps:$4 sm:$0xff]  }
 0x113   : > { %4096 = vmatprep.subr.bf16.mxu1 %v4676_v36  ;;  %v4697_v36 = vld [vmem:[%s4840_s23 + $0x210] ss:$28 sps:$4 sm:$0xff]  }
 0x114   : > { %v2102_v39 = vpop.f32.mrf.mxu0  ;;  %2779 = vmatmul.mubr.bf16.vlgmr.msra.gmra.mxu0 %v5385_v22 }
 0x115   : > { %v2215_v8 = vpop.f32.mrf.mxu1  ;;  %2892 = vmatmul.mubr.bf16.vlgmr.msra.gmra.mxu1 %v5391_v5  ;;  %2981 = vmatpush1.bf16.msra.mxu0 %v4673_v14 }
 0x116   : > { %v5394_v41 = vadd.f32 %v2215_v8, %v2102_v39  ;;  %4097 = vmatpush3.bf16.msra.mxu1 %v4677_v26  ;;  %v2104_v19 = vpop.f32.mrf.mxu0  ;;  %2788 = vmatprep.mubr.bf16.mxu0 %v5401_v49  ;;  %v4698_v8 = vld [vmem:[%s4840_s23 + $0x50] ss:$28 sps:$4 sm:$0xff]  }
 0x117   : > { %v2217_v46 = vpop.f32.mrf.mxu1  ;;  %2901 = vmatprep.mubr.bf16.mxu1 %v5407_v20  ;;  %4098 = vmatprep.subr.bf16.mxu1 %v4678_v38 }
 0x118   : > { %v5412_v50 = vadd.f32 %v2217_v46, %v2104_v19  ;;  %2982 = vmatprep.subr.bf16.mxu0 %v4682_v9  ;;  %v2106_v24 = vpop.f32.mrf.mxu0 }
 0x119   : > { %v2219_v54 = vpop.f32.mrf.mxu1  ;;  %2983 = vmatpush1.bf16.msra.mxu0 %v4680_v12  ;;  %v4699_v12 = vld [vmem:[%s4840_s23 + $0x1d8] ss:$28 sps:$4 sm:$0xff]  }
 0x11a   : > { %v5414_v28 = vadd.f32 %v2219_v54, %v2106_v24  ;;  %4099 = vmatpush3.bf16.msra.mxu1 %v4679_v42  ;;  %v2108_v34 = vpop.f32.mrf.mxu0  ;;  %2984 = vmatprep.subr.bf16.mxu0 %v4689_v21  ;;  %v5508_v21 = vld [vmem:[%s6437_s0 + $0x80] ss:$20 sps:$4 sm:$0xff]   ;;  %v5516_v54 = vld [vmem:[%s6437_s0 + $0xa4] ss:$20 sps:$4 sm:$0xff]  }
 0x11b   : > { %v2221_v31 = vpop.f32.mrf.mxu1  ;;  %4100 = vmatprep.subr.bf16.mxu1 %v4683_v7  ;;  %v5502_v7 = vld [vmem:[%s6437_s0 + $0x78] ss:$20 sps:$4 sm:$0xff]   ;;  %6468 = vst [vmem:[#allocation8_spill] sm:$0xff] %v5508_v21 }
 0x11c   : > { %v5418_v59 = vadd.f32 %v2221_v31, %v2108_v34  ;;  %v2112_v63 = vpop.f32.mrf.mxu0  ;;  %2789 = vmatmul.mubr.bf16.gmra.mxu0 %v5425_v40  ;;  %v5522_v34 = vld [vmem:[%s6437_s0 + $0xac] ss:$20 sps:$4 sm:$0xff]  }
 0x11d   : > { %v2225_v43 = vpop.f32.mrf.mxu1  ;;  %2902 = vmatmul.mubr.bf16.gmra.mxu1 %v5431_v53  ;;  %2798 = vmatprep.mubr.bf16.mxu0 %v5439_v3  ;;  %6469 = vst [vmem:[#allocation9_spill] sm:$0xff] %v5522_v34 }
 0x11e   : > { %v5434_v2 = vadd.f32 %v2225_v43, %v2112_v63  ;;  %2911 = vmatprep.mubr.bf16.mxu1 %v5445_v44  ;;  %v2114_v10 = vpop.f32.mrf.mxu0  ;;  %4101 = vmatpush3.bf16.msra.mxu1 %v4684_v45 }
 0x11f   : > { %v2227_v47 = vpop.f32.mrf.mxu1  ;;  %2985 = vmatpush1.bf16.msra.mxu0 %v4687_v57  ;;  %4102 = vmatprep.subr.bf16.mxu1 %v4685_v35  ;;  %v4700_v57 = vld [vmem:[%s4840_s23 + $0x18] ss:$28 sps:$4 sm:$0xff]  }
 0x120   : > { %v5450_v61 = vadd.f32 %v2227_v47, %v2114_v10  ;;  %2986 = vmatprep.subr.bf16.mxu0 %v4696_v37  ;;  %v2116_v52 = vpop.f32.mrf.mxu0 }
 0x121   : > { %v2229_v17 = vpop.f32.mrf.mxu1 }
 0x122   : > { %v5456_v23 = vadd.f32 %v2229_v17, %v2116_v52  ;;  %v2118_v55 = vpop.f32.mrf.mxu0  ;;  %4103 = vmatpush3.bf16.msra.mxu1 %v4686_v15  ;;  %v5536_v52 = vld [vmem:[%s6437_s0 + $0xa0] ss:$20 sps:$4 sm:$0xff]   ;;  %v5542_v17 = vld [vmem:[%s6437_s0 + $0xa8] ss:$20 sps:$4 sm:$0xff]  }
 0x123   : > { %v2231_v56 = vpop.f32.mrf.mxu1  ;;  %2987 = vmatpush1.bf16.msra.mxu0 %v4694_v48  ;;  %4104 = vmatprep.subr.bf16.mxu1 %v4690_v16  ;;  %6470 = vst [vmem:[#allocation10_spill] sm:$0xff] %v5542_v17 }
 0x124   : > { %v5459_v58 = vadd.f32 %v2231_v56, %v2118_v55  ;;  %4160 = vmatprep.subr.bf16.mxu0 %v5454_v51  ;;  %v2122_v60 = vpop.f32.mrf.mxu0  ;;  %2799 = vmatmul.mubr.bf16.gmra.mxu0 %v5466_v27  ;;  %v5556_v56 = vld [vmem:[%s6437_s0 + $0xd4] ss:$20 sps:$4 sm:$0xff]  }
 0x125   : > { %v2235_v62 = vpop.f32.mrf.mxu1  ;;  %2912 = vmatmul.mubr.bf16.gmra.mxu1 %v5472_v0  ;;  %2808 = vmatprep.mubr.bf16.mxu0 %v5480_v18  ;;  %6471 = vst [vmem:[#allocation11_spill] sm:$0xff] %v5556_v56  ;;  %v4702_v0 = vld [vmem:[%s4840_s23 + $0x520] ss:$28 sps:$4 sm:$0xff]  }
 0x126   : > { %v5475_v1 = vadd.f32 %v2235_v62, %v2122_v60  ;;  %2921 = vmatprep.mubr.bf16.mxu1 %v5486_v29  ;;  %v2124_v30 = vpop.f32.mrf.mxu0  ;;  %4105 = vmatpush3.bf16.msra.mxu1 %v4691_v11 }
 0x127   : > { %v2237_v6 = vpop.f32.mrf.mxu1  ;;  %4106 = vmatprep.subr.bf16.mxu1 %v4692_v25 }
 0x128   : > { %v5490_v33 = vadd.f32 %v2237_v6, %v2124_v30  ;;  %v2126_v14 = vpop.f32.mrf.mxu0 }
 0x129   : > { %v2239_v26 = vpop.f32.mrf.mxu1 }
 0x12a   : > { %v5493_v38 = vadd.f32 %v2239_v26, %v2126_v14  ;;  %v2128_v9 = vpop.f32.mrf.mxu0  ;;  %4107 = vmatpush3.bf16.msra.mxu1 %v4693_v32 }
 0x12b   : > { %v2241_v39 = vpop.f32.mrf.mxu1  ;;  %4108 = vmatprep.subr.bf16.mxu1 %v4697_v36 }
 0x12c   : > { %v5496_v42 = vadd.f32 %v2241_v39, %v2128_v9  ;;  %v2132_v19 = vpop.f32.mrf.mxu0  ;;  %2809 = vmatmul.mubr.bf16.gmra.mxu0 %v5502_v7  ;;  %v5568_v39 = vld [vmem:[%s6437_s0 + $0xc8] ss:$20 sps:$4 sm:$0xff]  }
 0x12d   : > { %v2245_v46 = vpop.f32.mrf.mxu1  ;;  %2922 = vmatmul.mubr.bf16.gmra.mxu1 %v5508_v21  ;;  %2818 = vmatprep.mubr.bf16.mxu0 %v5516_v54 }
 0x12e   : > { %v5511_v24 = vadd.f32 %v2245_v46, %v2132_v19  ;;  %2931 = vmatprep.mubr.bf16.mxu1 %v5522_v34  ;;  %v2134_v31 = vpop.f32.mrf.mxu0  ;;  %4109 = vmatpush3.bf16.msra.mxu1 %v4698_v8  ;;  %v5574_v8 = vld [vmem:[%s6437_s0 + $0xd0] ss:$20 sps:$4 sm:$0xff]   ;;  %v5582_v19 = vld [vmem:[%s6437_s0 + $0xf4] ss:$20 sps:$4 sm:$0xff]  }
 0x12f   : > { %v2247_v45 = vpop.f32.mrf.mxu1  ;;  %4110 = vmatprep.subr.bf16.mxu1 %v4699_v12  ;;  %6472 = vst [vmem:[#allocation12_spill] sm:$0xff] %v5574_v8  ;;  %v5588_v46 = vld [vmem:[%s6437_s0 + $0xfc] ss:$20 sps:$4 sm:$0xff]  }
 0x130   : > { %v5526_v35 = vadd.f32 %v2247_v45, %v2134_v31  ;;  %v2136_v37 = vpop.f32.mrf.mxu0 }
 0x131   : > { %v2249_v63 = vpop.f32.mrf.mxu1 }
 0x132   : > { %v5528_v43 = vadd.f32 %v2249_v63, %v2136_v37  ;;  %v2138_v10 = vpop.f32.mrf.mxu0  ;;  %4111 = vmatpush3.bf16.msra.mxu1 %v4700_v57 }
 0x133   : > { %v2251_v47 = vpop.f32.mrf.mxu1  ;;  %4260 = vmatprep.subr.bf16.mxu1 %v5454_v51  ;;  %v5550_v51 = vld [vmem:[%s6437_s0 + $0xcc] ss:$20 sps:$4 sm:$0xff]  }
 0x134   : > { %v5530_v15 = vadd.f32 %v2251_v47, %v2138_v10  ;;  %v2142_v48 = vpop.f32.mrf.mxu0  ;;  %2819 = vmatmul.mubr.bf16.gmra.mxu0 %v5536_v52 }
 0x135   : > { %v2255_v16 = vpop.f32.mrf.mxu1  ;;  %2932 = vmatmul.mubr.bf16.gmra.mxu1 %v5542_v17  ;;  %2828 = vmatprep.mubr.bf16.mxu0 %v5550_v51 }
 0x136   : > { %v5545_v55 = vadd.f32 %v2255_v16, %v2142_v48  ;;  %2941 = vmatprep.mubr.bf16.mxu1 %v5556_v56  ;;  %v2144_v11 = vpop.f32.mrf.mxu0 }
 0x137   : > { %v2257_v25 = vpop.f32.mrf.mxu1 }
 0x138   : > { %v5559_v60 = vadd.f32 %v2257_v25, %v2144_v11  ;;  %v2146_v62 = vpop.f32.mrf.mxu0 }
 0x139   : > { %v2259_v30 = vpop.f32.mrf.mxu1 }
 0x13a   : > { %v5561_v6 = vadd.f32 %v2259_v30, %v2146_v62  ;;  %v2148_v32 = vpop.f32.mrf.mxu0  ;;  %v5600_v62 = vld [vmem:[%s6437_s0 + $0xf0] ss:$20 sps:$4 sm:$0xff]   ;;  %v5606_v30 = vld [vmem:[%s6437_s0 + $0xf8] ss:$20 sps:$4 sm:$0xff]  }
 0x13b   : > { %v2261_v36 = vpop.f32.mrf.mxu1  ;;  %6474 = vst [vmem:[#allocation14_spill] sm:$0xff] %v5606_v30 }
 0x13c   : > { %v5563_v14 = vadd.f32 %v2261_v36, %v2148_v32  ;;  %v2152_v26 = vpop.f32.mrf.mxu0  ;;  %2829 = vmatmul.mubr.bf16.gmra.mxu0 %v5568_v39  ;;  %v5614_v36 = vld [vmem:[%s6437_s0 + $0x11c] ss:$20 sps:$4 sm:$0xff]  }
 0x13d   : > { %v2265_v9 = vpop.f32.mrf.mxu1  ;;  %2942 = vmatmul.mubr.bf16.gmra.mxu1 %v5574_v8  ;;  %2838 = vmatprep.mubr.bf16.mxu0 %v5582_v19  ;;  %v6477_v8 = vmov 0  }
 0x13e   : > { %v5577_v12 = vadd.f32 %v2265_v9, %v2152_v26  ;;  %2951 = vmatprep.mubr.bf16.mxu1 %v5588_v46  ;;  %v2154_v31 = vpop.f32.mrf.mxu0  ;;  %v5620_v26 = vld [vmem:[%s6437_s0 + $0x124] ss:$20 sps:$4 sm:$0xff]  }
 0x13f   : > { %v2267_v45 = vpop.f32.mrf.mxu1  ;;  %6475 = vst [vmem:[#allocation15_spill] sm:$0xff] %v5620_v26 }
 0x140   : > { %v5591_v57 = vadd.f32 %v2267_v45, %v2154_v31  ;;  %v2156_v37 = vpop.f32.mrf.mxu0 }
 0x141   : > { %v2269_v63 = vpop.f32.mrf.mxu1 }
 0x142   : > { %v5593_v10 = vadd.f32 %v2269_v63, %v2156_v37  ;;  %v2158_v47 = vpop.f32.mrf.mxu0 }
 0x143   : > { %v2271_v48 = vpop.f32.mrf.mxu1 }
 0x144   : > { %v5595_v16 = vadd.f32 %v2271_v48, %v2158_v47  ;;  %v2162_v11 = vpop.f32.mrf.mxu0  ;;  %2839 = vmatmul.mubr.bf16.gmra.mxu0 %v5600_v62 }
 0x145   : > { %v2275_v25 = vpop.f32.mrf.mxu1  ;;  %2952 = vmatmul.mubr.bf16.gmra.mxu1 %v5606_v30  ;;  %2848 = vmatprep.mubr.bf16.mxu0 %v5614_v36 }
 0x146   : > { %6473 = vst [vmem:[#allocation13_spill] sm:$0xff] %v5595_v16  ;;  %v5609_v32 = vadd.f32 %v2275_v25, %v2162_v11  ;;  %2961 = vmatprep.mubr.bf16.mxu1 %v5620_v26  ;;  %v5623_v9 = vpop.f32.mrf.mxu0 }
 0x147   : > { %v5625_v31 = vpop.f32.mrf.mxu1 }
 0x148   : > { %v2166_v45 = vpop.f32.mrf.mxu0 }
 0x149   : > { %v2279_v37 = vpop.f32.mrf.mxu1 }
 0x14a   : > { %v5627_v63 = vadd.f32 %v2279_v37, %v2166_v45  ;;  %v5629_v47 = vpop.f32.mrf.mxu0  ;;  %v5642_v45 = vld [vmem:[%s6437_s0 + $0x120] ss:$20 sps:$4 sm:$0xff]  }
 0x14b   : > { %v5631_v48 = vpop.f32.mrf.mxu1  ;;  %6476 = vst [vmem:[#allocation16_spill] sm:$0xff] %v5642_v45 }
 0x14c   : > { %v2172_v11 = vpop.f32.mrf.mxu0  ;;  %2849 = vmatmul.mubr.bf16.gmra.mxu0 %v5636_v4 }
 0x14d   : > { %v2285_v25 = vpop.f32.mrf.mxu1  ;;  %2962 = vmatmul.mubr.bf16.gmra.mxu1 %v5642_v45  ;;  %3004 = vmatprep.mubr.bf16.mxu0 %v6477_v8 }
 0x14e   : > { %v5645_v37 = vadd.f32 %v2285_v25, %v2172_v11  ;;  %3117 = vmatprep.mubr.bf16.mxu1 %v5374_v13  ;;  %v5649_v56 = vpop.f32.mrf.mxu0  ;;  %v4703_v11 = vld [vmem:[%s4840_s23 + $0x6a8] ss:$28 sps:$4 sm:$0xff]  }
 0x14f   : > { %v5651_v17 = vpop.f32.mrf.mxu1  ;;  %v5666_v13 = vld [vmem:[%s6437_s0 + $0x10] ss:$20 sps:$4 sm:$0xff]  }
 0x150   : > { %v2176_v34 = vpop.f32.mrf.mxu0  ;;  %6480 = vst [vmem:[#allocation19_spill] sm:$0xff] %v5666_v13 }
 0x151   : > { %v2289_v21 = vpop.f32.mrf.mxu1 }
 0x152   : > { %v5653_v29 = vadd.f32 %v2289_v21, %v2176_v34  ;;  %v5656_v44 = vpop.f32.mrf.mxu0  ;;  %v4704_v21 = vld [vmem:[%s4840_s23 + $0x4e8] ss:$28 sps:$4 sm:$0xff]  }
 0x153   : > { %v5658_v45 = vpop.f32.mrf.mxu1 }
 0x154   : > { %6478 = vst [vmem:[#allocation17_spill] sm:$0xff] %v5653_v29  ;;  %v2328_v25 = vpop.f32.mrf.mxu0  ;;  %4046 = vmatmul.mubr.msk.bf16.vlgmr.msra.gmra.mxu0 %vm2043_vm0, %v5666_v13  ;;  %v4706_v13 = vld [vmem:[%s4840_s23 + $0x4b0] ss:$28 sps:$4 sm:$0xff]  }
 0x155   : > { %v5661_v53 = vpop.f32.mrf.mxu1  ;;  %3118 = vmatmul.mubr.bf16.vlgmr.msra.gmra.mxu1 %v5385_v22  ;;  %4161 = vmatpush3.bf16.msra.mxu0 %v4702_v0 }
 0x156   : > { %6479 = vst [vmem:[#allocation18_spill] sm:$0xff] %v5661_v53  ;;  %4268 = vmatpush3.bf16.msra.mxu1 %v4702_v0  ;;  %v2330_v34 = vpop.f32.mrf.mxu0  ;;  %3014 = vmatprep.mubr.bf16.mxu0 %v6477_v8  ;;  %v4705_v53 = vld [vmem:[%s4840_s23 + $0x670] ss:$28 sps:$4 sm:$0xff]  }
 0x157   : > { %v5672_v26 = vpop.f32.mrf.mxu1  ;;  %3125 = vmatprep.mubr.bf16.mxu1 %v5401_v49  ;;  %4162 = vmatprep.subr.bf16.mxu0 %v4703_v11 }
 0x158   : > { %6481 = vst [vmem:[#allocation20_spill] sm:$0xff] %v5672_v26  ;;  %4261 = vmatprep.subr.bf16.mxu1 %v4703_v11  ;;  %v2332_v20 = vpop.f32.mrf.mxu0  ;;  %v4707_v26 = vld [vmem:[%s4840_s23 + $0x638] ss:$28 sps:$4 sm:$0xff]  }
 0x159   : > { %v5677_v30 = vpop.f32.mrf.mxu1  ;;  %4163 = vmatpush3.bf16.msra.mxu0 %v4704_v21  ;;  %v5690_v11 = vld [vmem:[%s6437_s0 + $0x38] ss:$20 sps:$4 sm:$0xff]  }
 0x15a   : > { %6482 = vst [vmem:[#allocation21_spill] sm:$0xff] %v5677_v30  ;;  %4269 = vmatpush3.bf16.msra.mxu1 %v4704_v21  ;;  %v2334_v22 = vpop.f32.mrf.mxu0  ;;  %4164 = vmatprep.subr.bf16.mxu0 %v4705_v53  ;;  %6485 = vst [vmem:[#allocation24_spill] sm:$0xff] %v5690_v11 }
 0x15b   : > { %v5679_v0 = vpop.f32.mrf.mxu1  ;;  %4262 = vmatprep.subr.bf16.mxu1 %v4705_v53 }
 0x15c   : > { %6483 = vst [vmem:[#allocation22_spill] sm:$0xff] %v5679_v0  ;;  %v5683_v5 = vpop.f32.mrf.mxu0  ;;  %4047 = vmatmul.mubr.msk.bf16.gmra.mxu0 %vm2043_vm0, %v5690_v11  ;;  %v4709_v0 = vld [vmem:[%s4840_s23 + $0x600] ss:$28 sps:$4 sm:$0xff]  }
 0x15d   : > { %v5685_v49 = vpop.f32.mrf.mxu1  ;;  %3126 = vmatmul.mubr.bf16.gmra.mxu1 %v5425_v40  ;;  %3024 = vmatprep.mubr.bf16.mxu0 %v6477_v8 }
 0x15e   : > { %6484 = vst [vmem:[#allocation23_spill] sm:$0xff] %v5685_v49  ;;  %3133 = vmatprep.mubr.bf16.mxu1 %v5439_v3  ;;  %v5697_v53 = vpop.f32.mrf.mxu0  ;;  %4165 = vmatpush3.bf16.msra.mxu0 %v4706_v13  ;;  %v4708_v49 = vld [vmem:[%s4840_s23 + $0x478] ss:$28 sps:$4 sm:$0xff]   ;;  %v4710_v3 = vld [vmem:[%s4840_s23 + $0x440] ss:$28 sps:$4 sm:$0xff]  }
 0x15f   : > { %v5699_v21 = vpop.f32.mrf.mxu1  ;;  %4270 = vmatpush3.bf16.msra.mxu1 %v4706_v13  ;;  %4166 = vmatprep.subr.bf16.mxu0 %v4707_v26 }
 0x160   : > { %6486 = vst [vmem:[#allocation25_spill] sm:$0xff] %v5699_v21  ;;  %4263 = vmatprep.subr.bf16.mxu1 %v4707_v26  ;;  %v5703_v30 = vpop.f32.mrf.mxu0  ;;  %v4711_v21 = vld [vmem:[%s4840_s23 + $0x5c8] ss:$28 sps:$4 sm:$0xff]   ;;  %v5718_v26 = vld [vmem:[%s6437_s0 + $0x60] ss:$20 sps:$4 sm:$0xff]  }
 0x161   : > { %v5705_v11 = vpop.f32.mrf.mxu1  ;;  %6490 = vst [vmem:[#allocation29_spill] sm:$0xff] %v5718_v26 }
 0x162   : > { %6487 = vst [vmem:[#allocation26_spill] sm:$0xff] %v5705_v11  ;;  %v5707_v40 = vpop.f32.mrf.mxu0  ;;  %4167 = vmatpush3.bf16.msra.mxu0 %v4708_v49 }
 0x163   : > { %v5709_v29 = vpop.f32.mrf.mxu1  ;;  %4271 = vmatpush3.bf16.msra.mxu1 %v4708_v49  ;;  %4168 = vmatprep.subr.bf16.mxu0 %v4709_v0  ;;  %v5724_v49 = vadd.f32 %v2328_v25, %v5394_v41 }
 0x164   : > { %6488 = vst [vmem:[#allocation27_spill] sm:$0xff] %v5709_v29  ;;  %4264 = vmatprep.subr.bf16.mxu1 %v4709_v0  ;;  %v2348_v13 = vpop.f32.mrf.mxu0  ;;  %4048 = vmatmul.mubr.msk.bf16.gmra.mxu0 %vm2043_vm0, %v5718_v26  ;;  %v5735_v26 = vadd.f32 %v2330_v34, %v5412_v50 }
 0x165   : > { %v5713_v16 = vpop.f32.mrf.mxu1  ;;  %3134 = vmatmul.mubr.bf16.gmra.mxu1 %v5466_v27  ;;  %v5727_v0 = vadd.f32 %v2348_v13, %v5475_v1  ;;  %3034 = vmatprep.mubr.bf16.mxu0 %v6477_v8  ;;  %v4713_v1 = vld [vmem:[%s4840_s23 + $0x590] ss:$28 sps:$4 sm:$0xff]  }
 0x166   : > { %6489 = vst [vmem:[#allocation28_spill] sm:$0xff] %v5713_v16  ;;  %3141 = vmatprep.mubr.bf16.mxu1 %v5480_v18  ;;  %v2350_v29 = vpop.f32.mrf.mxu0  ;;  %4169 = vmatpush3.bf16.msra.mxu0 %v4710_v3  ;;  %v4712_v16 = vld [vmem:[%s4840_s23 + $0x408] ss:$28 sps:$4 sm:$0xff]  }
 0x167   : > { %v5731_v11 = vpop.f32.mrf.mxu1  ;;  %4272 = vmatpush3.bf16.msra.mxu1 %v4710_v3  ;;  %v5740_v27 = vadd.f32 %v2350_v29, %v5490_v33  ;;  %4170 = vmatprep.subr.bf16.mxu0 %v4711_v21  ;;  %v5746_v3 = vadd.f32 %v2332_v20, %v5414_v28  ;;  %v4714_v29 = vld [vmem:[%s4840_s23 + $0x3d0] ss:$28 sps:$4 sm:$0xff]   ;;  %v5757_v33 = vadd.f32 %v2334_v22, %v5418_v59  ;;  %v4715_v28 = vld [vmem:[%s4840_s23 + $0x558] ss:$28 sps:$4 sm:$0xff]  }
 0x168   : > { %4265 = vmatprep.subr.bf16.mxu1 %v4711_v21  ;;  %v2352_v18 = vpop.f32.mrf.mxu0  ;;  %v5777_v59 = vadd.f32 %v5683_v5, %v5434_v2  ;;  %v5791_v5 = vadd.f32 %v5697_v53, %v5450_v61 }
 0x169   : > { %v5743_v25 = vpop.f32.mrf.mxu1  ;;  %v5751_v34 = vadd.f32 %v2352_v18, %v5493_v38 }
 0x16a   : > { %v2354_v13 = vpop.f32.mrf.mxu0  ;;  %4171 = vmatpush3.bf16.msra.mxu0 %v4712_v16 }
 0x16b   : > { %v5753_v41 = vpop.f32.mrf.mxu1  ;;  %4273 = vmatpush3.bf16.msra.mxu1 %v4712_v16  ;;  %v5762_v20 = vadd.f32 %v2354_v13, %v5496_v42  ;;  %4172 = vmatprep.subr.bf16.mxu0 %v4713_v1  ;;  %v5770_v16 = vld [vmem:[%s6437_s0 + $0x88] ss:$20 sps:$4 sm:$0xff]  }
 0x16c   : > { %4266 = vmatprep.subr.bf16.mxu1 %v4713_v1  ;;  %v2358_v38 = vpop.f32.mrf.mxu0  ;;  %4049 = vmatmul.mubr.msk.bf16.gmra.mxu0 %vm2043_vm0, %v5770_v16 }
 0x16d   : > { %v5765_v18 = vpop.f32.mrf.mxu1  ;;  %3142 = vmatmul.mubr.bf16.gmra.mxu1 %v5502_v7  ;;  %v5782_v22 = vadd.f32 %v2358_v38, %v5511_v24  ;;  %3044 = vmatprep.mubr.bf16.mxu0 %v6477_v8  ;;  %v4716_v7 = vld [vmem:[%s4840_s23 + $0x398] ss:$28 sps:$4 sm:$0xff]   ;;  %v5799_v38 = vld [vmem:[%s4840_s23 + $0x7c0] ss:$28 sps:$4 sm:$0xff]  }
 0x16e   : > { %3149 = vmatprep.mubr.bf16.mxu1 %v5516_v54  ;;  %v2360_v1 = vpop.f32.mrf.mxu0  ;;  %4173 = vmatpush3.bf16.msra.mxu0 %v4714_v29 }
 0x16f   : > { %v5786_v13 = vpop.f32.mrf.mxu1  ;;  %4274 = vmatpush3.bf16.msra.mxu1 %v4714_v29  ;;  %v5796_v24 = vadd.f32 %v2360_v1, %v5526_v35  ;;  %4174 = vmatprep.subr.bf16.mxu0 %v4715_v28  ;;  %v5805_v29 = vadd.f32 %v5703_v30, %v5456_v23 }
 0x170   : > { %4267 = vmatprep.subr.bf16.mxu1 %v4715_v28  ;;  %v2362_v54 = vpop.f32.mrf.mxu0  ;;  %v5816_v28 = vadd.f32 %v5707_v40, %v5459_v58 }
 0x171   : > { %v5801_v42 = vpop.f32.mrf.mxu1  ;;  %v5810_v53 = vadd.f32 %v2362_v54, %v5528_v43  ;;  %v5829_v54 = vld [vmem:[%s6437_s0 + $0xb0] ss:$20 sps:$4 sm:$0xff]  }
 0x172   : > { %6491 = vst [vmem:[#allocation30_spill] sm:$0xff] %v5801_v42  ;;  %v2364_v2 = vpop.f32.mrf.mxu0  ;;  %4175 = vmatpush3.bf16.msra.mxu0 %v4716_v7 }
 0x173   : > { %v5812_v35 = vpop.f32.mrf.mxu1  ;;  %4275 = vmatpush3.bf16.msra.mxu1 %v4716_v7  ;;  %v5821_v23 = vadd.f32 %v2364_v2, %v5530_v15 }
 0x174   : > { %6492 = vst [vmem:[#allocation31_spill] sm:$0xff] %v5812_v35  ;;  %4236 = vmatprep.subr.bf16.mxu1 %v5799_v38  ;;  %v2368_v30 = vpop.f32.mrf.mxu0  ;;  %4050 = vmatmul.mubr.msk.bf16.gmra.mxu0 %vm2043_vm0, %v5829_v54 }
 0x175   : > { %v5824_v43 = vpop.f32.mrf.mxu1  ;;  %3150 = vmatmul.mubr.bf16.gmra.mxu1 %v5536_v52  ;;  %3054 = vmatprep.mubr.bf16.mxu0 %v6477_v8  ;;  %v5849_v52 = vld [vmem:[%s6437_s0 + $0xd8] ss:$20 sps:$4 sm:$0xff]  }
 0x176   : > { %6493 = vst [vmem:[#allocation32_spill] sm:$0xff] %v5824_v43  ;;  %3157 = vmatprep.mubr.bf16.mxu1 %v5550_v51  ;;  %v2370_v15 = vpop.f32.mrf.mxu0  ;;  %6498 = vst [vmem:[#allocation37_spill] sm:$0xff] %v5849_v52 }
 0x177   : > { %v5838_v40 = vpop.f32.mrf.mxu1 }
 0x178   : > { %6494 = vst [vmem:[#allocation33_spill] sm:$0xff] %v5838_v40  ;;  %v2372_v7 = vpop.f32.mrf.mxu0 }
 0x179   : > { %v5840_v2 = vpop.f32.mrf.mxu1 }
 0x17a   : > { %6495 = vst [vmem:[#allocation34_spill] sm:$0xff] %v5840_v2  ;;  %v2374_v1 = vpop.f32.mrf.mxu0 }
 0x17b   : > { %v5842_v61 = vpop.f32.mrf.mxu1 }
 0x17c   : > { %6496 = vst [vmem:[#allocation35_spill] sm:$0xff] %v5842_v61  ;;  %v2378_v21 = vpop.f32.mrf.mxu0  ;;  %4051 = vmatmul.mubr.msk.bf16.gmra.mxu0 %vm2043_vm0, %v5849_v52 }
 0x17d   : > { %v5844_v50 = vpop.f32.mrf.mxu1  ;;  %3158 = vmatmul.mubr.bf16.gmra.mxu1 %v5568_v39  ;;  %3064 = vmatprep.mubr.bf16.mxu0 %v6477_v8  ;;  %v5871_v39 = vld [vmem:[%s6437_s0 + $0x100] ss:$20 sps:$4 sm:$0xff]  }
 0x17e   : > { %6497 = vst [vmem:[#allocation36_spill] sm:$0xff] %v5844_v50  ;;  %3165 = vmatprep.mubr.bf16.mxu1 %v5582_v19  ;;  %v2380_v51 = vpop.f32.mrf.mxu0  ;;  %6503 = vst [vmem:[#allocation42_spill] sm:$0xff] %v5871_v39  ;;  %v2278_v19 = vadd.f32 %v5625_v31, %v5623_v9  ;;  %v2282_v9 = vadd.f32 %v5631_v48, %v5629_v47  ;;  %v6505_v47 = vmax.f32 %v5735_v26, %v5740_v27 }
 0x17f   : > { %v5856_v58 = vpop.f32.mrf.mxu1  ;;  %v6506_v26 = vmax.f32 %v5746_v3, %v5751_v34 }
 0x180   : > { %6499 = vst [vmem:[#allocation38_spill] sm:$0xff] %v5856_v58  ;;  %v5858_v61 = vpop.f32.mrf.mxu0  ;;  %v5880_v58 = vpop.permute.xlu0 %3466 }
 0x181   : > { %v5860_v50 = vpop.f32.mrf.mxu1 }
 0x182   : > { %6500 = vst [vmem:[#allocation39_spill] sm:$0xff] %v5860_v50  ;;  %v5862_v2 = vpop.f32.mrf.mxu0  ;;  %v2369_v50 = vadd.f32 %v2368_v30, %v5545_v55 }
 0x183   : > { %v5864_v40 = vpop.f32.mrf.mxu1 }
 0x184   : > { %6501 = vst [vmem:[#allocation40_spill] sm:$0xff] %v5864_v40  ;;  %v2388_v43 = vpop.f32.mrf.mxu0  ;;  %4052 = vmatmul.mubr.msk.bf16.gmra.mxu0 %vm2043_vm0, %v5871_v39  ;;  %v2371_v39 = vadd.f32 %v2370_v15, %v5559_v60  ;;  %v2375_v60 = vadd.f32 %v2374_v1, %v5563_v14  ;;  %v5913_v14 = vld [vmem:[%s6437_s0 + $0x128] ss:$20 sps:$4 sm:$0xff]   ;;  %v2379_v1 = vadd.f32 %v2378_v21, %v5577_v12 }
 0x185   : > { %v5866_v35 = vpop.f32.mrf.mxu1  ;;  %3166 = vmatmul.mubr.bf16.gmra.mxu1 %v5600_v62  ;;  %v2389_v40 = vadd.f32 %v2388_v43, %v5609_v32  ;;  %3074 = vmatprep.mubr.bf16.mxu0 %v6477_v8  ;;  %v2373_v32 = vadd.f32 %v2372_v7, %v5561_v6  ;;  %v6504_v8 = vmax.f32 %v5724_v49, %v5727_v0  ;;  %v5903_v7 = vpop.permute.xlu0 %3471 }
 0x186   : > { %6502 = vst [vmem:[#allocation41_spill] sm:$0xff] %v5866_v35  ;;  %3173 = vmatprep.mubr.bf16.mxu1 %v5614_v36  ;;  %v2390_v35 = vpop.f32.mrf.mxu0  ;;  %v2288_v49 = vadd.f32 %v5651_v17, %v5649_v56 }
 0x187   : > { %v5884_v52 = vpop.f32.mrf.mxu1  ;;  %v3404_v42 = vmax.f32 %v2369_v50, %v2389_v40  ;;  %v2391_v62 = vadd.f32 %v2390_v35, %v2278_v19 }
 0x188   : > { %v2392_v55 = vpop.f32.mrf.mxu0 }
 0x189   : > { %v5889_v31 = vpop.f32.mrf.mxu1  ;;  %v3432_v36 = vmax.f32 %v6504_v8, %v3404_v42  ;;  %v3405_v30 = vmax.f32 %v2371_v39, %v2391_v62  ;;  %v2393_v43 = vadd.f32 %v2392_v55, %v5627_v63  ;;  %v4761_v42 = vld [vmem:[%s6437_s0 + $0xc] ss:$20 sps:$4 sm:$0xff]   ;;  %v2381_v39 = vadd.f32 %v2380_v51, %v5591_v57 }
 0x18a   : > { %v2394_v50 = vpop.f32.mrf.mxu0 }
 0x18b   : > { %v5897_v35 = vpop.f32.mrf.mxu1  ;;  %v3433_v48 = vmax.f32 %v6505_v47, %v3405_v30  ;;  %v3411_v15 = vmax.f32 %v2373_v32, %v2393_v43  ;;  %v3484_v40 = vadd.f32 %v5880_v58, %v3432_v36  ;;  %v2395_v6 = vadd.f32 %v2394_v50, %v2282_v9  ;;  %v6508_v30 = vld [vmem:[#allocation13_spill] sm:$0xff] }
 0x18c   : > { %v2398_v63 = vpop.f32.mrf.mxu0  ;;  %4053 = vmatmul.mubr.msk.bf16.gmra.mxu0 %vm2043_vm0, %v5913_v14  ;;  %v6507_v9 = vmax.f32 %v5757_v33, %v5762_v20  ;;  %v2292_v33 = vadd.f32 %v5658_v45, %v5656_v44  ;;  %v2383_v36 = vadd.f32 %v5858_v61, %v5593_v10  ;;  %v2385_v43 = vadd.f32 %v5862_v2, %v6508_v30  ;;  %v6510_v47 = vld [vmem:[#allocation17_spill] sm:$0xff]  ;;  %v4718_v44 = vld [vmem:[%s4840_s23 + $0x788] ss:$28 sps:$4 sm:$0xff]   ;;  %v6518_v30 = vld [vmem:[#allocation4_spill] sm:$0xff] }
 0x18d   : > { %v5908_v0 = vpop.f32.mrf.mxu1  ;;  %3174 = vmatmul.mubr.bf16.gmra.mxu1 %v5636_v4  ;;  %v3439_v27 = vmax.f32 %v6506_v26, %v3411_v15  ;;  %v3485_v17 = vadd.f32 %v5880_v58, %v3433_v48  ;;  %v3412_v56 = vmax.f32 %v2375_v60, %v2395_v6  ;;  %3214 = vmatprep.mubr.bf16.mxu0 %v4761_v42  ;;  %v3512_v19 = vmax.f32 %v3484_v40, 0.0  ;;  %v6512_v26 = vld [vmem:[#allocation2_spill] sm:$0xff] }
 0x18e   : > { %3262 = vmatprep.mubr.bf16.mxu1 %v5588_v46  ;;  %v2399_v4 = vadd.f32 %v2398_v63, %v5645_v37  ;;  %v2400_v62 = vpop.f32.mrf.mxu0  ;;  %v5935_v46 = vpop.permute.xlu1 %3476  ;;  %v6509_v60 = vmax.f32 %v5777_v59, %v5782_v22 }
 0x18f   : > { %v5929_v3 = vpop.f32.mrf.mxu1  ;;  %v3513_v34 = vmax.f32 %v3485_v17, 0.0  ;;  %v3440_v55 = vmax.f32 %v6507_v9, %v3412_v56  ;;  %v3491_v32 = vadd.f32 %v5903_v7, %v3439_v27  ;;  %v2401_v8 = vadd.f32 %v2400_v62, %v2288_v49  ;;  %v6513_v27 = vld [vmem:[#allocation14_spill] sm:$0xff]  ;;  %v4719_v62 = vld [vmem:[%s4840_s23 + $0x750] ss:$28 sps:$4 sm:$0xff]  }
 0x190   : > { %v3418_v12 = vmax.f32 %v2379_v1, %v2399_v4  ;;  %v2402_v57 = vpop.f32.mrf.mxu0  ;;  %v6511_v49 = vmax.f32 %v5791_v5, %v5796_v24  ;;  %v6514_v24 = vmax.f32 %v5805_v29, %v5810_v53  ;;  %v6515_v4 = vld [vmem:[#allocation3_spill] sm:$0xff] }
 0x191   : > { %v5942_v37 = vpop.f32.mrf.mxu1  ;;  %v4080_v21 = vpack.c.bf16 %v3513_v34, %v3512_v19  ;;  %v3492_v20 = vadd.f32 %v5903_v7, %v3440_v55  ;;  %v3419_v51 = vmax.f32 %v2381_v39, %v2401_v8  ;;  %v2403_v48 = vadd.f32 %v2402_v57, %v6510_v47 }
 0x192   : > { %v3446_v50 = vmax.f32 %v6509_v60, %v3418_v12  ;;  %v2404_v15 = vpop.f32.mrf.mxu0  ;;  %v3519_v45 = vmax.f32 %v3491_v32, 0.0  ;;  %v5967_v5 = vpop.permute.xlu1 %3481  ;;  %v6517_v32 = vld [vmem:[#allocation15_spill] sm:$0xff] }
 0x193   : > { %v5955_v40 = vpop.f32.mrf.mxu1  ;;  %3628 = vst [vmem:[%s5940_s11] sm:$0xff] %v4080_v21  ;;  %v3520_v6 = vmax.f32 %v3492_v20, 0.0  ;;  %v3447_v10 = vmax.f32 %v6511_v49, %v3419_v51  ;;  %v2405_v61 = vadd.f32 %v2404_v15, %v2292_v33  ;;  %v3425_v63 = vmax.f32 %v2383_v36, %v2403_v48  ;;  %v4720_v20 = vld [vmem:[%s4840_s23 + $0x718] ss:$28 sps:$4 sm:$0xff]   ;;  %v6521_v15 = vld [vmem:[#allocation19_spill] sm:$0xff] }
 0x194   : > { %v3498_v2 = vadd.f32 %v5935_v46, %v3446_v50  ;;  %v2554_v59 = vpop.f32.mrf.mxu0  ;;  %3215 = vmatmul.mubr.bf16.vlgmr.msra.gmra.mxu0 %v6512_v26  ;;  %v6520_v50 = vld [vmem:[#allocation5_spill] sm:$0xff]  ;;  %v6523_v26 = vld [vmem:[#allocation6_spill] sm:$0xff] }
 0x195   : > { %v2667_v22 = vpop.f32.mrf.mxu1  ;;  %3263 = vmatmul.mubr.bf16.vlgmr.msra.gmra.mxu1 %v6513_v27  ;;  %v4084_v17 = vpack.c.bf16 %v3520_v6, %v3519_v45  ;;  %v3499_v56 = vadd.f32 %v5935_v46, %v3447_v10  ;;  %v3426_v42 = vmax.f32 %v2385_v43, %v2405_v61  ;;  %v3453_v1 = vmax.f32 %v6514_v24, %v3425_v63  ;;  %v6519_v43 = vld [vmem:[#allocation16_spill] sm:$0xff]  ;;  %v6522_v10 = vld [vmem:[#allocation18_spill] sm:$0xff] }
 0x196   : > { %4237 = vmatpush3.bf16.msra.mxu1 %v5799_v38  ;;  %v2556_v39 = vpop.f32.mrf.mxu0  ;;  %3222 = vmatprep.mubr.bf16.mxu0 %v6515_v4  ;;  %v3526_v34 = vmax.f32 %v3498_v2, 0.0  ;;  %v6516_v38 = vmax.f32 %v5816_v28, %v5821_v23  ;;  %v2555_v61 = vadd.f32 %v2554_v59, %v6522_v10  ;;  %v6524_v27 = vld [vmem:[#allocation24_spill] sm:$0xff]  ;;  %v6528_v4 = vld [vmem:[#allocation29_spill] sm:$0xff] }
 0x197   : > { %v2669_v19 = vpop.f32.mrf.mxu1  ;;  %4238 = vmatprep.subr.bf16.mxu1 %v4718_v44  ;;  %3632 = vst [vmem:[%s5940_s11 + $0x1c] sm:$0xff] %v4084_v17  ;;  %v3527_v9 = vmax.f32 %v3499_v56, 0.0  ;;  %3270 = vmatprep.mubr.bf16.mxu1 %v6517_v32  ;;  %v3505_v29 = vadd.f32 %v5967_v5, %v3453_v1  ;;  %v6525_v17 = vld [vmem:[#allocation20_spill] sm:$0xff]  ;;  %v6527_v1 = vld [vmem:[#allocation7_spill] sm:$0xff]  ;;  %v6529_v59 = vld [vmem:[#allocation21_spill] sm:$0xff] }
 0x198   : > { %v3454_v55 = vmax.f32 %v6516_v38, %v3426_v42  ;;  %v2558_v53 = vpop.f32.mrf.mxu0  ;;  %v2557_v56 = vadd.f32 %v2556_v39, %v6525_v17  ;;  %v6526_v42 = vld [vmem:[#allocation28_spill] sm:$0xff]  ;;  %v6532_v10 = vld [vmem:[#allocation25_spill] sm:$0xff]  ;;  %v6535_v17 = vld [vmem:[#allocation26_spill] sm:$0xff] }
 0x199   : > { %v2671_v8 = vpop.f32.mrf.mxu1  ;;  %v4088_v12 = vpack.c.bf16 %v3527_v9, %v3526_v34  ;;  %v3533_v51 = vmax.f32 %v3505_v29, 0.0  ;;  %v6000_v9 = vadd.f32 %v2667_v22, %v2555_v61  ;;  %v2559_v38 = vadd.f32 %v2558_v53, %v6529_v59  ;;  %v6530_v29 = vld [vmem:[#allocation22_spill] sm:$0xff] }
 0x19a   : > { %v3506_v57 = vadd.f32 %v5967_v5, %v3454_v55  ;;  %4239 = vmatpush3.bf16.msra.mxu1 %v4718_v44  ;;  %v2560_v33 = vpop.f32.mrf.mxu0  ;;  %v6537_v59 = vld [vmem:[#allocation30_spill] sm:$0xff] }
 0x19b   : > { %v2673_v21 = vpop.f32.mrf.mxu1  ;;  %4240 = vmatprep.subr.bf16.mxu1 %v4719_v62  ;;  %3636 = vst [vmem:[%s5940_s11 + $0x38] sm:$0xff] %v4088_v12  ;;  %v2561_v12 = vadd.f32 %v2560_v33, %v6530_v29 }
 0x19c   : > { %v3534_v36 = vmax.f32 %v3506_v57, 0.0  ;;  %v2564_v28 = vpop.f32.mrf.mxu0  ;;  %3223 = vmatmul.mubr.bf16.gmra.mxu0 %v6518_v30  ;;  %v6531_v30 = vld [vmem:[#allocation23_spill] sm:$0xff] }
 0x19d   : > { %v2677_v23 = vpop.f32.mrf.mxu1  ;;  %3271 = vmatmul.mubr.bf16.gmra.mxu1 %v6519_v43  ;;  %3230 = vmatprep.mubr.bf16.mxu0 %v6520_v50  ;;  %v2565_v43 = vadd.f32 %v2564_v28, %v6531_v30  ;;  %v6015_v50 = vadd.f32 %v2671_v8, %v2559_v38  ;;  %v6540_v30 = vld [vmem:[#allocation37_spill] sm:$0xff] }
 0x19e   : > { %v4092_v60 = vpack.c.bf16 %v3534_v36, %v3533_v51  ;;  %4241 = vmatpush3.bf16.msra.mxu1 %v4719_v62  ;;  %v2566_v47 = vpop.f32.mrf.mxu0  ;;  %4244 = vmatprep.mubr.msk.bf16.mxu1 %vm2043_vm0, %v6521_v15  ;;  %v6022_v15 = vadd.f32 %v2673_v21, %v2561_v12  ;;  %v6538_v12 = vld [vmem:[#allocation31_spill] sm:$0xff] }
 0x19f   : > { %v2679_v48 = vpop.f32.mrf.mxu1  ;;  %4242 = vmatprep.subr.bf16.mxu1 %v4720_v20  ;;  %v2567_v61 = vadd.f32 %v2566_v47, %v6532_v10 }
 0x1a0   : > { %3640 = vst [vmem:[%s5940_s11 + $0x54] sm:$0xff] %v4092_v60  ;;  %v2568_v44 = vpop.f32.mrf.mxu0 }
 0x1a1   : > { %v2681_v45 = vpop.f32.mrf.mxu1 }
 0x1a2   : > { %4243 = vmatpush3.bf16.msra.mxu1 %v4720_v20  ;;  %v2570_v6 = vpop.f32.mrf.mxu0  ;;  %v6007_v20 = vadd.f32 %v2669_v19, %v2557_v56  ;;  %v2569_v56 = vadd.f32 %v2568_v44, %v6535_v17 }
 0x1a3   : > { %v5989_v49 = vpop.f32.mrf.mxu1 }
 0x1a4   : > { %v2574_v63 = vpop.f32.mrf.mxu0  ;;  %3231 = vmatmul.mubr.bf16.gmra.mxu0 %v6523_v26  ;;  %v6052_v29 = vadd.f32 %v2681_v45, %v2569_v56 }
 0x1a5   : > { %v2687_v2 = vpop.f32.mrf.mxu1  ;;  %4245 = vmatmul.mubr.msk.bf16.vlgmr.msra.gmra.mxu1 %vm2043_vm0, %v6524_v27  ;;  %v2575_v24 = vadd.f32 %v2574_v63, %v6526_v42  ;;  %3238 = vmatprep.mubr.bf16.mxu0 %v6527_v1  ;;  %v6534_v27 = vld [vmem:[#allocation9_spill] sm:$0xff]  ;;  %v6044_v1 = vadd.f32 %v2679_v48, %v2567_v61 }
 0x1a6   : > { %4248 = vmatprep.mubr.msk.bf16.mxu1 %vm2043_vm0, %v6528_v4  ;;  %v2576_v62 = vpop.f32.mrf.mxu0 }
 0x1a7   : > { %v2689_v34 = vpop.f32.mrf.mxu1  ;;  %v6003_v55 = vadd.f32 %v2687_v2, %v2575_v24  ;;  %v2577_v32 = vadd.f32 %v2576_v62, %v5731_v11  ;;  %v6536_v62 = vld [vmem:[#allocation27_spill] sm:$0xff] }
 0x1a8   : > { %v2578_v39 = vpop.f32.mrf.mxu0 }
 0x1a9   : > { %v2691_v57 = vpop.f32.mrf.mxu1  ;;  %v6011_v36 = vadd.f32 %v2689_v34, %v2577_v32  ;;  %v2579_v22 = vadd.f32 %v2578_v39, %v5743_v25  ;;  %v6533_v25 = vld [vmem:[#allocation8_spill] sm:$0xff]  ;;  %v2571_v34 = vadd.f32 %v2570_v6, %v6536_v62 }
 0x1aa   : > { %v2580_v53 = vpop.f32.mrf.mxu0 }
 0x1ab   : > { %v2693_v60 = vpop.f32.mrf.mxu1  ;;  %v6019_v33 = vadd.f32 %v2691_v57, %v2579_v22  ;;  %v2581_v19 = vadd.f32 %v2580_v53, %v5753_v41  ;;  %v6036_v41 = vadd.f32 %v2677_v23, %v2565_v43  ;;  %v6539_v22 = vld [vmem:[#allocation10_spill] sm:$0xff]  ;;  %v6063_v43 = vadd.f32 %v5989_v49, %v2571_v34  ;;  %v6544_v34 = vld [vmem:[#allocation32_spill] sm:$0xff] }
 0x1ac   : > { %v2584_v63 = vpop.f32.mrf.mxu0  ;;  %3239 = vmatmul.mubr.bf16.gmra.mxu0 %v6533_v25 }
 0x1ad   : > { %v2697_v2 = vpop.f32.mrf.mxu1  ;;  %4249 = vmatmul.mubr.msk.bf16.gmra.mxu1 %vm2043_vm0, %v5770_v16  ;;  %v6030_v28 = vadd.f32 %v2693_v60, %v2581_v19  ;;  %v2585_v26 = vadd.f32 %v2584_v63, %v5765_v18  ;;  %3246 = vmatprep.mubr.bf16.mxu0 %v6534_v27  ;;  %v6541_v60 = vld [vmem:[#allocation11_spill] sm:$0xff]  ;;  %v6542_v19 = vld [vmem:[#allocation42_spill] sm:$0xff] }
 0x1ae   : > { %4252 = vmatprep.mubr.msk.bf16.mxu1 %vm2043_vm0, %v5829_v54  ;;  %v2586_v21 = vpop.f32.mrf.mxu0 }
 0x1af   : > { %v2699_v47 = vpop.f32.mrf.mxu1  ;;  %v6041_v42 = vadd.f32 %v2697_v2, %v2585_v26  ;;  %v2587_v24 = vadd.f32 %v2586_v21, %v5786_v13  ;;  %v6548_v13 = vld [vmem:[#allocation35_spill] sm:$0xff] }
 0x1b0   : > { %v2588_v18 = vpop.f32.mrf.mxu0 }
 0x1b1   : > { %v2701_v4 = vpop.f32.mrf.mxu1  ;;  %v6049_v23 = vadd.f32 %v2699_v47, %v2587_v24  ;;  %v2589_v44 = vadd.f32 %v2588_v18, %v6537_v59  ;;  %v6543_v47 = vld [vmem:[#allocation12_spill] sm:$0xff] }
 0x1b2   : > { %v2590_v38 = vpop.f32.mrf.mxu0 }
 0x1b3   : > { %v2703_v32 = vpop.f32.mrf.mxu1  ;;  %v6056_v48 = vadd.f32 %v2701_v4, %v2589_v44  ;;  %v2591_v39 = vadd.f32 %v2590_v38, %v6538_v12 }
 0x1b4   : > { %v2594_v57 = vpop.f32.mrf.mxu0  ;;  %3247 = vmatmul.mubr.bf16.gmra.mxu0 %v6539_v22 }
 0x1b5   : > { %v2707_v6 = vpop.f32.mrf.mxu1  ;;  %4253 = vmatmul.mubr.msk.bf16.gmra.mxu1 %vm2043_vm0, %v6540_v30  ;;  %v6067_v53 = vadd.f32 %v2703_v32, %v2591_v39  ;;  %3254 = vmatprep.mubr.bf16.mxu0 %v6541_v60  ;;  %v2595_v59 = vadd.f32 %v2594_v57, %v6544_v34  ;;  %v6545_v32 = vld [vmem:[#allocation33_spill] sm:$0xff]  ;;  %v6547_v30 = vld [vmem:[#allocation34_spill] sm:$0xff] }
 0x1b6   : > { %4256 = vmatprep.mubr.msk.bf16.mxu1 %vm2043_vm0, %v6542_v19  ;;  %v2596_v10 = vpop.f32.mrf.mxu0  ;;  %v6546_v39 = vld [vmem:[#allocation41_spill] sm:$0xff] }
 0x1b7   : > { %v2709_v61 = vpop.f32.mrf.mxu1  ;;  %v2597_v12 = vadd.f32 %v2596_v10, %v6545_v32 }
 0x1b8   : > { %v2598_v2 = vpop.f32.mrf.mxu0 }
 0x1b9   : > { %v2711_v25 = vpop.f32.mrf.mxu1  ;;  %v2599_v60 = vadd.f32 %v2598_v2, %v6547_v30  ;;  %v2710_v11 = vadd.f32 %v2709_v61, %v2597_v12  ;;  %v6549_v2 = vmax.f32 %v6000_v9, %v6003_v55  ;;  %v6552_v12 = vld [vmem:[#allocation38_spill] sm:$0xff] }
 0x1ba   : > { %v2600_v26 = vpop.f32.mrf.mxu0 }
 0x1bb   : > { %v2713_v49 = vpop.f32.mrf.mxu1  ;;  %v2601_v54 = vadd.f32 %v2600_v26, %v6548_v13  ;;  %v2712_v10 = vadd.f32 %v2711_v25, %v2599_v60  ;;  %v6550_v13 = vld [vmem:[#allocation36_spill] sm:$0xff] }
 0x1bc   : > { %v2604_v27 = vpop.f32.mrf.mxu0  ;;  %3255 = vmatmul.mubr.bf16.gmra.mxu0 %v6543_v47 }
 0x1bd   : > { %v2717_v21 = vpop.f32.mrf.mxu1  ;;  %4257 = vmatmul.mubr.msk.bf16.gmra.mxu1 %vm2043_vm0, %v5913_v14  ;;  %v2708_v14 = vadd.f32 %v2707_v6, %v2595_v59  ;;  %v2605_v26 = vadd.f32 %v2604_v27, %v6550_v13 }
 0x1be   : > { %v2606_v17 = vpop.f32.mrf.mxu0 }
 0x1bf   : > { %v2719_v56 = vpop.f32.mrf.mxu1  ;;  %v2607_v9 = vadd.f32 %v2606_v17, %v6552_v12  ;;  %v2718_v60 = vadd.f32 %v2717_v21, %v2605_v26 }
 0x1c0   : > { %v2608_v24 = vpop.f32.mrf.mxu0 }
 0x1c1   : > { %v2721_v18 = vpop.f32.mrf.mxu1 }
 0x1c2   : > { %v2610_v4 = vpop.f32.mrf.mxu0 }
 0x1c3   : > { %v6077_v62 = vpop.f32.mrf.mxu1 }
 0x1c4   : > { %v2614_v44 = vpop.f32.mrf.mxu0 }
 0x1c5   : > { %v2727_v38 = vpop.f32.mrf.mxu1  ;;  %v2615_v22 = vadd.f32 %v2614_v44, %v6546_v39 }
 0x1c6   : > { %v2616_v19 = vpop.f32.mrf.mxu0 }
 0x1c7   : > { %v2729_v47 = vpop.f32.mrf.mxu1  ;;  %v2728_v63 = vadd.f32 %v2727_v38, %v2615_v22  ;;  %v2617_v45 = vadd.f32 %v2616_v19, %v5884_v52  ;;  %v2714_v38 = vadd.f32 %v2713_v49, %v2601_v54  ;;  %v6554_v49 = vmax.f32 %v6015_v50, %v6019_v33  ;;  %v6556_v33 = vld [vmem:[#allocation40_spill] sm:$0xff] }
 0x1c8   : > { %v2618_v16 = vpop.f32.mrf.mxu0  ;;  %v2720_v50 = vadd.f32 %v2719_v56, %v2607_v9 }
 0x1c9   : > { %v2731_v8 = vpop.f32.mrf.mxu1  ;;  %v3406_v57 = vmax.f32 %v2708_v14, %v2728_v63  ;;  %v2730_v34 = vadd.f32 %v2729_v47, %v2617_v45  ;;  %v2619_v51 = vadd.f32 %v2618_v16, %v5889_v31  ;;  %v6551_v31 = vmax.f32 %v6007_v20, %v6011_v36 }
 0x1ca   : > { %v2620_v32 = vpop.f32.mrf.mxu0 }
 0x1cb   : > { %v2733_v44 = vpop.f32.mrf.mxu1  ;;  %v3434_v39 = vmax.f32 %v6549_v2, %v3406_v57  ;;  %v3407_v6 = vmax.f32 %v2710_v11, %v2730_v34  ;;  %v2732_v59 = vadd.f32 %v2731_v8, %v2619_v51  ;;  %v2621_v52 = vadd.f32 %v2620_v32, %v5897_v35  ;;  %v6553_v35 = vld [vmem:[#allocation39_spill] sm:$0xff] }
 0x1cc   : > { %v2624_v22 = vpop.f32.mrf.mxu0  ;;  %v2609_v8 = vadd.f32 %v2608_v24, %v6553_v35  ;;  %v6555_v24 = vmax.f32 %v6022_v15, %v6030_v28 }
 0x1cd   : > { %v2737_v61 = vpop.f32.mrf.mxu1  ;;  %v3486_v45 = vadd.f32 %v5880_v58, %v3434_v39  ;;  %v3435_v16 = vmax.f32 %v6551_v31, %v3407_v6  ;;  %v3413_v63 = vmax.f32 %v2712_v10, %v2732_v59  ;;  %v2734_v25 = vadd.f32 %v2733_v44, %v2621_v52 }
 0x1ce   : > { %v2625_v55 = vadd.f32 %v2624_v22, %v5908_v0  ;;  %v2626_v51 = vpop.f32.mrf.mxu0  ;;  %v2611_v10 = vadd.f32 %v2610_v4, %v6556_v33  ;;  %v6557_v52 = vmax.f32 %v6036_v41, %v6041_v42  ;;  %v6558_v41 = vmax.f32 %v6044_v1, %v6049_v23 }
 0x1cf   : > { %v2739_v11 = vpop.f32.mrf.mxu1  ;;  %v3487_v54 = vadd.f32 %v5880_v58, %v3435_v16  ;;  %v3441_v27 = vmax.f32 %v6554_v49, %v3413_v63  ;;  %v3414_v30 = vmax.f32 %v2714_v38, %v2734_v25  ;;  %v3514_v20 = vmax.f32 %v3486_v45, 0.0 }
 0x1d0   : > { %v2738_v36 = vadd.f32 %v2737_v61, %v2625_v55  ;;  %v2627_v19 = vadd.f32 %v2626_v51, %v5929_v3  ;;  %v2628_v47 = vpop.f32.mrf.mxu0  ;;  %v2722_v3 = vadd.f32 %v2721_v18, %v2609_v8  ;;  %v2724_v18 = vadd.f32 %v6077_v62, %v2611_v10 }
 0x1d1   : > { %v2741_v17 = vpop.f32.mrf.mxu1  ;;  %v3515_v14 = vmax.f32 %v3487_v54, 0.0  ;;  %v3493_v0 = vadd.f32 %v5903_v7, %v3441_v27  ;;  %v3442_v57 = vmax.f32 %v6555_v24, %v3414_v30  ;;  %v2629_v34 = vadd.f32 %v2628_v47, %v5942_v37 }
 0x1d2   : > { %v3420_v21 = vmax.f32 %v2718_v60, %v2738_v36  ;;  %v2740_v32 = vadd.f32 %v2739_v11, %v2627_v19  ;;  %v2630_v44 = vpop.f32.mrf.mxu0  ;;  %v6559_v63 = vmax.f32 %v6052_v29, %v6056_v48  ;;  %v6560_v8 = vmax.f32 %v6063_v43, %v6067_v53 }
 0x1d3   : > { %v2743_v2 = vpop.f32.mrf.mxu1  ;;  %v4081_v39 = vpack.c.bf16 %v3515_v14, %v3514_v20  ;;  %v3494_v6 = vadd.f32 %v5903_v7, %v3442_v57  ;;  %v2742_v59 = vadd.f32 %v2741_v17, %v2629_v34  ;;  %v2631_v37 = vadd.f32 %v2630_v44, %v5955_v40 }
 0x1d4   : > { %v3448_v15 = vmax.f32 %v6557_v52, %v3420_v21  ;;  %v3421_v28 = vmax.f32 %v2720_v50, %v2740_v32  ;;  %v2780_v38 = vpop.f32.mrf.mxu0  ;;  %v3521_v4 = vmax.f32 %v3493_v0, 0.0 }
 0x1d5   : > { %v2893_v56 = vpop.f32.mrf.mxu1  ;;  %3629 = vst [vmem:[%s5940_s11 + $0x8] sm:$0xff] %v4081_v39  ;;  %v3522_v13 = vmax.f32 %v3494_v6, 0.0  ;;  %v3427_v26 = vmax.f32 %v2722_v3, %v2742_v59  ;;  %v2744_v45 = vadd.f32 %v2743_v2, %v2631_v37 }
 0x1d6   : > { %v6115_v22 = vadd.f32 %v2893_v56, %v2780_v38  ;;  %v3500_v61 = vadd.f32 %v5935_v46, %v3448_v15  ;;  %v3449_v42 = vmax.f32 %v6558_v41, %v3421_v28  ;;  %v2782_v31 = vpop.f32.mrf.mxu0 }
 0x1d7   : > { %v2895_v40 = vpop.f32.mrf.mxu1  ;;  %v4085_v16 = vpack.c.bf16 %v3522_v13, %v3521_v4  ;;  %v3455_v25 = vmax.f32 %v6559_v63, %v3427_v26  ;;  %v3428_v55 = vmax.f32 %v2724_v18, %v2744_v45 }
 0x1d8   : > { %v6125_v12 = vadd.f32 %v2895_v40, %v2782_v31  ;;  %v3501_v9 = vadd.f32 %v5935_v46, %v3449_v42  ;;  %v2784_v62 = vpop.f32.mrf.mxu0  ;;  %v3528_v1 = vmax.f32 %v3500_v61, 0.0 }
 0x1d9   : > { %v2897_v51 = vpop.f32.mrf.mxu1  ;;  %3633 = vst [vmem:[%s5940_s11 + $0x24] sm:$0xff] %v4085_v16  ;;  %v3507_v35 = vadd.f32 %v5967_v5, %v3455_v25  ;;  %v3456_v29 = vmax.f32 %v6560_v8, %v3428_v55 }
 0x1da   : > { %v6129_v11 = vadd.f32 %v2897_v51, %v2784_v62  ;;  %v3529_v23 = vmax.f32 %v3501_v9, 0.0  ;;  %v2786_v48 = vpop.f32.mrf.mxu0 }
 0x1db   : > { %v2899_v54 = vpop.f32.mrf.mxu1  ;;  %v3508_v30 = vadd.f32 %v5967_v5, %v3456_v29  ;;  %v3535_v19 = vmax.f32 %v3507_v35, 0.0 }
 0x1dc   : > { %v6135_v49 = vadd.f32 %v2899_v54, %v2786_v48  ;;  %v4089_v27 = vpack.c.bf16 %v3529_v23, %v3528_v1  ;;  %v2790_v60 = vpop.f32.mrf.mxu0 }
 0x1dd   : > { %v2903_v20 = vpop.f32.mrf.mxu1  ;;  %v3536_v47 = vmax.f32 %v3508_v30, 0.0 }
 0x1de   : > { %v6138_v36 = vadd.f32 %v2903_v20, %v2790_v60  ;;  %3637 = vst [vmem:[%s5940_s11 + $0x40] sm:$0xff] %v4089_v27  ;;  %v2792_v17 = vpop.f32.mrf.mxu0 }
 0x1df   : > { %v2905_v14 = vpop.f32.mrf.mxu1  ;;  %v4093_v43 = vpack.c.bf16 %v3536_v47, %v3535_v19 }
 0x1e0   : > { %v6141_v0 = vadd.f32 %v2905_v14, %v2792_v17  ;;  %v2794_v53 = vpop.f32.mrf.mxu0 }
 0x1e1   : > { %v2907_v24 = vpop.f32.mrf.mxu1  ;;  %3641 = vst [vmem:[%s5940_s11 + $0x5c] sm:$0xff] %v4093_v43 }
 0x1e2   : > { %v6143_v57 = vadd.f32 %v2907_v24, %v2794_v53  ;;  %v2796_v34 = vpop.f32.mrf.mxu0 }
 0x1e3   : > { %v2909_v50 = vpop.f32.mrf.mxu1 }
 0x1e4   : > { %v6146_v33 = vadd.f32 %v2909_v50, %v2796_v34  ;;  %v2800_v10 = vpop.f32.mrf.mxu0 }
 0x1e5   : > { %v2913_v21 = vpop.f32.mrf.mxu1 }
 0x1e6   : > { %v6148_v32 = vadd.f32 %v2913_v21, %v2800_v10  ;;  %v2802_v44 = vpop.f32.mrf.mxu0 }
 0x1e7   : > { %v2915_v2 = vpop.f32.mrf.mxu1 }
 0x1e8   : > { %v6150_v3 = vadd.f32 %v2915_v2, %v2802_v44  ;;  %v2804_v39 = vpop.f32.mrf.mxu0 }
 0x1e9   : > { %v2917_v6 = vpop.f32.mrf.mxu1 }
 0x1ea   : > { %v6152_v59 = vadd.f32 %v2917_v6, %v2804_v39  ;;  %v2806_v52 = vpop.f32.mrf.mxu0 }
 0x1eb   : > { %v2919_v15 = vpop.f32.mrf.mxu1 }
 0x1ec   : > { %v6154_v28 = vadd.f32 %v2919_v15, %v2806_v52  ;;  %v2810_v37 = vpop.f32.mrf.mxu0 }
 0x1ed   : > { %v2923_v38 = vpop.f32.mrf.mxu1 }
 0x1ee   : > { %v6156_v56 = vadd.f32 %v2923_v38, %v2810_v37  ;;  %v2812_v4 = vpop.f32.mrf.mxu0 }
 0x1ef   : > { %v2925_v13 = vpop.f32.mrf.mxu1 }
 0x1f0   : > { %v6158_v26 = vadd.f32 %v2925_v13, %v2812_v4  ;;  %v2814_v18 = vpop.f32.mrf.mxu0 }
 0x1f1   : > { %v2927_v61 = vpop.f32.mrf.mxu1 }
 0x1f2   : > { %v6160_v41 = vadd.f32 %v2927_v61, %v2814_v18  ;;  %v2816_v42 = vpop.f32.mrf.mxu0 }
 0x1f3   : > { %v2929_v45 = vpop.f32.mrf.mxu1 }
 0x1f4   : > { %v6162_v31 = vadd.f32 %v2929_v45, %v2816_v42  ;;  %v2820_v40 = vpop.f32.mrf.mxu0 }
 0x1f5   : > { %v2933_v16 = vpop.f32.mrf.mxu1 }
 0x1f6   : > { %v6164_v63 = vadd.f32 %v2933_v16, %v2820_v40  ;;  %v2822_v25 = vpop.f32.mrf.mxu0 }
 0x1f7   : > { %v2935_v9 = vpop.f32.mrf.mxu1 }
 0x1f8   : > { %v6166_v55 = vadd.f32 %v2935_v9, %v2822_v25  ;;  %v2824_v62 = vpop.f32.mrf.mxu0 }
 0x1f9   : > { %v2937_v51 = vpop.f32.mrf.mxu1 }
 0x1fa   : > { %v6168_v1 = vadd.f32 %v2937_v51, %v2824_v62  ;;  %v2826_v23 = vpop.f32.mrf.mxu0 }
 0x1fb   : > { %v2939_v35 = vpop.f32.mrf.mxu1 }
 0x1fc   : > { %v6170_v8 = vadd.f32 %v2939_v35, %v2826_v23  ;;  %v2830_v29 = vpop.f32.mrf.mxu0 }
 0x1fd   : > { %v2943_v48 = vpop.f32.mrf.mxu1 }
 0x1fe   : > { %v6172_v54 = vadd.f32 %v2943_v48, %v2830_v29  ;;  %v2832_v27 = vpop.f32.mrf.mxu0 }
 0x1ff   : > { %v2945_v30 = vpop.f32.mrf.mxu1 }
 0x200   : > { %v6174_v60 = vadd.f32 %v2945_v30, %v2832_v27  ;;  %v2834_v20 = vpop.f32.mrf.mxu0 }
 0x201   : > { %v2947_v19 = vpop.f32.mrf.mxu1 }
 0x202   : > { %v6176_v47 = vadd.f32 %v2947_v19, %v2834_v20  ;;  %v2836_v17 = vpop.f32.mrf.mxu0 }
 0x203   : > { %v2949_v14 = vpop.f32.mrf.mxu1 }
 0x204   : > { %v6178_v43 = vadd.f32 %v2949_v14, %v2836_v17  ;;  %v2840_v53 = vpop.f32.mrf.mxu0 }
 0x205   : > { %v2953_v24 = vpop.f32.mrf.mxu1 }
 0x206   : > { %v6180_v34 = vadd.f32 %v2953_v24, %v2840_v53  ;;  %v6182_v50 = vpop.f32.mrf.mxu0 }
 0x207   : > { %v6184_v10 = vpop.f32.mrf.mxu1 }
 0x208   : > { %v2844_v21 = vpop.f32.mrf.mxu0 }
 0x209   : > { %v2957_v44 = vpop.f32.mrf.mxu1 }
 0x20a   : > { %v6186_v2 = vadd.f32 %v2957_v44, %v2844_v21  ;;  %v6188_v39 = vpop.f32.mrf.mxu0 }
 0x20b   : > { %v6190_v6 = vpop.f32.mrf.mxu1 }
 0x20c   : > { %v2850_v52 = vpop.f32.mrf.mxu0 }
 0x20d   : > { %v2963_v15 = vpop.f32.mrf.mxu1 }
 0x20e   : > { %v6192_v37 = vadd.f32 %v2963_v15, %v2850_v52  ;;  %v6194_v38 = vpop.f32.mrf.mxu0 }
 0x20f   : > { %v6196_v4 = vpop.f32.mrf.mxu1 }
 0x210   : > { %v2854_v13 = vpop.f32.mrf.mxu0 }
 0x211   : > { %v2967_v18 = vpop.f32.mrf.mxu1 }
 0x212   : > { %v6198_v61 = vadd.f32 %v2967_v18, %v2854_v13  ;;  %v6200_v42 = vpop.f32.mrf.mxu0 }
 0x213   : > { %v6202_v45 = vpop.f32.mrf.mxu1 }
 0x214   : > { %v3006_v40 = vpop.f32.mrf.mxu0 }
 0x215   : > { %v4112_v16 = vpop.f32.mrf.mxu1  ;;  %v6213_v13 = vadd.f32 %v3006_v40, %v6115_v22 }
 0x216   : > { %v3008_v25 = vpop.f32.mrf.mxu0 }
 0x217   : > { %v4113_v9 = vpop.f32.mrf.mxu1 }
 0x218   : > { %v6204_v62 = vadd.f32 %v4113_v9, %v4112_v16  ;;  %v3010_v51 = vpop.f32.mrf.mxu0 }
 0x219   : > { %v4115_v23 = vpop.f32.mrf.mxu1  ;;  %v6229_v22 = vadd.f32 %v3010_v51, %v6129_v11 }
 0x21a   : > { %v3012_v35 = vpop.f32.mrf.mxu0 }
 0x21b   : > { %v4116_v29 = vpop.f32.mrf.mxu1 }
 0x21c   : > { %v6206_v48 = vadd.f32 %v4116_v29, %v4115_v23  ;;  %v3016_v27 = vpop.f32.mrf.mxu0  ;;  %v6219_v23 = vadd.f32 %v3008_v25, %v6125_v12 }
 0x21d   : > { %v4118_v30 = vpop.f32.mrf.mxu1 }
 0x21e   : > { %6561 = vst [vmem:[#allocation13_spill] sm:$0xff] %v6206_v48  ;;  %v3018_v20 = vpop.f32.mrf.mxu0 }
 0x21f   : > { %v4119_v19 = vpop.f32.mrf.mxu1 }
 0x220   : > { %v6208_v17 = vadd.f32 %v4119_v19, %v4118_v30  ;;  %v3020_v14 = vpop.f32.mrf.mxu0 }
 0x221   : > { %v4121_v53 = vpop.f32.mrf.mxu1 }
 0x222   : > { %v3022_v24 = vpop.f32.mrf.mxu0 }
 0x223   : > { %v4122_v21 = vpop.f32.mrf.mxu1 }
 0x224   : > { %v6210_v44 = vadd.f32 %v4122_v21, %v4121_v53  ;;  %v3026_v52 = vpop.f32.mrf.mxu0 }
 0x225   : > { %v4124_v15 = vpop.f32.mrf.mxu1  ;;  %v6216_v18 = vadd.f32 %v3026_v52, %v6148_v32  ;;  %v6237_v52 = vadd.f32 %v3012_v35, %v6135_v49 }
 0x226   : > { %6562 = vst [vmem:[#allocation17_spill] sm:$0xff] %v6210_v44  ;;  %v3028_v16 = vpop.f32.mrf.mxu0 }
 0x227   : > { %v4125_v9 = vpop.f32.mrf.mxu1  ;;  %v6224_v30 = vadd.f32 %v3028_v16, %v6150_v3  ;;  %v6255_v3 = vadd.f32 %v3018_v20, %v6141_v0 }
 0x228   : > { %v6226_v19 = vadd.f32 %v4125_v9, %v4124_v15  ;;  %v3030_v53 = vpop.f32.mrf.mxu0  ;;  %v6247_v9 = vadd.f32 %v3016_v27, %v6138_v36 }
 0x229   : > { %v4127_v21 = vpop.f32.mrf.mxu1  ;;  %v6234_v40 = vadd.f32 %v3030_v53, %v6152_v59 }
 0x22a   : > { %v3032_v12 = vpop.f32.mrf.mxu0 }
 0x22b   : > { %v4128_v25 = vpop.f32.mrf.mxu1  ;;  %v6242_v15 = vadd.f32 %v3032_v12, %v6154_v28  ;;  %v6273_v28 = vadd.f32 %v3022_v24, %v6146_v33 }
 0x22c   : > { %v6244_v16 = vadd.f32 %v4128_v25, %v4127_v21  ;;  %v3036_v11 = vpop.f32.mrf.mxu0  ;;  %v6265_v25 = vadd.f32 %v3020_v14, %v6143_v57 }
 0x22d   : > { %v4130_v51 = vpop.f32.mrf.mxu1  ;;  %v6252_v53 = vadd.f32 %v3036_v11, %v6156_v56 }
 0x22e   : > { %6563 = vst [vmem:[#allocation2_spill] sm:$0xff] %v6244_v16  ;;  %v3038_v49 = vpop.f32.mrf.mxu0 }
 0x22f   : > { %v4131_v35 = vpop.f32.mrf.mxu1  ;;  %v6260_v21 = vadd.f32 %v3038_v49, %v6158_v26 }
 0x230   : > { %v6262_v12 = vadd.f32 %v4131_v35, %v4130_v51  ;;  %v3040_v36 = vpop.f32.mrf.mxu0 }
 0x231   : > { %v4133_v27 = vpop.f32.mrf.mxu1  ;;  %v6270_v11 = vadd.f32 %v3040_v36, %v6160_v41 }
 0x232   : > { %6564 = vst [vmem:[#allocation14_spill] sm:$0xff] %v6262_v12  ;;  %v3042_v0 = vpop.f32.mrf.mxu0 }
 0x233   : > { %v4134_v20 = vpop.f32.mrf.mxu1  ;;  %v6278_v51 = vadd.f32 %v3042_v0, %v6162_v31 }
 0x234   : > { %v6280_v49 = vadd.f32 %v4134_v20, %v4133_v27  ;;  %v3046_v57 = vpop.f32.mrf.mxu0 }
 0x235   : > { %v4136_v14 = vpop.f32.mrf.mxu1 }
 0x236   : > { %6565 = vst [vmem:[#allocation3_spill] sm:$0xff] %v6280_v49  ;;  %v3048_v41 = vpop.f32.mrf.mxu0 }
 0x237   : > { %v4137_v36 = vpop.f32.mrf.mxu1 }
 0x238   : > { %v6284_v56 = vadd.f32 %v4137_v36, %v4136_v14  ;;  %v3050_v59 = vpop.f32.mrf.mxu0 }
 0x239   : > { %v4139_v33 = vpop.f32.mrf.mxu1 }
 0x23a   : > { %6566 = vst [vmem:[#allocation15_spill] sm:$0xff] %v6284_v56  ;;  %v3052_v24 = vpop.f32.mrf.mxu0  ;;  %v2956_v56 = vadd.f32 %v6184_v10, %v6182_v50 }
 0x23b   : > { %v4140_v32 = vpop.f32.mrf.mxu1 }
 0x23c   : > { %v6286_v29 = vadd.f32 %v4140_v32, %v4139_v33  ;;  %v3056_v26 = vpop.f32.mrf.mxu0  ;;  %v3047_v32 = vadd.f32 %v3046_v57, %v6164_v63  ;;  %v6571_v63 = vmax.f32 %v6213_v13, %v6216_v18  ;;  %v3053_v57 = vadd.f32 %v3052_v24, %v6170_v8 }
 0x23d   : > { %v4142_v31 = vpop.f32.mrf.mxu1  ;;  %v2966_v13 = vadd.f32 %v6196_v4, %v6194_v38  ;;  %v6573_v8 = vmax.f32 %v6229_v22, %v6234_v40  ;;  %v6574_v4 = vmax.f32 %v6237_v52, %v6242_v15  ;;  %v6575_v52 = vmax.f32 %v6247_v9, %v6252_v53 }
 0x23e   : > { %6567 = vst [vmem:[#allocation4_spill] sm:$0xff] %v6286_v29  ;;  %v3058_v0 = vpop.f32.mrf.mxu0 }
 0x23f   : > { %v4143_v27 = vpop.f32.mrf.mxu1 }
 0x240   : > { %v6288_v20 = vadd.f32 %v4143_v27, %v4142_v31  ;;  %v3060_v49 = vpop.f32.mrf.mxu0  ;;  %v3049_v31 = vadd.f32 %v3048_v41, %v6166_v55 }
 0x241   : > { %v4145_v44 = vpop.f32.mrf.mxu1 }
 0x242   : > { %6568 = vst [vmem:[#allocation16_spill] sm:$0xff] %v6288_v20  ;;  %v3062_v16 = vpop.f32.mrf.mxu0 }
 0x243   : > { %v4146_v35 = vpop.f32.mrf.mxu1 }
 0x244   : > { %v6290_v12 = vadd.f32 %v4146_v35, %v4145_v44  ;;  %v3066_v14 = vpop.f32.mrf.mxu0  ;;  %v2960_v44 = vadd.f32 %v6190_v6, %v6188_v39  ;;  %v6572_v39 = vmax.f32 %v6219_v23, %v6224_v30  ;;  %v3059_v23 = vadd.f32 %v3058_v0, %v6174_v60 }
 0x245   : > { %v6292_v36 = vpop.f32.mrf.mxu1  ;;  %v3067_v33 = vadd.f32 %v3066_v14, %v6180_v34  ;;  %v2970_v60 = vadd.f32 %v6202_v45, %v6200_v42 }
 0x246   : > { %6569 = vst [vmem:[#allocation5_spill] sm:$0xff] %v6290_v12  ;;  %6570 = vst [vmem:[#allocation19_spill] sm:$0xff] %v6292_v36  ;;  %v3068_v29 = vpop.f32.mrf.mxu0  ;;  %v3051_v36 = vadd.f32 %v3050_v59, %v6168_v1 }
 0x247   : > { %v6298_v48 = vpop.f32.mrf.mxu1  ;;  %v3408_v27 = vmax.f32 %v3047_v32, %v3067_v33  ;;  %v3069_v20 = vadd.f32 %v3068_v29, %v2956_v56 }
 0x248   : > { %v3070_v35 = vpop.f32.mrf.mxu0 }
 0x249   : > { %v6303_v12 = vpop.f32.mrf.mxu1  ;;  %v3436_v50 = vmax.f32 %v6571_v63, %v3408_v27  ;;  %v3409_v34 = vmax.f32 %v3049_v31, %v3069_v20  ;;  %v3071_v10 = vadd.f32 %v3070_v35, %v6186_v2  ;;  %v3057_v20 = vadd.f32 %v3056_v26, %v6172_v54 }
 0x24a   : > { %v3072_v55 = vpop.f32.mrf.mxu0  ;;  %v3061_v35 = vadd.f32 %v3060_v49, %v6176_v47  ;;  %v3063_v63 = vadd.f32 %v3062_v16, %v6178_v43 }
 0x24b   : > { %v6311_v41 = vpop.f32.mrf.mxu1  ;;  %v3488_v29 = vadd.f32 %v5880_v58, %v3436_v50  ;;  %v3437_v6 = vmax.f32 %v6572_v39, %v3409_v34  ;;  %v3415_v56 = vmax.f32 %v3051_v36, %v3071_v10  ;;  %v3073_v1 = vadd.f32 %v3072_v55, %v2960_v44 }
 0x24c   : > { %v3076_v59 = vpop.f32.mrf.mxu0  ;;  %v6577_v39 = vmax.f32 %v6265_v25, %v6270_v11 }
 0x24d   : > { %v6317_v14 = vpop.f32.mrf.mxu1  ;;  %v3489_v2 = vadd.f32 %v5880_v58, %v3437_v6  ;;  %v3443_v18 = vmax.f32 %v6573_v8, %v3415_v56  ;;  %v3416_v24 = vmax.f32 %v3053_v57, %v3073_v1  ;;  %v3516_v30 = vmax.f32 %v3488_v29, 0.0 }
 0x24e   : > { %v3077_v36 = vadd.f32 %v3076_v59, %v6192_v37  ;;  %v3078_v32 = vpop.f32.mrf.mxu0  ;;  %v6576_v57 = vmax.f32 %v6255_v3, %v6260_v21  ;;  %v6578_v59 = vmax.f32 %v6273_v28, %v6278_v51 }
 0x24f   : > { %v6328_v33 = vpop.f32.mrf.mxu1  ;;  %v3517_v31 = vmax.f32 %v3489_v2, 0.0  ;;  %v3495_v38 = vadd.f32 %v5903_v7, %v3443_v18  ;;  %v3444_v22 = vmax.f32 %v6574_v4, %v3416_v24  ;;  %v3079_v40 = vadd.f32 %v3078_v32, %v2966_v13 }
 0x250   : > { %v3422_v27 = vmax.f32 %v3057_v20, %v3077_v36  ;;  %v3080_v44 = vpop.f32.mrf.mxu0 }
 0x251   : > { %v6334_v54 = vpop.f32.mrf.mxu1  ;;  %v4082_v37 = vpack.c.bf16 %v3517_v31, %v3516_v30  ;;  %v3496_v26 = vadd.f32 %v5903_v7, %v3444_v22  ;;  %v3423_v0 = vmax.f32 %v3059_v23, %v3079_v40  ;;  %v3081_v50 = vadd.f32 %v3080_v44, %v6198_v61 }
 0x252   : > { %v3450_v15 = vmax.f32 %v6575_v52, %v3422_v27  ;;  %v3082_v34 = vpop.f32.mrf.mxu0  ;;  %v3523_v42 = vmax.f32 %v3495_v38, 0.0 }
 0x253   : > { %v6345_v10 = vpop.f32.mrf.mxu1  ;;  %3630 = vst [vmem:[%s5940_s11 + $0x10] sm:$0xff] %v4082_v37  ;;  %v3524_v45 = vmax.f32 %v3496_v26, 0.0  ;;  %v3451_v55 = vmax.f32 %v6576_v57, %v3423_v0  ;;  %v3083_v47 = vadd.f32 %v3082_v34, %v2970_v60  ;;  %v3429_v16 = vmax.f32 %v3061_v35, %v3081_v50 }
 0x254   : > { %v3502_v43 = vadd.f32 %v5935_v46, %v3450_v15  ;;  %v4176_v49 = vpop.f32.mrf.mxu0 }
 0x255   : > { %v6352_v9 = vpop.f32.mrf.mxu1  ;;  %v4086_v53 = vpack.c.bf16 %v3524_v45, %v3523_v42  ;;  %v3503_v61 = vadd.f32 %v5935_v46, %v3451_v55  ;;  %v3430_v29 = vmax.f32 %v3063_v63, %v3083_v47  ;;  %v3457_v6 = vmax.f32 %v6577_v39, %v3429_v16  ;;  %v6579_v39 = vld [vmem:[#allocation13_spill] sm:$0xff] }
 0x256   : > { %v4177_v56 = vpop.f32.mrf.mxu0  ;;  %v3530_v3 = vmax.f32 %v3502_v43, 0.0 }
 0x257   : > { %v6358_v1 = vpop.f32.mrf.mxu1  ;;  %3634 = vst [vmem:[%s5940_s11 + $0x2c] sm:$0xff] %v4086_v53  ;;  %v3531_v21 = vmax.f32 %v3503_v61, 0.0  ;;  %v3458_v13 = vmax.f32 %v6578_v59, %v3430_v29  ;;  %v3509_v2 = vadd.f32 %v5967_v5, %v3457_v6  ;;  %v4178_v35 = vadd.f32 %v4177_v56, %v4176_v49  ;;  %v6580_v59 = vld [vmem:[#allocation14_spill] sm:$0xff] }
 0x258   : > { %v4179_v8 = vpop.f32.mrf.mxu0 }
 0x259   : > { %v6365_v18 = vpop.f32.mrf.mxu1  ;;  %v4090_v24 = vpack.c.bf16 %v3531_v21, %v3530_v3  ;;  %v3510_v25 = vadd.f32 %v5967_v5, %v3458_v13  ;;  %v3537_v23 = vmax.f32 %v3509_v2, 0.0  ;;  %v3217_v57 = vadd.f32 %v4178_v35, %v6204_v62 }
 0x25a   : > { %v4180_v11 = vpop.f32.mrf.mxu0 }
 0x25b   : > { %v6368_v20 = vpop.f32.mrf.mxu1  ;;  %3638 = vst [vmem:[%s5940_s11 + $0x48] sm:$0xff] %v4090_v24  ;;  %v3538_v30 = vmax.f32 %v3510_v25, 0.0  ;;  %v4181_v50 = vadd.f32 %v4180_v11, %v4179_v8 }
 0x25c   : > { %v4182_v36 = vpop.f32.mrf.mxu0 }
 0x25d   : > { %v6371_v32 = vpop.f32.mrf.mxu1  ;;  %v4094_v28 = vpack.c.bf16 %v3538_v30, %v3537_v23  ;;  %v3220_v6 = vadd.f32 %v4181_v50, %v6579_v39 }
 0x25e   : > { %v4183_v51 = vpop.f32.mrf.mxu0 }
 0x25f   : > { %v6373_v31 = vpop.f32.mrf.mxu1  ;;  %3642 = vst [vmem:[%s5940_s11 + $0x64] sm:$0xff] %v4094_v28  ;;  %v4184_v34 = vadd.f32 %v4183_v51, %v4182_v36  ;;  %v6582_v51 = vld [vmem:[#allocation17_spill] sm:$0xff] }
 0x260   : > { %v4185_v38 = vpop.f32.mrf.mxu0 }
 0x261   : > { %v6376_v4 = vpop.f32.mrf.mxu1  ;;  %v3225_v49 = vadd.f32 %v4184_v34, %v6208_v17  ;;  %v4214_v34 = vadd.f32 %v6358_v1, %v6352_v9  ;;  %v4156_v9 = vadd.f32 %v6328_v33, %v6317_v14  ;;  %v6586_v1 = vld [vmem:[#allocation4_spill] sm:$0xff]  ;;  %v4159_v33 = vadd.f32 %v6345_v10, %v6334_v54 }
 0x262   : > { %v4186_v22 = vpop.f32.mrf.mxu0 }
 0x263   : > { %v6378_v40 = vpop.f32.mrf.mxu1  ;;  %v4187_v21 = vadd.f32 %v4186_v22, %v4185_v38 }
 0x264   : > { %v4188_v27 = vpop.f32.mrf.mxu0 }
 0x265   : > { %v4246_v44 = vpop.f32.mrf.mxu1  ;;  %v3228_v38 = vadd.f32 %v4187_v21, %v6582_v51  ;;  %v6588_v51 = vld [vmem:[#allocation5_spill] sm:$0xff] }
 0x266   : > { %v4189_v60 = vpop.f32.mrf.mxu0  ;;  %v6392_v8 = vadd.f32 %v4246_v44, %v3225_v49  ;;  %v4217_v49 = vadd.f32 %v6368_v20, %v6365_v18  ;;  %v6587_v20 = vld [vmem:[#allocation16_spill] sm:$0xff] }
 0x267   : > { %v3313_v37 = vpop.f32.mrf.mxu1  ;;  %v4190_v63 = vadd.f32 %v4189_v60, %v4188_v27  ;;  %v6583_v27 = vld [vmem:[#allocation3_spill] sm:$0xff] }
 0x268   : > { %v4191_v26 = vpop.f32.mrf.mxu0  ;;  %v6382_v53 = vadd.f32 %v3313_v37, %v3217_v57 }
 0x269   : > { %v4247_v0 = vpop.f32.mrf.mxu1  ;;  %v3233_v47 = vadd.f32 %v4190_v63, %v6226_v19  ;;  %v6581_v19 = vld [vmem:[#allocation2_spill] sm:$0xff] }
 0x26a   : > { %v4192_v52 = vpop.f32.mrf.mxu0  ;;  %v3325_v35 = vadd.f32 %v4247_v0, %v3228_v38 }
 0x26b   : > { %v3316_v15 = vpop.f32.mrf.mxu1  ;;  %v4193_v55 = vadd.f32 %v4192_v52, %v4191_v26 }
 0x26c   : > { %v4194_v42 = vpop.f32.mrf.mxu0  ;;  %v6394_v11 = vadd.f32 %v3316_v15, %v3220_v6 }
 0x26d   : > { %v4250_v45 = vpop.f32.mrf.mxu1  ;;  %v3236_v2 = vadd.f32 %v4193_v55, %v6581_v19  ;;  %v6584_v55 = vld [vmem:[#allocation19_spill] sm:$0xff] }
 0x26e   : > { %v4195_v43 = vpop.f32.mrf.mxu0 }
 0x26f   : > { %v3329_v16 = vpop.f32.mrf.mxu1  ;;  %v4196_v61 = vadd.f32 %v4195_v43, %v4194_v42  ;;  %v6585_v43 = vld [vmem:[#allocation15_spill] sm:$0xff] }
 0x270   : > { %v6384_v29 = vadd.f32 %v3329_v16, %v3233_v47  ;;  %v4197_v56 = vpop.f32.mrf.mxu0  ;;  %v4150_v47 = vadd.f32 %v6298_v48, %v6584_v55  ;;  %v4153_v48 = vadd.f32 %v6311_v41, %v6303_v12 }
 0x271   : > { %v4251_v3 = vpop.f32.mrf.mxu1  ;;  %v3241_v13 = vadd.f32 %v4196_v61, %v6580_v59  ;;  %v4220_v61 = vadd.f32 %v6373_v31, %v6371_v32  ;;  %v4223_v32 = vadd.f32 %v6378_v40, %v6376_v4 }
 0x272   : > { %v3382_v62 = vmax.f32 %v6382_v53, %v6384_v29  ;;  %v4198_v24 = vpop.f32.mrf.mxu0  ;;  %v3265_v39 = vadd.f32 %v4214_v34, %v4150_v47  ;;  %v3268_v14 = vadd.f32 %v4217_v49, %v4153_v48 }
 0x273   : > { %v3332_v25 = vpop.f32.mrf.mxu1  ;;  %v3338_v23 = vadd.f32 %v4250_v45, %v3241_v13  ;;  %v4199_v17 = vadd.f32 %v4198_v24, %v4197_v56  ;;  %v3273_v31 = vadd.f32 %v4220_v61, %v4156_v9  ;;  %v3276_v4 = vadd.f32 %v4223_v32, %v4159_v33 }
 0x274   : > { %v3333_v30 = vadd.f32 %v3332_v25, %v3236_v2  ;;  %v4200_v36 = vpop.f32.mrf.mxu0 }
 0x275   : > { %v4254_v28 = vpop.f32.mrf.mxu1  ;;  %v3396_v22 = vmax.f32 %v6392_v8, %v3338_v23  ;;  %v3244_v60 = vadd.f32 %v4199_v17, %v6583_v27 }
 0x276   : > { %v3389_v37 = vmax.f32 %v6394_v11, %v3333_v30  ;;  %v4201_v26 = vpop.f32.mrf.mxu0 }
 0x277   : > { %v3345_v44 = vpop.f32.mrf.mxu1  ;;  %v3341_v63 = vadd.f32 %v4251_v3, %v3244_v60  ;;  %v4202_v52 = vadd.f32 %v4201_v26, %v4200_v36 }
 0x278   : > { %v4203_v15 = vpop.f32.mrf.mxu0 }
 0x279   : > { %v4255_v50 = vpop.f32.mrf.mxu1  ;;  %v3403_v42 = vmax.f32 %v3325_v35, %v3341_v63  ;;  %v3249_v16 = vadd.f32 %v4202_v52, %v6585_v43 }
 0x27a   : > { %v4204_v45 = vpop.f32.mrf.mxu0 }
 0x27b   : > { %v3348_v57 = vpop.f32.mrf.mxu1  ;;  %v4205_v53 = vadd.f32 %v4204_v45, %v4203_v15  ;;  %v3346_v21 = vadd.f32 %v3345_v44, %v3249_v16 }
 0x27c   : > { %v4206_v0 = vpop.f32.mrf.mxu0 }
 0x27d   : > { %v4258_v29 = vpop.f32.mrf.mxu1  ;;  %v3252_v6 = vadd.f32 %v4205_v53, %v6586_v1 }
 0x27e   : > { %v4207_v56 = vpop.f32.mrf.mxu0  ;;  %v3370_v25 = vadd.f32 %v4258_v29, %v3273_v31 }
 0x27f   : > { %v3361_v3 = vpop.f32.mrf.mxu1  ;;  %v4208_v59 = vadd.f32 %v4207_v56, %v4206_v0  ;;  %v3349_v24 = vadd.f32 %v3348_v57, %v3252_v6 }
 0x280   : > { %v3362_v13 = vadd.f32 %v3361_v3, %v3265_v39  ;;  %v4209_v19 = vpop.f32.mrf.mxu0 }
 0x281   : > { %v4259_v18 = vpop.f32.mrf.mxu1  ;;  %v3257_v2 = vadd.f32 %v4208_v59, %v6587_v20 }
 0x282   : > { %v3410_v8 = vmax.f32 %v3346_v21, %v3362_v13  ;;  %v4210_v11 = vpop.f32.mrf.mxu0  ;;  %v3373_v60 = vadd.f32 %v4259_v18, %v3276_v4 }
 0x283   : > { %v3364_v12 = vpop.f32.mrf.mxu1  ;;  %v3354_v41 = vadd.f32 %v4254_v28, %v3257_v2  ;;  %v4211_v17 = vadd.f32 %v4210_v11, %v4209_v19 }
 0x284   : > { %v3438_v23 = vmax.f32 %v3382_v62, %v3410_v8  ;;  %v3365_v30 = vadd.f32 %v3364_v12, %v3268_v14 }
 0x285   : > { %v3424_v40 = vmax.f32 %v3354_v41, %v3370_v25  ;;  %v3260_v38 = vadd.f32 %v4211_v17, %v6588_v51 }
 0x286   : > { %v3490_v36 = vadd.f32 %v5880_v58, %v3438_v23  ;;  %v3417_v27 = vmax.f32 %v3349_v24, %v3365_v30 }
 0x287   : > { %v3452_v26 = vmax.f32 %v3396_v22, %v3424_v40  ;;  %v3357_v10 = vadd.f32 %v4255_v50, %v3260_v38 }
 0x288   : > { %v3518_v54 = vmax.f32 %v3490_v36, 0.0  ;;  %v3445_v44 = vmax.f32 %v3389_v37, %v3417_v27 }
 0x289   : > { %v3504_v62 = vadd.f32 %v5935_v46, %v3452_v26  ;;  %v3431_v35 = vmax.f32 %v3357_v10, %v3373_v60 }
 0x28a   : > { %v4083_v28 = vpack.c.bf16 %v3518_v54, %v3518_v54  ;;  %v3497_v63 = vadd.f32 %v5903_v7, %v3445_v44 }
 0x28b   : > { %v3532_v52 = vmax.f32 %v3504_v62, 0.0  ;;  %v3459_v58 = vmax.f32 %v3403_v42, %v3431_v35 }
 0x28c   : > { %3631 = vst [vmem:[%s5940_s11 + $0x18] sm:$0xf] %v4083_v28  ;;  %v3525_v15 = vmax.f32 %v3497_v63, 0.0 }
 0x28d   : > { %v4091_v34 = vpack.c.bf16 %v3532_v52, %v3532_v52  ;;  %v3511_v45 = vadd.f32 %v5967_v5, %v3459_v58 }
 0x28e   : > { %v4087_v57 = vpack.c.bf16 %v3525_v15, %v3525_v15 }
 0x28f   : > { %3639 = vst [vmem:[%s5940_s11 + $0x50] sm:$0xf] %v4091_v34  ;;  %v3539_v22 = vmax.f32 %v3511_v45, 0.0 }
 0x290   : > { %3635 = vst [vmem:[%s5940_s11 + $0x34] sm:$0xf] %v4087_v57 }
 0x291   : > { %v4095_v50 = vpack.c.bf16 %v3539_v22, %v3539_v22 }
 0x293   : > { %3643 = vst [vmem:[%s5940_s11 + $0x6c] sm:$0xf] %v4095_v50 }
 0x294 PF: > { %s13_s14 = sadd.s32 1, %s4784_s14   ;;  %s6589_s12 = smov %s4780_s13 }
 0x295   : > { %p10_p5 = scmp.ge.s32.totalorder %s13_s14, 4   ;;  %s6590_s13 = smov %s6592_s15 }
 0x297   :  { %12 = sbr.rel (!%p10_p5) target bundleno = 2 (0x2), region = 62 }

// kernel: net_forward.7
= control target key start
LH: loop header
LB: loop body
LE: loop exit
PB: predicated region body
PF: predicated region fallthrough
CT: control target
= control target key end

     0   :  { %10 = vsyncpa [#allocation4], 0  ;;  %s6418_s18 = smov 0   ;;  %s6994_s0 = inlined_call_operand.vmem [shape: bf16[2,25088], index: 0, kind: input, shape index: {}]   ;;  %s6995_s1 = inlined_call_operand.vmem [shape: bf16[25088,128], index: 1, kind: input, shape index: {}]   ;;  %s6996_s2 = inlined_call_operand.vmem [shape: f32[1,128], index: 2, kind: input, shape index: {}]   ;;  %s6997_s3 = inlined_call_operand.vmem [shape: f32[128,14], index: 3, kind: input, shape index: {}]   ;;  %s6998_s4 = inlined_call_operand.vmem [shape: f32[1,14], index: 4, kind: input, shape index: {}]   ;;  %s6999_s5 = inlined_call_operand.hbm [shape: f32[2,14], index: 5, kind: output, shape index: {}]  }
   0x1 LB: > { %s6424_s19 = sadd.s32 4294967295, %s6379_s18   ;;  %p4914_p0 = scmp.ge.s32.totalorder %s6379_s18, 1  ;;  %s6379_s18 = sphi %s6418_s18, %s16_s18  }
   0x2   : > { %p194_p1 = scmp.lt.s32.totalorder %s6379_s18, 5 }
   0x4   : > { %p195_p2 = pnand %p4914_p0, %p194_p1 }
   0x5   : > { %s221_s20 = smul.u32 (!%p195_p2), 49, %s6424_s19  ;;  %p4916_p5 = scmp.ne.s32.totalorder (!%p195_p2), %s6424_s19, 0 }
   0x6   : > { %198 = sbr.rel (%p195_p2) target bundleno = 881 (0x371), region = 40 }
   0x7   : > { %s226_s21 = smul.u32 (!%p195_p2), 784, %s6424_s19  ;;  %p222_p3 = scmp.lt.s32.totalorder (!%p195_p2), %s221_s20, 195 }
   0x9   : > { %p227_p4 = scmp.lt.s32.totalorder (!%p195_p2), %s226_s21, 3135 }
   0xb   : > { %s7001_s20 = smov (!%p222_p3, %s221_s20), 195  ;;  %s7003_s21 = smov (!%p227_p4, %s226_s21), 3135 }
   0xc   : > { %s6433_s24 = scalar_lea.vmem %s6994_s0, %s7001_s20  ;;  %s4915_s25 = sshll.u32 %s7003_s21, 2 }
   0xd   : > { %s6438_s28 = scalar_lea.vmem %s6995_s1, %s4915_s25  ;;  %236 = sbr.rel (%p4916_p5) target bundleno = 20 (0x14), region = 44 }
  0x12   : > { %v6381_v0 = vmov 0.0  }
  0x13   : > { %237 = vst [vmem:[#allocation2] sm:$0x3] %v6381_v0 }
  0x14 PF: > { %v5947_v1 = vld [vmem:[%s6438_s28 + $0x78] sm:$0xff]   ;;  %v5951_v5 = vld [vmem:[%s6438_s28 + $0x70] sm:$0xff]   ;;  %v5955_v9 = vld [vmem:[%s6438_s28 + $0x68] sm:$0xff]   ;;  %v1041_v30 = vlaneseq  ;;  %v6382_v36 = vmov 1966171168   ;;  %vm6384_vm0 = vmmov 0  }
  0x15   : > { %v5948_v2 = vld [vmem:[%s6438_s28 + $0xf8] sm:$0xff]   ;;  %5317 = vmatprep.subr.bf16.mxu0 %v5947_v1  ;;  %v5952_v6 = vld [vmem:[%s6438_s28 + $0xf0] sm:$0xff]   ;;  %v5956_v10 = vld [vmem:[%s6438_s28 + $0xe8] sm:$0xff]   ;;  %v1039_v37 = vunpack.c.l.s4 %v6382_v36  ;;  %p5310_p6 = scmp.ne.s32.totalorder %s6424_s19, 3 }
  0x16   : > { %v5949_v3 = vld [vmem:[%s6438_s28 + $0x38] sm:$0xff]   ;;  %5339 = vmatprep.subr.bf16.mxu1 %v5948_v2  ;;  %v5953_v7 = vld [vmem:[%s6438_s28 + $0x30] sm:$0xff]   ;;  %v5957_v11 = vld [vmem:[%s6438_s28 + $0x28] sm:$0xff]   ;;  %v1042_v34 = vshrl.u32 %v1041_v30, 7 }
  0x17   : > { %v5950_v4 = vld [vmem:[%s6438_s28 + $0xb8] sm:$0xff]   ;;  %5318 = vmatpush3.bf16.msra.mxu0 %v5949_v3  ;;  %v5954_v8 = vld [vmem:[%s6438_s28 + $0xb0] sm:$0xff]   ;;  %v5958_v12 = vld [vmem:[%s6438_s28 + $0xa8] sm:$0xff]   ;;  %v1040_v40 = vunpack.c.0.s8 %v1039_v37 }
  0x18   : > { %5340 = vmatpush3.bf16.msra.mxu1 %v5950_v4  ;;  %5319 = vmatprep.subr.bf16.mxu0 %v5951_v5  ;;  %v5959_v13 = vld [vmem:[%s6438_s28 + $0x60] sm:$0xff]   ;;  %v5963_v17 = vld [vmem:[%s6438_s28 + $0x58] sm:$0xff]   ;;  %v5967_v21 = vld [vmem:[%s6438_s28 + $0x50] sm:$0xff]  }
  0x19   : > { %5341 = vmatprep.subr.bf16.mxu1 %v5952_v6  ;;  %v5960_v14 = vld [vmem:[%s6438_s28 + $0xe0] sm:$0xff]   ;;  %v5964_v18 = vld [vmem:[%s6438_s28 + $0xd8] sm:$0xff]   ;;  %v5968_v22 = vld [vmem:[%s6438_s28 + $0xd0] sm:$0xff]   ;;  %v6476_v42 = vsub.s32 %v1040_v40, %v1042_v34 }
  0x1a   : > { %v5961_v15 = vld [vmem:[%s6438_s28 + $0x20] sm:$0xff]   ;;  %v5965_v19 = vld [vmem:[%s6438_s28 + $0x18] sm:$0xff]   ;;  %v5969_v23 = vld [vmem:[%s6438_s28 + $0x10] sm:$0xff]  }
  0x1b   : > { %5320 = vmatpush3.bf16.msra.mxu0 %v5953_v7  ;;  %v5962_v16 = vld [vmem:[%s6438_s28 + $0xa0] sm:$0xff]   ;;  %v5966_v20 = vld [vmem:[%s6438_s28 + $0x98] sm:$0xff]   ;;  %v5970_v24 = vld [vmem:[%s6438_s28 + $0x90] sm:$0xff]  }
  0x1c   : > { %5342 = vmatpush3.bf16.msra.mxu1 %v5954_v8  ;;  %5321 = vmatprep.subr.bf16.mxu0 %v5955_v9  ;;  %v5971_v25 = vld [vmem:[%s6438_s28 + $0x48] sm:$0xff]   ;;  %v5975_v29 = vld [vmem:[%s6438_s28 + $0x40] sm:$0xff]   ;;  %v5980_v35 = vld [vmem:[%s6438_s28 + $0x178] sm:$0xff]  }
  0x1d   : > { %5343 = vmatprep.subr.bf16.mxu1 %v5956_v10  ;;  %v5972_v26 = vld [vmem:[%s6438_s28 + $0xc8] sm:$0xff]   ;;  %v5976_v31 = vld [vmem:[%s6438_s28 + $0xc0] sm:$0xff]   ;;  %v5982_v41 = vld [vmem:[%s6438_s28 + $0x1f8] sm:$0xff]  }
  0x1e   : > { %v5973_v27 = vld [vmem:[%s6438_s28 + $0x8] sm:$0xff]   ;;  %v5977_v32 = vld [vmem:[%s6438_s28] sm:$0xff]   ;;  %v5981_v48 = vld [vmem:[%s6438_s28 + $0x138] sm:$0xff]  }
  0x1f   : > { %5322 = vmatpush3.bf16.msra.mxu0 %v5957_v11  ;;  %v5974_v28 = vld [vmem:[%s6438_s28 + $0x88] sm:$0xff]   ;;  %v5978_v33 = vld [vmem:[%s6438_s28 + $0x80] sm:$0xff]   ;;  %v5983_v50 = vld [vmem:[%s6438_s28 + $0x1b8] sm:$0xff]  }
  0x20   : > { %5344 = vmatpush3.bf16.msra.mxu1 %v5958_v12  ;;  %5323 = vmatprep.subr.bf16.mxu0 %v5959_v13  ;;  %v239_v38 = vld [vmem:[%s6433_s24] sm:$0xff]  ;;  %v5984_v53 = vld [vmem:[%s6438_s28 + $0x170] sm:$0xff]   ;;  %v5988_v59 = vld [vmem:[%s6438_s28 + $0x168] sm:$0xff]  }
  0x21   : > { %5345 = vmatprep.subr.bf16.mxu1 %v5960_v14  ;;  %v1037_v39 = vcombine.high %v239_v38, %v239_v38  ;;  %v1044_v43 = vrot.slane %v239_v38, %v6476_v42  ;;  %v5985_v55 = vld [vmem:[%s6438_s28 + $0x130] sm:$0xff]   ;;  %v5989_v60 = vld [vmem:[%s6438_s28 + $0x128] sm:$0xff]   ;;  %v5992_v63 = vld [vmem:[%s6438_s28 + $0x160] sm:$0xff]  }
  0x22   : > { %v5986_v56 = vld [vmem:[%s6438_s28 + $0x1f0] sm:$0xff]   ;;  %v5990_v61 = vld [vmem:[%s6438_s28 + $0x1e8] sm:$0xff]   ;;  %v5993_v0 = vld [vmem:[%s6438_s28 + $0x120] sm:$0xff]  }
  0x23   : > { %5324 = vmatpush3.bf16.msra.mxu0 %v5961_v15  ;;  %v6480_v44 = vrot.slane %v1037_v39, %v6476_v42  ;;  %v1052_v45 = vcombine.high %v1044_v43, %v1044_v43  ;;  %v1060_v46 = vrot.slane %v1044_v43, %v6476_v42  ;;  %v5987_v58 = vld [vmem:[%s6438_s28 + $0x1b0] sm:$0xff]   ;;  %v5991_v62 = vld [vmem:[%s6438_s28 + $0x1a8] sm:$0xff]   ;;  %v5994_v1 = vld [vmem:[%s6438_s28 + $0x1e0] sm:$0xff]  }
  0x24   : > { %5346 = vmatpush3.bf16.msra.mxu1 %v5962_v16  ;;  %5325 = vmatprep.subr.bf16.mxu0 %v5963_v17  ;;  %v5995_v2 = vld [vmem:[%s6438_s28 + $0x1a0] sm:$0xff]   ;;  %v5996_v3 = vld [vmem:[%s6438_s28 + $0x158] sm:$0xff]   ;;  %v6000_v7 = vld [vmem:[%s6438_s28 + $0x150] sm:$0xff]  }
  0x25   : > { %5347 = vmatprep.subr.bf16.mxu1 %v5964_v18  ;;  %v1053_v47 = vcombine.high %v6480_v44, %v6480_v44  ;;  %v1074_v49 = vrot.slane %v1052_v45, %v6476_v42  ;;  %v1082_v52 = vcombine.high %v1060_v46, %v1060_v46  ;;  %v5997_v4 = vld [vmem:[%s6438_s28 + $0x118] sm:$0xff]   ;;  %v6001_v8 = vld [vmem:[%s6438_s28 + $0x110] sm:$0xff]   ;;  %v6004_v11 = vld [vmem:[%s6438_s28 + $0x148] sm:$0xff]  }
  0x26   : > { %v5998_v5 = vld [vmem:[%s6438_s28 + $0x1d8] sm:$0xff]   ;;  %v6002_v9 = vld [vmem:[%s6438_s28 + $0x1d0] sm:$0xff]   ;;  %v6005_v12 = vld [vmem:[%s6438_s28 + $0x108] sm:$0xff]  }
  0x27   : > { %5326 = vmatpush3.bf16.msra.mxu0 %v5965_v19  ;;  %v1081_v51 = vrot.slane %v1053_v47, %v6476_v42  ;;  %3778 = vmatprep.mubr.bf16.mxu0 %v1074_v49  ;;  %v1084_v54 = vcombine.high %v1074_v49, %v1074_v49  ;;  %v5999_v6 = vld [vmem:[%s6438_s28 + $0x198] sm:$0xff]   ;;  %v6003_v10 = vld [vmem:[%s6438_s28 + $0x190] sm:$0xff]   ;;  %v6006_v13 = vld [vmem:[%s6438_s28 + $0x1c8] sm:$0xff]   ;;  %v1067_v19 = vrot.slane %v6480_v44, %v6476_v42 }
  0x28   : > { %5348 = vmatpush3.bf16.msra.mxu1 %v5966_v20  ;;  %5327 = vmatprep.subr.bf16.mxu0 %v5967_v21  ;;  %v6007_v14 = vld [vmem:[%s6438_s28 + $0x188] sm:$0xff]   ;;  %v6008_v15 = vld [vmem:[%s6438_s28 + $0x140] sm:$0xff]   ;;  %v6012_v20 = vld [vmem:[%s6438_s28 + $0x278] sm:$0xff]  }
  0x29   : > { %5349 = vmatprep.subr.bf16.mxu1 %v5968_v22  ;;  %v1085_v57 = vcombine.high %v1081_v51, %v1081_v51  ;;  %3818 = vmatprep.mubr.bf16.mxu1 %v1084_v54  ;;  %v6009_v16 = vld [vmem:[%s6438_s28 + $0x100] sm:$0xff]   ;;  %v6013_v21 = vld [vmem:[%s6438_s28 + $0x238] sm:$0xff]   ;;  %v6021_v30 = vld [vmem:[%s6438_s28 + $0x228] sm:$0xff]  }
  0x2a   : > { %v6010_v17 = vld [vmem:[%s6438_s28 + $0x1c0] sm:$0xff]   ;;  %v6014_v22 = vld [vmem:[%s6438_s28 + $0x2f8] sm:$0xff]   ;;  %v6033_v43 = vld [vmem:[%s6438_s28 + $0x210] sm:$0xff]  }
  0x2b   : > { %5328 = vmatpush3.bf16.msra.mxu0 %v5969_v23  ;;  %v6011_v18 = vld [vmem:[%s6438_s28 + $0x180] sm:$0xff]   ;;  %v6015_v23 = vld [vmem:[%s6438_s28 + $0x2b8] sm:$0xff]   ;;  %v6034_v44 = vld [vmem:[%s6438_s28 + $0x2d0] sm:$0xff]  }
  0x2c   : > { %5350 = vmatpush3.bf16.msra.mxu1 %v5970_v24  ;;  %5329 = vmatprep.subr.bf16.mxu0 %v5971_v25  ;;  %v1083_v24 = vcombine.high %v1067_v19, %v1067_v19  ;;  %v6016_v25 = vld [vmem:[%s6438_s28 + $0x270] sm:$0xff]   ;;  %v6025_v34 = vld [vmem:[%s6438_s28 + $0x220] sm:$0xff]   ;;  %v6028_v37 = vld [vmem:[%s6438_s28 + $0x258] sm:$0xff]  }
  0x2d   : > { %5351 = vmatprep.subr.bf16.mxu1 %v5972_v26  ;;  %v6017_v26 = vld [vmem:[%s6438_s28 + $0x230] sm:$0xff]   ;;  %v6027_v36 = vld [vmem:[%s6438_s28 + $0x2a0] sm:$0xff]   ;;  %v6029_v38 = vld [vmem:[%s6438_s28 + $0x218] sm:$0xff]  }
  0x2e   : > { %v6030_v39 = vld [vmem:[%s6438_s28 + $0x2d8] sm:$0xff]   ;;  %v6035_v45 = vld [vmem:[%s6438_s28 + $0x290] sm:$0xff]   ;;  %v6036_v47 = vld [vmem:[%s6438_s28 + $0x248] sm:$0xff]  }
  0x2f   : > { %5330 = vmatpush3.bf16.msra.mxu0 %v5973_v27  ;;  %v6018_v27 = vld [vmem:[%s6438_s28 + $0x2f0] sm:$0xff]   ;;  %v6031_v40 = vld [vmem:[%s6438_s28 + $0x298] sm:$0xff]   ;;  %v6039_v54 = vld [vmem:[%s6438_s28 + $0x288] sm:$0xff]  }
  0x30   : > { %5352 = vmatpush3.bf16.msra.mxu1 %v5974_v28  ;;  %5331 = vmatprep.subr.bf16.mxu0 %v5975_v29  ;;  %v6019_v28 = vld [vmem:[%s6438_s28 + $0x2b0] sm:$0xff]   ;;  %v6020_v29 = vld [vmem:[%s6438_s28 + $0x268] sm:$0xff]  }
  0x31   : > { %5353 = vmatprep.subr.bf16.mxu1 %v5976_v31  ;;  %v6022_v31 = vld [vmem:[%s6438_s28 + $0x2e8] sm:$0xff]  }
  0x33   : > { %5332 = vmatpush3.bf16.msra.mxu0 %v5977_v32  ;;  %v6023_v32 = vld [vmem:[%s6438_s28 + $0x2a8] sm:$0xff]  }
  0x34   : > { %5354 = vmatpush3.bf16.msra.mxu1 %v5978_v33  ;;  %5361 = vmatprep.subr.bf16.mxu0 %v5980_v35  ;;  %v6024_v33 = vld [vmem:[%s6438_s28 + $0x260] sm:$0xff]  }
  0x35   : > { %5383 = vmatprep.subr.bf16.mxu1 %v5982_v41  ;;  %v6026_v35 = vld [vmem:[%s6438_s28 + $0x2e0] sm:$0xff]   ;;  %v6032_v41 = vld [vmem:[%s6438_s28 + $0x250] sm:$0xff]  }
  0x36   : > { %3779 = vmatmul.mubr.bf16.vlgmr.msra.gmra.mxu0 %v1060_v46  ;;  %v240_v46 = vld [vmem:[%s6433_s24 + $0x8] sm:$0xff] }
  0x37   : > { %5362 = vmatpush3.bf16.msra.mxu0 %v5981_v48  ;;  %3819 = vmatmul.mubr.bf16.vlgmr.msra.gmra.mxu1 %v1082_v52  ;;  %v1093_v48 = vrot.slane %v240_v46, %v6476_v42  ;;  %v1086_v49 = vcombine.high %v240_v46, %v240_v46  ;;  %v6086_v46 = vld [vmem:[%s6438_s28 + $0x428] sm:$0xff]  }
  0x38   : > { %5363 = vmatprep.subr.bf16.mxu0 %v5984_v53  ;;  %5384 = vmatpush3.bf16.msra.mxu1 %v5983_v50  ;;  %v6037_v50 = vld [vmem:[%s6438_s28 + $0x208] sm:$0xff]  }
  0x39   : > { %3858 = vmatprep.mubr.bf16.mxu0 %v1081_v51  ;;  %5385 = vmatprep.subr.bf16.mxu1 %v5986_v56  ;;  %v6038_v51 = vld [vmem:[%s6438_s28 + $0x2c8] sm:$0xff]   ;;  %v1101_v52 = vcombine.high %v1093_v48, %v1093_v48  ;;  %v6549_v53 = vrot.slane %v1086_v49, %v6476_v42  ;;  %v6089_v49 = vld [vmem:[%s6438_s28 + $0x460] sm:$0xff]  }
  0x3a   : > { %3898 = vmatprep.mubr.bf16.mxu1 %v1085_v57  ;;  %v6041_v57 = vld [vmem:[%s6438_s28 + $0x200] sm:$0xff]  }
  0x3b   : > { %5364 = vmatpush3.bf16.msra.mxu0 %v5985_v55  ;;  %v6040_v55 = vld [vmem:[%s6438_s28 + $0x240] sm:$0xff]   ;;  %v1123_v56 = vrot.slane %v1101_v52, %v6476_v42 }
  0x3c   : > { %5365 = vmatprep.subr.bf16.mxu0 %v5988_v59  ;;  %5386 = vmatpush3.bf16.msra.mxu1 %v5987_v58  ;;  %v1102_v58 = vcombine.high %v6549_v53, %v6549_v53  ;;  %v6042_v59 = vld [vmem:[%s6438_s28 + $0x2c0] sm:$0xff]  }
  0x3d   : > { %5387 = vmatprep.subr.bf16.mxu1 %v5990_v61  ;;  %v6043_v61 = vld [vmem:[%s6438_s28 + $0x280] sm:$0xff]  }
  0x3e   : > { %v6092_v52 = vld [vmem:[%s6438_s28 + $0x4a0] sm:$0xff]  }
  0x3f   : > { %5366 = vmatpush3.bf16.msra.mxu0 %v5989_v60  ;;  %v1133_v60 = vcombine.high %v1123_v56, %v1123_v56 }
  0x40   : > { %5367 = vmatprep.subr.bf16.mxu0 %v5992_v63  ;;  %5388 = vmatpush3.bf16.msra.mxu1 %v5991_v62  ;;  %v1109_v62 = vrot.slane %v1093_v48, %v6476_v42  ;;  %v6044_v63 = vld [vmem:[%s6438_s28 + $0x378] sm:$0xff]   ;;  %v6088_v48 = vld [vmem:[%s6438_s28 + $0x4a8] sm:$0xff]  }
  0x41   : > { %5389 = vmatprep.subr.bf16.mxu1 %v5994_v1  ;;  %v1130_v1 = vrot.slane %v1102_v58, %v6476_v42  ;;  %v6098_v58 = vld [vmem:[%s6438_s28 + $0x410] sm:$0xff]  }
  0x43   : > { %5368 = vmatpush3.bf16.msra.mxu0 %v5993_v0  ;;  %v6045_v0 = vld [vmem:[%s6438_s28 + $0x338] sm:$0xff]  }
  0x44   : > { %5369 = vmatprep.subr.bf16.mxu0 %v5996_v3  ;;  %5390 = vmatpush3.bf16.msra.mxu1 %v5995_v2  ;;  %v6046_v2 = vld [vmem:[%s6438_s28 + $0x3f8] sm:$0xff]  }
  0x45   : > { %5391 = vmatprep.subr.bf16.mxu1 %v5998_v5  ;;  %v6047_v3 = vld [vmem:[%s6438_s28 + $0x3b8] sm:$0xff]   ;;  %v6048_v5 = vld [vmem:[%s6438_s28 + $0x370] sm:$0xff]  }
  0x47   : > { %5370 = vmatpush3.bf16.msra.mxu0 %v5997_v4  ;;  %v1131_v4 = vcombine.high %v1109_v62, %v1109_v62 }
  0x48   : > { %5371 = vmatprep.subr.bf16.mxu0 %v6000_v7  ;;  %5392 = vmatpush3.bf16.msra.mxu1 %v5999_v6  ;;  %v6049_v6 = vld [vmem:[%s6438_s28 + $0x330] sm:$0xff]   ;;  %v1134_v7 = vcombine.high %v1130_v1, %v1130_v1 }
  0x49   : > { %5393 = vmatprep.subr.bf16.mxu1 %v6002_v9  ;;  %v6051_v9 = vld [vmem:[%s6438_s28 + $0x3b0] sm:$0xff]  }
  0x4b   : > { %5372 = vmatpush3.bf16.msra.mxu0 %v6001_v8  ;;  %v6050_v8 = vld [vmem:[%s6438_s28 + $0x3f0] sm:$0xff]  }
  0x4c   : > { %5373 = vmatprep.subr.bf16.mxu0 %v6004_v11  ;;  %5394 = vmatpush3.bf16.msra.mxu1 %v6003_v10  ;;  %v6052_v10 = vld [vmem:[%s6438_s28 + $0x368] sm:$0xff]  }
  0x4d   : > { %5395 = vmatprep.subr.bf16.mxu1 %v6006_v13  ;;  %v6053_v11 = vld [vmem:[%s6438_s28 + $0x328] sm:$0xff]  }
  0x4e   : > { %v6055_v13 = vld [vmem:[%s6438_s28 + $0x3a8] sm:$0xff]  }
  0x4f   : > { %5374 = vmatpush3.bf16.msra.mxu0 %v6005_v12  ;;  %v6054_v12 = vld [vmem:[%s6438_s28 + $0x3e8] sm:$0xff]  }
  0x50   : > { %5375 = vmatprep.subr.bf16.mxu0 %v6008_v15  ;;  %5396 = vmatpush3.bf16.msra.mxu1 %v6007_v14  ;;  %v6056_v14 = vld [vmem:[%s6438_s28 + $0x360] sm:$0xff]  }
  0x51   : > { %5397 = vmatprep.subr.bf16.mxu1 %v6010_v17  ;;  %v6057_v15 = vld [vmem:[%s6438_s28 + $0x320] sm:$0xff]  }
  0x52   : > { %v6059_v17 = vld [vmem:[%s6438_s28 + $0x3a0] sm:$0xff]  }
  0x53   : > { %5376 = vmatpush3.bf16.msra.mxu0 %v6009_v16  ;;  %v6058_v16 = vld [vmem:[%s6438_s28 + $0x3e0] sm:$0xff]  }
  0x54   : > { %5405 = vmatprep.subr.bf16.mxu0 %v6012_v20  ;;  %5398 = vmatpush3.bf16.msra.mxu1 %v6011_v18  ;;  %v6060_v18 = vld [vmem:[%s6438_s28 + $0x358] sm:$0xff]  }
  0x55   : > { %5427 = vmatprep.subr.bf16.mxu1 %v6014_v22  ;;  %v6062_v20 = vld [vmem:[%s6438_s28 + $0x3d8] sm:$0xff]   ;;  %v6064_v22 = vld [vmem:[%s6438_s28 + $0x350] sm:$0xff]  }
  0x56   : > { %3859 = vmatmul.mubr.bf16.vlgmr.msra.gmra.mxu0 %v1067_v19  ;;  %v6061_v19 = vld [vmem:[%s6438_s28 + $0x318] sm:$0xff]  }
  0x57   : > { %5406 = vmatpush3.bf16.msra.mxu0 %v6013_v21  ;;  %3899 = vmatmul.mubr.bf16.vlgmr.msra.gmra.mxu1 %v1083_v24  ;;  %v6063_v21 = vld [vmem:[%s6438_s28 + $0x398] sm:$0xff]   ;;  %v6066_v24 = vld [vmem:[%s6438_s28 + $0x3d0] sm:$0xff]  }
  0x58   : > { %5407 = vmatprep.subr.bf16.mxu0 %v6016_v25  ;;  %5428 = vmatpush3.bf16.msra.mxu1 %v6015_v23  ;;  %v6065_v23 = vld [vmem:[%s6438_s28 + $0x310] sm:$0xff]  }
  0x59   : > { %5429 = vmatprep.subr.bf16.mxu1 %v6018_v27  ;;  %3938 = vmatprep.mubr.bf16.mxu0 %v1123_v56  ;;  %v6067_v25 = vld [vmem:[%s6438_s28 + $0x390] sm:$0xff]   ;;  %v6069_v27 = vld [vmem:[%s6438_s28 + $0x308] sm:$0xff]   ;;  %v6096_v56 = vld [vmem:[%s6438_s28 + $0x498] sm:$0xff]  }
  0x5a   : > { %3978 = vmatprep.mubr.bf16.mxu1 %v1133_v60  ;;  %v6100_v60 = vld [vmem:[%s6438_s28 + $0x490] sm:$0xff]  }
  0x5b   : > { %5408 = vmatpush3.bf16.msra.mxu0 %v6017_v26  ;;  %v6068_v26 = vld [vmem:[%s6438_s28 + $0x348] sm:$0xff]  }
  0x5c   : > { %5409 = vmatprep.subr.bf16.mxu0 %v6020_v29  ;;  %5430 = vmatpush3.bf16.msra.mxu1 %v6019_v28  ;;  %v6070_v28 = vld [vmem:[%s6438_s28 + $0x3c8] sm:$0xff]  }
  0x5d   : > { %5431 = vmatprep.subr.bf16.mxu1 %v6022_v31  ;;  %v6071_v29 = vld [vmem:[%s6438_s28 + $0x388] sm:$0xff]   ;;  %v6073_v31 = vld [vmem:[%s6438_s28 + $0x300] sm:$0xff]  }
  0x5f   : > { %5410 = vmatpush3.bf16.msra.mxu0 %v6021_v30  ;;  %v6072_v30 = vld [vmem:[%s6438_s28 + $0x340] sm:$0xff]  }
  0x60   : > { %5411 = vmatprep.subr.bf16.mxu0 %v6024_v33  ;;  %5432 = vmatpush3.bf16.msra.mxu1 %v6023_v32  ;;  %v6074_v32 = vld [vmem:[%s6438_s28 + $0x3c0] sm:$0xff]  }
  0x61   : > { %5433 = vmatprep.subr.bf16.mxu1 %v6026_v35  ;;  %v6076_v33 = vld [vmem:[%s6438_s28 + $0x380] sm:$0xff]   ;;  %v6077_v35 = vld [vmem:[%s6438_s28 + $0x478] sm:$0xff]  }
  0x63   : > { %5412 = vmatpush3.bf16.msra.mxu0 %v6025_v34  ;;  %v1116_v34 = vrot.slane %v6549_v53, %v6476_v42  ;;  %v6093_v53 = vld [vmem:[%s6438_s28 + $0x458] sm:$0xff]  }
  0x64   : > { %5413 = vmatprep.subr.bf16.mxu0 %v6028_v37  ;;  %5434 = vmatpush3.bf16.msra.mxu1 %v6027_v36  ;;  %v6078_v36 = vld [vmem:[%s6438_s28 + $0x438] sm:$0xff]  }
  0x65   : > { %5435 = vmatprep.subr.bf16.mxu1 %v6030_v39  ;;  %v6079_v37 = vld [vmem:[%s6438_s28 + $0x4f8] sm:$0xff]   ;;  %v1132_v39 = vcombine.high %v1116_v34, %v1116_v34 }
  0x67   : > { %5414 = vmatpush3.bf16.msra.mxu0 %v6029_v38  ;;  %v6080_v38 = vld [vmem:[%s6438_s28 + $0x4b8] sm:$0xff]  }
  0x68   : > { %5415 = vmatprep.subr.bf16.mxu0 %v6032_v41  ;;  %5436 = vmatpush3.bf16.msra.mxu1 %v6031_v40  ;;  %v6081_v40 = vld [vmem:[%s6438_s28 + $0x470] sm:$0xff]  }
  0x69   : > { %5437 = vmatprep.subr.bf16.mxu1 %v6034_v44  ;;  %v6082_v41 = vld [vmem:[%s6438_s28 + $0x430] sm:$0xff]  }
  0x6a   : > { %v6084_v44 = vld [vmem:[%s6438_s28 + $0x4b0] sm:$0xff]  }
  0x6b   : > { %5416 = vmatpush3.bf16.msra.mxu0 %v6033_v43  ;;  %v6083_v43 = vld [vmem:[%s6438_s28 + $0x4f0] sm:$0xff]  }
  0x6c   : > { %5417 = vmatprep.subr.bf16.mxu0 %v6036_v47  ;;  %5438 = vmatpush3.bf16.msra.mxu1 %v6035_v45  ;;  %v6085_v45 = vld [vmem:[%s6438_s28 + $0x468] sm:$0xff]  }
  0x6d   : > { %5439 = vmatprep.subr.bf16.mxu1 %v6038_v51  ;;  %v6087_v47 = vld [vmem:[%s6438_s28 + $0x4e8] sm:$0xff]   ;;  %v6091_v51 = vld [vmem:[%s6438_s28 + $0x4e0] sm:$0xff]  }
  0x6f   : > { %5418 = vmatpush3.bf16.msra.mxu0 %v6037_v50  ;;  %v6090_v50 = vld [vmem:[%s6438_s28 + $0x420] sm:$0xff]  }
  0x70   : > { %5419 = vmatprep.subr.bf16.mxu0 %v6040_v55  ;;  %5440 = vmatpush3.bf16.msra.mxu1 %v6039_v54  ;;  %v6094_v54 = vld [vmem:[%s6438_s28 + $0x418] sm:$0xff]  }
  0x71   : > { %5441 = vmatprep.subr.bf16.mxu1 %v6042_v59  ;;  %v6095_v55 = vld [vmem:[%s6438_s28 + $0x4d8] sm:$0xff]   ;;  %v6099_v59 = vld [vmem:[%s6438_s28 + $0x4d0] sm:$0xff]  }
  0x73   : > { %5420 = vmatpush3.bf16.msra.mxu0 %v6041_v57  ;;  %v6097_v57 = vld [vmem:[%s6438_s28 + $0x450] sm:$0xff]  }
  0x74   : > { %5449 = vmatprep.subr.bf16.mxu0 %v6044_v63  ;;  %5442 = vmatpush3.bf16.msra.mxu1 %v6043_v61  ;;  %v241_v61 = vld [vmem:[%s6433_s24 + $0x10] sm:$0xff] }
  0x75   : > { %5471 = vmatprep.subr.bf16.mxu1 %v6046_v2  ;;  %v1142_v63 = vrot.slane %v241_v61, %v6476_v42  ;;  %v6103_v2 = vld [vmem:[%s6438_s28 + $0x4c8] sm:$0xff]  }
  0x76   : > { %3939 = vmatmul.mubr.bf16.vlgmr.msra.gmra.mxu0 %v1109_v62  ;;  %v6101_v62 = vld [vmem:[%s6438_s28 + $0x448] sm:$0xff]  }
  0x77   : > { %5450 = vmatpush3.bf16.msra.mxu0 %v6045_v0  ;;  %4018 = vmatprep.mubr.bf16.mxu0 %v1130_v1  ;;  %v1135_v0 = vcombine.high %v241_v61, %v241_v61  ;;  %v6102_v1 = vld [vmem:[%s6438_s28 + $0x408] sm:$0xff]  }
  0x78   : > { %3979 = vmatmul.mubr.bf16.vlgmr.msra.gmra.mxu1 %v1131_v4  ;;  %5451 = vmatprep.subr.bf16.mxu0 %v6048_v5  ;;  %v6104_v5 = vld [vmem:[%s6438_s28 + $0x488] sm:$0xff]  }
  0x79   : > { %5472 = vmatpush3.bf16.msra.mxu1 %v6047_v3  ;;  %4058 = vmatprep.mubr.bf16.mxu1 %v1134_v7  ;;  %v1150_v3 = vcombine.high %v1142_v63, %v1142_v63  ;;  %v6625_v4 = vrot.slane %v1135_v0, %v6476_v42  ;;  %v6151_v61 = vld [vmem:[%s6438_s28 + $0x628] sm:$0xff]   ;;  %v6154_v0 = vld [vmem:[%s6438_s28 + $0x660] sm:$0xff]  }
  0x7a   : > { %5473 = vmatprep.subr.bf16.mxu1 %v6050_v8  ;;  %v6106_v8 = vld [vmem:[%s6438_s28 + $0x400] sm:$0xff]  }
  0x7b   : > { %5452 = vmatpush3.bf16.msra.mxu0 %v6049_v6  ;;  %v6105_v6 = vld [vmem:[%s6438_s28 + $0x440] sm:$0xff]   ;;  %v1172_v7 = vrot.slane %v1150_v3, %v6476_v42 }
  0x7c   : > { %5453 = vmatprep.subr.bf16.mxu0 %v6052_v10  ;;  %v6107_v10 = vld [vmem:[%s6438_s28 + $0x4c0] sm:$0xff]  }
  0x7d   : > { %5474 = vmatpush3.bf16.msra.mxu1 %v6051_v9  ;;  %v1151_v9 = vcombine.high %v6625_v4, %v6625_v4  ;;  %v6157_v3 = vld [vmem:[%s6438_s28 + $0x6a0] sm:$0xff]  }
  0x7e   : > { %5475 = vmatprep.subr.bf16.mxu1 %v6054_v12  ;;  %v6108_v12 = vld [vmem:[%s6438_s28 + $0x480] sm:$0xff]  }
  0x7f   : > { %5454 = vmatpush3.bf16.msra.mxu0 %v6053_v11  ;;  %v1182_v11 = vcombine.high %v1172_v7, %v1172_v7 }
  0x80   : > { %5455 = vmatprep.subr.bf16.mxu0 %v6056_v14  ;;  %v6109_v14 = vld [vmem:[%s6438_s28 + $0x578] sm:$0xff]  }
  0x81   : > { %5476 = vmatpush3.bf16.msra.mxu1 %v6055_v13  ;;  %v1158_v13 = vrot.slane %v1142_v63, %v6476_v42  ;;  %v6153_v63 = vld [vmem:[%s6438_s28 + $0x6a8] sm:$0xff]  }
  0x82   : > { %5477 = vmatprep.subr.bf16.mxu1 %v6058_v16  ;;  %v1179_v16 = vrot.slane %v1151_v9, %v6476_v42  ;;  %v6163_v9 = vld [vmem:[%s6438_s28 + $0x610] sm:$0xff]  }
  0x83   : > { %5456 = vmatpush3.bf16.msra.mxu0 %v6057_v15  ;;  %v6110_v15 = vld [vmem:[%s6438_s28 + $0x538] sm:$0xff]  }
  0x84   : > { %5457 = vmatprep.subr.bf16.mxu0 %v6060_v18  ;;  %v6112_v18 = vld [vmem:[%s6438_s28 + $0x5b8] sm:$0xff]  }
  0x85   : > { %5478 = vmatpush3.bf16.msra.mxu1 %v6059_v17  ;;  %v6111_v17 = vld [vmem:[%s6438_s28 + $0x5f8] sm:$0xff]  }
  0x86   : > { %5479 = vmatprep.subr.bf16.mxu1 %v6062_v20  ;;  %v6113_v20 = vld [vmem:[%s6438_s28 + $0x570] sm:$0xff]  }
  0x87   : > { %5458 = vmatpush3.bf16.msra.mxu0 %v6061_v19  ;;  %v1180_v19 = vcombine.high %v1158_v13, %v1158_v13 }
  0x88   : > { %5459 = vmatprep.subr.bf16.mxu0 %v6064_v22  ;;  %v1183_v22 = vcombine.high %v1179_v16, %v1179_v16 }
  0x89   : > { %5480 = vmatpush3.bf16.msra.mxu1 %v6063_v21  ;;  %v6114_v21 = vld [vmem:[%s6438_s28 + $0x530] sm:$0xff]  }
  0x8a   : > { %5481 = vmatprep.subr.bf16.mxu1 %v6066_v24  ;;  %v6116_v24 = vld [vmem:[%s6438_s28 + $0x5b0] sm:$0xff]  }
  0x8b   : > { %5460 = vmatpush3.bf16.msra.mxu0 %v6065_v23  ;;  %v6115_v23 = vld [vmem:[%s6438_s28 + $0x5f0] sm:$0xff]  }
  0x8c   : > { %5461 = vmatprep.subr.bf16.mxu0 %v6068_v26  ;;  %v6118_v26 = vld [vmem:[%s6438_s28 + $0x528] sm:$0xff]  }
  0x8d   : > { %5482 = vmatpush3.bf16.msra.mxu1 %v6067_v25  ;;  %v6117_v25 = vld [vmem:[%s6438_s28 + $0x568] sm:$0xff]  }
  0x8e   : > { %5483 = vmatprep.subr.bf16.mxu1 %v6070_v28  ;;  %v6120_v28 = vld [vmem:[%s6438_s28 + $0x5a8] sm:$0xff]  }
  0x8f   : > { %5462 = vmatpush3.bf16.msra.mxu0 %v6069_v27  ;;  %v6119_v27 = vld [vmem:[%s6438_s28 + $0x5e8] sm:$0xff]  }
  0x90   : > { %5463 = vmatprep.subr.bf16.mxu0 %v6072_v30  ;;  %v6122_v30 = vld [vmem:[%s6438_s28 + $0x520] sm:$0xff]  }
  0x91   : > { %5484 = vmatpush3.bf16.msra.mxu1 %v6071_v29  ;;  %v6121_v29 = vld [vmem:[%s6438_s28 + $0x560] sm:$0xff]  }
  0x92   : > { %5485 = vmatprep.subr.bf16.mxu1 %v6074_v32  ;;  %v6124_v32 = vld [vmem:[%s6438_s28 + $0x5a0] sm:$0xff]  }
  0x93   : > { %5464 = vmatpush3.bf16.msra.mxu0 %v6073_v31  ;;  %v6123_v31 = vld [vmem:[%s6438_s28 + $0x5e0] sm:$0xff]  }
  0x94   : > { %5493 = vmatprep.subr.bf16.mxu0 %v6077_v35  ;;  %v6127_v35 = vld [vmem:[%s6438_s28 + $0x5d8] sm:$0xff]  }
  0x95   : > { %5486 = vmatpush3.bf16.msra.mxu1 %v6076_v33  ;;  %v6125_v33 = vld [vmem:[%s6438_s28 + $0x558] sm:$0xff]  }
  0x96   : > { %4019 = vmatmul.mubr.bf16.vlgmr.msra.gmra.mxu0 %v1116_v34  ;;  %5515 = vmatprep.subr.bf16.mxu1 %v6079_v37  ;;  %v6126_v34 = vld [vmem:[%s6438_s28 + $0x518] sm:$0xff]   ;;  %v6129_v37 = vld [vmem:[%s6438_s28 + $0x550] sm:$0xff]  }
  0x97   : > { %5494 = vmatpush3.bf16.msra.mxu0 %v6078_v36  ;;  %4098 = vmatprep.mubr.bf16.mxu0 %v1172_v7  ;;  %v6128_v36 = vld [vmem:[%s6438_s28 + $0x598] sm:$0xff]  }
  0x98   : > { %4059 = vmatmul.mubr.bf16.vlgmr.msra.gmra.mxu1 %v1132_v39  ;;  %5495 = vmatprep.subr.bf16.mxu0 %v6081_v40  ;;  %v6131_v39 = vld [vmem:[%s6438_s28 + $0x5d0] sm:$0xff]   ;;  %v6161_v7 = vld [vmem:[%s6438_s28 + $0x698] sm:$0xff]  }
  0x99   : > { %5516 = vmatpush3.bf16.msra.mxu1 %v6080_v38  ;;  %4138 = vmatprep.mubr.bf16.mxu1 %v1182_v11  ;;  %v6130_v38 = vld [vmem:[%s6438_s28 + $0x510] sm:$0xff]   ;;  %v6166_v11 = vld [vmem:[%s6438_s28 + $0x648] sm:$0xff]  }
  0x9a   : > { %5517 = vmatprep.subr.bf16.mxu1 %v6083_v43  ;;  %v6132_v40 = vld [vmem:[%s6438_s28 + $0x590] sm:$0xff]   ;;  %v6134_v43 = vld [vmem:[%s6438_s28 + $0x508] sm:$0xff]  }
  0x9b   : > { %5496 = vmatpush3.bf16.msra.mxu0 %v6082_v41  ;;  %v6133_v41 = vld [vmem:[%s6438_s28 + $0x548] sm:$0xff]  }
  0x9c   : > { %5497 = vmatprep.subr.bf16.mxu0 %v6085_v45  ;;  %v6136_v45 = vld [vmem:[%s6438_s28 + $0x588] sm:$0xff]  }
  0x9d   : > { %5518 = vmatpush3.bf16.msra.mxu1 %v6084_v44  ;;  %v6135_v44 = vld [vmem:[%s6438_s28 + $0x5c8] sm:$0xff]  }
  0x9e   : > { %5519 = vmatprep.subr.bf16.mxu1 %v6087_v47  ;;  %v6138_v47 = vld [vmem:[%s6438_s28 + $0x500] sm:$0xff]  }
  0x9f   : > { %5498 = vmatpush3.bf16.msra.mxu0 %v6086_v46  ;;  %v6137_v46 = vld [vmem:[%s6438_s28 + $0x540] sm:$0xff]  }
  0xa0   : > { %5499 = vmatprep.subr.bf16.mxu0 %v6089_v49  ;;  %v6141_v49 = vld [vmem:[%s6438_s28 + $0x580] sm:$0xff]  }
  0xa1   : > { %5520 = vmatpush3.bf16.msra.mxu1 %v6088_v48  ;;  %v6139_v48 = vld [vmem:[%s6438_s28 + $0x5c0] sm:$0xff]  }
  0xa2   : > { %5521 = vmatprep.subr.bf16.mxu1 %v6091_v51  ;;  %v6142_v51 = vld [vmem:[%s6438_s28 + $0x678] sm:$0xff]  }
  0xa3   : > { %5500 = vmatpush3.bf16.msra.mxu0 %v6090_v50  ;;  %v1165_v50 = vrot.slane %v6625_v4, %v6476_v42  ;;  %v6158_v4 = vld [vmem:[%s6438_s28 + $0x658] sm:$0xff]  }
  0xa4   : > { %5501 = vmatprep.subr.bf16.mxu0 %v6093_v53  ;;  %v6144_v53 = vld [vmem:[%s6438_s28 + $0x6f8] sm:$0xff]  }
  0xa5   : > { %5522 = vmatpush3.bf16.msra.mxu1 %v6092_v52  ;;  %v6143_v52 = vld [vmem:[%s6438_s28 + $0x638] sm:$0xff]  }
  0xa6   : > { %5523 = vmatprep.subr.bf16.mxu1 %v6095_v55  ;;  %v1181_v55 = vcombine.high %v1165_v50, %v1165_v50 }
  0xa7   : > { %5502 = vmatpush3.bf16.msra.mxu0 %v6094_v54  ;;  %v6145_v54 = vld [vmem:[%s6438_s28 + $0x6b8] sm:$0xff]  }
  0xa8   : > { %5503 = vmatprep.subr.bf16.mxu0 %v6097_v57  ;;  %v6147_v57 = vld [vmem:[%s6438_s28 + $0x630] sm:$0xff]  }
  0xa9   : > { %5524 = vmatpush3.bf16.msra.mxu1 %v6096_v56  ;;  %v6146_v56 = vld [vmem:[%s6438_s28 + $0x670] sm:$0xff]  }
  0xaa   : > { %5525 = vmatprep.subr.bf16.mxu1 %v6099_v59  ;;  %v6149_v59 = vld [vmem:[%s6438_s28 + $0x6b0] sm:$0xff]  }
  0xab   : > { %5504 = vmatpush3.bf16.msra.mxu0 %v6098_v58  ;;  %v6148_v58 = vld [vmem:[%s6438_s28 + $0x6f0] sm:$0xff]  }
  0xac   : > { %5505 = vmatprep.subr.bf16.mxu0 %v6101_v62  ;;  %v6152_v62 = vld [vmem:[%s6438_s28 + $0x6e8] sm:$0xff]  }
  0xad   : > { %5526 = vmatpush3.bf16.msra.mxu1 %v6100_v60  ;;  %v6150_v60 = vld [vmem:[%s6438_s28 + $0x668] sm:$0xff]  }
  0xae   : > { %5527 = vmatprep.subr.bf16.mxu1 %v6103_v2  ;;  %v6156_v2 = vld [vmem:[%s6438_s28 + $0x6e0] sm:$0xff]  }
  0xaf   : > { %5506 = vmatpush3.bf16.msra.mxu0 %v6102_v1  ;;  %v6155_v1 = vld [vmem:[%s6438_s28 + $0x620] sm:$0xff]  }
  0xb0   : > { %5507 = vmatprep.subr.bf16.mxu0 %v6105_v6  ;;  %v6160_v6 = vld [vmem:[%s6438_s28 + $0x6d8] sm:$0xff]  }
  0xb1   : > { %5528 = vmatpush3.bf16.msra.mxu1 %v6104_v5  ;;  %v6159_v5 = vld [vmem:[%s6438_s28 + $0x618] sm:$0xff]  }
  0xb2   : > { %5529 = vmatprep.subr.bf16.mxu1 %v6107_v10  ;;  %v6164_v10 = vld [vmem:[%s6438_s28 + $0x6d0] sm:$0xff]  }
  0xb3   : > { %5508 = vmatpush3.bf16.msra.mxu0 %v6106_v8  ;;  %v6162_v8 = vld [vmem:[%s6438_s28 + $0x650] sm:$0xff]  }
  0xb4   : > { %5537 = vmatprep.subr.bf16.mxu0 %v6109_v14 }
  0xb5   : > { %5530 = vmatpush3.bf16.msra.mxu1 %v6108_v12  ;;  %v242_v12 = vld [vmem:[%s6433_s24 + $0x18] sm:$0xff] }
  0xb6   : > { %4099 = vmatmul.mubr.bf16.vlgmr.msra.gmra.mxu0 %v1158_v13  ;;  %5559 = vmatprep.subr.bf16.mxu1 %v6111_v17  ;;  %v6165_v13 = vld [vmem:[%s6438_s28 + $0x690] sm:$0xff]   ;;  %v1191_v14 = vrot.slane %v242_v12, %v6476_v42  ;;  %v6167_v17 = vld [vmem:[%s6438_s28 + $0x608] sm:$0xff]  }
  0xb7   : > { %5538 = vmatpush3.bf16.msra.mxu0 %v6110_v15  ;;  %4178 = vmatprep.mubr.bf16.mxu0 %v1179_v16  ;;  %v1184_v15 = vcombine.high %v242_v12, %v242_v12  ;;  %v6168_v16 = vld [vmem:[%s6438_s28 + $0x6c8] sm:$0xff]   ;;  %v6207_v12 = vld [vmem:[%s6438_s28 + $0x878] sm:$0xff]  }
  0xb8   : > { %4139 = vmatmul.mubr.bf16.vlgmr.msra.gmra.mxu1 %v1180_v19  ;;  %5539 = vmatprep.subr.bf16.mxu0 %v6113_v20  ;;  %v6170_v20 = vld [vmem:[%s6438_s28 + $0x640] sm:$0xff]  }
  0xb9   : > { %5560 = vmatpush3.bf16.msra.mxu1 %v6112_v18  ;;  %4218 = vmatprep.mubr.bf16.mxu1 %v1183_v22  ;;  %v1199_v18 = vcombine.high %v1191_v14, %v1191_v14  ;;  %v6701_v19 = vrot.slane %v1184_v15, %v6476_v42  ;;  %v6208_v15 = vld [vmem:[%s6438_s28 + $0x838] sm:$0xff]  }
  0xba   : > { %5561 = vmatprep.subr.bf16.mxu1 %v6115_v23 }
  0xbb   : > { %5540 = vmatpush3.bf16.msra.mxu0 %v6114_v21  ;;  %v6169_v21 = vld [vmem:[%s6438_s28 + $0x688] sm:$0xff]   ;;  %v1221_v22 = vrot.slane %v1199_v18, %v6476_v42  ;;  %v1200_v23 = vcombine.high %v6701_v19, %v6701_v19  ;;  %v6210_v18 = vld [vmem:[%s6438_s28 + $0x8b8] sm:$0xff]  }
  0xbc   : > { %5541 = vmatprep.subr.bf16.mxu0 %v6117_v25  ;;  %v6171_v25 = vld [vmem:[%s6438_s28 + $0x600] sm:$0xff]  }
  0xbd   : > { %5562 = vmatpush3.bf16.msra.mxu1 %v6116_v24  ;;  %v6172_v24 = vld [vmem:[%s6438_s28 + $0x6c0] sm:$0xff]  }
  0xbe   : > { %5563 = vmatprep.subr.bf16.mxu1 %v6119_v27  ;;  %v1207_v27 = vrot.slane %v1191_v14, %v6476_v42  ;;  %v6209_v14 = vld [vmem:[%s6438_s28 + $0x8f8] sm:$0xff]  }
  0xbf   : > { %5542 = vmatpush3.bf16.msra.mxu0 %v6118_v26  ;;  %v1231_v26 = vcombine.high %v1221_v22, %v1221_v22 }
  0xc0   : > { %5543 = vmatprep.subr.bf16.mxu0 %v6121_v29  ;;  %v6173_v29 = vld [vmem:[%s6438_s28 + $0x680] sm:$0xff]  }
  0xc1   : > { %5564 = vmatpush3.bf16.msra.mxu1 %v6120_v28  ;;  %v6174_v28 = vld [vmem:[%s6438_s28 + $0x778] sm:$0xff]  }
  0xc2   : > { %5565 = vmatprep.subr.bf16.mxu1 %v6123_v31  ;;  %v6176_v31 = vld [vmem:[%s6438_s28 + $0x7f8] sm:$0xff]  }
  0xc3   : > { %5544 = vmatpush3.bf16.msra.mxu0 %v6122_v30  ;;  %v1228_v30 = vrot.slane %v1200_v23, %v6476_v42 }
  0xc4   : > { %5545 = vmatprep.subr.bf16.mxu0 %v6125_v33  ;;  %v1229_v33 = vcombine.high %v1207_v27, %v1207_v27 }
  0xc5   : > { %5566 = vmatpush3.bf16.msra.mxu1 %v6124_v32  ;;  %v6175_v32 = vld [vmem:[%s6438_s28 + $0x738] sm:$0xff]  }
  0xc6   : > { %5567 = vmatprep.subr.bf16.mxu1 %v6127_v35  ;;  %v6177_v35 = vld [vmem:[%s6438_s28 + $0x7b8] sm:$0xff]  }
  0xc7   : > { %5546 = vmatpush3.bf16.msra.mxu0 %v6126_v34  ;;  %v6178_v34 = vld [vmem:[%s6438_s28 + $0x770] sm:$0xff]  }
  0xc8   : > { %5547 = vmatprep.subr.bf16.mxu0 %v6129_v37 }
  0xc9   : > { %5568 = vmatpush3.bf16.msra.mxu1 %v6128_v36  ;;  %v1232_v36 = vcombine.high %v1228_v30, %v1228_v30 }
  0xca   : > { %5569 = vmatprep.subr.bf16.mxu1 %v6131_v39  ;;  %v6179_v39 = vld [vmem:[%s6438_s28 + $0x730] sm:$0xff]  }
  0xcb   : > { %5548 = vmatpush3.bf16.msra.mxu0 %v6130_v38  ;;  %v6180_v38 = vld [vmem:[%s6438_s28 + $0x7f0] sm:$0xff]  }
  0xcc   : > { %5549 = vmatprep.subr.bf16.mxu0 %v6133_v41 }
  0xcd   : > { %5570 = vmatpush3.bf16.msra.mxu1 %v6132_v40 }
  0xce   : > { %5571 = vmatprep.subr.bf16.mxu1 %v6135_v44 }
  0xcf   : > { %5550 = vmatpush3.bf16.msra.mxu0 %v6134_v43  ;;  %v6182_v43 = vld [vmem:[%s6438_s28 + $0x768] sm:$0xff]  }
  0xd0   : > { %5551 = vmatprep.subr.bf16.mxu0 %v6137_v46 }
  0xd1   : > { %5572 = vmatpush3.bf16.msra.mxu1 %v6136_v45  ;;  %v6181_v45 = vld [vmem:[%s6438_s28 + $0x7b0] sm:$0xff]  }
  0xd2   : > { %5573 = vmatprep.subr.bf16.mxu1 %v6139_v48  ;;  %v6184_v48 = vld [vmem:[%s6438_s28 + $0x7e8] sm:$0xff]  }
  0xd3   : > { %5552 = vmatpush3.bf16.msra.mxu0 %v6138_v47 }
  0xd4   : > { %5581 = vmatprep.subr.bf16.mxu0 %v6142_v51 }
  0xd5   : > { %5574 = vmatpush3.bf16.msra.mxu1 %v6141_v49 }
  0xd6   : > { %4179 = vmatmul.mubr.bf16.vlgmr.msra.gmra.mxu0 %v1165_v50  ;;  %5603 = vmatprep.subr.bf16.mxu1 %v6144_v53  ;;  %v6183_v50 = vld [vmem:[%s6438_s28 + $0x728] sm:$0xff]  }
  0xd7   : > { %5582 = vmatpush3.bf16.msra.mxu0 %v6143_v52  ;;  %4258 = vmatprep.mubr.bf16.mxu0 %v1221_v22  ;;  %v6186_v52 = vld [vmem:[%s6438_s28 + $0x760] sm:$0xff]  }
  0xd8   : > { %4219 = vmatmul.mubr.bf16.vlgmr.msra.gmra.mxu1 %v1181_v55  ;;  %5583 = vmatprep.subr.bf16.mxu0 %v6146_v56  ;;  %v6185_v55 = vld [vmem:[%s6438_s28 + $0x7a8] sm:$0xff]   ;;  %v6188_v56 = vld [vmem:[%s6438_s28 + $0x7e0] sm:$0xff]  }
  0xd9   : > { %5604 = vmatpush3.bf16.msra.mxu1 %v6145_v54  ;;  %4298 = vmatprep.mubr.bf16.mxu1 %v1231_v26  ;;  %v6214_v26 = vld [vmem:[%s6438_s28 + $0x8b0] sm:$0xff]  }
  0xda   : > { %5605 = vmatprep.subr.bf16.mxu1 %v6148_v58  ;;  %v6187_v58 = vld [vmem:[%s6438_s28 + $0x720] sm:$0xff]  }
  0xdb   : > { %5584 = vmatpush3.bf16.msra.mxu0 %v6147_v57 }
  0xdc   : > { %5585 = vmatprep.subr.bf16.mxu0 %v6150_v60  ;;  %v6189_v60 = vld [vmem:[%s6438_s28 + $0x7a0] sm:$0xff]  }
  0xdd   : > { %5606 = vmatpush3.bf16.msra.mxu1 %v6149_v59  ;;  %v6190_v59 = vld [vmem:[%s6438_s28 + $0x758] sm:$0xff]  }
  0xde   : > { %5607 = vmatprep.subr.bf16.mxu1 %v6152_v62  ;;  %v6191_v62 = vld [vmem:[%s6438_s28 + $0x718] sm:$0xff]  }
  0xdf   : > { %5586 = vmatpush3.bf16.msra.mxu0 %v6151_v61  ;;  %v6192_v61 = vld [vmem:[%s6438_s28 + $0x7d8] sm:$0xff]  }
  0xe0   : > { %5587 = vmatprep.subr.bf16.mxu0 %v6154_v0  ;;  %v6193_v0 = vld [vmem:[%s6438_s28 + $0x798] sm:$0xff]  }
  0xe1   : > { %5608 = vmatpush3.bf16.msra.mxu1 %v6153_v63  ;;  %v6194_v63 = vld [vmem:[%s6438_s28 + $0x750] sm:$0xff]  }
  0xe2   : > { %5609 = vmatprep.subr.bf16.mxu1 %v6156_v2  ;;  %v6195_v2 = vld [vmem:[%s6438_s28 + $0x710] sm:$0xff]  }
  0xe3   : > { %5588 = vmatpush3.bf16.msra.mxu0 %v6155_v1  ;;  %v6196_v1 = vld [vmem:[%s6438_s28 + $0x7d0] sm:$0xff]  }
  0xe4   : > { %5589 = vmatprep.subr.bf16.mxu0 %v6158_v4  ;;  %v6197_v4 = vld [vmem:[%s6438_s28 + $0x790] sm:$0xff]  }
  0xe5   : > { %5610 = vmatpush3.bf16.msra.mxu1 %v6157_v3  ;;  %v6198_v3 = vld [vmem:[%s6438_s28 + $0x748] sm:$0xff]  }
  0xe6   : > { %5611 = vmatprep.subr.bf16.mxu1 %v6160_v6  ;;  %v6199_v6 = vld [vmem:[%s6438_s28 + $0x708] sm:$0xff]  }
  0xe7   : > { %5590 = vmatpush3.bf16.msra.mxu0 %v6159_v5  ;;  %v6200_v5 = vld [vmem:[%s6438_s28 + $0x7c8] sm:$0xff]  }
  0xe8   : > { %5591 = vmatprep.subr.bf16.mxu0 %v6162_v8  ;;  %v6201_v8 = vld [vmem:[%s6438_s28 + $0x788] sm:$0xff]  }
  0xe9   : > { %5612 = vmatpush3.bf16.msra.mxu1 %v6161_v7  ;;  %v6202_v7 = vld [vmem:[%s6438_s28 + $0x740] sm:$0xff]  }
  0xea   : > { %5613 = vmatprep.subr.bf16.mxu1 %v6164_v10  ;;  %v6203_v10 = vld [vmem:[%s6438_s28 + $0x700] sm:$0xff]  }
  0xeb   : > { %5592 = vmatpush3.bf16.msra.mxu0 %v6163_v9  ;;  %v6204_v9 = vld [vmem:[%s6438_s28 + $0x7c0] sm:$0xff]  }
  0xec   : > { %5593 = vmatprep.subr.bf16.mxu0 %v6166_v11  ;;  %v1214_v11 = vrot.slane %v6701_v19, %v6476_v42  ;;  %v6213_v19 = vld [vmem:[%s6438_s28 + $0x8f0] sm:$0xff]  }
  0xed   : > { %5614 = vmatpush3.bf16.msra.mxu1 %v6165_v13  ;;  %v6206_v13 = vld [vmem:[%s6438_s28 + $0x780] sm:$0xff]  }
  0xee   : > { %5615 = vmatprep.subr.bf16.mxu1 %v6168_v16  ;;  %v1230_v16 = vcombine.high %v1214_v11, %v1214_v11 }
  0xef   : > { %5594 = vmatpush3.bf16.msra.mxu0 %v6167_v17  ;;  %v6211_v17 = vld [vmem:[%s6438_s28 + $0x870] sm:$0xff]  }
  0xf0   : > { %5595 = vmatprep.subr.bf16.mxu0 %v6170_v20 }
  0xf1   : > { %5616 = vmatpush3.bf16.msra.mxu1 %v6169_v21  ;;  %v6212_v21 = vld [vmem:[%s6438_s28 + $0x830] sm:$0xff]  }
  0xf2   : > { %5617 = vmatprep.subr.bf16.mxu1 %v6172_v24  ;;  %v6215_v24 = vld [vmem:[%s6438_s28 + $0x868] sm:$0xff]  }
  0xf3   : > { %5596 = vmatpush3.bf16.msra.mxu0 %v6171_v25 }
  0xf4   : > { %5625 = vmatprep.subr.bf16.mxu0 %v6174_v28 }
  0xf5   : > { %5618 = vmatpush3.bf16.msra.mxu1 %v6173_v29  ;;  %v6217_v29 = vld [vmem:[%s6438_s28 + $0x8e8] sm:$0xff]  }
  0xf6   : > { %v5333_v37 = vpop.f32.mrf.mxu0  ;;  %4259 = vmatmul.mubr.bf16.vlgmr.msra.gmra.mxu0 %v1207_v27  ;;  %5647 = vmatprep.subr.bf16.mxu1 %v6176_v31 }
  0xf7   : > { %5626 = vmatpush3.bf16.msra.mxu0 %v6175_v32  ;;  %4338 = vmatprep.mubr.bf16.mxu0 %v1228_v30  ;;  %v5355_v40 = vpop.f32.mrf.mxu1  ;;  %v6216_v32 = vld [vmem:[%s6438_s28 + $0x828] sm:$0xff]  }
  0xf8   : > { %v5334_v41 = vpop.f32.mrf.mxu0  ;;  %4299 = vmatmul.mubr.bf16.vlgmr.msra.gmra.mxu1 %v1229_v33  ;;  %5627 = vmatprep.subr.bf16.mxu0 %v6178_v34  ;;  %v6219_v34 = vld [vmem:[%s6438_s28 + $0x860] sm:$0xff]  }
  0xf9   : > { %v5335_v44 = vadd.f32 %v5334_v41, %v5333_v37  ;;  %5648 = vmatpush3.bf16.msra.mxu1 %v6177_v35  ;;  %4378 = vmatprep.mubr.bf16.mxu1 %v1232_v36  ;;  %v5356_v46 = vpop.f32.mrf.mxu1  ;;  %v6218_v37 = vld [vmem:[%s6438_s28 + $0x8a8] sm:$0xff]   ;;  %v6223_v41 = vld [vmem:[%s6438_s28 + $0x858] sm:$0xff]  }
  0xfa   : > { %v5336_v47 = vpop.f32.mrf.mxu0  ;;  %5649 = vmatprep.subr.bf16.mxu1 %v6180_v38  ;;  %v5357_v49 = vadd.f32 %v5356_v46, %v5355_v40  ;;  %v6221_v38 = vld [vmem:[%s6438_s28 + $0x8e0] sm:$0xff]   ;;  %v6227_v46 = vld [vmem:[%s6438_s28 + $0x850] sm:$0xff]  }
  0xfb   : > { %5628 = vmatpush3.bf16.msra.mxu0 %v6179_v39  ;;  %v5358_v53 = vpop.f32.mrf.mxu1  ;;  %v6220_v40 = vld [vmem:[%s6438_s28 + $0x820] sm:$0xff]   ;;  %v6226_v47 = vld [vmem:[%s6438_s28 + $0x898] sm:$0xff]  }
  0xfc   : > { %v5337_v51 = vpop.f32.mrf.mxu0  ;;  %5629 = vmatprep.subr.bf16.mxu0 %v6182_v43  ;;  %v6725_v54 = vadd.f32 %v5357_v49, %v5335_v44  ;;  %v6222_v43 = vld [vmem:[%s6438_s28 + $0x8a0] sm:$0xff]   ;;  %v6225_v44 = vld [vmem:[%s6438_s28 + $0x8d8] sm:$0xff]   ;;  %v6228_v49 = vld [vmem:[%s6438_s28 + $0x810] sm:$0xff]  }
  0xfd   : > { %5650 = vmatpush3.bf16.msra.mxu1 %v6181_v45  ;;  %v5359_v57 = vpop.f32.mrf.mxu1  ;;  %v6224_v45 = vld [vmem:[%s6438_s28 + $0x818] sm:$0xff]   ;;  %v243_v51 = vld [vmem:[%s6433_s24 + $0x20] sm:$0xff] }
  0xfe   : > { %5651 = vmatprep.subr.bf16.mxu1 %v6184_v48  ;;  %v6229_v48 = vld [vmem:[%s6438_s28 + $0x8d0] sm:$0xff]   ;;  %v1240_v53 = vrot.slane %v243_v51, %v6476_v42 }
  0xff   : > { %5630 = vmatpush3.bf16.msra.mxu0 %v6183_v50  ;;  %v6231_v50 = vld [vmem:[%s6438_s28 + $0x848] sm:$0xff]  }
 0x100   : > { %5631 = vmatprep.subr.bf16.mxu0 %v6186_v52  ;;  %v6230_v52 = vld [vmem:[%s6438_s28 + $0x890] sm:$0xff]   ;;  %v1248_v57 = vcombine.high %v1240_v53, %v1240_v53 }
 0x101   : > { %5652 = vmatpush3.bf16.msra.mxu1 %v6185_v55  ;;  %v6233_v55 = vld [vmem:[%s6438_s28 + $0x8c8] sm:$0xff]  }
 0x102   : > { %5653 = vmatprep.subr.bf16.mxu1 %v6188_v56  ;;  %v6232_v56 = vld [vmem:[%s6438_s28 + $0x808] sm:$0xff]  }
 0x103   : > { %5632 = vmatpush3.bf16.msra.mxu0 %v6187_v58 }
 0x104   : > { %5633 = vmatprep.subr.bf16.mxu0 %v6190_v59  ;;  %v6235_v59 = vld [vmem:[%s6438_s28 + $0x840] sm:$0xff]  }
 0x105   : > { %5654 = vmatpush3.bf16.msra.mxu1 %v6189_v60  ;;  %v6234_v60 = vld [vmem:[%s6438_s28 + $0x888] sm:$0xff]  }
 0x106   : > { %5655 = vmatprep.subr.bf16.mxu1 %v6192_v61  ;;  %v1270_v61 = vrot.slane %v1248_v57, %v6476_v42  ;;  %v6276_v57 = vld [vmem:[%s6438_s28 + $0xa70] sm:$0xff]  }
 0x107   : > { %5634 = vmatpush3.bf16.msra.mxu0 %v6191_v62 }
 0x108   : > { %5635 = vmatprep.subr.bf16.mxu0 %v6194_v63  ;;  %v6237_v63 = vld [vmem:[%s6438_s28 + $0x8c0] sm:$0xff]  }
 0x109   : > { %5656 = vmatpush3.bf16.msra.mxu1 %v6193_v0  ;;  %v6236_v0 = vld [vmem:[%s6438_s28 + $0x800] sm:$0xff]  }
 0x10a   : > { %5657 = vmatprep.subr.bf16.mxu1 %v6196_v1  ;;  %v1280_v1 = vcombine.high %v1270_v61, %v1270_v61 }
 0x10b   : > { %5636 = vmatpush3.bf16.msra.mxu0 %v6195_v2  ;;  %v1256_v2 = vrot.slane %v1240_v53, %v6476_v42  ;;  %v6271_v53 = vld [vmem:[%s6438_s28 + $0x980] sm:$0xff]  }
 0x10c   : > { %5637 = vmatprep.subr.bf16.mxu0 %v6198_v3  ;;  %v6239_v3 = vld [vmem:[%s6438_s28 + $0x978] sm:$0xff]  }
 0x10d   : > { %5658 = vmatpush3.bf16.msra.mxu1 %v6197_v4  ;;  %v6238_v4 = vld [vmem:[%s6438_s28 + $0x880] sm:$0xff]  }
 0x10e   : > { %5659 = vmatprep.subr.bf16.mxu1 %v6200_v5 }
 0x10f   : > { %5638 = vmatpush3.bf16.msra.mxu0 %v6199_v6  ;;  %v6241_v6 = vld [vmem:[%s6438_s28 + $0x9f8] sm:$0xff]  }
 0x110   : > { %5639 = vmatprep.subr.bf16.mxu0 %v6202_v7  ;;  %v6240_v7 = vld [vmem:[%s6438_s28 + $0x938] sm:$0xff]  }
 0x111   : > { %5660 = vmatpush3.bf16.msra.mxu1 %v6201_v8  ;;  %v1278_v8 = vcombine.high %v1256_v2, %v1256_v2 }
 0x112   : > { %5661 = vmatprep.subr.bf16.mxu1 %v6204_v9  ;;  %v6243_v9 = vld [vmem:[%s6438_s28 + $0x970] sm:$0xff]  }
 0x113   : > { %5640 = vmatpush3.bf16.msra.mxu0 %v6203_v10  ;;  %v6242_v10 = vld [vmem:[%s6438_s28 + $0x9b8] sm:$0xff]  }
 0x114   : > { %5669 = vmatprep.subr.bf16.mxu0 %v6207_v12 }
 0x115   : > { %5662 = vmatpush3.bf16.msra.mxu1 %v6206_v13  ;;  %v6245_v13 = vld [vmem:[%s6438_s28 + $0x9f0] sm:$0xff]  }
 0x116   : > { %v5377_v20 = vpop.f32.mrf.mxu0  ;;  %4339 = vmatmul.mubr.bf16.vlgmr.msra.gmra.mxu0 %v1214_v11  ;;  %5691 = vmatprep.subr.bf16.mxu1 %v6209_v14  ;;  %v6244_v14 = vld [vmem:[%s6438_s28 + $0x930] sm:$0xff]  }
 0x117   : > { %5670 = vmatpush3.bf16.msra.mxu0 %v6208_v15  ;;  %v5399_v23 = vpop.f32.mrf.mxu1  ;;  %4418 = vmatprep.mubr.bf16.mxu0 %v1270_v61  ;;  %v6277_v61 = vld [vmem:[%s6438_s28 + $0xa30] sm:$0xff]  }
 0x118   : > { %v5378_v22 = vpop.f32.mrf.mxu0  ;;  %4379 = vmatmul.mubr.bf16.vlgmr.msra.gmra.mxu1 %v1230_v16  ;;  %5671 = vmatprep.subr.bf16.mxu0 %v6211_v17  ;;  %v6247_v17 = vld [vmem:[%s6438_s28 + $0x968] sm:$0xff]  }
 0x119   : > { %v5379_v25 = vadd.f32 %v5378_v22, %v5377_v20  ;;  %5692 = vmatpush3.bf16.msra.mxu1 %v6210_v18  ;;  %v5400_v28 = vpop.f32.mrf.mxu1  ;;  %4458 = vmatprep.mubr.bf16.mxu1 %v1280_v1  ;;  %v6246_v20 = vld [vmem:[%s6438_s28 + $0x9b0] sm:$0xff]   ;;  %v6249_v22 = vld [vmem:[%s6438_s28 + $0x9e8] sm:$0xff]  }
 0x11a   : > { %v5380_v27 = vpop.f32.mrf.mxu0  ;;  %5693 = vmatprep.subr.bf16.mxu1 %v6213_v19  ;;  %v5401_v31 = vadd.f32 %v5400_v28, %v5399_v23 }
 0x11b   : > { %v3861_v30 = vadd.f32 %v5379_v25, %v6725_v54  ;;  %5672 = vmatpush3.bf16.msra.mxu0 %v6212_v21  ;;  %v5402_v35 = vpop.f32.mrf.mxu1  ;;  %v1233_v54 = vcombine.high %v243_v51, %v243_v51  ;;  %v6248_v25 = vld [vmem:[%s6438_s28 + $0x928] sm:$0xff]   ;;  %v6251_v27 = vld [vmem:[%s6438_s28 + $0x960] sm:$0xff]  }
 0x11c   : > { %v5381_v33 = vpop.f32.mrf.mxu0  ;;  %5673 = vmatprep.subr.bf16.mxu0 %v6215_v24  ;;  %v6254_v35 = vld [vmem:[%s6438_s28 + $0x9a0] sm:$0xff]  }
 0x11d   : > { %v6762_v36 = vadd.f32 %v5401_v31, %v3861_v30  ;;  %5694 = vmatpush3.bf16.msra.mxu1 %v6214_v26  ;;  %v5403_v39 = vpop.f32.mrf.mxu1  ;;  %v6782_v58 = vrot.slane %v1233_v54, %v6476_v42  ;;  %v6250_v30 = vld [vmem:[%s6438_s28 + $0x9a8] sm:$0xff]   ;;  %v6253_v31 = vld [vmem:[%s6438_s28 + $0x9e0] sm:$0xff]   ;;  %v6274_v54 = vld [vmem:[%s6438_s28 + $0xaf8] sm:$0xff]  }
 0x11e   : > { %5695 = vmatprep.subr.bf16.mxu1 %v6217_v29  ;;  %v6252_v33 = vld [vmem:[%s6438_s28 + $0x920] sm:$0xff]   ;;  %v6258_v39 = vld [vmem:[%s6438_s28 + $0x998] sm:$0xff]  }
 0x11f   : > { %5674 = vmatpush3.bf16.msra.mxu0 %v6216_v32  ;;  %v1249_v62 = vcombine.high %v6782_v58, %v6782_v58  ;;  %v1263_v51 = vrot.slane %v6782_v58, %v6476_v42  ;;  %v6278_v58 = vld [vmem:[%s6438_s28 + $0xaf0] sm:$0xff]  }
 0x120   : > { %5675 = vmatprep.subr.bf16.mxu0 %v6219_v34  ;;  %v6255_v34 = vld [vmem:[%s6438_s28 + $0x958] sm:$0xff]  }
 0x121   : > { %5696 = vmatpush3.bf16.msra.mxu1 %v6218_v37  ;;  %v1277_v5 = vrot.slane %v1249_v62, %v6476_v42  ;;  %v6256_v37 = vld [vmem:[%s6438_s28 + $0x918] sm:$0xff]  }
 0x122   : > { %5697 = vmatprep.subr.bf16.mxu1 %v6221_v38  ;;  %v6259_v38 = vld [vmem:[%s6438_s28 + $0x950] sm:$0xff]  }
 0x123   : > { %5676 = vmatpush3.bf16.msra.mxu0 %v6220_v40  ;;  %v1281_v11 = vcombine.high %v1277_v5, %v1277_v5  ;;  %v6261_v40 = vld [vmem:[%s6438_s28 + $0x9d0] sm:$0xff]  }
 0x124   : > { %5677 = vmatprep.subr.bf16.mxu0 %v6223_v41  ;;  %v6260_v41 = vld [vmem:[%s6438_s28 + $0x910] sm:$0xff]  }
 0x125   : > { %5698 = vmatpush3.bf16.msra.mxu1 %v6222_v43  ;;  %v6263_v43 = vld [vmem:[%s6438_s28 + $0x948] sm:$0xff]  }
 0x126   : > { %5699 = vmatprep.subr.bf16.mxu1 %v6225_v44  ;;  %v6262_v44 = vld [vmem:[%s6438_s28 + $0x990] sm:$0xff]  }
 0x127   : > { %5678 = vmatpush3.bf16.msra.mxu0 %v6224_v45  ;;  %v6265_v45 = vld [vmem:[%s6438_s28 + $0x9c8] sm:$0xff]  }
 0x128   : > { %5679 = vmatprep.subr.bf16.mxu0 %v6227_v46  ;;  %v6264_v46 = vld [vmem:[%s6438_s28 + $0x908] sm:$0xff]  }
 0x129   : > { %5700 = vmatpush3.bf16.msra.mxu1 %v6226_v47  ;;  %v6267_v47 = vld [vmem:[%s6438_s28 + $0x940] sm:$0xff]  }
 0x12a   : > { %5701 = vmatprep.subr.bf16.mxu1 %v6229_v48  ;;  %v6266_v48 = vld [vmem:[%s6438_s28 + $0x988] sm:$0xff]  }
 0x12b   : > { %5680 = vmatpush3.bf16.msra.mxu0 %v6228_v49  ;;  %v6269_v49 = vld [vmem:[%s6438_s28 + $0x9c0] sm:$0xff]  }
 0x12c   : > { %5681 = vmatprep.subr.bf16.mxu0 %v6231_v50  ;;  %v6268_v50 = vld [vmem:[%s6438_s28 + $0x900] sm:$0xff]  }
 0x12d   : > { %5702 = vmatpush3.bf16.msra.mxu1 %v6230_v52  ;;  %v6272_v52 = vld [vmem:[%s6438_s28 + $0xa78] sm:$0xff]  }
 0x12e   : > { %5703 = vmatprep.subr.bf16.mxu1 %v6233_v55  ;;  %v6273_v55 = vld [vmem:[%s6438_s28 + $0xa38] sm:$0xff]  }
 0x12f   : > { %5682 = vmatpush3.bf16.msra.mxu0 %v6232_v56  ;;  %v1279_v56 = vcombine.high %v1263_v51, %v1263_v51 }
 0x130   : > { %5683 = vmatprep.subr.bf16.mxu0 %v6235_v59  ;;  %v6275_v59 = vld [vmem:[%s6438_s28 + $0xab8] sm:$0xff]  }
 0x131   : > { %5704 = vmatpush3.bf16.msra.mxu1 %v6234_v60 }
 0x132   : > { %5705 = vmatprep.subr.bf16.mxu1 %v6237_v63 }
 0x133   : > { %5684 = vmatpush3.bf16.msra.mxu0 %v6236_v0  ;;  %v6280_v0 = vld [vmem:[%s6438_s28 + $0xa68] sm:$0xff]  }
 0x134   : > { %5713 = vmatprep.subr.bf16.mxu0 %v6239_v3 }
 0x135   : > { %5706 = vmatpush3.bf16.msra.mxu1 %v6238_v4 }
 0x136   : > { %v5421_v12 = vpop.f32.mrf.mxu0  ;;  %4419 = vmatmul.mubr.bf16.vlgmr.msra.gmra.mxu0 %v1256_v2  ;;  %5735 = vmatprep.subr.bf16.mxu1 %v6241_v6  ;;  %v6279_v2 = vld [vmem:[%s6438_s28 + $0xab0] sm:$0xff]  }
 0x137   : > { %5714 = vmatpush3.bf16.msra.mxu0 %v6240_v7  ;;  %4498 = vmatprep.mubr.bf16.mxu0 %v1277_v5  ;;  %v6282_v5 = vld [vmem:[%s6438_s28 + $0xae8] sm:$0xff]  }
 0x138   : > { %v5422_v15 = vpop.f32.mrf.mxu0  ;;  %v5443_v16 = vpop.f32.mrf.mxu1  ;;  %4459 = vmatmul.mubr.bf16.vlgmr.msra.gmra.mxu1 %v1278_v8  ;;  %5715 = vmatprep.subr.bf16.mxu0 %v6243_v9  ;;  %v6281_v8 = vld [vmem:[%s6438_s28 + $0xa28] sm:$0xff]  }
 0x139   : > { %v5423_v18 = vadd.f32 %v5422_v15, %v5421_v12  ;;  %5736 = vmatpush3.bf16.msra.mxu1 %v6242_v10  ;;  %4538 = vmatprep.mubr.bf16.mxu1 %v1281_v11  ;;  %v6284_v10 = vld [vmem:[%s6438_s28 + $0xa60] sm:$0xff]  }
 0x13a   : > { %v5424_v19 = vpop.f32.mrf.mxu0  ;;  %v5444_v21 = vpop.f32.mrf.mxu1  ;;  %5737 = vmatprep.subr.bf16.mxu1 %v6245_v13  ;;  %v6283_v13 = vld [vmem:[%s6438_s28 + $0xaa8] sm:$0xff]  }
 0x13b   : > { %v3941_v23 = vadd.f32 %v5423_v18, %v6762_v36  ;;  %v5445_v24 = vadd.f32 %v5444_v21, %v5443_v16  ;;  %5716 = vmatpush3.bf16.msra.mxu0 %v6244_v14  ;;  %v6257_v36 = vld [vmem:[%s6438_s28 + $0x9d8] sm:$0xff]   ;;  %v6286_v14 = vld [vmem:[%s6438_s28 + $0xae0] sm:$0xff]   ;;  %v6292_v21 = vld [vmem:[%s6438_s28 + $0xa50] sm:$0xff]  }
 0x13c   : > { %v5425_v26 = vpop.f32.mrf.mxu0  ;;  %5717 = vmatprep.subr.bf16.mxu0 %v6247_v17  ;;  %v5446_v28 = vpop.f32.mrf.mxu1  ;;  %v6285_v16 = vld [vmem:[%s6438_s28 + $0xa20] sm:$0xff]   ;;  %v6288_v17 = vld [vmem:[%s6438_s28 + $0xa58] sm:$0xff]  }
 0x13d   : > { %v6807_v29 = vadd.f32 %v5445_v24, %v3941_v23  ;;  %5738 = vmatpush3.bf16.msra.mxu1 %v6246_v20  ;;  %v6287_v18 = vld [vmem:[%s6438_s28 + $0xaa0] sm:$0xff]   ;;  %v6290_v20 = vld [vmem:[%s6438_s28 + $0xad8] sm:$0xff]   ;;  %v6294_v23 = vld [vmem:[%s6438_s28 + $0xad0] sm:$0xff]  }
 0x13e   : > { %5739 = vmatprep.subr.bf16.mxu1 %v6249_v22  ;;  %v5447_v32 = vpop.f32.mrf.mxu1  ;;  %v6289_v19 = vld [vmem:[%s6438_s28 + $0xa18] sm:$0xff]   ;;  %v6293_v24 = vld [vmem:[%s6438_s28 + $0xa10] sm:$0xff]   ;;  %v244_v26 = vld [vmem:[%s6433_s24 + $0x28] sm:$0xff] }
 0x13f   : > { %5718 = vmatpush3.bf16.msra.mxu0 %v6248_v25  ;;  %v6291_v22 = vld [vmem:[%s6438_s28 + $0xa98] sm:$0xff]   ;;  %v6296_v25 = vld [vmem:[%s6438_s28 + $0xa48] sm:$0xff]   ;;  %v1289_v28 = vrot.slane %v244_v26, %v6476_v42 }
 0x140   : > { %5719 = vmatprep.subr.bf16.mxu0 %v6251_v27  ;;  %v6295_v27 = vld [vmem:[%s6438_s28 + $0xa90] sm:$0xff]  }
 0x141   : > { %5740 = vmatpush3.bf16.msra.mxu1 %v6250_v30  ;;  %v6298_v30 = vld [vmem:[%s6438_s28 + $0xac8] sm:$0xff]   ;;  %v1297_v32 = vcombine.high %v1289_v28, %v1289_v28 }
 0x142   : > { %5741 = vmatprep.subr.bf16.mxu1 %v6253_v31  ;;  %v6297_v31 = vld [vmem:[%s6438_s28 + $0xa08] sm:$0xff]  }
 0x143   : > { %5720 = vmatpush3.bf16.msra.mxu0 %v6252_v33 }
 0x144   : > { %5721 = vmatprep.subr.bf16.mxu0 %v6255_v34  ;;  %v6300_v34 = vld [vmem:[%s6438_s28 + $0xa40] sm:$0xff]  }
 0x145   : > { %5742 = vmatpush3.bf16.msra.mxu1 %v6254_v35  ;;  %v6299_v35 = vld [vmem:[%s6438_s28 + $0xa88] sm:$0xff]  }
 0x146   : > { %5743 = vmatprep.subr.bf16.mxu1 %v6257_v36  ;;  %v1319_v36 = vrot.slane %v1297_v32, %v6476_v42  ;;  %v6338_v32 = vld [vmem:[%s6438_s28 + $0xc30] sm:$0xff]  }
 0x147   : > { %5722 = vmatpush3.bf16.msra.mxu0 %v6256_v37 }
 0x148   : > { %5723 = vmatprep.subr.bf16.mxu0 %v6259_v38  ;;  %v6302_v38 = vld [vmem:[%s6438_s28 + $0xac0] sm:$0xff]  }
 0x149   : > { %5744 = vmatpush3.bf16.msra.mxu1 %v6258_v39  ;;  %v6301_v39 = vld [vmem:[%s6438_s28 + $0xa00] sm:$0xff]  }
 0x14a   : > { %5745 = vmatprep.subr.bf16.mxu1 %v6261_v40  ;;  %v1329_v40 = vcombine.high %v1319_v36, %v1319_v36 }
 0x14b   : > { %5724 = vmatpush3.bf16.msra.mxu0 %v6260_v41  ;;  %v1305_v41 = vrot.slane %v1289_v28, %v6476_v42  ;;  %v6337_v28 = vld [vmem:[%s6438_s28 + $0xc38] sm:$0xff]  }
 0x14c   : > { %5725 = vmatprep.subr.bf16.mxu0 %v6263_v43  ;;  %v6304_v43 = vld [vmem:[%s6438_s28 + $0xb78] sm:$0xff]  }
 0x14d   : > { %5746 = vmatpush3.bf16.msra.mxu1 %v6262_v44  ;;  %v6303_v44 = vld [vmem:[%s6438_s28 + $0xa80] sm:$0xff]  }
 0x14e   : > { %5747 = vmatprep.subr.bf16.mxu1 %v6265_v45 }
 0x14f   : > { %5726 = vmatpush3.bf16.msra.mxu0 %v6264_v46  ;;  %v6306_v46 = vld [vmem:[%s6438_s28 + $0xbf8] sm:$0xff]  }
 0x150   : > { %5727 = vmatprep.subr.bf16.mxu0 %v6267_v47  ;;  %v6305_v47 = vld [vmem:[%s6438_s28 + $0xb38] sm:$0xff]  }
 0x151   : > { %5748 = vmatpush3.bf16.msra.mxu1 %v6266_v48  ;;  %v1327_v48 = vcombine.high %v1305_v41, %v1305_v41 }
 0x152   : > { %5749 = vmatprep.subr.bf16.mxu1 %v6269_v49  ;;  %v6308_v49 = vld [vmem:[%s6438_s28 + $0xb70] sm:$0xff]  }
 0x153   : > { %5728 = vmatpush3.bf16.msra.mxu0 %v6268_v50  ;;  %v6307_v50 = vld [vmem:[%s6438_s28 + $0xbb8] sm:$0xff]  }
 0x154   : > { %5757 = vmatprep.subr.bf16.mxu0 %v6272_v52 }
 0x155   : > { %5750 = vmatpush3.bf16.msra.mxu1 %v6271_v53  ;;  %v6310_v53 = vld [vmem:[%s6438_s28 + $0xbf0] sm:$0xff]  }
 0x156   : > { %v5465_v60 = vpop.f32.mrf.mxu0  ;;  %4499 = vmatmul.mubr.bf16.vlgmr.msra.gmra.mxu0 %v1263_v51  ;;  %5779 = vmatprep.subr.bf16.mxu1 %v6274_v54  ;;  %v6309_v54 = vld [vmem:[%s6438_s28 + $0xb30] sm:$0xff]  }
 0x157   : > { %5758 = vmatpush3.bf16.msra.mxu0 %v6273_v55  ;;  %4578 = vmatprep.mubr.bf16.mxu0 %v1319_v36 }
 0x158   : > { %v5466_v62 = vpop.f32.mrf.mxu0  ;;  %v5487_v63 = vpop.f32.mrf.mxu1  ;;  %4539 = vmatmul.mubr.bf16.vlgmr.msra.gmra.mxu1 %v1279_v56  ;;  %5759 = vmatprep.subr.bf16.mxu0 %v6276_v57  ;;  %v6312_v57 = vld [vmem:[%s6438_s28 + $0xb68] sm:$0xff]  }
 0x159   : > { %v5467_v1 = vadd.f32 %v5466_v62, %v5465_v60  ;;  %5780 = vmatpush3.bf16.msra.mxu1 %v6275_v59  ;;  %4618 = vmatprep.mubr.bf16.mxu1 %v1329_v40  ;;  %v6311_v60 = vld [vmem:[%s6438_s28 + $0xbb0] sm:$0xff]   ;;  %v6314_v62 = vld [vmem:[%s6438_s28 + $0xbe8] sm:$0xff]  }
 0x15a   : > { %v5468_v3 = vpop.f32.mrf.mxu0  ;;  %v5488_v4 = vpop.f32.mrf.mxu1  ;;  %5781 = vmatprep.subr.bf16.mxu1 %v6278_v58  ;;  %v6339_v40 = vld [vmem:[%s6438_s28 + $0xc28] sm:$0xff]  }
 0x15b   : > { %v4021_v6 = vadd.f32 %v5467_v1, %v6807_v29  ;;  %v5489_v7 = vadd.f32 %v5488_v4, %v5487_v63  ;;  %5760 = vmatpush3.bf16.msra.mxu0 %v6277_v61  ;;  %v1282_v29 = vcombine.high %v244_v26, %v244_v26  ;;  %v6313_v1 = vld [vmem:[%s6438_s28 + $0xb28] sm:$0xff]   ;;  %v6316_v3 = vld [vmem:[%s6438_s28 + $0xb60] sm:$0xff]  }
 0x15c   : > { %v5469_v9 = vpop.f32.mrf.mxu0  ;;  %5761 = vmatprep.subr.bf16.mxu0 %v6280_v0  ;;  %v5490_v11 = vpop.f32.mrf.mxu1 }
 0x15d   : > { %v6844_v12 = vadd.f32 %v5489_v7, %v4021_v6  ;;  %5782 = vmatpush3.bf16.msra.mxu1 %v6279_v2  ;;  %v6864_v33 = vrot.slane %v1282_v29, %v6476_v42  ;;  %v6315_v6 = vld [vmem:[%s6438_s28 + $0xba8] sm:$0xff]   ;;  %v6318_v7 = vld [vmem:[%s6438_s28 + $0xbe0] sm:$0xff]   ;;  %v6383_v29 = vmov 0.0  }
 0x15e   : > { %5783 = vmatprep.subr.bf16.mxu1 %v6282_v5  ;;  %v5491_v15 = vpop.f32.mrf.mxu1  ;;  %v6317_v9 = vld [vmem:[%s6438_s28 + $0xb20] sm:$0xff]  }
 0x15f   : > { %5762 = vmatpush3.bf16.msra.mxu0 %v6281_v8  ;;  %v1298_v37 = vcombine.high %v6864_v33, %v6864_v33  ;;  %v6319_v11 = vld [vmem:[%s6438_s28 + $0xba0] sm:$0xff]   ;;  %v6323_v15 = vld [vmem:[%s6438_s28 + $0xb98] sm:$0xff]   ;;  %v1312_v26 = vrot.slane %v6864_v33, %v6476_v42 }
 0x160   : > { %5763 = vmatprep.subr.bf16.mxu0 %v6284_v10  ;;  %v6320_v10 = vld [vmem:[%s6438_s28 + $0xb58] sm:$0xff]  }
 0x161   : > { %5784 = vmatpush3.bf16.msra.mxu1 %v6283_v13  ;;  %v1326_v45 = vrot.slane %v1298_v37, %v6476_v42  ;;  %v6321_v13 = vld [vmem:[%s6438_s28 + $0xb18] sm:$0xff]  }
 0x162   : > { %5785 = vmatprep.subr.bf16.mxu1 %v6286_v14  ;;  %v6324_v14 = vld [vmem:[%s6438_s28 + $0xb50] sm:$0xff]  }
 0x163   : > { %5764 = vmatpush3.bf16.msra.mxu0 %v6285_v16  ;;  %v1330_v51 = vcombine.high %v1326_v45, %v1326_v45  ;;  %v6326_v16 = vld [vmem:[%s6438_s28 + $0xbd0] sm:$0xff]  }
 0x164   : > { %5765 = vmatprep.subr.bf16.mxu0 %v6288_v17  ;;  %v6325_v17 = vld [vmem:[%s6438_s28 + $0xb10] sm:$0xff]  }
 0x165   : > { %5786 = vmatpush3.bf16.msra.mxu1 %v6287_v18  ;;  %v6328_v18 = vld [vmem:[%s6438_s28 + $0xb48] sm:$0xff]  }
 0x166   : > { %5787 = vmatprep.subr.bf16.mxu1 %v6290_v20  ;;  %v6327_v20 = vld [vmem:[%s6438_s28 + $0xb90] sm:$0xff]  }
 0x167   : > { %5766 = vmatpush3.bf16.msra.mxu0 %v6289_v19  ;;  %v6330_v19 = vld [vmem:[%s6438_s28 + $0xbc8] sm:$0xff]  }
 0x168   : > { %5767 = vmatprep.subr.bf16.mxu0 %v6292_v21  ;;  %v6329_v21 = vld [vmem:[%s6438_s28 + $0xb08] sm:$0xff]  }
 0x169   : > { %5788 = vmatpush3.bf16.msra.mxu1 %v6291_v22  ;;  %v6332_v22 = vld [vmem:[%s6438_s28 + $0xb40] sm:$0xff]  }
 0x16a   : > { %5789 = vmatprep.subr.bf16.mxu1 %v6294_v23  ;;  %v6331_v23 = vld [vmem:[%s6438_s28 + $0xb88] sm:$0xff]  }
 0x16b   : > { %5768 = vmatpush3.bf16.msra.mxu0 %v6293_v24  ;;  %v6334_v24 = vld [vmem:[%s6438_s28 + $0xbc0] sm:$0xff]  }
 0x16c   : > { %5769 = vmatprep.subr.bf16.mxu0 %v6296_v25  ;;  %v6333_v25 = vld [vmem:[%s6438_s28 + $0xb00] sm:$0xff]  }
 0x16d   : > { %5790 = vmatpush3.bf16.msra.mxu1 %v6295_v27  ;;  %v6336_v27 = vld [vmem:[%s6438_s28 + $0xb80] sm:$0xff]  }
 0x16e   : > { %5791 = vmatprep.subr.bf16.mxu1 %v6298_v30  ;;  %v1328_v30 = vcombine.high %v1312_v26, %v1312_v26 }
 0x16f   : > { %5770 = vmatpush3.bf16.msra.mxu0 %v6297_v31 }
 0x170   : > { %5771 = vmatprep.subr.bf16.mxu0 %v6300_v34 }
 0x171   : > { %5792 = vmatpush3.bf16.msra.mxu1 %v6299_v35 }
 0x172   : > { %5793 = vmatprep.subr.bf16.mxu1 %v6302_v38 }
 0x173   : > { %5772 = vmatpush3.bf16.msra.mxu0 %v6301_v39 }
 0x174   : > { %5801 = vmatprep.subr.bf16.mxu0 %v6304_v43 }
 0x175   : > { %5794 = vmatpush3.bf16.msra.mxu1 %v6303_v44 }
 0x176   : > { %v5509_v52 = vpop.f32.mrf.mxu0  ;;  %4579 = vmatmul.mubr.bf16.vlgmr.msra.gmra.mxu0 %v1305_v41  ;;  %5823 = vmatprep.subr.bf16.mxu1 %v6306_v46  ;;  %v6340_v46 = vld [vmem:[%s6438_s28 + $0xc20] sm:$0xff]  }
 0x177   : > { %5802 = vmatpush3.bf16.msra.mxu0 %v6305_v47  ;;  %4658 = vmatprep.mubr.bf16.mxu0 %v1326_v45  ;;  %v6341_v47 = vld [vmem:[%s6438_s28 + $0xc18] sm:$0xff]  }
 0x178   : > { %v5510_v55 = vpop.f32.mrf.mxu0  ;;  %v5531_v56 = vpop.f32.mrf.mxu1  ;;  %4619 = vmatmul.mubr.bf16.vlgmr.msra.gmra.mxu1 %v1327_v48  ;;  %5803 = vmatprep.subr.bf16.mxu0 %v6308_v49  ;;  %v6342_v48 = vld [vmem:[%s6438_s28 + $0xc10] sm:$0xff]   ;;  %v6343_v49 = vld [vmem:[%s6438_s28 + $0xc08] sm:$0xff]  }
 0x179   : > { %v5511_v59 = vadd.f32 %v5510_v55, %v5509_v52  ;;  %5824 = vmatpush3.bf16.msra.mxu1 %v6307_v50  ;;  %4698 = vmatprep.mubr.bf16.mxu1 %v1330_v51  ;;  %v6344_v50 = vld [vmem:[%s6438_s28 + $0xc00] sm:$0xff]   ;;  %v4917_v51 = vld.sshfl [vmem:[%s6433_s24 + $0x30] sm:$0x1 pattern:$0x75316420] }
 0x17a   : > { %v5512_v58 = vpop.f32.mrf.mxu0  ;;  %v5532_v61 = vpop.f32.mrf.mxu1  ;;  %5825 = vmatprep.subr.bf16.mxu1 %v6310_v53  ;;  %v1344_v52 = vrot.slane %v4917_v51, %v6476_v42 }
 0x17b   : > { %v4101_v63 = vadd.f32 %v5511_v59, %v6844_v12  ;;  %v5533_v0 = vadd.f32 %v5532_v61, %v5531_v56  ;;  %5804 = vmatpush3.bf16.msra.mxu0 %v6309_v54  ;;  %v6322_v12 = vld [vmem:[%s6438_s28 + $0xbd8] sm:$0xff]  }
 0x17c   : > { %v5513_v2 = vpop.f32.mrf.mxu0  ;;  %5805 = vmatprep.subr.bf16.mxu0 %v6312_v57  ;;  %v5534_v4 = vpop.f32.mrf.mxu1 }
 0x17d   : > { %v6889_v5 = vadd.f32 %v5533_v0, %v4101_v63  ;;  %5826 = vmatpush3.bf16.msra.mxu1 %v6311_v60 }
 0x17e   : > { %5827 = vmatprep.subr.bf16.mxu1 %v6314_v62  ;;  %v5535_v8 = vpop.f32.mrf.mxu1 }
 0x17f   : > { %5806 = vmatpush3.bf16.msra.mxu0 %v6313_v1 }
 0x180   : > { %5807 = vmatprep.subr.bf16.mxu0 %v6316_v3 }
 0x181   : > { %5828 = vmatpush3.bf16.msra.mxu1 %v6315_v6 }
 0x182   : > { %5829 = vmatprep.subr.bf16.mxu1 %v6318_v7 }
 0x183   : > { %5808 = vmatpush3.bf16.msra.mxu0 %v6317_v9 }
 0x184   : > { %5809 = vmatprep.subr.bf16.mxu0 %v6320_v10 }
 0x185   : > { %5830 = vmatpush3.bf16.msra.mxu1 %v6319_v11 }
 0x186   : > { %5831 = vmatprep.subr.bf16.mxu1 %v6322_v12 }
 0x187   : > { %5810 = vmatpush3.bf16.msra.mxu0 %v6321_v13 }
 0x188   : > { %5811 = vmatprep.subr.bf16.mxu0 %v6324_v14 }
 0x189   : > { %5832 = vmatpush3.bf16.msra.mxu1 %v6323_v15 }
 0x18a   : > { %5833 = vmatprep.subr.bf16.mxu1 %v6326_v16 }
 0x18b   : > { %5812 = vmatpush3.bf16.msra.mxu0 %v6325_v17 }
 0x18c   : > { %5813 = vmatprep.subr.bf16.mxu0 %v6328_v18 }
 0x18d   : > { %5834 = vmatpush3.bf16.msra.mxu1 %v6327_v20 }
 0x18e   : > { %5835 = vmatprep.subr.bf16.mxu1 %v6330_v19 }
 0x18f   : > { %5814 = vmatpush3.bf16.msra.mxu0 %v6329_v21 }
 0x190   : > { %5815 = vmatprep.subr.bf16.mxu0 %v6332_v22 }
 0x191   : > { %5836 = vmatpush3.bf16.msra.mxu1 %v6331_v23 }
 0x192   : > { %5837 = vmatprep.subr.bf16.mxu1 %v6334_v24 }
 0x193   : > { %5816 = vmatpush3.bf16.msra.mxu0 %v6333_v25 }
 0x194   : > { %5871 = vmatprep.subr.bf16.mxu0 %v6383_v29 }
 0x195   : > { %5838 = vmatpush3.bf16.msra.mxu1 %v6336_v27 }
 0x196   : > { %v5553_v31 = vpop.f32.mrf.mxu0  ;;  %4659 = vmatmul.mubr.bf16.vlgmr.msra.gmra.mxu0 %v1312_v26 }
 0x197   : > { %5872 = vmatpush3.bf16.msra.mxu0 %v6337_v28  ;;  %5887 = vmatprep.mubr.msk.bf16.mxu0 %vm6384_vm0, %v6383_v29 }
 0x198   : > { %v5554_v34 = vpop.f32.mrf.mxu0  ;;  %v5575_v35 = vpop.f32.mrf.mxu1  ;;  %4699 = vmatmul.mubr.bf16.vlgmr.msra.gmra.mxu1 %v1328_v30  ;;  %5873 = vmatprep.subr.bf16.mxu0 %v6383_v29 }
 0x199   : > { %v5555_v33 = vadd.f32 %v5554_v34, %v5553_v31 }
 0x19a   : > { %v5556_v36 = vpop.f32.mrf.mxu0  ;;  %v5576_v37 = vpop.f32.mrf.mxu1 }
 0x19b   : > { %v4181_v38 = vadd.f32 %v5555_v33, %v6889_v5  ;;  %v5577_v39 = vadd.f32 %v5576_v37, %v5575_v35  ;;  %5874 = vmatpush3.bf16.msra.mxu0 %v6338_v32 }
 0x19c   : > { %v5557_v41 = vpop.f32.mrf.mxu0  ;;  %5875 = vmatprep.subr.bf16.mxu0 %v6383_v29  ;;  %v5578_v43 = vpop.f32.mrf.mxu1 }
 0x19d   : > { %v4221_v44 = vadd.f32 %v5577_v39, %v4181_v38 }
 0x19e   : > { %v5579_v45 = vpop.f32.mrf.mxu1 }
 0x19f   : > { %5876 = vmatpush3.bf16.msra.mxu0 %v6339_v40 }
 0x1a0   : > { %5877 = vmatprep.subr.bf16.mxu0 %v6383_v29 }
 0x1a3   : > { %5878 = vmatpush3.bf16.msra.mxu0 %v6340_v46 }
 0x1a4   : > { %5879 = vmatprep.subr.bf16.mxu0 %v6383_v29 }
 0x1a7   : > { %5880 = vmatpush3.bf16.msra.mxu0 %v6341_v47 }
 0x1a8   : > { %5881 = vmatprep.subr.bf16.mxu0 %v6383_v29 }
 0x1ab   : > { %5882 = vmatpush3.bf16.msra.mxu0 %v6342_v48 }
 0x1ac   : > { %5883 = vmatprep.subr.bf16.mxu0 %v6383_v29 }
 0x1af   : > { %5884 = vmatpush3.bf16.msra.mxu0 %v6343_v49 }
 0x1b0   : > { %5885 = vmatprep.subr.bf16.mxu0 %v6383_v29 }
 0x1b3   : > { %5886 = vmatpush3.bf16.msra.mxu0 %v6344_v50 }
 0x1b6   : > { %v5597_v53 = vpop.f32.mrf.mxu0  ;;  %5888 = vmatmul.mubr.bf16.vlgmr.msra.gmra.mxu0 %v1344_v52 }
 0x1b8   : > { %v5598_v54 = vpop.f32.mrf.mxu0  ;;  %v5619_v55 = vpop.f32.mrf.mxu1 }
 0x1b9   : > { %v5599_v56 = vadd.f32 %v5598_v54, %v5597_v53 }
 0x1ba   : > { %v5600_v57 = vpop.f32.mrf.mxu0  ;;  %v5620_v59 = vpop.f32.mrf.mxu1 }
 0x1bb   : > { %v4261_v60 = vadd.f32 %v5599_v56, %v4221_v44  ;;  %v5621_v58 = vadd.f32 %v5620_v59, %v5619_v55 }
 0x1bc   : > { %v5601_v61 = vpop.f32.mrf.mxu0  ;;  %v5622_v62 = vpop.f32.mrf.mxu1 }
 0x1bd   : > { %v4301_v63 = vadd.f32 %v5621_v58, %v4261_v60  ;;  %v238_v61 = vld [vmem:[#allocation2] sm:$0x3] }
 0x1be   : > { %v5623_v0 = vpop.f32.mrf.mxu1 }
 0x1d6   : > { %v5641_v1 = vpop.f32.mrf.mxu0 }
 0x1d8   : > { %v5642_v2 = vpop.f32.mrf.mxu0  ;;  %v5663_v3 = vpop.f32.mrf.mxu1 }
 0x1d9   : > { %v5643_v4 = vadd.f32 %v5642_v2, %v5641_v1 }
 0x1da   : > { %v5644_v5 = vpop.f32.mrf.mxu0  ;;  %v5664_v42 = vpop.f32.mrf.mxu1 }
 0x1db   : > { %v4341_v6 = vadd.f32 %v5643_v4, %v4301_v63  ;;  %v5665_v7 = vadd.f32 %v5664_v42, %v5663_v3 }
 0x1dc   : > { %v5645_v8 = vpop.f32.mrf.mxu0  ;;  %v5666_v9 = vpop.f32.mrf.mxu1 }
 0x1dd   : > { %v4381_v10 = vadd.f32 %v5665_v7, %v4341_v6 }
 0x1de   : > { %v5667_v11 = vpop.f32.mrf.mxu1 }
 0x1f6   : > { %v5685_v12 = vpop.f32.mrf.mxu0 }
 0x1f8   : > { %v5686_v13 = vpop.f32.mrf.mxu0  ;;  %v5707_v14 = vpop.f32.mrf.mxu1 }
 0x1f9   : > { %v5687_v15 = vadd.f32 %v5686_v13, %v5685_v12 }
 0x1fa   : > { %v5688_v16 = vpop.f32.mrf.mxu0  ;;  %v5708_v17 = vpop.f32.mrf.mxu1 }
 0x1fb   : > { %v4421_v18 = vadd.f32 %v5687_v15, %v4381_v10  ;;  %v5709_v20 = vadd.f32 %v5708_v17, %v5707_v14 }
 0x1fc   : > { %v5689_v19 = vpop.f32.mrf.mxu0  ;;  %v5710_v21 = vpop.f32.mrf.mxu1 }
 0x1fd   : > { %v4461_v22 = vadd.f32 %v5709_v20, %v4421_v18 }
 0x1fe   : > { %v5711_v23 = vpop.f32.mrf.mxu1 }
 0x216   : > { %v5729_v24 = vpop.f32.mrf.mxu0 }
 0x218   : > { %v5730_v25 = vpop.f32.mrf.mxu0  ;;  %v5751_v26 = vpop.f32.mrf.mxu1 }
 0x219   : > { %v5731_v27 = vadd.f32 %v5730_v25, %v5729_v24 }
 0x21a   : > { %v5732_v28 = vpop.f32.mrf.mxu0  ;;  %v5752_v29 = vpop.f32.mrf.mxu1 }
 0x21b   : > { %v4501_v30 = vadd.f32 %v5731_v27, %v4461_v22  ;;  %v5753_v31 = vadd.f32 %v5752_v29, %v5751_v26 }
 0x21c   : > { %v5733_v32 = vpop.f32.mrf.mxu0  ;;  %v5754_v34 = vpop.f32.mrf.mxu1 }
 0x21d   : > { %v4541_v35 = vadd.f32 %v5753_v31, %v4501_v30 }
 0x21e   : > { %v5755_v33 = vpop.f32.mrf.mxu1 }
 0x236   : > { %v5773_v36 = vpop.f32.mrf.mxu0 }
 0x238   : > { %v5774_v37 = vpop.f32.mrf.mxu0  ;;  %v5795_v38 = vpop.f32.mrf.mxu1 }
 0x239   : > { %v5775_v53 = vadd.f32 %v5774_v37, %v5773_v36 }
 0x23a   : > { %v5776_v39 = vpop.f32.mrf.mxu0  ;;  %v5796_v40 = vpop.f32.mrf.mxu1 }
 0x23b   : > { %v4581_v54 = vadd.f32 %v5775_v53, %v4541_v35  ;;  %v5797_v55 = vadd.f32 %v5796_v40, %v5795_v38 }
 0x23c   : > { %v5777_v41 = vpop.f32.mrf.mxu0  ;;  %v5798_v43 = vpop.f32.mrf.mxu1 }
 0x23d   : > { %v4621_v57 = vadd.f32 %v5797_v55, %v4581_v54 }
 0x23e   : > { %v5799_v44 = vpop.f32.mrf.mxu1 }
 0x256   : > { %v5817_v45 = vpop.f32.mrf.mxu0 }
 0x258   : > { %v5818_v46 = vpop.f32.mrf.mxu0  ;;  %v5839_v47 = vpop.f32.mrf.mxu1 }
 0x259   : > { %v5819_v56 = vadd.f32 %v5818_v46, %v5817_v45 }
 0x25a   : > { %v5820_v48 = vpop.f32.mrf.mxu0  ;;  %v5840_v49 = vpop.f32.mrf.mxu1 }
 0x25b   : > { %v4661_v59 = vadd.f32 %v5819_v56, %v4621_v57  ;;  %v5841_v60 = vadd.f32 %v5840_v49, %v5839_v47 }
 0x25c   : > { %v5821_v50 = vpop.f32.mrf.mxu0  ;;  %v5842_v51 = vpop.f32.mrf.mxu1 }
 0x25d   : > { %v4701_v58 = vadd.f32 %v5841_v60, %v4661_v59 }
 0x25e   : > { %v5843_v52 = vpop.f32.mrf.mxu1 }
 0x276   : > { %v4740_v62 = vpop.f32.mrf.mxu0 }
 0x277   : > { %v4741_v63 = vadd.f32 %v4740_v62, %v4701_v58 }
 0x278   : > { %v5889_v0 = vpop.f32.mrf.mxu0  ;;  %4751 = sbr.rel (%p5310_p6) target bundleno = 866 (0x362), region = 48 }
 0x279   : > { %v4746_v1 = vadd.f32 %v4741_v63, %v238_v61 }
 0x27a   : > { %v4743_v2 = vpop.f32.mrf.mxu0 }
 0x27b   : > { %4747 = vst [vmem:[#allocation2] sm:$0x3] %v4746_v1 }
 0x27c   : > { %v5890_v3 = vpop.f32.mrf.mxu0 }
 0x27d   : > { %v4776_v4 = vld [vmem:[%s6997_s3 + $0x78] sm:$0xff]  ;;  %v6385_v5 = vmov 0.0   ;;  %v4775_v42 = vld [vmem:[%s6997_s3 + $0x70] sm:$0xff]  ;;  %vm6386_vm1 = vmmov 0   ;;  %v4774_v6 = vld [vmem:[%s6997_s3 + $0x68] sm:$0xff]  ;;  %vm4854_vm2 = vcmask 107520  }
 0x27e   : > { %5891 = vmatprep.subr.mxu0 %v6385_v5  ;;  %5923 = vmatprep.mubr.msk.f32.mxu0 %vm6386_vm1, %v6385_v5  ;;  %v4773_v7 = vld [vmem:[%s6997_s3 + $0x60] sm:$0xff]  ;;  %v4772_v8 = vld [vmem:[%s6997_s3 + $0x58] sm:$0xff]  ;;  %v4771_v9 = vld [vmem:[%s6997_s3 + $0x50] sm:$0xff] }
 0x27f   : > { %5892 = vmatpush3.msra.mxu0 %v4776_v4  ;;  %v4770_v10 = vld [vmem:[%s6997_s3 + $0x48] sm:$0xff]  ;;  %v4769_v11 = vld [vmem:[%s6997_s3 + $0x40] sm:$0xff]  ;;  %v4768_v12 = vld [vmem:[%s6997_s3 + $0x38] sm:$0xff] }
 0x280   : > { %5893 = vmatprep.subr.mxu0 %v6385_v5  ;;  %v4767_v13 = vld [vmem:[%s6997_s3 + $0x30] sm:$0xff]  ;;  %v4766_v14 = vld [vmem:[%s6997_s3 + $0x28] sm:$0xff]  ;;  %v4765_v15 = vld [vmem:[%s6997_s3 + $0x20] sm:$0xff] }
 0x281   : > { %5894 = vmatpush3.msra.mxu0 %v4775_v42  ;;  %v4764_v16 = vld [vmem:[%s6997_s3 + $0x18] sm:$0xff]  ;;  %v4763_v17 = vld [vmem:[%s6997_s3 + $0x10] sm:$0xff]  ;;  %v5311_v20 = vld [vmem:[%s6996_s2] ss:$0 sm:$0xff] }
 0x282   : > { %5895 = vmatprep.subr.mxu0 %v6385_v5  ;;  %v4752_v18 = vld [vmem:[#allocation2] sm:$0x3]  ;;  %v4762_v19 = vld [vmem:[%s6997_s3 + $0x8] sm:$0xff] }
 0x283   : > { %5896 = vmatpush3.msra.mxu0 %v4774_v6  ;;  %v4761_v21 = vld [vmem:[%s6997_s3] sm:$0xff]  ;;  %v4760_v22 = vadd.f32 %v5311_v20, %v4752_v18 }
 0x284   : > { %5897 = vmatprep.subr.mxu0 %v6385_v5  ;;  %v5312_v23 = vld [vmem:[%s6998_s4] ss:$0 sm:$0xff] }
 0x285   : > { %5898 = vmatpush3.msra.mxu0 %v4773_v7 }
 0x286   : > { %5899 = vmatprep.subr.mxu0 %v6385_v5 }
 0x287   : > { %5900 = vmatpush3.msra.mxu0 %v4772_v8 }
 0x288   : > { %5901 = vmatprep.subr.mxu0 %v6385_v5 }
 0x289   : > { %5902 = vmatpush3.msra.mxu0 %v4771_v9 }
 0x28a   : > { %5903 = vmatprep.subr.mxu0 %v6385_v5 }
 0x28b   : > { %5904 = vmatpush3.msra.mxu0 %v4770_v10 }
 0x28c   : > { %5905 = vmatprep.subr.mxu0 %v6385_v5 }
 0x28d   : > { %5906 = vmatpush3.msra.mxu0 %v4769_v11 }
 0x28e   : > { %5907 = vmatprep.subr.mxu0 %v6385_v5 }
 0x28f   : > { %5908 = vmatpush3.msra.mxu0 %v4768_v12 }
 0x290   : > { %5909 = vmatprep.subr.mxu0 %v6385_v5 }
 0x291   : > { %5910 = vmatpush3.msra.mxu0 %v4767_v13 }
 0x292   : > { %5911 = vmatprep.subr.mxu0 %v6385_v5 }
 0x293   : > { %5912 = vmatpush3.msra.mxu0 %v4766_v14 }
 0x294   : > { %5913 = vmatprep.subr.mxu0 %v6385_v5 }
 0x295   : > { %5914 = vmatpush3.msra.mxu0 %v4765_v15 }
 0x296   : > { %5915 = vmatprep.subr.mxu0 %v6385_v5 }
 0x297   : > { %5916 = vmatpush3.msra.mxu0 %v4764_v16 }
 0x298   : > { %5917 = vmatprep.subr.mxu0 %v6385_v5 }
 0x299   : > { %5918 = vmatpush3.msra.mxu0 %v4763_v17 }
 0x29a   : > { %5919 = vmatprep.subr.mxu0 %v6385_v5 }
 0x29b   : > { %5920 = vmatpush3.msra.mxu0 %v4762_v19 }
 0x29c   : > { %5921 = vmatprep.subr.mxu0 %v6385_v5 }
 0x29d   : > { %5922 = vmatpush3.msra.mxu0 %v4761_v21 }
 0x29e   : > { %5924 = vmatmul.mubr.f32.vlgmr.msra.gmra.mxu0 %v4760_v22 }
 0x35e   : > { %v4850_v24 = vpop.f32.mrf.mxu0 }
 0x35f   : > { %v4851_v25 = vadd.f32 %v5312_v23, %v4850_v24 }
 0x360   : > { %v5925_v26 = vpop.f32.mrf.mxu0 }
 0x361   : > { %4855 = vst.msk [vmem:[#allocation3] sm:$0x3] %vm4854_vm2, %v4851_v25 }
 0x362 PF: > { %p5930_p7 = scmp.eq.s32.totalorder %s6424_s19, 3  ;;  %s6387_s17 = smov [#allocation3]  }
 0x363   : > { %s4863_s20 = sshll.u32 %s6387_s17, 4  ;;  %s4864_s20 = int_to_ptr.vmem [resolvable:$true] %s4863_s20 }
 0x364   : > { %s6345_s21 = scalar_lea.vmem %s4864_s20, 32  ;;  %p6352_p11 = scmp.lt.s32.totalorder %s4864_s20, %s4864_s20 }
 0x365   : > { %p6346_p8 = scmp.ne.s32.totalorder %s4864_s20, %s6345_s21  ;;  %p6353_p12 = scmp.lt.s32.totalorder %s6345_s21, %s6345_s21 }
 0x367   : > { %p6347_p9 = pnand %p6346_p8, %p5930_p7  ;;  %p6354_p13 = por %p6353_p12, %p6352_p11 }
 0x369   : > { %p6348_p10 = pneg %p6347_p9 }
 0x36b   : > { %p6355_p0 = pnand %p6354_p13, %p6348_p10 }
 0x36d   : > { %6358 = shalt.err (!%p6355_p0)
}
 0x36e   : > { %5927 = dma.vmem_to_hbm [thread:$0]  (%p5930_p7), %s4864_s20, 32, %s6999_s5, [#allocation4]  }
 0x36f   : > { %6374 = dma.done.wait (%p5930_p7), [#allocation4], 32  }
 0x370   : > { %6376 = vsyncadd (%p5930_p7), [#allocation4], 4294967264 }
 0x371 PF: > { %s16_s18 = sadd.s32 1, %s6379_s18  }
 0x372   : > { %p13_p1 = scmp.ge.s32.totalorder %s16_s18, 6  }
 0x374   :  { %15 = sbr.rel (!%p13_p1) target bundleno = 1 (0x1), region = 78 }
 0x379   :  { %4876 = vsyncpa [#allocation4], 1 }
 0x37a   :  { %4878 = vsyncpa [#allocation4 + $0x1], 1 }

</bundles_post_ra>
